<compile_context>
chip_gen: v7x
topology: tpu7x:2x2x1
jax: 0.10.0
libtpu: 0.0.40
codegen_flags: <defaults>
</compile_context>

<pallas_src>
import numpy as np
import jax
import jax.numpy as jnp
from jax.experimental import pallas as pl
from jax.experimental.pallas import tpu as pltpu

EPS = 1e-5  # LayerNorm / BatchNorm eps (PyTorch default)

# Feature flags / limits discovered once at startup (before jit tracing).
_BUFFERED_OK = False
_VMEM_LIMIT = None


# ----------------------------------------------------------------------------
# Hardware / feature probes
# ----------------------------------------------------------------------------
def _pick_vmem_limit():
    """48 MiB on 64-MiB-VMEM parts (v7x), 96 MiB on 128-MiB parts, 64 MiB fallback."""
    global _VMEM_LIMIT
    if _VMEM_LIMIT is None:
        try:
            cap = pltpu.get_tpu_info().vmem_capacity_bytes
        except Exception:
            cap = None
        if cap is not None and cap <= 64 * 1024 * 1024:
            _VMEM_LIMIT = 48 * 1024 * 1024
        elif cap is not None:
            _VMEM_LIMIT = 96 * 1024 * 1024
        else:
            _VMEM_LIMIT = 64 * 1024 * 1024
    return _VMEM_LIMIT


def _detect_features():
    """Probe whether BlockSpec(pipeline_mode=pl.Buffered(1)) is supported on this
    jax/libtpu install; otherwise fall back to plain (double-buffered) specs."""
    global _BUFFERED_OK
    try:
        def k(x_ref, w_ref, o_ref):
            o_ref[...] = x_ref[...] + w_ref[...]

        x = jnp.zeros((16, 128), jnp.float32)
        w = jnp.zeros((8, 128), jnp.float32)
        out = pl.pallas_call(
            k,
            out_shape=jax.ShapeDtypeStruct((16, 128), jnp.float32),
            grid=(2,),
            in_specs=[pl.BlockSpec((8, 128), lambda i: (i, 0)),
                      pl.BlockSpec((8, 128), lambda i: (0, 0),
                                   pipeline_mode=pl.Buffered(1))],
            out_specs=pl.BlockSpec((8, 128), lambda i: (i, 0)),
        )(x, w)
        jax.block_until_ready(out)
        _BUFFERED_OK = True
    except Exception:
        _BUFFERED_OK = False


def _const_spec(shape):
    """Full-array BlockSpec with a constant index map (weights / biases).
    Single-buffered (Buffered(1)) when supported — constant index needs no double buffer."""
    nd = len(shape)
    index_map = lambda *_: (0,) * nd
    if _BUFFERED_OK:
        return pl.BlockSpec(shape, index_map, pipeline_mode=pl.Buffered(1))
    return pl.BlockSpec(shape, index_map)


# ----------------------------------------------------------------------------
# Tiling helpers
# ----------------------------------------------------------------------------
def _choose_seq_tile(length, target):
    """Largest tile of the token axis that divides `length` (multiple of 8)."""
    if length <= target:
        return length
    for t in range(target, 7, -1):
        if length % t == 0 and t % 8 == 0:
            return t
    return length


def _choose_window_tile(nwin, n_tok, target_rows=1024, row_align=16):
    """Windows per attention grid step: divide nwin, keep rows 16-aligned,
    and leave >= 2 grid steps when possible (megacore sharding on v7x)."""
    target = max(1, target_rows // max(n_tok, 1))
    best = nwin
    for tw in range(min(nwin, target), 0, -1):
        if nwin % tw == 0 and ((tw * n_tok) % row_align == 0 or tw == nwin):
            best = tw
            break
    if nwin // best < 2:
        for tw in range(best // 2, 0, -1):
            if nwin % tw == 0 and (tw * n_tok) % row_align == 0:
                best = tw
                break
    return best


# ----------------------------------------------------------------------------
# Pallas kernels
# ----------------------------------------------------------------------------
def _layernorm(x, g, b):
    mean = jnp.mean(x, axis=-1, keepdims=True)
    var = jnp.mean((x - mean) ** 2, axis=-1, keepdims=True)
    return (x - mean) * jax.lax.rsqrt(var + EPS) * g + b


def _ln_kernel(mov_ref, fix_ref, p_ref, mo_ref, fo_ref):
    # p: (4, C) rows = [mov_gamma, mov_beta, fix_gamma, fix_beta]
    p = p_ref[...]
    mo_ref[0] = _layernorm(mov_ref[0], p[0:1, :], p[1:2, :])
    fo_ref[0] = _layernorm(fix_ref[0], p[2:3, :], p[3:4, :])


def layer_norm_dual(mov, fix, ln_params, tile_l=1024):
    # mov/fix: (B, L, C) f32; ln_params: (4, C) f32
    B, L, C = mov.shape
    TL = _choose_seq_tile(L, tile_l)
    x_spec = pl.BlockSpec((1, TL, C), lambda b, l: (b, l, 0))
    # TODO(synk): when C < 128, outputs use masked vst.msk stores; a pad-to-128 lane
    # layout (with masked LN statistics) would make the store path dense.
    return pl.pallas_call(
        _ln_kernel,
        out_shape=(jax.ShapeDtypeStruct((B, L, C), mov.dtype),
                   jax.ShapeDtypeStruct((B, L, C), fix.dtype)),
        grid=(B, L // TL),
        in_specs=[x_spec, x_spec, _const_spec((4, C))],
        out_specs=(x_spec, x_spec),
        compiler_params=pltpu.CompilerParams(
            dimension_semantics=("parallel", "parallel"),
            vmem_limit_bytes=_pick_vmem_limit()),
    )(mov, fix, ln_params)


def _gelu_exact(x):
    # nn.GELU() default (approximate='none'): 0.5*x*(1+erf(x/sqrt(2)))
    # TODO(synk): tanh-approx GELU would move work to the EUP slot but deviates from
    # the reference module's exact-erf GELU, so it is intentionally not used here.
    return 0.5 * x * (1.0 + jax.lax.erf(x * (1.0 / np.sqrt(2.0))))


def _softmax_lastdim(x):
    m = jnp.max(x, axis=-1, keepdims=True)
    e = jnp.exp(x - m)
    return e * pl.reciprocal(jnp.sum(e, axis=-1, keepdims=True), approx=True)


def _res_ln_mlp_kernel(msc_ref, fsc_ref, md_ref, fd_ref, p_ref,
                       w1_ref, b1_ref, w2_ref, b2_ref, mo_ref, fo_ref):
    p = p_ref[...]      # (4, C)  [mov_g, mov_b, fix_g, fix_b]
    b1 = b1_ref[...]    # (2, Hd)
    b2 = b2_ref[...]    # (2, C)

    def one(sc, d, g, b, w1, bb1, w2, bb2):
        x = sc + d                                            # residual: shortcut + attn out
        xn = _layernorm(x, g, b)
        h = jnp.dot(xn.astype(jnp.bfloat16), w1,
                    preferred_element_type=jnp.float32) + bb1
        h = _gelu_exact(h)
        y = jnp.dot(h.astype(jnp.bfloat16), w2,
                    preferred_element_type=jnp.float32) + bb2
        return x + y                                          # x + mlp(norm2(x))

    mo_ref[0] = one(msc_ref[0], md_ref[0], p[0:1, :], p[1:2, :],
                    w1_ref[0], b1[0:1, :], w2_ref[0], b2[0:1, :])
    fo_ref[0] = one(fsc_ref[0], fd_ref[0], p[2:3, :], p[3:4, :],
                    w1_ref[1], b1[1:2, :], w2_ref[1], b2[1:2, :])


def res_ln_mlp_dual(mov_sc, fix_sc, mov_d, fix_d, pp, tile_l=512):
    # mov_sc/fix_sc/mov_d/fix_d: (B, L, C) f32
    B, L, C = mov_sc.shape
    Hd = pp['mlp_w1'].shape[-1]
    TL = _choose_seq_tile(L, tile_l)
    x_spec = pl.BlockSpec((1, TL, C), lambda b, l: (b, l, 0))
    return pl.pallas_call(
        _res_ln_mlp_kernel,
        out_shape=(jax.ShapeDtypeStruct((B, L, C), mov_sc.dtype),
                   jax.ShapeDtypeStruct((B, L, C), fix_sc.dtype)),
        grid=(B, L // TL),
        in_specs=[x_spec, x_spec, x_spec, x_spec,
                  _const_spec((4, C)),
                  _const_spec((2, C, Hd)),
                  _const_spec((2, Hd)),
                  _const_spec((2, Hd, C)),
                  _const_spec((2, C))],
        out_specs=(x_spec, x_spec),
        compiler_params=pltpu.CompilerParams(
            dimension_semantics=("parallel", "parallel"),
            vmem_limit_bytes=_pick_vmem_limit()),
    )(mov_sc, fix_sc, mov_d, fix_d, pp['ln2'],
      pp['mlp_w1'], pp['mlp_b1'], pp['mlp_w2'], pp['mlp_b2'])


def make_attn_kernel(num_heads, head_dim, TW, N, C):
    scale = head_dim ** (-0.5)
    TWN = TW * N
    nh, hd = num_heads, head_dim

    def kernel(mov_ref, fix_ref, dmov_ref, dfix_ref,
               qw_ref, kvw_ref, pw_ref, bvec_ref, rb_ref,
               mov_o_ref, fix_o_ref):
        bvec = bvec_ref[...]                                  # (2, 4C) f32
        m_qb, m_kvb, m_pb = bvec[0:1, 0:C], bvec[0:1, C:3 * C], bvec[0:1, 3 * C:4 * C]
        f_qb, f_kvb, f_pb = bvec[1:2, 0:C], bvec[1:2, C:3 * C], bvec[1:2, 3 * C:4 * C]

        # Projections: one big K=C matmul each (bf16 operands, f32 accum), then cast
        # the whole result to bf16 right after the bias add to cut live VMEM/vregs.
        mov_kv = (jnp.dot(mov_ref[...], kvw_ref[0],
                          preferred_element_type=jnp.float32) + m_kvb).astype(jnp.bfloat16)
        fix_kv = (jnp.dot(fix_ref[...], kvw_ref[1],
                          preferred_element_type=jnp.float32) + f_kvb).astype(jnp.bfloat16)
        dmov_q = ((jnp.dot(dmov_ref[...], qw_ref[0],
                           preferred_element_type=jnp.float32) + m_qb)
                  * scale).astype(jnp.bfloat16)
        dfix_q = ((jnp.dot(dfix_ref[...], qw_ref[1],
                           preferred_element_type=jnp.float32) + f_qb)
                  * scale).astype(jnp.bfloat16)

        def heads(x, off):
            # (TWN, *) -> (nh*TW, N, hd) with batch index = h*TW + w.
            # Leading-axis concat + leading-only reshapes (no sublane transposes).
            return jnp.concatenate(
                [x[:, off + h * hd: off + (h + 1) * hd].reshape(TW, N, hd)
                 for h in range(nh)], axis=0)

        mK, mV = heads(mov_kv, 0), heads(mov_kv, C)
        fK, fV = heads(fix_kv, 0), heads(fix_kv, C)
        dmQ, dfQ = heads(dmov_q, 0), heads(dfix_q, 0)

        rb = rb_ref[...]                                      # (nh, N, N) f32

        def attn(q, k):
            # one batched QK^T over all (head, window) pairs + one softmax
            a = jax.lax.dot_general(q, k, (((2,), (2,)), ((0,), (0,))),
                                    preferred_element_type=jnp.float32)
            a = a.reshape(nh, TW, N, N) + rb[:, None]
            return _softmax_lastdim(a).reshape(nh * TW, N, N).astype(jnp.bfloat16)

        mov_attn = attn(dfQ, mK)                              # dfix_Q @ mov_K^T
        fix_attn = attn(dmQ, fK)                              # dmov_Q @ fix_K^T

        def av(a, v, transposed):
            # transposed=True contracts the attention matrix on its ROW axis,
            # i.e. attn^T @ V, matching the reference's fix_attn.transpose(2,3) @ V.
            dn = (((1,), (1,)), ((0,), (0,))) if transposed else (((2,), (1,)), ((0,), (0,)))
            return jax.lax.dot_general(a, v, dn, preferred_element_type=jnp.float32)

        mov_sv = av(mov_attn, mV, False)                      # (nh*TW, N, hd)
        mov_cv = av(fix_attn, mV, True)
        fix_sv = av(fix_attn, fV, False)
        fix_cv = av(mov_attn, fV, True)

        def merge(sv, cv):
            # channel layout matches torch: [self heads 0..nh-1 | cross heads 0..nh-1]
            cols = ([sv[h * TW:(h + 1) * TW].reshape(TWN, hd) for h in range(nh)]
                    + [cv[h * TW:(h + 1) * TW].reshape(TWN, hd) for h in range(nh)])
            return jnp.concatenate(cols, axis=1).astype(jnp.bfloat16)   # (TWN, 2C)

        # ONE (TWN, 2C) x (2C, C) projection per stream (saturates MXU contraction).
        mov_o_ref[...] = jnp.dot(merge(mov_sv, mov_cv), pw_ref[0],
                                 preferred_element_type=jnp.float32) + m_pb
        fix_o_ref[...] = jnp.dot(merge(fix_sv, fix_cv), pw_ref[1],
                                 preferred_element_type=jnp.float32) + f_pb

    return kernel


def window_attention(mov_w, fix_w, dmov_w, dfix_w, pp, num_heads):
    B_, N, C = mov_w.shape
    head_dim = C // num_heads
    TW = _choose_window_tile(B_, N, target_rows=1024)
    TWN = TW * N
    kernel = make_attn_kernel(num_heads, head_dim, TW, N, C)

    def tok(a):                                               # flatten windows -> rows, bf16
        return a.reshape(B_ * N, C).astype(jnp.bfloat16)

    weights = [pp['attn_qw'], pp['attn_kvw'], pp['attn_pw'], pp['attn_b'], pp['rel_bias']]
    tok_spec = pl.BlockSpec((TWN, C), lambda i: (i, 0))

    mov_o, fix_o = pl.pallas_call(
        kernel,
        out_shape=(jax.ShapeDtypeStruct((B_ * N, C), jnp.float32),
                   jax.ShapeDtypeStruct((B_ * N, C), jnp.float32)),
        grid=(B_ // TW,),
        in_specs=[tok_spec] * 4 + [_const_spec(w.shape) for w in weights],
        out_specs=(tok_spec, tok_spec),
        compiler_params=pltpu.CompilerParams(
            dimension_semantics=("parallel",),
            vmem_limit_bytes=_pick_vmem_limit()),
    )(tok(mov_w), tok(fix_w), tok(dmov_w), tok(dfix_w), *weights)
    return mov_o.reshape(B_, N, C), fix_o.reshape(B_, N, C)


# ----------------------------------------------------------------------------
# Plain-JAX glue (reshapes, offset convs, deformable sampling)
# ----------------------------------------------------------------------------
def window_partition(x, ws):
    B, H, W, L, C = x.shape
    x = x.reshape(B, H // ws[0], ws[0], W // ws[1], ws[1], L // ws[2], ws[2], C)
    return jnp.transpose(x, (0, 1, 3, 5, 2, 4, 6, 7)).reshape(-1, ws[0], ws[1], ws[2], C)


def window_reverse(windows, ws, H, W, L):
    B = windows.shape[0] // (H * W * L // (ws[0] * ws[1] * ws[2]))
    x = windows.reshape(B, H // ws[0], W // ws[1], L // ws[2], ws[0], ws[1], ws[2], -1)
    return jnp.transpose(x, (0, 1, 4, 2, 5, 3, 6, 7)).reshape(B, H, W, L, -1)


def deform_window_partition(x, ws):
    B, Head, H, W, L, C = x.shape
    x = x.reshape(B, Head, H // ws[0], ws[0], W // ws[1], ws[1], L // ws[2], ws[2], C)
    return jnp.transpose(x, (0, 1, 2, 4, 6, 3, 5, 7, 8)).reshape(
        B, Head, -1, ws[0], ws[1], ws[2], C)


def conv3d(x, w, padding):
    # x: (B, Cin, D, H, W)  w: (Cout, Cin, kD, kH, kW)   (PyTorch NCDHW / OIDHW)
    return jax.lax.conv_general_dilated(
        x, w, window_strides=(1, 1, 1), padding=padding,
        dimension_numbers=('NCDHW', 'OIDHW', 'NCDHW'))


def batchnorm3d_train(x):
    # BatchNorm3d in train mode (fresh module): batch stats, gamma=1, beta=0
    mean = jnp.mean(x, axis=(0, 2, 3, 4), keepdims=True)
    var = jnp.mean((x - mean) ** 2, axis=(0, 2, 3, 4), keepdims=True)
    return (x - mean) * jax.lax.rsqrt(var + EPS)


def offset_block(x, p):
    # TODO(synk): Offset_block conv3d/BN stack kept in plain JAX (tiny 1e-5-init convs,
    # not the hot path); the attention & MLP matmuls are the Pallas kernels.
    x = conv3d(x, p['w1'], [(1, 1)] * 3)
    x = jax.nn.relu(batchnorm3d_train(x))
    x = conv3d(x, p['w2'], [(1, 1)] * 3)
    x = jax.nn.relu(batchnorm3d_train(x))
    x = conv3d(x, p['w3'], [(0, 0)] * 3)
    return x


def grid_sample_3d(inp, grid):
    # Matches torch.nn.functional.grid_sample defaults for 5-D inputs:
    # mode='bilinear' (trilinear), padding_mode='zeros', align_corners=False.
    # inp: (Bn, Cc, D, H, W); grid: (Bn, Do, Ho, Wo, 3) with (x, y, z) in [-1, 1].
    Bn, Cc, D, H, W = inp.shape
    x = grid[..., 0]
    y = grid[..., 1]
    z = grid[..., 2]
    ix = ((x + 1.0) * W - 1.0) / 2.0
    iy = ((y + 1.0) * H - 1.0) / 2.0
    iz = ((z + 1.0) * D - 1.0) / 2.0
    ix0 = jnp.floor(ix); iy0 = jnp.floor(iy); iz0 = jnp.floor(iz)
    ix1 = ix0 + 1.0; iy1 = iy0 + 1.0; iz1 = iz0 + 1.0
    wx1 = ix - ix0; wx0 = 1.0 - wx1
    wy1 = iy - iy0; wy0 = 1.0 - wy1
    wz1 = iz - iz0; wz0 = 1.0 - wz1

    inp_flat = inp.reshape(Bn, Cc, D * H * W)
    out_spatial = grid.shape[1:4]

    def corner(zc, yc, xc, wz, wy, wx):
        valid = ((zc >= 0) & (zc <= D - 1) & (yc >= 0) & (yc <= H - 1) &
                 (xc >= 0) & (xc <= W - 1))
        zi = jnp.clip(zc, 0, D - 1).astype(jnp.int32)
        yi = jnp.clip(yc, 0, H - 1).astype(jnp.int32)
        xi = jnp.clip(xc, 0, W - 1).astype(jnp.int32)
        idx = (zi * H + yi) * W + xi                        # (Bn, Do, Ho, Wo)
        g = jnp.take_along_axis(inp_flat, idx.reshape(Bn, 1, -1), axis=2)
        g = g.reshape(Bn, Cc, *out_spatial)
        w = (wz * wy * wx * valid.astype(inp.dtype))[:, None]
        return g * w

    return (corner(iz0, iy0, ix0, wz0, wy0, wx0) + corner(iz0, iy0, ix1, wz0, wy0, wx1)
            + corner(iz0, iy1, ix0, wz0, wy1, wx0) + corner(iz0, iy1, ix1, wz0, wy1, wx1)
            + corner(iz1, iy0, ix0, wz1, wy0, wx0) + corner(iz1, iy0, ix1, wz1, wy0, wx1)
            + corner(iz1, iy1, ix0, wz1, wy1, wx0) + corner(iz1, iy1, ix1, wz1, wy1, wx1))


def relative_position_index(ws):
    coords = np.stack(np.meshgrid(np.arange(ws[0]), np.arange(ws[1]), np.arange(ws[2]),
                                  indexing='ij'))
    cf = coords.reshape(3, -1)
    rel = (cf[:, :, None] - cf[:, None, :]).transpose(1, 2, 0).astype(np.int64)
    rel[:, :, 0] += ws[0] - 1
    rel[:, :, 1] += ws[1] - 1
    rel[:, :, 2] += ws[2] - 1
    rel[:, :, 0] *= (2 * ws[1] - 1) * (2 * ws[2] - 1)
    rel[:, :, 1] *= 2 * ws[2] - 1
    return rel.sum(-1)                                       # (N, N)


def compute_rel_bias(rpb_table, ws, num_heads):
    N = ws[0] * ws[1] * ws[2]
    idx = relative_position_index(ws).reshape(-1)
    bias = rpb_table[idx].reshape(N, N, num_heads)
    return jnp.transpose(bias, (2, 0, 1)).astype(jnp.float32)   # (nh, N, N)


def make_base_grid(Hp, Wp, Tp, ws):
    vecs = [jnp.arange(s, dtype=jnp.float32) for s in (Hp, Wp, Tp)]
    g = jnp.stack(jnp.meshgrid(*vecs, indexing='ij'))        # (3, Hp, Wp, Tp)
    g = jnp.transpose(g[None], (0, 2, 3, 4, 1))              # (1, Hp, Wp, Tp, 3)
    g = g[..., ::-1]                                         # -> (t, w, h)
    gw = window_partition(g, ws)                             # (nW, ws0, ws1, ws2, 3)
    nW = gw.shape[0]
    return gw.reshape(1, nW, -1, 3)[None]                    # (1, 1, nW, N, 3)


# ----------------------------------------------------------------------------
# Full SwinTransformerBlock forward (shift_size = (0,0,0), no padding needed)
# ----------------------------------------------------------------------------
def swin_block_forward(mov, fix, pp, H, W, T, ws, num_heads):
    B, L, C = mov.shape
    assert L == H * W * T, 'input feature has wrong size'
    N = ws[0] * ws[1] * ws[2]
    head_dim = C // num_heads

    mov_shortcut, fix_shortcut = mov, fix

    # --- norm1 for both streams, one Pallas call, no activation stacking -------
    mov_n, fix_n = layer_norm_dual(mov, fix, pp['ln1'])
    mov_n = mov_n.reshape(B, H, W, T, C)
    fix_n = fix_n.reshape(B, H, W, T, C)

    # shift_size=(0,0,0) and H/W/T divisible by window size -> no pad / roll / mask.
    # TODO(synk): shifted-window path (roll + additive attention mask) not implemented.
    Hp, Wp, Tp = H, W, T
    shifted_mov, shifted_fix = mov_n, fix_n

    # --- deformable offsets (tiny 1e-5-init convs, plain JAX) ------------------
    off_mov = jnp.transpose(shifted_mov, (0, 4, 1, 2, 3))        # NCDHW
    off_fix = jnp.transpose(shifted_fix, (0, 4, 1, 2, 3))
    offset_range = jnp.array([Hp, Wp, Tp], jnp.float32).reshape(1, 1, 3, 1, 1, 1) * 0.5

    off1 = offset_block(jnp.concatenate([off_mov, off_fix], axis=1), pp['off1'])
    offset_mov_org = jnp.tanh(off1).reshape(B, num_heads, 3, Hp, Wp, Tp) * offset_range
    off2 = offset_block(jnp.concatenate([off_fix, off_mov], axis=1), pp['off2'])
    offset_fix_org = jnp.tanh(off2).reshape(B, num_heads, 3, Hp, Wp, Tp) * offset_range

    base_grid = pp['base_grid']                                  # (1, 1, nW, N, 3)
    shape_norm = jnp.array([Tp, Hp, Wp], jnp.float32)            # reference's ordering

    def sample_stream(vol, off_org):
        # offsets are identical across the head_dim channels of a head -> gather at
        # (B*num_heads, head_dim, ...) granularity instead of B*C replicated grids.
        off = deform_window_partition(jnp.transpose(off_org, (0, 1, 3, 4, 5, 2)), ws)
        nW = off.shape[2]
        off = off.reshape(B, num_heads, nW, N, 3)[..., ::-1]     # (t, w, h) order
        locs = 2.0 * ((base_grid + off) / (shape_norm - 1.0) - 0.5)
        locs = locs.reshape(B * num_heads, 1, nW, N, 3)
        inp = jnp.transpose(vol, (0, 4, 1, 2, 3)).reshape(
            B * num_heads, head_dim, Hp, Wp, Tp)
        samp = grid_sample_3d(inp, locs)                         # (B*nh, hd, 1, nW, N)
        samp = samp.reshape(B, num_heads, head_dim, nW, N)
        samp = jnp.transpose(samp, (0, 3, 4, 1, 2)).reshape(B * nW, N, C)
        return samp

    dmov_windows = sample_stream(shifted_mov, offset_mov_org)
    dfix_windows = sample_stream(shifted_fix, offset_fix_org)

    mov_windows = window_partition(shifted_mov, ws).reshape(-1, N, C)
    fix_windows = window_partition(shifted_fix, ws).reshape(-1, N, C)

    mov_attn_w, fix_attn_w = window_attention(
        mov_windows, fix_windows, dmov_windows, dfix_windows, pp, num_heads)

    shifted_mov = window_reverse(mov_attn_w.reshape(-1, ws[0], ws[1], ws[2], C),
                                 ws, Hp, Wp, Tp)
    shifted_fix = window_reverse(fix_attn_w.reshape(-1, ws[0], ws[1], ws[2], C),
                                 ws, Hp, Wp, Tp)

    # --- residual + norm2 + MLP + residual, both streams, one fused call -------
    mov_out, fix_out = res_ln_mlp_dual(
        mov_shortcut, fix_shortcut,
        shifted_mov.reshape(B, L, C), shifted_fix.reshape(B, L, C), pp)
    return mov_out, fix_out


# ----------------------------------------------------------------------------
# Parameters: deterministic synthetic raw params + one-time kernel-ready prep
# ----------------------------------------------------------------------------
def make_params(key, dim, num_heads, mlp_hidden, ws):
    keys = jax.random.split(key, 64)
    it = iter(keys)

    def nrm(shape, std=0.02):
        return std * jax.random.normal(next(it), shape, dtype=jnp.float32)

    p = {}
    for name in ['m_norm1', 'f_norm1', 'm_norm2', 'f_norm2']:
        p[name + '_g'] = jnp.ones((dim,), jnp.float32) + nrm((dim,), 0.1)
        p[name + '_b'] = nrm((dim,), 0.1)
    p['m_q_w'] = nrm((dim, dim)); p['m_q_b'] = nrm((dim,))
    p['f_q_w'] = nrm((dim, dim)); p['f_q_b'] = nrm((dim,))
    p['m_kv_w'] = nrm((dim, 2 * dim)); p['m_kv_b'] = nrm((2 * dim,))
    p['f_kv_w'] = nrm((dim, 2 * dim)); p['f_kv_b'] = nrm((2 * dim,))
    p['m_proj_w'] = nrm((2 * dim, dim)); p['m_proj_b'] = nrm((dim,))
    p['f_proj_w'] = nrm((2 * dim, dim)); p['f_proj_b'] = nrm((dim,))
    n_rpb = (2 * ws[0] - 1) * (2 * ws[1] - 1) * (2 * ws[2] - 1)
    p['rpb_table'] = nrm((n_rpb, num_heads), 0.02)
    for name in ['m_mlp', 'f_mlp']:
        p[name + '_w1'] = nrm((dim, mlp_hidden)); p[name + '_b1'] = nrm((mlp_hidden,))
        p[name + '_w2'] = nrm((mlp_hidden, dim)); p[name + '_b2'] = nrm((dim,))
    in_ch = dim * 2
    for name in ['off1', 'off2']:
        p[name] = {
            'w1': nrm((in_ch // 2, in_ch, 3, 3, 3), 1e-5),
            'w2': nrm((in_ch // 4, in_ch // 2, 3, 3, 3), 1e-5),
            'w3': nrm((3 * num_heads, in_ch // 4, 1, 1, 1), 1e-5),
        }
    return p


def prepare_params(raw, ws, num_heads, H, W, T):
    """One-time, hoisted weight prep: bf16 casts, packing, rel-bias & base grid."""
    bf = lambda a: a.astype(jnp.bfloat16)
    pp = {
        # LayerNorm params packed per kernel: rows [mov_g, mov_b, fix_g, fix_b]
        'ln1': jnp.stack([raw['m_norm1_g'], raw['m_norm1_b'],
                          raw['f_norm1_g'], raw['f_norm1_b']]),
        'ln2': jnp.stack([raw['m_norm2_g'], raw['m_norm2_b'],
                          raw['f_norm2_g'], raw['f_norm2_b']]),
        # Attention weights packed per stream (mov=0, fix=1)
        'attn_qw': bf(jnp.stack([raw['m_q_w'], raw['f_q_w']])),          # (2, C, C)
        'attn_kvw': bf(jnp.stack([raw['m_kv_w'], raw['f_kv_w']])),       # (2, C, 2C)
        'attn_pw': bf(jnp.stack([raw['m_proj_w'], raw['f_proj_w']])),    # (2, 2C, C)
        # Small attention biases packed into one (2, 4C) array: [q_b | kv_b | proj_b]
        'attn_b': jnp.stack([
            jnp.concatenate([raw['m_q_b'], raw['m_kv_b'], raw['m_proj_b']]),
            jnp.concatenate([raw['f_q_b'], raw['f_kv_b'], raw['f_proj_b']])]),
        'rel_bias': compute_rel_bias(raw['rpb_table'], ws, num_heads),
        # MLP weights packed per stream
        'mlp_w1': bf(jnp.stack([raw['m_mlp_w1'], raw['f_mlp_w1']])),     # (2, C, Hd)
        'mlp_b1': jnp.stack([raw['m_mlp_b1'], raw['f_mlp_b1']]),         # (2, Hd)
        'mlp_w2': bf(jnp.stack([raw['m_mlp_w2'], raw['f_mlp_w2']])),     # (2, Hd, C)
        'mlp_b2': jnp.stack([raw['m_mlp_b2'], raw['f_mlp_b2']]),         # (2, C)
        'base_grid': make_base_grid(H, W, T, ws),
        'off1': raw['off1'],
        'off2': raw['off2'],
    }
    return pp


# ----------------------------------------------------------------------------
if __name__ == "__main__":
    B = 2
    dim = 8
    num_heads = 2
    H = W = T = 4
    ws = (2, 2, 2)
    mlp_hidden = int(dim * 4.0)
    L = H * W * T

    # Probe hardware / optional Pallas features once, before any jit tracing.
    _detect_features()
    _pick_vmem_limit()

    key = jax.random.PRNGKey(0)
    kp, km, kf = jax.random.split(key, 3)
    raw_params = make_params(kp, dim, num_heads, mlp_hidden, ws)
    params = prepare_params(raw_params, ws, num_heads, H, W, T)

    mov = jax.random.normal(km, (B, L, dim), dtype=jnp.float32)
    fix = jax.random.normal(kf, (B, L, dim), dtype=jnp.float32)

    fwd = jax.jit(swin_block_forward, static_argnums=(3, 4, 5, 6, 7))
    mov_out, fix_out = fwd(mov, fix, params, H, W, T, ws, num_heads)
    (mov_out, fix_out) = jax.block_until_ready((mov_out, fix_out))

    assert mov_out.shape == (B, L, dim) and fix_out.shape == (B, L, dim)
    assert bool(jnp.all(jnp.isfinite(mov_out))) and bool(jnp.all(jnp.isfinite(fix_out)))
    print("KERNEL_OK")
</pallas_src>

<mosaic_0001>
module attributes {stable_mosaic.version = 11 : i64} {
  func.func @k(%arg0: i32, %arg1: memref<8x128xf32, #tpu.memory_space<vmem>>, %arg2: memref<8x128xf32, #tpu.memory_space<vmem>>, %arg3: memref<8x128xf32, #tpu.memory_space<vmem>>) attributes {dimension_semantics = [#tpu.dimension_semantics<arbitrary>], iteration_bounds = array<i64: 2>, scalar_prefetch = 0 : i64, scratch_operands = 0 : i64, tpu.core_type = #tpu.core_type<tc>, window_params = [{transform_indices = @transform_0, window_bounds = array<i64: 8, 128>}, {pipeline_mode = #tpu.pipeline_mode<synchronous>, transform_indices = @transform_1, window_bounds = array<i64: 8, 128>}, {transform_indices = @transform_2, window_bounds = array<i64: 8, 128>}]} {
    %c0 = arith.constant 0 : index
    %c0_0 = arith.constant 0 : index
    %0 = vector.load %arg1[%c0, %c0_0] : memref<8x128xf32, #tpu.memory_space<vmem>>, vector<8x128xf32>
    %c0_1 = arith.constant 0 : index
    %c0_2 = arith.constant 0 : index
    %1 = vector.load %arg2[%c0_1, %c0_2] : memref<8x128xf32, #tpu.memory_space<vmem>>, vector<8x128xf32>
    %2 = arith.addf %0, %1 : vector<8x128xf32>
    %c0_3 = arith.constant 0 : index
    %c0_4 = arith.constant 0 : index
    %3 = vector.load %arg3[%c0_3, %c0_4] : memref<8x128xf32, #tpu.memory_space<vmem>>, vector<8x128xf32>
    tpu.vector_store %arg3[%c0_3, %c0_4], %2 {strides = array<i32>} : memref<8x128xf32, #tpu.memory_space<vmem>>, vector<8x128xf32>,
    return
  }
  func.func @transform_0(%arg0: i32) -> (i32, i32) {
    %c0_i32 = arith.constant 0 : i32
    %c0_i32_0 = arith.constant 0 : i32
    return %arg0, %c0_i32 : i32, i32
  }
  func.func @transform_1(%arg0: i32) -> (i32, i32) {
    %c0_i32 = arith.constant 0 : i32
    %c0_i32_0 = arith.constant 0 : i32
    %c0_i32_1 = arith.constant 0 : i32
    return %c0_i32, %c0_i32_0 : i32, i32
  }
  func.func @transform_2(%arg0: i32) -> (i32, i32) {
    %c0_i32 = arith.constant 0 : i32
    %c0_i32_0 = arith.constant 0 : i32
    return %arg0, %c0_i32 : i32, i32
  }
}

module attributes {stable_mosaic.version = 11 : i64} {
  func.func @_ln_kernel(%arg0: i32, %arg1: i32, %arg2: memref<1x64x8xf32, #tpu.memory_space<vmem>>, %arg3: memref<1x64x8xf32, #tpu.memory_space<vmem>>, %arg4: memref<4x8xf32, #tpu.memory_space<vmem>>, %arg5: memref<1x64x8xf32, #tpu.memory_space<vmem>>, %arg6: memref<1x64x8xf32, #tpu.memory_space<vmem>>) attributes {dimension_semantics = [#tpu.dimension_semantics<parallel>, #tpu.dimension_semantics<parallel>], iteration_bounds = array<i64: 2, 1>, scalar_prefetch = 0 : i64, scratch_operands = 0 : i64, tpu.core_type = #tpu.core_type<tc>, window_params = [{transform_indices = @transform_0, window_bounds = array<i64: 1, 64, 8>}, {transform_indices = @transform_1, window_bounds = array<i64: 1, 64, 8>}, {pipeline_mode = #tpu.pipeline_mode<synchronous>, transform_indices = @transform_2, window_bounds = array<i64: 4, 8>}, {transform_indices = @transform_3, window_bounds = array<i64: 1, 64, 8>}, {transform_indices = @transform_4, window_bounds = array<i64: 1, 64, 8>}]} {
    %c0 = arith.constant 0 : index
    %c0_0 = arith.constant 0 : index
    %0 = vector.load %arg4[%c0, %c0_0] : memref<4x8xf32, #tpu.memory_space<vmem>>, vector<4x8xf32>
    %c0_1 = arith.constant 0 : index
    %c0_2 = arith.constant 0 : index
    %c0_3 = arith.constant 0 : index
    %1 = vector.load %arg2[%c0_1, %c0_2, %c0_3] : memref<1x64x8xf32, #tpu.memory_space<vmem>>, vector<1x64x8xf32>
    %2 = vector.shape_cast %1 : vector<1x64x8xf32> to vector<64x8xf32>
    %3 = vector.extract_strided_slice %0 {offsets = [0, 0], sizes = [1, 8], strides = [1, 1]} : vector<4x8xf32> to vector<1x8xf32>
    %4 = vector.extract_strided_slice %0 {offsets = [1, 0], sizes = [1, 8], strides = [1, 1]} : vector<4x8xf32> to vector<1x8xf32>
    %cst = arith.constant dense<0.000000e+00> : vector<64xf32>
    %5 = vector.multi_reduction <add>, %2, %cst [1] : vector<64x8xf32> to vector<64xf32>
    %6 = vector.shape_cast %5 : vector<64xf32> to vector<64x1xf32>
    %cst_4 = arith.constant 8.000000e+00 : f32
    %7 = vector.broadcast %cst_4 : f32 to vector<64x1xf32>
    %8 = arith.divf %6, %7 : vector<64x1xf32>
    %9 = vector.broadcast %8 : vector<64x1xf32> to vector<64x8xf32>
    %10 = arith.subf %2, %9 : vector<64x8xf32>
    %11 = arith.mulf %10, %10 : vector<64x8xf32>
    %cst_5 = arith.constant dense<0.000000e+00> : vector<64xf32>
    %12 = vector.multi_reduction <add>, %11, %cst_5 [1] : vector<64x8xf32> to vector<64xf32>
    %13 = vector.shape_cast %12 : vector<64xf32> to vector<64x1xf32>
    %cst_6 = arith.constant 8.000000e+00 : f32
    %14 = vector.broadcast %cst_6 : f32 to vector<64x1xf32>
    %15 = arith.divf %13, %14 : vector<64x1xf32>
    %16 = vector.broadcast %8 : vector<64x1xf32> to vector<64x8xf32>
    %17 = arith.subf %2, %16 : vector<64x8xf32>
    %cst_7 = arith.constant 9.99999974E-6 : f32
    %18 = vector.broadcast %cst_7 : f32 to vector<64x1xf32>
    %19 = arith.addf %15, %18 : vector<64x1xf32>
    %20 = math.rsqrt %19 : vector<64x1xf32>
    %21 = vector.broadcast %20 : vector<64x1xf32> to vector<64x8xf32>
    %22 = arith.mulf %17, %21 : vector<64x8xf32>
    %23 = vector.broadcast %3 : vector<1x8xf32> to vector<64x8xf32>
    %24 = arith.mulf %22, %23 : vector<64x8xf32>
    %25 = vector.broadcast %4 : vector<1x8xf32> to vector<64x8xf32>
    %26 = arith.addf %24, %25 : vector<64x8xf32>
    %c0_8 = arith.constant 0 : index
    %c0_9 = arith.constant 0 : index
    %c0_10 = arith.constant 0 : index
    %27 = vector.load %arg5[%c0_8, %c0_9, %c0_10] : memref<1x64x8xf32, #tpu.memory_space<vmem>>, vector<1x64x8xf32>
    %28 = vector.shape_cast %27 : vector<1x64x8xf32> to vector<64x8xf32>
    %29 = vector.shape_cast %26 : vector<64x8xf32> to vector<1x64x8xf32>
    tpu.vector_store %arg5[%c0_8, %c0_9, %c0_10], %29 {strides = array<i32>} : memref<1x64x8xf32, #tpu.memory_space<vmem>>, vector<1x64x8xf32>,
    %c0_11 = arith.constant 0 : index
    %c0_12 = arith.constant 0 : index
    %c0_13 = arith.constant 0 : index
    %30 = vector.load %arg3[%c0_11, %c0_12, %c0_13] : memref<1x64x8xf32, #tpu.memory_space<vmem>>, vector<1x64x8xf32>
    %31 = vector.shape_cast %30 : vector<1x64x8xf32> to vector<64x8xf32>
    %32 = vector.extract_strided_slice %0 {offsets = [2, 0], sizes = [1, 8], strides = [1, 1]} : vector<4x8xf32> to vector<1x8xf32>
    %33 = vector.extract_strided_slice %0 {offsets = [3, 0], sizes = [1, 8], strides = [1, 1]} : vector<4x8xf32> to vector<1x8xf32>
    %cst_14 = arith.constant dense<0.000000e+00> : vector<64xf32>
    %34 = vector.multi_reduction <add>, %31, %cst_14 [1] : vector<64x8xf32> to vector<64xf32>
    %35 = vector.shape_cast %34 : vector<64xf32> to vector<64x1xf32>
    %cst_15 = arith.constant 8.000000e+00 : f32
    %36 = vector.broadcast %cst_15 : f32 to vector<64x1xf32>
    %37 = arith.divf %35, %36 : vector<64x1xf32>
    %38 = vector.broadcast %37 : vector<64x1xf32> to vector<64x8xf32>
    %39 = arith.subf %31, %38 : vector<64x8xf32>
    %40 = arith.mulf %39, %39 : vector<64x8xf32>
    %cst_16 = arith.constant dense<0.000000e+00> : vector<64xf32>
    %41 = vector.multi_reduction <add>, %40, %cst_16 [1] : vector<64x8xf32> to vector<64xf32>
    %42 = vector.shape_cast %41 : vector<64xf32> to vector<64x1xf32>
    %cst_17 = arith.constant 8.000000e+00 : f32
    %43 = vector.broadcast %cst_17 : f32 to vector<64x1xf32>
    %44 = arith.divf %42, %43 : vector<64x1xf32>
    %45 = vector.broadcast %37 : vector<64x1xf32> to vector<64x8xf32>
    %46 = arith.subf %31, %45 : vector<64x8xf32>
    %cst_18 = arith.constant 9.99999974E-6 : f32
    %47 = vector.broadcast %cst_18 : f32 to vector<64x1xf32>
    %48 = arith.addf %44, %47 : vector<64x1xf32>
    %49 = math.rsqrt %48 : vector<64x1xf32>
    %50 = vector.broadcast %49 : vector<64x1xf32> to vector<64x8xf32>
    %51 = arith.mulf %46, %50 : vector<64x8xf32>
    %52 = vector.broadcast %32 : vector<1x8xf32> to vector<64x8xf32>
    %53 = arith.mulf %51, %52 : vector<64x8xf32>
    %54 = vector.broadcast %33 : vector<1x8xf32> to vector<64x8xf32>
    %55 = arith.addf %53, %54 : vector<64x8xf32>
    %c0_19 = arith.constant 0 : index
    %c0_20 = arith.constant 0 : index
    %c0_21 = arith.constant 0 : index
    %56 = vector.load %arg6[%c0_19, %c0_20, %c0_21] : memref<1x64x8xf32, #tpu.memory_space<vmem>>, vector<1x64x8xf32>
    %57 = vector.shape_cast %56 : vector<1x64x8xf32> to vector<64x8xf32>
    %58 = vector.shape_cast %55 : vector<64x8xf32> to vector<1x64x8xf32>
    tpu.vector_store %arg6[%c0_19, %c0_20, %c0_21], %58 {strides = array<i32>} : memref<1x64x8xf32, #tpu.memory_space<vmem>>, vector<1x64x8xf32>,
    return
  }
  func.func @transform_0(%arg0: i32, %arg1: i32) -> (i32, i32, i32) {
    %c0_i32 = arith.constant 0 : i32
    %c0_i32_0 = arith.constant 0 : i32
    return %arg0, %arg1, %c0_i32 : i32, i32, i32
  }
  func.func @transform_1(%arg0: i32, %arg1: i32) -> (i32, i32, i32) {
    %c0_i32 = arith.constant 0 : i32
    %c0_i32_0 = arith.constant 0 : i32
    return %arg0, %arg1, %c0_i32 : i32, i32, i32
  }
  func.func @transform_2(%arg0: i32, %arg1: i32) -> (i32, i32) {
    %c0_i32 = arith.constant 0 : i32
    %c0_i32_0 = arith.constant 0 : i32
    %c0_i32_1 = arith.constant 0 : i32
    return %c0_i32, %c0_i32_0 : i32, i32
  }
  func.func @transform_3(%arg0: i32, %arg1: i32) -> (i32, i32, i32) {
    %c0_i32 = arith.constant 0 : i32
    %c0_i32_0 = arith.constant 0 : i32
    return %arg0, %arg1, %c0_i32 : i32, i32, i32
  }
  func.func @transform_4(%arg0: i32, %arg1: i32) -> (i32, i32, i32) {
    %c0_i32 = arith.constant 0 : i32
    %c0_i32_0 = arith.constant 0 : i32
    return %arg0, %arg1, %c0_i32 : i32, i32, i32
  }
}

module attributes {stable_mosaic.version = 11 : i64} {
  func.func @kernel(%arg0: i32, %arg1: memref<64x8xbf16, #tpu.memory_space<vmem>>, %arg2: memref<64x8xbf16, #tpu.memory_space<vmem>>, %arg3: memref<64x8xbf16, #tpu.memory_space<vmem>>, %arg4: memref<64x8xbf16, #tpu.memory_space<vmem>>, %arg5: memref<2x8x8xbf16, #tpu.memory_space<vmem>>, %arg6: memref<2x8x16xbf16, #tpu.memory_space<vmem>>, %arg7: memref<2x16x8xbf16, #tpu.memory_space<vmem>>, %arg8: memref<2x32xf32, #tpu.memory_space<vmem>>, %arg9: memref<2x8x8xf32, #tpu.memory_space<vmem>>, %arg10: memref<64x8xf32, #tpu.memory_space<vmem>>, %arg11: memref<64x8xf32, #tpu.memory_space<vmem>>) attributes {dimension_semantics = [#tpu.dimension_semantics<parallel>], iteration_bounds = array<i64: 2>, scalar_prefetch = 0 : i64, scratch_operands = 0 : i64, tpu.core_type = #tpu.core_type<tc>, window_params = [{transform_indices = @transform_0, window_bounds = array<i64: 64, 8>}, {transform_indices = @transform_1, window_bounds = array<i64: 64, 8>}, {transform_indices = @transform_2, window_bounds = array<i64: 64, 8>}, {transform_indices = @transform_3, window_bounds = array<i64: 64, 8>}, {pipeline_mode = #tpu.pipeline_mode<synchronous>, transform_indices = @transform_4, window_bounds = array<i64: 2, 8, 8>}, {pipeline_mode = #tpu.pipeline_mode<synchronous>, transform_indices = @transform_5, window_bounds = array<i64: 2, 8, 16>}, {pipeline_mode = #tpu.pipeline_mode<synchronous>, transform_indices = @transform_6, window_bounds = array<i64: 2, 16, 8>}, {pipeline_mode = #tpu.pipeline_mode<synchronous>, transform_indices = @transform_7, window_bounds = array<i64: 2, 32>}, {pipeline_mode = #tpu.pipeline_mode<synchronous>, transform_indices = @transform_8, window_bounds = array<i64: 2, 8, 8>}, {transform_indices = @transform_9, window_bounds = array<i64: 64, 8>}, {transform_indices = @transform_10, window_bounds = array<i64: 64, 8>}]} {
    %c0 = arith.constant 0 : index
    %c0_0 = arith.constant 0 : index
    %0 = vector.load %arg8[%c0, %c0_0] : memref<2x32xf32, #tpu.memory_space<vmem>>, vector<2x32xf32>
    %1 = vector.extract_strided_slice %0 {offsets = [0, 0], sizes = [1, 8], strides = [1, 1]} : vector<2x32xf32> to vector<1x8xf32>
    %2 = vector.extract_strided_slice %0 {offsets = [0, 8], sizes = [1, 16], strides = [1, 1]} : vector<2x32xf32> to vector<1x16xf32>
    %3 = vector.extract_strided_slice %0 {offsets = [0, 24], sizes = [1, 8], strides = [1, 1]} : vector<2x32xf32> to vector<1x8xf32>
    %4 = vector.extract_strided_slice %0 {offsets = [1, 0], sizes = [1, 8], strides = [1, 1]} : vector<2x32xf32> to vector<1x8xf32>
    %5 = vector.extract_strided_slice %0 {offsets = [1, 8], sizes = [1, 16], strides = [1, 1]} : vector<2x32xf32> to vector<1x16xf32>
    %6 = vector.extract_strided_slice %0 {offsets = [1, 24], sizes = [1, 8], strides = [1, 1]} : vector<2x32xf32> to vector<1x8xf32>
    %c0_1 = arith.constant 0 : index
    %c0_2 = arith.constant 0 : index
    %7 = vector.load %arg1[%c0_1, %c0_2] : memref<64x8xbf16, #tpu.memory_space<vmem>>, vector<64x8xbf16>
    %c0_3 = arith.constant 0 : index
    %c0_4 = arith.constant 0 : index
    %c0_5 = arith.constant 0 : index
    %8 = vector.load %arg6[%c0_3, %c0_4, %c0_5] : memref<2x8x16xbf16, #tpu.memory_space<vmem>>, vector<1x8x16xbf16>
    %9 = vector.shape_cast %8 : vector<1x8x16xbf16> to vector<8x16xbf16>
    %cst = arith.constant dense<0.000000e+00> : vector<64x16xf32>
    %10 = tpu.matmul %7, %9, %cst {dimension_numbers = #tpu.dot_dimension_numbers<[1], [0], [0], [1], [0, 0, 1, 1], [], []>} : vector<64x8xbf16>, vector<8x16xbf16>, vector<64x16xf32> -> vector<64x16xf32>
    %11 = vector.broadcast %2 : vector<1x16xf32> to vector<64x16xf32>
    %12 = arith.addf %10, %11 : vector<64x16xf32>
    %13 = arith.truncf %12 : vector<64x16xf32> to vector<64x16xbf16>
    %c0_6 = arith.constant 0 : index
    %c0_7 = arith.constant 0 : index
    %14 = vector.load %arg2[%c0_6, %c0_7] : memref<64x8xbf16, #tpu.memory_space<vmem>>, vector<64x8xbf16>
    %c1 = arith.constant 1 : index
    %c0_8 = arith.constant 0 : index
    %c0_9 = arith.constant 0 : index
    %15 = vector.load %arg6[%c1, %c0_8, %c0_9] : memref<2x8x16xbf16, #tpu.memory_space<vmem>>, vector<1x8x16xbf16>
    %16 = vector.shape_cast %15 : vector<1x8x16xbf16> to vector<8x16xbf16>
    %cst_10 = arith.constant dense<0.000000e+00> : vector<64x16xf32>
    %17 = tpu.matmul %14, %16, %cst_10 {dimension_numbers = #tpu.dot_dimension_numbers<[1], [0], [0], [1], [0, 0, 1, 1], [], []>} : vector<64x8xbf16>, vector<8x16xbf16>, vector<64x16xf32> -> vector<64x16xf32>
    %18 = vector.broadcast %5 : vector<1x16xf32> to vector<64x16xf32>
    %19 = arith.addf %17, %18 : vector<64x16xf32>
    %20 = arith.truncf %19 : vector<64x16xf32> to vector<64x16xbf16>
    %c0_11 = arith.constant 0 : index
    %c0_12 = arith.constant 0 : index
    %21 = vector.load %arg3[%c0_11, %c0_12] : memref<64x8xbf16, #tpu.memory_space<vmem>>, vector<64x8xbf16>
    %c0_13 = arith.constant 0 : index
    %c0_14 = arith.constant 0 : index
    %c0_15 = arith.constant 0 : index
    %22 = vector.load %arg5[%c0_13, %c0_14, %c0_15] : memref<2x8x8xbf16, #tpu.memory_space<vmem>>, vector<1x8x8xbf16>
    %23 = vector.shape_cast %22 : vector<1x8x8xbf16> to vector<8x8xbf16>
    %cst_16 = arith.constant dense<0.000000e+00> : vector<64x8xf32>
    %24 = tpu.matmul %21, %23, %cst_16 {dimension_numbers = #tpu.dot_dimension_numbers<[1], [0], [0], [1], [0, 0, 1, 1], [], []>} : vector<64x8xbf16>, vector<8x8xbf16>, vector<64x8xf32> -> vector<64x8xf32>
    %25 = vector.broadcast %1 : vector<1x8xf32> to vector<64x8xf32>
    %26 = arith.addf %24, %25 : vector<64x8xf32>
    %cst_17 = arith.constant 5.000000e-01 : f32
    %27 = vector.broadcast %cst_17 : f32 to vector<64x8xf32>
    %28 = arith.mulf %26, %27 : vector<64x8xf32>
    %29 = arith.truncf %28 : vector<64x8xf32> to vector<64x8xbf16>
    %c0_18 = arith.constant 0 : index
    %c0_19 = arith.constant 0 : index
    %30 = vector.load %arg4[%c0_18, %c0_19] : memref<64x8xbf16, #tpu.memory_space<vmem>>, vector<64x8xbf16>
    %c1_20 = arith.constant 1 : index
    %c0_21 = arith.constant 0 : index
    %c0_22 = arith.constant 0 : index
    %31 = vector.load %arg5[%c1_20, %c0_21, %c0_22] : memref<2x8x8xbf16, #tpu.memory_space<vmem>>, vector<1x8x8xbf16>
    %32 = vector.shape_cast %31 : vector<1x8x8xbf16> to vector<8x8xbf16>
    %cst_23 = arith.constant dense<0.000000e+00> : vector<64x8xf32>
    %33 = tpu.matmul %30, %32, %cst_23 {dimension_numbers = #tpu.dot_dimension_numbers<[1], [0], [0], [1], [0, 0, 1, 1], [], []>} : vector<64x8xbf16>, vector<8x8xbf16>, vector<64x8xf32> -> vector<64x8xf32>
    %34 = vector.broadcast %4 : vector<1x8xf32> to vector<64x8xf32>
    %35 = arith.addf %33, %34 : vector<64x8xf32>
    %cst_24 = arith.constant 5.000000e-01 : f32
    %36 = vector.broadcast %cst_24 : f32 to vector<64x8xf32>
    %37 = arith.mulf %35, %36 : vector<64x8xf32>
    %38 = arith.truncf %37 : vector<64x8xf32> to vector<64x8xbf16>
    %39 = vector.extract_strided_slice %13 {offsets = [0, 0], sizes = [64, 4], strides = [1, 1]} : vector<64x16xbf16> to vector<64x4xbf16>
    %40 = vector.shape_cast %39 : vector<64x4xbf16> to vector<8x8x4xbf16>
    %41 = vector.extract_strided_slice %13 {offsets = [0, 4], sizes = [64, 4], strides = [1, 1]} : vector<64x16xbf16> to vector<64x4xbf16>
    %42 = vector.shape_cast %41 : vector<64x4xbf16> to vector<8x8x4xbf16>
    %43 = tpu.concatenate %40, %42 in 0 : vector<8x8x4xbf16>, vector<8x8x4xbf16> -> vector<16x8x4xbf16>
    %44 = vector.extract_strided_slice %13 {offsets = [0, 8], sizes = [64, 4], strides = [1, 1]} : vector<64x16xbf16> to vector<64x4xbf16>
    %45 = vector.shape_cast %44 : vector<64x4xbf16> to vector<8x8x4xbf16>
    %46 = vector.extract_strided_slice %13 {offsets = [0, 12], sizes = [64, 4], strides = [1, 1]} : vector<64x16xbf16> to vector<64x4xbf16>
    %47 = vector.shape_cast %46 : vector<64x4xbf16> to vector<8x8x4xbf16>
    %48 = tpu.concatenate %45, %47 in 0 : vector<8x8x4xbf16>, vector<8x8x4xbf16> -> vector<16x8x4xbf16>
    %49 = vector.extract_strided_slice %20 {offsets = [0, 0], sizes = [64, 4], strides = [1, 1]} : vector<64x16xbf16> to vector<64x4xbf16>
    %50 = vector.shape_cast %49 : vector<64x4xbf16> to vector<8x8x4xbf16>
    %51 = vector.extract_strided_slice %20 {offsets = [0, 4], sizes = [64, 4], strides = [1, 1]} : vector<64x16xbf16> to vector<64x4xbf16>
    %52 = vector.shape_cast %51 : vector<64x4xbf16> to vector<8x8x4xbf16>
    %53 = tpu.concatenate %50, %52 in 0 : vector<8x8x4xbf16>, vector<8x8x4xbf16> -> vector<16x8x4xbf16>
    %54 = vector.extract_strided_slice %20 {offsets = [0, 8], sizes = [64, 4], strides = [1, 1]} : vector<64x16xbf16> to vector<64x4xbf16>
    %55 = vector.shape_cast %54 : vector<64x4xbf16> to vector<8x8x4xbf16>
    %56 = vector.extract_strided_slice %20 {offsets = [0, 12], sizes = [64, 4], strides = [1, 1]} : vector<64x16xbf16> to vector<64x4xbf16>
    %57 = vector.shape_cast %56 : vector<64x4xbf16> to vector<8x8x4xbf16>
    %58 = tpu.concatenate %55, %57 in 0 : vector<8x8x4xbf16>, vector<8x8x4xbf16> -> vector<16x8x4xbf16>
    %59 = vector.extract_strided_slice %29 {offsets = [0, 0], sizes = [64, 4], strides = [1, 1]} : vector<64x8xbf16> to vector<64x4xbf16>
    %60 = vector.shape_cast %59 : vector<64x4xbf16> to vector<8x8x4xbf16>
    %61 = vector.extract_strided_slice %29 {offsets = [0, 4], sizes = [64, 4], strides = [1, 1]} : vector<64x8xbf16> to vector<64x4xbf16>
    %62 = vector.shape_cast %61 : vector<64x4xbf16> to vector<8x8x4xbf16>
    %63 = tpu.concatenate %60, %62 in 0 : vector<8x8x4xbf16>, vector<8x8x4xbf16> -> vector<16x8x4xbf16>
    %64 = vector.extract_strided_slice %38 {offsets = [0, 0], sizes = [64, 4], strides = [1, 1]} : vector<64x8xbf16> to vector<64x4xbf16>
    %65 = vector.shape_cast %64 : vector<64x4xbf16> to vector<8x8x4xbf16>
    %66 = vector.extract_strided_slice %38 {offsets = [0, 4], sizes = [64, 4], strides = [1, 1]} : vector<64x8xbf16> to vector<64x4xbf16>
    %67 = vector.shape_cast %66 : vector<64x4xbf16> to vector<8x8x4xbf16>
    %68 = tpu.concatenate %65, %67 in 0 : vector<8x8x4xbf16>, vector<8x8x4xbf16> -> vector<16x8x4xbf16>
    %c0_25 = arith.constant 0 : index
    %c0_26 = arith.constant 0 : index
    %c0_27 = arith.constant 0 : index
    %69 = vector.load %arg9[%c0_25, %c0_26, %c0_27] : memref<2x8x8xf32, #tpu.memory_space<vmem>>, vector<2x8x8xf32>
    %cst_28 = arith.constant dense<0.000000e+00> : vector<16x8x8xf32>
    %70 = tpu.matmul %68, %43, %cst_28 {dimension_numbers = #tpu.dot_dimension_numbers<[2], [2], [1], [1], [0, 0, 0, 1, 1, 1], [0], [0]>} : vector<16x8x4xbf16>, vector<16x8x4xbf16>, vector<16x8x8xf32> -> vector<16x8x8xf32>
    %71 = vector.shape_cast %70 : vector<16x8x8xf32> to vector<2x8x8x8xf32>
    %72 = vector.shape_cast %69 : vector<2x8x8xf32> to vector<2x1x8x8xf32>
    %73 = vector.broadcast %72 : vector<2x1x8x8xf32> to vector<2x8x8x8xf32>
    %74 = arith.addf %71, %73 : vector<2x8x8x8xf32>
    %cst_29 = arith.constant dense<0xFF800000> : vector<2x8x8xf32>
    %75 = vector.multi_reduction <maximumf>, %74, %cst_29 [3] : vector<2x8x8x8xf32> to vector<2x8x8xf32>
    %76 = vector.shape_cast %75 : vector<2x8x8xf32> to vector<2x8x8x1xf32>
    %77 = vector.broadcast %76 : vector<2x8x8x1xf32> to vector<2x8x8x8xf32>
    %78 = arith.subf %74, %77 : vector<2x8x8x8xf32>
    %79 = math.exp %78 : vector<2x8x8x8xf32>
    %cst_30 = arith.constant dense<0.000000e+00> : vector<2x8x8xf32>
    %80 = vector.multi_reduction <add>, %79, %cst_30 [3] : vector<2x8x8x8xf32> to vector<2x8x8xf32>
    %81 = vector.shape_cast %80 : vector<2x8x8xf32> to vector<2x8x8x1xf32>
    %82 = tpu.reciprocal %81 {approx = true} : vector<2x8x8x1xf32> -> vector<2x8x8x1xf32>
    %83 = vector.broadcast %82 : vector<2x8x8x1xf32> to vector<2x8x8x8xf32>
    %84 = arith.mulf %79, %83 : vector<2x8x8x8xf32>
    %85 = vector.shape_cast %84 : vector<2x8x8x8xf32> to vector<16x8x8xf32>
    %86 = arith.truncf %85 : vector<16x8x8xf32> to vector<16x8x8xbf16>
    %cst_31 = arith.constant dense<0.000000e+00> : vector<16x8x8xf32>
    %87 = tpu.matmul %63, %53, %cst_31 {dimension_numbers = #tpu.dot_dimension_numbers<[2], [2], [1], [1], [0, 0, 0, 1, 1, 1], [0], [0]>} : vector<16x8x4xbf16>, vector<16x8x4xbf16>, vector<16x8x8xf32> -> vector<16x8x8xf32>
    %88 = vector.shape_cast %87 : vector<16x8x8xf32> to vector<2x8x8x8xf32>
    %89 = vector.shape_cast %69 : vector<2x8x8xf32> to vector<2x1x8x8xf32>
    %90 = vector.broadcast %89 : vector<2x1x8x8xf32> to vector<2x8x8x8xf32>
    %91 = arith.addf %88, %90 : vector<2x8x8x8xf32>
    %cst_32 = arith.constant dense<0xFF800000> : vector<2x8x8xf32>
    %92 = vector.multi_reduction <maximumf>, %91, %cst_32 [3] : vector<2x8x8x8xf32> to vector<2x8x8xf32>
    %93 = vector.shape_cast %92 : vector<2x8x8xf32> to vector<2x8x8x1xf32>
    %94 = vector.broadcast %93 : vector<2x8x8x1xf32> to vector<2x8x8x8xf32>
    %95 = arith.subf %91, %94 : vector<2x8x8x8xf32>
    %96 = math.exp %95 : vector<2x8x8x8xf32>
    %cst_33 = arith.constant dense<0.000000e+00> : vector<2x8x8xf32>
    %97 = vector.multi_reduction <add>, %96, %cst_33 [3] : vector<2x8x8x8xf32> to vector<2x8x8xf32>
    %98 = vector.shape_cast %97 : vector<2x8x8xf32> to vector<2x8x8x1xf32>
    %99 = tpu.reciprocal %98 {approx = true} : vector<2x8x8x1xf32> -> vector<2x8x8x1xf32>
    %100 = vector.broadcast %99 : vector<2x8x8x1xf32> to vector<2x8x8x8xf32>
    %101 = arith.mulf %96, %100 : vector<2x8x8x8xf32>
    %102 = vector.shape_cast %101 : vector<2x8x8x8xf32> to vector<16x8x8xf32>
    %103 = arith.truncf %102 : vector<16x8x8xf32> to vector<16x8x8xbf16>
    %cst_34 = arith.constant dense<0.000000e+00> : vector<16x8x4xf32>
    %104 = tpu.matmul %86, %48, %cst_34 {dimension_numbers = #tpu.dot_dimension_numbers<[2], [1], [1], [2], [0, 0, 0, 1, 1, 2], [0], [0]>} : vector<16x8x8xbf16>, vector<16x8x4xbf16>, vector<16x8x4xf32> -> vector<16x8x4xf32>
    %cst_35 = arith.constant dense<0.000000e+00> : vector<16x8x4xf32>
    %105 = tpu.matmul %103, %48, %cst_35 {dimension_numbers = #tpu.dot_dimension_numbers<[1], [1], [2], [2], [0, 0, 0, 2, 1, 2], [0], [0]>} : vector<16x8x8xbf16>, vector<16x8x4xbf16>, vector<16x8x4xf32> -> vector<16x8x4xf32>
    %cst_36 = arith.constant dense<0.000000e+00> : vector<16x8x4xf32>
    %106 = tpu.matmul %103, %58, %cst_36 {dimension_numbers = #tpu.dot_dimension_numbers<[2], [1], [1], [2], [0, 0, 0, 1, 1, 2], [0], [0]>} : vector<16x8x8xbf16>, vector<16x8x4xbf16>, vector<16x8x4xf32> -> vector<16x8x4xf32>
    %cst_37 = arith.constant dense<0.000000e+00> : vector<16x8x4xf32>
    %107 = tpu.matmul %86, %58, %cst_37 {dimension_numbers = #tpu.dot_dimension_numbers<[1], [1], [2], [2], [0, 0, 0, 2, 1, 2], [0], [0]>} : vector<16x8x8xbf16>, vector<16x8x4xbf16>, vector<16x8x4xf32> -> vector<16x8x4xf32>
    %108 = vector.extract_strided_slice %104 {offsets = [0, 0, 0], sizes = [8, 8, 4], strides = [1, 1, 1]} : vector<16x8x4xf32> to vector<8x8x4xf32>
    %109 = vector.shape_cast %108 : vector<8x8x4xf32> to vector<64x4xf32>
    %110 = vector.extract_strided_slice %104 {offsets = [8, 0, 0], sizes = [8, 8, 4], strides = [1, 1, 1]} : vector<16x8x4xf32> to vector<8x8x4xf32>
    %111 = vector.shape_cast %110 : vector<8x8x4xf32> to vector<64x4xf32>
    %112 = vector.extract_strided_slice %105 {offsets = [0, 0, 0], sizes = [8, 8, 4], strides = [1, 1, 1]} : vector<16x8x4xf32> to vector<8x8x4xf32>
    %113 = vector.shape_cast %112 : vector<8x8x4xf32> to vector<64x4xf32>
    %114 = vector.extract_strided_slice %105 {offsets = [8, 0, 0], sizes = [8, 8, 4], strides = [1, 1, 1]} : vector<16x8x4xf32> to vector<8x8x4xf32>
    %115 = vector.shape_cast %114 : vector<8x8x4xf32> to vector<64x4xf32>
    %116 = tpu.concatenate %109, %111, %113, %115 in 1 : vector<64x4xf32>, vector<64x4xf32>, vector<64x4xf32>, vector<64x4xf32> -> vector<64x16xf32>
    %117 = arith.truncf %116 : vector<64x16xf32> to vector<64x16xbf16>
    %c0_38 = arith.constant 0 : index
    %c0_39 = arith.constant 0 : index
    %c0_40 = arith.constant 0 : index
    %118 = vector.load %arg7[%c0_38, %c0_39, %c0_40] : memref<2x16x8xbf16, #tpu.memory_space<vmem>>, vector<1x16x8xbf16>
    %119 = vector.shape_cast %118 : vector<1x16x8xbf16> to vector<16x8xbf16>
    %cst_41 = arith.constant dense<0.000000e+00> : vector<64x8xf32>
    %120 = tpu.matmul %117, %119, %cst_41 {dimension_numbers = #tpu.dot_dimension_numbers<[1], [0], [0], [1], [0, 0, 1, 1], [], []>} : vector<64x16xbf16>, vector<16x8xbf16>, vector<64x8xf32> -> vector<64x8xf32>
    %121 = vector.broadcast %3 : vector<1x8xf32> to vector<64x8xf32>
    %122 = arith.addf %120, %121 : vector<64x8xf32>
    %c0_42 = arith.constant 0 : index
    %c0_43 = arith.constant 0 : index
    %123 = vector.load %arg10[%c0_42, %c0_43] : memref<64x8xf32, #tpu.memory_space<vmem>>, vector<64x8xf32>
    tpu.vector_store %arg10[%c0_42, %c0_43], %122 {strides = array<i32>} : memref<64x8xf32, #tpu.memory_space<vmem>>, vector<64x8xf32>,
    %124 = vector.extract_strided_slice %106 {offsets = [0, 0, 0], sizes = [8, 8, 4], strides = [1, 1, 1]} : vector<16x8x4xf32> to vector<8x8x4xf32>
    %125 = vector.shape_cast %124 : vector<8x8x4xf32> to vector<64x4xf32>
    %126 = vector.extract_strided_slice %106 {offsets = [8, 0, 0], sizes = [8, 8, 4], strides = [1, 1, 1]} : vector<16x8x4xf32> to vector<8x8x4xf32>
    %127 = vector.shape_cast %126 : vector<8x8x4xf32> to vector<64x4xf32>
    %128 = vector.extract_strided_slice %107 {offsets = [0, 0, 0], sizes = [8, 8, 4], strides = [1, 1, 1]} : vector<16x8x4xf32> to vector<8x8x4xf32>
    %129 = vector.shape_cast %128 : vector<8x8x4xf32> to vector<64x4xf32>
    %130 = vector.extract_strided_slice %107 {offsets = [8, 0, 0], sizes = [8, 8, 4], strides = [1, 1, 1]} : vector<16x8x4xf32> to vector<8x8x4xf32>
    %131 = vector.shape_cast %130 : vector<8x8x4xf32> to vector<64x4xf32>
    %132 = tpu.concatenate %125, %127, %129, %131 in 1 : vector<64x4xf32>, vector<64x4xf32>, vector<64x4xf32>, vector<64x4xf32> -> vector<64x16xf32>
    %133 = arith.truncf %132 : vector<64x16xf32> to vector<64x16xbf16>
    %c1_44 = arith.constant 1 : index
    %c0_45 = arith.constant 0 : index
    %c0_46 = arith.constant 0 : index
    %134 = vector.load %arg7[%c1_44, %c0_45, %c0_46] : memref<2x16x8xbf16, #tpu.memory_space<vmem>>, vector<1x16x8xbf16>
    %135 = vector.shape_cast %134 : vector<1x16x8xbf16> to vector<16x8xbf16>
    %cst_47 = arith.constant dense<0.000000e+00> : vector<64x8xf32>
    %136 = tpu.matmul %133, %135, %cst_47 {dimension_numbers = #tpu.dot_dimension_numbers<[1], [0], [0], [1], [0, 0, 1, 1], [], []>} : vector<64x16xbf16>, vector<16x8xbf16>, vector<64x8xf32> -> vector<64x8xf32>
    %137 = vector.broadcast %6 : vector<1x8xf32> to vector<64x8xf32>
    %138 = arith.addf %136, %137 : vector<64x8xf32>
    %c0_48 = arith.constant 0 : index
    %c0_49 = arith.constant 0 : index
    %139 = vector.load %arg11[%c0_48, %c0_49] : memref<64x8xf32, #tpu.memory_space<vmem>>, vector<64x8xf32>
    tpu.vector_store %arg11[%c0_48, %c0_49], %138 {strides = array<i32>} : memref<64x8xf32, #tpu.memory_space<vmem>>, vector<64x8xf32>,
    return
  }
  func.func @transform_0(%arg0: i32) -> (i32, i32) {
    %c0_i32 = arith.constant 0 : i32
    %c0_i32_0 = arith.constant 0 : i32
    return %arg0, %c0_i32 : i32, i32
  }
  func.func @transform_1(%arg0: i32) -> (i32, i32) {
    %c0_i32 = arith.constant 0 : i32
    %c0_i32_0 = arith.constant 0 : i32
    return %arg0, %c0_i32 : i32, i32
  }
  func.func @transform_2(%arg0: i32) -> (i32, i32) {
    %c0_i32 = arith.constant 0 : i32
    %c0_i32_0 = arith.constant 0 : i32
    return %arg0, %c0_i32 : i32, i32
  }
  func.func @transform_3(%arg0: i32) -> (i32, i32) {
    %c0_i32 = arith.constant 0 : i32
    %c0_i32_0 = arith.constant 0 : i32
    return %arg0, %c0_i32 : i32, i32
  }
  func.func @transform_4(%arg0: i32) -> (i32, i32, i32) {
    %c0_i32 = arith.constant 0 : i32
    %c0_i32_0 = arith.constant 0 : i32
    %c0_i32_1 = arith.constant 0 : i32
    %c0_i32_2 = arith.constant 0 : i32
    return %c0_i32, %c0_i32_0, %c0_i32_1 : i32, i32, i32
  }
  func.func @transform_5(%arg0: i32) -> (i32, i32, i32) {
    %c0_i32 = arith.constant 0 : i32
    %c0_i32_0 = arith.constant 0 : i32
    %c0_i32_1 = arith.constant 0 : i32
    %c0_i32_2 = arith.constant 0 : i32
    return %c0_i32, %c0_i32_0, %c0_i32_1 : i32, i32, i32
  }
  func.func @transform_6(%arg0: i32) -> (i32, i32, i32) {
    %c0_i32 = arith.constant 0 : i32
    %c0_i32_0 = arith.constant 0 : i32
    %c0_i32_1 = arith.constant 0 : i32
    %c0_i32_2 = arith.constant 0 : i32
    return %c0_i32, %c0_i32_0, %c0_i32_1 : i32, i32, i32
  }
  func.func @transform_7(%arg0: i32) -> (i32, i32) {
    %c0_i32 = arith.constant 0 : i32
    %c0_i32_0 = arith.constant 0 : i32
    %c0_i32_1 = arith.constant 0 : i32
    return %c0_i32, %c0_i32_0 : i32, i32
  }
  func.func @transform_8(%arg0: i32) -> (i32, i32, i32) {
    %c0_i32 = arith.constant 0 : i32
    %c0_i32_0 = arith.constant 0 : i32
    %c0_i32_1 = arith.constant 0 : i32
    %c0_i32_2 = arith.constant 0 : i32
    return %c0_i32, %c0_i32_0, %c0_i32_1 : i32, i32, i32
  }
  func.func @transform_9(%arg0: i32) -> (i32, i32) {
    %c0_i32 = arith.constant 0 : i32
    %c0_i32_0 = arith.constant 0 : i32
    return %arg0, %c0_i32 : i32, i32
  }
  func.func @transform_10(%arg0: i32) -> (i32, i32) {
    %c0_i32 = arith.constant 0 : i32
    %c0_i32_0 = arith.constant 0 : i32
    return %arg0, %c0_i32 : i32, i32
  }
}

module attributes {stable_mosaic.version = 11 : i64} {
  func.func @_res_ln_mlp_kernel(%arg0: i32, %arg1: i32, %arg2: memref<1x64x8xf32, #tpu.memory_space<vmem>>, %arg3: memref<1x64x8xf32, #tpu.memory_space<vmem>>, %arg4: memref<1x64x8xf32, #tpu.memory_space<vmem>>, %arg5: memref<1x64x8xf32, #tpu.memory_space<vmem>>, %arg6: memref<4x8xf32, #tpu.memory_space<vmem>>, %arg7: memref<2x8x32xbf16, #tpu.memory_space<vmem>>, %arg8: memref<2x32xf32, #tpu.memory_space<vmem>>, %arg9: memref<2x32x8xbf16, #tpu.memory_space<vmem>>, %arg10: memref<2x8xf32, #tpu.memory_space<vmem>>, %arg11: memref<1x64x8xf32, #tpu.memory_space<vmem>>, %arg12: memref<1x64x8xf32, #tpu.memory_space<vmem>>) attributes {dimension_semantics = [#tpu.dimension_semantics<parallel>, #tpu.dimension_semantics<parallel>], iteration_bounds = array<i64: 2, 1>, scalar_prefetch = 0 : i64, scratch_operands = 0 : i64, tpu.core_type = #tpu.core_type<tc>, window_params = [{transform_indices = @transform_0, window_bounds = array<i64: 1, 64, 8>}, {transform_indices = @transform_1, window_bounds = array<i64: 1, 64, 8>}, {transform_indices = @transform_2, window_bounds = array<i64: 1, 64, 8>}, {transform_indices = @transform_3, window_bounds = array<i64: 1, 64, 8>}, {pipeline_mode = #tpu.pipeline_mode<synchronous>, transform_indices = @transform_4, window_bounds = array<i64: 4, 8>}, {pipeline_mode = #tpu.pipeline_mode<synchronous>, transform_indices = @transform_5, window_bounds = array<i64: 2, 8, 32>}, {pipeline_mode = #tpu.pipeline_mode<synchronous>, transform_indices = @transform_6, window_bounds = array<i64: 2, 32>}, {pipeline_mode = #tpu.pipeline_mode<synchronous>, transform_indices = @transform_7, window_bounds = array<i64: 2, 32, 8>}, {pipeline_mode = #tpu.pipeline_mode<synchronous>, transform_indices = @transform_8, window_bounds = array<i64: 2, 8>}, {transform_indices = @transform_9, window_bounds = array<i64: 1, 64, 8>}, {transform_indices = @transform_10, window_bounds = array<i64: 1, 64, 8>}]} {
    %c0 = arith.constant 0 : index
    %c0_0 = arith.constant 0 : index
    %0 = vector.load %arg6[%c0, %c0_0] : memref<4x8xf32, #tpu.memory_space<vmem>>, vector<4x8xf32>
    %c0_1 = arith.constant 0 : index
    %c0_2 = arith.constant 0 : index
    %1 = vector.load %arg8[%c0_1, %c0_2] : memref<2x32xf32, #tpu.memory_space<vmem>>, vector<2x32xf32>
    %c0_3 = arith.constant 0 : index
    %c0_4 = arith.constant 0 : index
    %2 = vector.load %arg10[%c0_3, %c0_4] : memref<2x8xf32, #tpu.memory_space<vmem>>, vector<2x8xf32>
    %c0_5 = arith.constant 0 : index
    %c0_6 = arith.constant 0 : index
    %c0_7 = arith.constant 0 : index
    %3 = vector.load %arg2[%c0_5, %c0_6, %c0_7] : memref<1x64x8xf32, #tpu.memory_space<vmem>>, vector<1x64x8xf32>
    %4 = vector.shape_cast %3 : vector<1x64x8xf32> to vector<64x8xf32>
    %c0_8 = arith.constant 0 : index
    %c0_9 = arith.constant 0 : index
    %c0_10 = arith.constant 0 : index
    %5 = vector.load %arg4[%c0_8, %c0_9, %c0_10] : memref<1x64x8xf32, #tpu.memory_space<vmem>>, vector<1x64x8xf32>
    %6 = vector.shape_cast %5 : vector<1x64x8xf32> to vector<64x8xf32>
    %7 = vector.extract_strided_slice %0 {offsets = [0, 0], sizes = [1, 8], strides = [1, 1]} : vector<4x8xf32> to vector<1x8xf32>
    %8 = vector.extract_strided_slice %0 {offsets = [1, 0], sizes = [1, 8], strides = [1, 1]} : vector<4x8xf32> to vector<1x8xf32>
    %c0_11 = arith.constant 0 : index
    %c0_12 = arith.constant 0 : index
    %c0_13 = arith.constant 0 : index
    %9 = vector.load %arg7[%c0_11, %c0_12, %c0_13] : memref<2x8x32xbf16, #tpu.memory_space<vmem>>, vector<1x8x32xbf16>
    %10 = vector.shape_cast %9 : vector<1x8x32xbf16> to vector<8x32xbf16>
    %11 = vector.extract_strided_slice %1 {offsets = [0, 0], sizes = [1, 32], strides = [1, 1]} : vector<2x32xf32> to vector<1x32xf32>
    %c0_14 = arith.constant 0 : index
    %c0_15 = arith.constant 0 : index
    %c0_16 = arith.constant 0 : index
    %12 = vector.load %arg9[%c0_14, %c0_15, %c0_16] : memref<2x32x8xbf16, #tpu.memory_space<vmem>>, vector<1x32x8xbf16>
    %13 = vector.shape_cast %12 : vector<1x32x8xbf16> to vector<32x8xbf16>
    %14 = vector.extract_strided_slice %2 {offsets = [0, 0], sizes = [1, 8], strides = [1, 1]} : vector<2x8xf32> to vector<1x8xf32>
    %15 = arith.addf %4, %6 : vector<64x8xf32>
    %cst = arith.constant dense<0.000000e+00> : vector<64xf32>
    %16 = vector.multi_reduction <add>, %15, %cst [1] : vector<64x8xf32> to vector<64xf32>
    %17 = vector.shape_cast %16 : vector<64xf32> to vector<64x1xf32>
    %cst_17 = arith.constant 8.000000e+00 : f32
    %18 = vector.broadcast %cst_17 : f32 to vector<64x1xf32>
    %19 = arith.divf %17, %18 : vector<64x1xf32>
    %20 = vector.broadcast %19 : vector<64x1xf32> to vector<64x8xf32>
    %21 = arith.subf %15, %20 : vector<64x8xf32>
    %22 = arith.mulf %21, %21 : vector<64x8xf32>
    %cst_18 = arith.constant dense<0.000000e+00> : vector<64xf32>
    %23 = vector.multi_reduction <add>, %22, %cst_18 [1] : vector<64x8xf32> to vector<64xf32>
    %24 = vector.shape_cast %23 : vector<64xf32> to vector<64x1xf32>
    %cst_19 = arith.constant 8.000000e+00 : f32
    %25 = vector.broadcast %cst_19 : f32 to vector<64x1xf32>
    %26 = arith.divf %24, %25 : vector<64x1xf32>
    %27 = vector.broadcast %19 : vector<64x1xf32> to vector<64x8xf32>
    %28 = arith.subf %15, %27 : vector<64x8xf32>
    %cst_20 = arith.constant 9.99999974E-6 : f32
    %29 = vector.broadcast %cst_20 : f32 to vector<64x1xf32>
    %30 = arith.addf %26, %29 : vector<64x1xf32>
    %31 = math.rsqrt %30 : vector<64x1xf32>
    %32 = vector.broadcast %31 : vector<64x1xf32> to vector<64x8xf32>
    %33 = arith.mulf %28, %32 : vector<64x8xf32>
    %34 = vector.broadcast %7 : vector<1x8xf32> to vector<64x8xf32>
    %35 = arith.mulf %33, %34 : vector<64x8xf32>
    %36 = vector.broadcast %8 : vector<1x8xf32> to vector<64x8xf32>
    %37 = arith.addf %35, %36 : vector<64x8xf32>
    %38 = arith.truncf %37 : vector<64x8xf32> to vector<64x8xbf16>
    %cst_21 = arith.constant dense<0.000000e+00> : vector<64x32xf32>
    %39 = tpu.matmul %38, %10, %cst_21 {dimension_numbers = #tpu.dot_dimension_numbers<[1], [0], [0], [1], [0, 0, 1, 1], [], []>} : vector<64x8xbf16>, vector<8x32xbf16>, vector<64x32xf32> -> vector<64x32xf32>
    %40 = vector.broadcast %11 : vector<1x32xf32> to vector<64x32xf32>
    %41 = arith.addf %39, %40 : vector<64x32xf32>
    %cst_22 = arith.constant 5.000000e-01 : f32
    %42 = vector.broadcast %cst_22 : f32 to vector<64x32xf32>
    %43 = arith.mulf %42, %41 : vector<64x32xf32>
    %cst_23 = arith.constant 0.707106769 : f32
    %44 = vector.broadcast %cst_23 : f32 to vector<64x32xf32>
    %45 = arith.mulf %41, %44 : vector<64x32xf32>
    %46 = math.erf %45 : vector<64x32xf32>
    %cst_24 = arith.constant 1.000000e+00 : f32
    %47 = vector.broadcast %cst_24 : f32 to vector<64x32xf32>
    %48 = arith.addf %47, %46 : vector<64x32xf32>
    %49 = arith.mulf %43, %48 : vector<64x32xf32>
    %50 = arith.truncf %49 : vector<64x32xf32> to vector<64x32xbf16>
    %cst_25 = arith.constant dense<0.000000e+00> : vector<64x8xf32>
    %51 = tpu.matmul %50, %13, %cst_25 {dimension_numbers = #tpu.dot_dimension_numbers<[1], [0], [0], [1], [0, 0, 1, 1], [], []>} : vector<64x32xbf16>, vector<32x8xbf16>, vector<64x8xf32> -> vector<64x8xf32>
    %52 = vector.broadcast %14 : vector<1x8xf32> to vector<64x8xf32>
    %53 = arith.addf %51, %52 : vector<64x8xf32>
    %54 = arith.addf %15, %53 : vector<64x8xf32>
    %c0_26 = arith.constant 0 : index
    %c0_27 = arith.constant 0 : index
    %c0_28 = arith.constant 0 : index
    %55 = vector.load %arg11[%c0_26, %c0_27, %c0_28] : memref<1x64x8xf32, #tpu.memory_space<vmem>>, vector<1x64x8xf32>
    %56 = vector.shape_cast %55 : vector<1x64x8xf32> to vector<64x8xf32>
    %57 = vector.shape_cast %54 : vector<64x8xf32> to vector<1x64x8xf32>
    tpu.vector_store %arg11[%c0_26, %c0_27, %c0_28], %57 {strides = array<i32>} : memref<1x64x8xf32, #tpu.memory_space<vmem>>, vector<1x64x8xf32>,
    %c0_29 = arith.constant 0 : index
    %c0_30 = arith.constant 0 : index
    %c0_31 = arith.constant 0 : index
    %58 = vector.load %arg3[%c0_29, %c0_30, %c0_31] : memref<1x64x8xf32, #tpu.memory_space<vmem>>, vector<1x64x8xf32>
    %59 = vector.shape_cast %58 : vector<1x64x8xf32> to vector<64x8xf32>
    %c0_32 = arith.constant 0 : index
    %c0_33 = arith.constant 0 : index
    %c0_34 = arith.constant 0 : index
    %60 = vector.load %arg5[%c0_32, %c0_33, %c0_34] : memref<1x64x8xf32, #tpu.memory_space<vmem>>, vector<1x64x8xf32>
    %61 = vector.shape_cast %60 : vector<1x64x8xf32> to vector<64x8xf32>
    %62 = vector.extract_strided_slice %0 {offsets = [2, 0], sizes = [1, 8], strides = [1, 1]} : vector<4x8xf32> to vector<1x8xf32>
    %63 = vector.extract_strided_slice %0 {offsets = [3, 0], sizes = [1, 8], strides = [1, 1]} : vector<4x8xf32> to vector<1x8xf32>
    %c1 = arith.constant 1 : index
    %c0_35 = arith.constant 0 : index
    %c0_36 = arith.constant 0 : index
    %64 = vector.load %arg7[%c1, %c0_35, %c0_36] : memref<2x8x32xbf16, #tpu.memory_space<vmem>>, vector<1x8x32xbf16>
    %65 = vector.shape_cast %64 : vector<1x8x32xbf16> to vector<8x32xbf16>
    %66 = vector.extract_strided_slice %1 {offsets = [1, 0], sizes = [1, 32], strides = [1, 1]} : vector<2x32xf32> to vector<1x32xf32>
    %c1_37 = arith.constant 1 : index
    %c0_38 = arith.constant 0 : index
    %c0_39 = arith.constant 0 : index
    %67 = vector.load %arg9[%c1_37, %c0_38, %c0_39] : memref<2x32x8xbf16, #tpu.memory_space<vmem>>, vector<1x32x8xbf16>
    %68 = vector.shape_cast %67 : vector<1x32x8xbf16> to vector<32x8xbf16>
    %69 = vector.extract_strided_slice %2 {offsets = [1, 0], sizes = [1, 8], strides = [1, 1]} : vector<2x8xf32> to vector<1x8xf32>
    %70 = arith.addf %59, %61 : vector<64x8xf32>
    %cst_40 = arith.constant dense<0.000000e+00> : vector<64xf32>
    %71 = vector.multi_reduction <add>, %70, %cst_40 [1] : vector<64x8xf32> to vector<64xf32>
    %72 = vector.shape_cast %71 : vector<64xf32> to vector<64x1xf32>
    %cst_41 = arith.constant 8.000000e+00 : f32
    %73 = vector.broadcast %cst_41 : f32 to vector<64x1xf32>
    %74 = arith.divf %72, %73 : vector<64x1xf32>
    %75 = vector.broadcast %74 : vector<64x1xf32> to vector<64x8xf32>
    %76 = arith.subf %70, %75 : vector<64x8xf32>
    %77 = arith.mulf %76, %76 : vector<64x8xf32>
    %cst_42 = arith.constant dense<0.000000e+00> : vector<64xf32>
    %78 = vector.multi_reduction <add>, %77, %cst_42 [1] : vector<64x8xf32> to vector<64xf32>
    %79 = vector.shape_cast %78 : vector<64xf32> to vector<64x1xf32>
    %cst_43 = arith.constant 8.000000e+00 : f32
    %80 = vector.broadcast %cst_43 : f32 to vector<64x1xf32>
    %81 = arith.divf %79, %80 : vector<64x1xf32>
    %82 = vector.broadcast %74 : vector<64x1xf32> to vector<64x8xf32>
    %83 = arith.subf %70, %82 : vector<64x8xf32>
    %cst_44 = arith.constant 9.99999974E-6 : f32
    %84 = vector.broadcast %cst_44 : f32 to vector<64x1xf32>
    %85 = arith.addf %81, %84 : vector<64x1xf32>
    %86 = math.rsqrt %85 : vector<64x1xf32>
    %87 = vector.broadcast %86 : vector<64x1xf32> to vector<64x8xf32>
    %88 = arith.mulf %83, %87 : vector<64x8xf32>
    %89 = vector.broadcast %62 : vector<1x8xf32> to vector<64x8xf32>
    %90 = arith.mulf %88, %89 : vector<64x8xf32>
    %91 = vector.broadcast %63 : vector<1x8xf32> to vector<64x8xf32>
    %92 = arith.addf %90, %91 : vector<64x8xf32>
    %93 = arith.truncf %92 : vector<64x8xf32> to vector<64x8xbf16>
    %cst_45 = arith.constant dense<0.000000e+00> : vector<64x32xf32>
    %94 = tpu.matmul %93, %65, %cst_45 {dimension_numbers = #tpu.dot_dimension_numbers<[1], [0], [0], [1], [0, 0, 1, 1], [], []>} : vector<64x8xbf16>, vector<8x32xbf16>, vector<64x32xf32> -> vector<64x32xf32>
    %95 = vector.broadcast %66 : vector<1x32xf32> to vector<64x32xf32>
    %96 = arith.addf %94, %95 : vector<64x32xf32>
    %cst_46 = arith.constant 5.000000e-01 : f32
    %97 = vector.broadcast %cst_46 : f32 to vector<64x32xf32>
    %98 = arith.mulf %97, %96 : vector<64x32xf32>
    %cst_47 = arith.constant 0.707106769 : f32
    %99 = vector.broadcast %cst_47 : f32 to vector<64x32xf32>
    %100 = arith.mulf %96, %99 : vector<64x32xf32>
    %101 = math.erf %100 : vector<64x32xf32>
    %cst_48 = arith.constant 1.000000e+00 : f32
    %102 = vector.broadcast %cst_48 : f32 to vector<64x32xf32>
    %103 = arith.addf %102, %101 : vector<64x32xf32>
    %104 = arith.mulf %98, %103 : vector<64x32xf32>
    %105 = arith.truncf %104 : vector<64x32xf32> to vector<64x32xbf16>
    %cst_49 = arith.constant dense<0.000000e+00> : vector<64x8xf32>
    %106 = tpu.matmul %105, %68, %cst_49 {dimension_numbers = #tpu.dot_dimension_numbers<[1], [0], [0], [1], [0, 0, 1, 1], [], []>} : vector<64x32xbf16>, vector<32x8xbf16>, vector<64x8xf32> -> vector<64x8xf32>
    %107 = vector.broadcast %69 : vector<1x8xf32> to vector<64x8xf32>
    %108 = arith.addf %106, %107 : vector<64x8xf32>
    %109 = arith.addf %70, %108 : vector<64x8xf32>
    %c0_50 = arith.constant 0 : index
    %c0_51 = arith.constant 0 : index
    %c0_52 = arith.constant 0 : index
    %110 = vector.load %arg12[%c0_50, %c0_51, %c0_52] : memref<1x64x8xf32, #tpu.memory_space<vmem>>, vector<1x64x8xf32>
    %111 = vector.shape_cast %110 : vector<1x64x8xf32> to vector<64x8xf32>
    %112 = vector.shape_cast %109 : vector<64x8xf32> to vector<1x64x8xf32>
    tpu.vector_store %arg12[%c0_50, %c0_51, %c0_52], %112 {strides = array<i32>} : memref<1x64x8xf32, #tpu.memory_space<vmem>>, vector<1x64x8xf32>,
    return
  }
  func.func @transform_0(%arg0: i32, %arg1: i32) -> (i32, i32, i32) {
    %c0_i32 = arith.constant 0 : i32
    %c0_i32_0 = arith.constant 0 : i32
    return %arg0, %arg1, %c0_i32 : i32, i32, i32
  }
  func.func @transform_1(%arg0: i32, %arg1: i32) -> (i32, i32, i32) {
    %c0_i32 = arith.constant 0 : i32
    %c0_i32_0 = arith.constant 0 : i32
    return %arg0, %arg1, %c0_i32 : i32, i32, i32
  }
  func.func @transform_2(%arg0: i32, %arg1: i32) -> (i32, i32, i32) {
    %c0_i32 = arith.constant 0 : i32
    %c0_i32_0 = arith.constant 0 : i32
    return %arg0, %arg1, %c0_i32 : i32, i32, i32
  }
  func.func @transform_3(%arg0: i32, %arg1: i32) -> (i32, i32, i32) {
    %c0_i32 = arith.constant 0 : i32
    %c0_i32_0 = arith.constant 0 : i32
    return %arg0, %arg1, %c0_i32 : i32, i32, i32
  }
  func.func @transform_4(%arg0: i32, %arg1: i32) -> (i32, i32) {
    %c0_i32 = arith.constant 0 : i32
    %c0_i32_0 = arith.constant 0 : i32
    %c0_i32_1 = arith.constant 0 : i32
    return %c0_i32, %c0_i32_0 : i32, i32
  }
  func.func @transform_5(%arg0: i32, %arg1: i32) -> (i32, i32, i32) {
    %c0_i32 = arith.constant 0 : i32
    %c0_i32_0 = arith.constant 0 : i32
    %c0_i32_1 = arith.constant 0 : i32
    %c0_i32_2 = arith.constant 0 : i32
    return %c0_i32, %c0_i32_0, %c0_i32_1 : i32, i32, i32
  }
  func.func @transform_6(%arg0: i32, %arg1: i32) -> (i32, i32) {
    %c0_i32 = arith.constant 0 : i32
    %c0_i32_0 = arith.constant 0 : i32
    %c0_i32_1 = arith.constant 0 : i32
    return %c0_i32, %c0_i32_0 : i32, i32
  }
  func.func @transform_7(%arg0: i32, %arg1: i32) -> (i32, i32, i32) {
    %c0_i32 = arith.constant 0 : i32
    %c0_i32_0 = arith.constant 0 : i32
    %c0_i32_1 = arith.constant 0 : i32
    %c0_i32_2 = arith.constant 0 : i32
    return %c0_i32, %c0_i32_0, %c0_i32_1 : i32, i32, i32
  }
  func.func @transform_8(%arg0: i32, %arg1: i32) -> (i32, i32) {
    %c0_i32 = arith.constant 0 : i32
    %c0_i32_0 = arith.constant 0 : i32
    %c0_i32_1 = arith.constant 0 : i32
    return %c0_i32, %c0_i32_0 : i32, i32
  }
  func.func @transform_9(%arg0: i32, %arg1: i32) -> (i32, i32, i32) {
    %c0_i32 = arith.constant 0 : i32
    %c0_i32_0 = arith.constant 0 : i32
    return %arg0, %arg1, %c0_i32 : i32, i32, i32
  }
  func.func @transform_10(%arg0: i32, %arg1: i32) -> (i32, i32, i32) {
    %c0_i32 = arith.constant 0 : i32
    %c0_i32_0 = arith.constant 0 : i32
    return %arg0, %arg1, %c0_i32 : i32, i32, i32
  }
}

</mosaic_0001>

<bundles_post_ra>
// kernel: tpu_custom_call.1
= control target key start
LH: loop header
LB: loop body
LE: loop exit
PB: predicated region body
PF: predicated region fallthrough
CT: control target
= control target key end

     0   :  { %7 = vsyncpa [#allocation3], 0  ;;  %s690_s0 = inlined_call_operand.hbm [shape: f32[16,128], index: 0, kind: input, shape index: {}]   ;;  %s691_s1 = inlined_call_operand.hbm [shape: f32[8,128], index: 1, kind: input, shape index: {}]   ;;  %s692_s2 = inlined_call_operand.hbm [shape: f32[16,128], index: 2, kind: output, shape index: {}]  }
   0x1   :  { %9 = vsyncpa [#allocation3 + $0x1], 0 }
   0x2   :  { %10 = vsyncpa [#allocation6], 0 }
   0x3   :  { %11 = vsyncpa [#allocation4], 0 }
   0x4   :  { %13 = vsyncpa [#allocation4 + $0x1], 0  ;;  %s489_s9 = smov 0   ;;  %s491_s10 = smov 0  }
   0x5   :  { %s493_s11 = smov 0   ;;  %s495_s12 = smov 0  }
   0x6 LB: > { %s510_s13 = sadd.s32 4294967295, %s469_s12   ;;  %s270_s14 = sadd.s32 4294967294, %s469_s12   ;;  %s469_s12 = sphi %s495_s12, %s716_s12   ;;  %s465_s11 = sphi %s493_s11, %s715_s11   ;;  %s461_s10 = sphi %s491_s10, %s714_s10   ;;  %s457_s9 = sphi %s489_s9, %s713_s9  }
   0x7   : > { %p39_p0 = scmp.ne.s32.totalorder %s461_s10, %s457_s9  ;;  %p693_p1 = scmp.eq.s32.totalorder %s510_s13, 0 }
   0x8   : > { %p90_p3 = scmp.eq.s32.totalorder %s270_s14, 1  ;;  %p271_p5 = scmp.ge.s32.totalorder %s469_s12, 1 }
   0x9   : > { %p519_p4 = por %p693_p1, %p39_p0  ;;  %p97_p7 = scmp.lt.s32.totalorder %s469_s12, 3 }
   0xa   : > { %p524_p6 = por %p90_p3, %p39_p0  ;;  %s471_s18 = smov [#allocation5]  }
   0xb   : > { %s696_s15 = scalar_select %p519_p4, 1, 0 }
   0xc   : > { %s697_s16 = scalar_select %p524_p6, 1, 0 }
   0xd   : > { %p529_p8 = pnand %p271_p5, %p97_p7  ;;  %s110_s19 = sshll.u32 %s471_s18, 4  ;;  %s111_s19 = int_to_ptr.vmem [resolvable:$true] %s110_s19 }
   0xe   : > { %s537_s20 = sadd.s32 1, %s469_s12   ;;  %s26_s24 = sadd.s32 1, %s465_s11 }
   0xf   : > { %s698_s17 = scalar_select %p529_p8, 1, 0 }
  0x10   : > { %p292_p10 = pneg %p529_p8  ;;  %s23_s22 = ssub.s32 %s469_s12, %s537_s20 }
  0x11   : > { %p547_p12 = scmp.eq.s32.totalorder %s23_s22, 0  ;;  %s341_s27 = scalar_lea.hbm %s691_s1, 128 }
  0x12   : > { %p541_p11 = pnand %p292_p10, %p693_p1  ;;  %p342_p0 = scmp.ne.s32.totalorder %s691_s1, %s341_s27 }
  0x13   : > { %s700_s23 = scalar_select %p547_p12, 1, 0 }
  0x14   : > { %p343_p3 = pneg %p541_p11  ;;  %p348_p10 = scmp.lt.u32.totalorder %s341_s27, %s691_s1 }
  0x16   : > { %p344_p5 = pnand %p343_p3, %p342_p0 }
  0x18   : > { %p345_p7 = pneg %p344_p5 }
  0x1a   : > { %p350_p9 = pnand %p348_p10, %p345_p7 }
  0x1c   : > { %353 = shalt.err (!%p350_p9)
}
  0x1d   : > { %s354_s4 = scalar_lea.vmem %s111_s19, 128  ;;  %p362_p6 = scmp.lt.s32.totalorder %s111_s19, %s111_s19 }
  0x1e   : > { %p355_p1 = scmp.ne.s32.totalorder %s111_s19, %s354_s4  ;;  %p363_p4 = scmp.lt.s32.totalorder %s354_s4, %s354_s4 }
  0x20   : > { %p357_p2 = pnand %p355_p1, %p343_p3  ;;  %p364_p8 = por %p363_p4, %p362_p6 }
  0x22   : > { %p358_p13 = pneg %p357_p2 }
  0x24   : > { %p365_p12 = pnand %p364_p8, %p358_p13 }
  0x26   : > { %368 = shalt.err (!%p365_p12)
}
  0x27   : > { %295 = dma.hbm_to_vmem [thread:$0]  (!%p541_p11), %s691_s1, 128, %s111_s19, [#allocation6]  }
  0x28   : > { %p701_p1 = scmp.ne.s32.totalorder %s700_s23, 0  ;;  %p34_p2 = scmp.eq.s32.totalorder %s469_s12, 0 }
  0x29   : > { %p702_p4 = scmp.ne.s32.totalorder %s465_s11, %s461_s10  ;;  %p703_p6 = scmp.eq.s32.totalorder %s510_s13, 1 }
  0x2a   : > { %s573_s7 = scalar_select %p701_p1, %s465_s11, %s26_s24  }
  0x2b   : > { %p581_p8 = por %p703_p6, %p702_p4  ;;  %p305_p9 = scmp.lt.s32.totalorder %s469_s12, 2 }
  0x2c   : > { %s121_s14 = sand.u32 1, %s465_s11   ;;  %p705_p12 = pmov %p702_p4 }
  0x2d   : > { %s274_s18 = sshll.u32 %s121_s14, 3  ;;  %s275_s21 = sshll.u32 %s469_s12, 7 }
  0x2e   : > { %p35_p13 = por %p34_p2, %p705_p12  ;;  %s594_s19 = scalar_lea.hbm %s690_s0, %s275_s21 }
  0x2f   : > { %s125_s23 = scalar_lea.vmem [#allocation2], %s274_s18  ;;  %s122_s27 = scalar_lea.sflag [#allocation3], %s121_s14 }
  0x30   : > { %s132_s24 = sshll.u32 %s125_s23, 4  ;;  %p596_p11 = pnand %p305_p9, %p35_p13  ;;  %s600_s24 = int_to_ptr.vmem [resolvable:$true] %s132_s24 }
  0x31   : > { %s369_s28 = scalar_lea.hbm %s594_s19, 128  ;;  %s374_s3 = scalar_lea.hbm %s690_s0, 256 }
  0x32   : > { %p370_p0 = scmp.ne.s32.totalorder %s594_s19, %s369_s28  ;;  %p371_p3 = pneg %p596_p11 }
  0x33   : > { %p375_p10 = scmp.lt.u32.totalorder %s594_s19, %s690_s0  ;;  %p376_p1 = scmp.lt.u32.totalorder %s374_s3, %s369_s28 }
  0x34   : > { %p372_p5 = pnand %p371_p3, %p370_p0  ;;  %p378_p4 = scmp.lt.u32.totalorder %s369_s28, %s594_s19 }
  0x35   : > { %p377_p2 = por %p376_p1, %p375_p10 }
  0x36   : > { %p373_p7 = pneg %p372_p5 }
  0x37   : > { %p379_p6 = por %p378_p4, %p377_p2 }
  0x39   : > { %p380_p9 = pnand %p379_p6, %p373_p7 }
  0x3b   : > { %383 = shalt.err (!%p380_p9)
}
  0x3c   : > { %s384_s6 = scalar_lea.vmem %s600_s24, 128  ;;  %s472_s14 = smov [#allocation2]  }
  0x3d   : > { %p385_p12 = scmp.ne.s32.totalorder %s600_s24, %s384_s6  ;;  %s389_s18 = sshll.u32 %s472_s14, 4  ;;  %s390_s18 = int_to_ptr.vmem [resolvable:$false] %s389_s18 }
  0x3e   : > { %s391_s21 = scalar_lea.vmem %s390_s18, 256  ;;  %p392_p5 = scmp.lt.s32.totalorder %s600_s24, %s390_s18 }
  0x3f   : > { %p387_p13 = pnand %p385_p12, %p371_p3  ;;  %p393_p10 = scmp.lt.s32.totalorder %s391_s21, %s384_s6 }
  0x41   : > { %p388_p0 = pneg %p387_p13  ;;  %p394_p1 = por %p393_p10, %p392_p5 }
  0x43   : > { %p395_p2 = pnand %p394_p1, %p388_p0 }
  0x45   : > { %398 = shalt.err (!%p395_p2)
}
  0x46   : > { %299 = dma.hbm_to_vmem [thread:$0]  (!%p596_p11), %s594_s19, 128, %s600_s24, %s122_s27  }
  0x47   : > { %p707_p7 = scmp.ne.s32.totalorder %s698_s17, 0 }
  0x48   : > { %s630_s22 = sand.u32 (!%p707_p7), 1, %s461_s10   ;;  %p708_p3 = scmp.ne.s32.totalorder (!%p707_p7), %s696_s15, 0 }
  0x49   : > { %141 = sbr.rel (%p707_p7) target bundleno = 109 (0x6d), region = 28  ;;  %s277_s25 = sshll.u32 (!%p707_p7), %s630_s22, 3 }
  0x4a   : > { %s144_s23 = scalar_lea.sflag (!%p707_p7), [#allocation3], %s630_s22  ;;  %s147_s28 = scalar_lea.vmem (!%p707_p7), [#allocation2], %s277_s25 }
  0x50   : > { %444 = dma.done.wait (%p708_p3), %s144_s23, 128  }
  0x51   : > { %446 = vsyncadd (%p708_p3), %s144_s23, 4294967168  ;;  %p709_p4 = scmp.eq.s32.totalorder %s510_s13, 0 }
  0x53   : > { %448 = dma.done.wait (%p709_p4), [#allocation6], 128   ;;  %p710_p11 = pmov %p709_p4 }
  0x54   : > { %s171_s17 = scalar_lea.vmem [#allocation7], %s277_s25  ;;  %s281_s24 = sshll.u32 %s510_s13, 7  ;;  %v172_v0 = vld [vmem:[%s147_s28] sm:$0xff]  ;;  %v173_v1 = vld [vmem:[#allocation5] sm:$0xff] }
  0x55   : > { %450 = vsyncadd (%p710_p11), [#allocation6], 4294967168  ;;  %s190_s19 = sshll.u32 %s171_s17, 4  ;;  %v174_v2 = vadd.f32 %v173_v1, %v172_v0  ;;  %s648_s27 = scalar_lea.hbm %s692_s2, %s281_s24  ;;  %s643_s19 = int_to_ptr.vmem [resolvable:$true] %s190_s19 }
  0x56   : > { %s177_s29 = scalar_lea.sflag [#allocation4], %s630_s22  ;;  %s399_s30 = scalar_lea.vmem %s643_s19, 128 }
  0x57   : > { %175 = vst [vmem:[%s171_s17] sm:$0xff] %v174_v2  ;;  %p400_p6 = scmp.ne.s32.totalorder %s643_s19, %s399_s30  ;;  %s473_s13 = smov [#allocation7]  }
  0x58   : > { %s403_s3 = sshll.u32 %s473_s13, 4  ;;  %s404_s3 = int_to_ptr.vmem [resolvable:$false] %s403_s3 }
  0x59   : > { %p401_p9 = pnand %p400_p6, %p581_p8  ;;  %s405_s4 = scalar_lea.vmem %s404_s3, 256 }
  0x5a   : > { %p406_p13 = scmp.lt.s32.totalorder %s643_s19, %s404_s3  ;;  %p407_p0 = scmp.lt.s32.totalorder %s405_s4, %s399_s30 }
  0x5b   : > { %p402_p12 = pneg %p401_p9 }
  0x5c   : > { %p408_p5 = por %p407_p0, %p406_p13 }
  0x5e   : > { %p409_p10 = pnand %p408_p5, %p402_p12 }
  0x60   : > { %412 = shalt.err (!%p409_p10)
}
  0x61   : > { %s413_s5 = scalar_lea.hbm %s648_s27, 128  ;;  %s417_s18 = scalar_lea.hbm %s692_s2, 256 }
  0x62   : > { %p414_p1 = scmp.ne.s32.totalorder %s648_s27, %s413_s5  ;;  %p418_p3 = scmp.lt.u32.totalorder %s648_s27, %s692_s2 }
  0x63   : > { %p419_p4 = scmp.lt.u32.totalorder %s417_s18, %s413_s5  ;;  %p421_p6 = scmp.lt.u32.totalorder %s413_s5, %s648_s27 }
  0x64   : > { %p415_p2 = pnand %p414_p1, %p581_p8 }
  0x65   : > { %p420_p11 = por %p419_p4, %p418_p3 }
  0x66   : > { %p416_p7 = pneg %p415_p2 }
  0x67   : > { %p422_p9 = por %p421_p6, %p420_p11 }
  0x69   : > { %p423_p12 = pnand %p422_p9, %p416_p7 }
  0x6b   : > { %426 = shalt.err (!%p423_p12)
}
  0x6c   : > { %290 = dma.vmem_to_hbm [thread:$0]  (%p581_p8), %s643_s19, 128, %s648_s27, %s177_s29  }
  0x6d PF: > { %s202_s25 = sand.u32 1, %s457_s9   ;;  %p711_p13 = scmp.ne.s32.totalorder %s697_s16, 0 }
  0x6e   : > { %p712_p0 = scmp.ge.s32.totalorder %s469_s12, 2  ;;  %s203_s23 = scalar_lea.sflag [#allocation4], %s202_s25 }
  0x70   : > { %p301_p5 = pnand %p712_p0, %p711_p13 }
  0x72   : > { %452 = dma.done.wait (!%p301_p5), %s203_s23, 128  }
  0x73   : > { %454 = vsyncadd (!%p301_p5), %s203_s23, 4294967168  ;;  %p16_p10 = scmp.ge.s32.totalorder %s537_s20, 4   ;;  %s713_s9 = smov %s461_s10 }
  0x74   : > { %s714_s10 = smov %s465_s11  ;;  %s715_s11 = smov %s573_s7 }
  0x75   : > { %s716_s12 = smov %s537_s20  ;;  %18 = sbr.rel (!%p16_p10) target bundleno = 6 (0x6), region = 77 }
  0x7c   :  { %208 = vsyncpa [#allocation3], 1 }
  0x7d   :  { %210 = vsyncpa [#allocation3 + $0x1], 1 }
  0x7e   :  { %211 = vsyncpa [#allocation6], 1 }
  0x7f   :  { %212 = vsyncpa [#allocation4], 1 }
  0x80   :  { %214 = vsyncpa [#allocation4 + $0x1], 1 }

// kernel: swin_block_forward.3
= control target key start
LH: loop header
LB: loop body
LE: loop exit
PB: predicated region body
PF: predicated region fallthrough
CT: control target
= control target key end

     0   :  { %s1761_s0 = inlined_call_operand.hbm [shape: f32[2,64,8], index: 0, kind: input, shape index: {}]   ;;  %s1762_s1 = inlined_call_operand.hbm [shape: f32[2,64,8], index: 1, kind: input, shape index: {}]   ;;  %s1763_s2 = inlined_call_operand.hbm [shape: f32[4,8], index: 2, kind: input, shape index: {}]   ;;  %s1764_s3 = inlined_call_operand.hbm [shape: f32[2,64,8], index: 3, kind: output, shape index: {0}]   ;;  %s1765_s4 = inlined_call_operand.hbm [shape: f32[2,64,8], index: 4, kind: output, shape index: {1}]  }
   0x1   :  { %1773 = sst [smem:[#allocation17_spill]] %s1761_s0 }
   0x2   :  { %1774 = sst [smem:[#allocation18_spill]] %s1763_s2 }
   0x3   :  { %10 = vsyncpa [#allocation3], 0 }
   0x4   :  { %12 = vsyncpa [#allocation3 + $0x1], 0 }
   0x5   :  { %13 = vsyncpa [#allocation6], 0 }
   0x6   :  { %15 = vsyncpa [#allocation6 + $0x1], 0 }
   0x7   :  { %16 = vsyncpa [#allocation4], 0 }
   0x8   :  { %18 = vsyncpa [#allocation4 + $0x1], 0 }
   0x9   :  { %19 = vsyncpa [#allocation10], 0 }
   0xa   :  { %21 = vsyncpa [#allocation10 + $0x1], 0  ;;  %s1188_s15 = smov 0   ;;  %s1190_s16 = smov 0  }
   0xb   :  { %s1192_s17 = smov 0   ;;  %s1194_s18 = smov 0  }
   0xc   :  { %s1196_s19 = smov 0   ;;  %s1198_s20 = smov 0  }
   0xd LB: > { %s1219_s21 = sadd.s32 4294967295, %s1152_s20   ;;  %s795_s22 = sadd.s32 4294967294, %s1152_s20   ;;  %s1152_s20 = sphi %s1198_s20, %s27_s20   ;;  %s1148_s19 = sphi %s1196_s19, %s1801_s19   ;;  %s1144_s18 = sphi %s1194_s18, %s1800_s18   ;;  %s1140_s17 = sphi %s1192_s17, %s1799_s17   ;;  %s1136_s16 = sphi %s1190_s16, %s1798_s16   ;;  %s1132_s15 = sphi %s1188_s15, %s1797_s15  }
   0xe   : > { %s48_s23 = sadd.s32 1, %s1140_s17  ;;  %p55_p0 = scmp.ne.s32.totalorder %s1140_s17, %s1136_s16 }
   0xf   : > { %p56_p1 = scmp.eq.s32.totalorder %s1152_s20, 0  ;;  %p61_p2 = scmp.ne.s32.totalorder %s1136_s16, %s1132_s15 }
  0x10   : > { %p1766_p3 = scmp.eq.s32.totalorder %s1219_s21, 0  ;;  %p136_p4 = scmp.eq.s32.totalorder %s1219_s21, 1 }
  0x11   : > { %p1230_p5 = por %p56_p1, %p55_p0  ;;  %p142_p6 = scmp.eq.s32.totalorder %s795_s22, 1 }
  0x12   : > { %p1236_p7 = por %p1766_p3, %p61_p2  ;;  %p1240_p8 = por %p136_p4, %p55_p0 }
  0x13   : > { %p1244_p9 = por %p142_p6, %p61_p2  ;;  %p796_p10 = scmp.ge.s32.totalorder %s1152_s20, 1 }
  0x14   : > { %s1776_s25 = scalar_select %p1236_p7, 1, 0 }
  0x15   : > { %s1777_s26 = scalar_select %p1240_p8, 1, 0 }
  0x16   : > { %s1778_s27 = scalar_select %p1244_p9, 1, 0 }
  0x17   : > { %p177_p11 = scmp.lt.s32.totalorder %s1152_s20, 3  ;;  %s1154_s29 = smov [#allocation7]  }
  0x18   : > { %s190_s30 = sshll.u32 %s1154_s29, 4  ;;  %p854_p1 = scmp.lt.s32.totalorder %s1152_s20, 2  ;;  %s191_s30 = int_to_ptr.vmem [resolvable:$true] %s190_s30 }
  0x19   : > { %p1251_p13 = pnand %p796_p10, %p177_p11  ;;  %s39_s7 = sadd.s32 1, %s1148_s19 }
  0x1a   : > { %p1260_p4 = pnand %p854_p1, %p1230_p5  ;;  %p1271_p6 = scmp.ge.s32.totalorder %s39_s7, 2 }
  0x1b   : > { %s1779_s28 = scalar_select %p1251_p13, 1, 0 }
  0x1c   : > { %p835_p0 = pneg %p1251_p13  ;;  %s201_s9 = sand.u32 1, %s1140_s17  }
  0x1d   : > { %s1780_s5 = scalar_select %p1260_p4, 1, 0 }
  0x1e   : > { %p1266_p2 = pnand %p835_p0, %p1766_p3  ;;  %s1783_s2 = sld [smem:[#allocation18_spill]] }
  0x1f   : > { %s1782_s8 = scalar_select %p1271_p6, 1, 0 }
  0x20   : > { %p944_p10 = pneg %p1266_p2 }
  0x24   : > { %s942_s12 = scalar_lea.hbm %s1783_s2, 64 }
  0x25   : > { %p943_p5 = scmp.ne.s32.totalorder %s1783_s2, %s942_s12  ;;  %p949_p0 = scmp.lt.u32.totalorder %s942_s12, %s1783_s2 }
  0x27   : > { %p945_p11 = pnand %p944_p10, %p943_p5 }
  0x29   : > { %p946_p1 = pneg %p945_p11 }
  0x2b   : > { %p951_p12 = pnand %p949_p0, %p946_p1 }
  0x2d   : > { %954 = shalt.err (!%p951_p12)
}
  0x2e   : > { %s955_s29 = scalar_lea.vmem %s191_s30, 64  ;;  %p963_p7 = scmp.lt.s32.totalorder %s191_s30, %s191_s30 }
  0x2f   : > { %p956_p3 = scmp.ne.s32.totalorder %s191_s30, %s955_s29  ;;  %p964_p13 = scmp.lt.s32.totalorder %s955_s29, %s955_s29 }
  0x31   : > { %p958_p9 = pnand %p956_p3, %p944_p10  ;;  %p965_p4 = por %p964_p13, %p963_p7 }
  0x33   : > { %p959_p8 = pneg %p958_p9 }
  0x35   : > { %p966_p6 = pnand %p965_p4, %p959_p8 }
  0x37   : > { %969 = shalt.err (!%p966_p6)
}
  0x38   : > { %838 = dma.hbm_to_vmem [thread:$0]  (!%p1266_p2), %s1783_s2, 64, %s191_s30, [#allocation6]  }
  0x39   : > { %p1784_p3 = scmp.ne.s32.totalorder %s1782_s8, 0  ;;  %s1296_s12 = sshll.u32 %s201_s9, 6 }
  0x3a   : > { %s1771_s13 = sshll.u32 %s1148_s19, 10  ;;  %s1786_s0 = sld [smem:[#allocation17_spill]] }
  0x3b   : > { %s1803_s7 = smov (%p1784_p3, %s39_s7), 0  ;;  %s205_s30 = scalar_lea.vmem [#allocation2], %s1296_s12 }
  0x3c   : > { %1785 = sst [smem:[#allocation16_spill]] %s1803_s7  ;;  %s43_s6 = ssub.s32 %s1148_s19, %s1803_s7 }
  0x3d   : > { %p46_p7 = scmp.eq.s32.totalorder %s43_s6, 0  ;;  %s214_s8 = sshll.u32 %s205_s30, 4  ;;  %s1314_s8 = int_to_ptr.vmem [resolvable:$true] %s214_s8 }
  0x3e   : > { %s1316_s10 = scalar_lea.sflag [#allocation3], %s201_s9  ;;  %p1787_p9 = scmp.ne.s32.totalorder %s1780_s5, 0 }
  0x3f   : > { %s1312_s29 = scalar_select %p46_p7, %s1140_s17, %s48_s23  }
  0x40   : > { %s1306_s24 = scalar_lea.hbm %s1786_s0, %s1771_s13  ;;  %p972_p12 = pneg %p1787_p9 }
  0x41   : > { %s970_s11 = scalar_lea.hbm %s1306_s24, 1024  ;;  %s975_s22 = scalar_lea.hbm %s1786_s0, 2048 }
  0x42   : > { %p971_p8 = scmp.ne.s32.totalorder %s1306_s24, %s970_s11  ;;  %p976_p2 = scmp.lt.u32.totalorder %s1306_s24, %s1786_s0 }
  0x43   : > { %p977_p6 = scmp.lt.u32.totalorder %s975_s22, %s970_s11  ;;  %p979_p10 = scmp.lt.u32.totalorder %s970_s11, %s1306_s24 }
  0x44   : > { %p973_p13 = pnand %p972_p12, %p971_p8 }
  0x45   : > { %p978_p5 = por %p977_p6, %p976_p2 }
  0x46   : > { %p974_p4 = pneg %p973_p13 }
  0x47   : > { %p980_p11 = por %p979_p10, %p978_p5 }
  0x49   : > { %p981_p1 = pnand %p980_p11, %p974_p4 }
  0x4b   : > { %984 = shalt.err (!%p981_p1)
}
  0x4c   : > { %s985_s23 = scalar_lea.vmem %s1314_s8, 1024  ;;  %s1155_s9 = smov [#allocation2]  }
  0x4d   : > { %p986_p0 = scmp.ne.s32.totalorder %s1314_s8, %s985_s23  ;;  %s990_s6 = sshll.u32 %s1155_s9, 4  ;;  %s991_s6 = int_to_ptr.vmem [resolvable:$false] %s990_s6 }
  0x4e   : > { %s992_s13 = scalar_lea.vmem %s991_s6, 2048  ;;  %p993_p8 = scmp.lt.s32.totalorder %s1314_s8, %s991_s6 }
  0x4f   : > { %p988_p3 = pnand %p986_p0, %p972_p12  ;;  %p994_p13 = scmp.lt.s32.totalorder %s992_s13, %s985_s23 }
  0x51   : > { %p989_p7 = pneg %p988_p3  ;;  %p995_p2 = por %p994_p13, %p993_p8 }
  0x53   : > { %p996_p6 = pnand %p995_p2, %p989_p7 }
  0x55   : > { %999 = shalt.err (!%p996_p6)
}
  0x56   : > { %s1156_s11 = smov 128   ;;  %s1157_s14 = smov 8  }
  0x57   : > { %842 = dma.hbm_to_vmem [thread:$0]  (!%p1787_p9), %s1306_s24, 1024, %s1314_s8, %s1316_s10, %s1156_s11, %s1156_s11, %s1157_s14  }
  0x58   : > { %s1788_s22 = sshll.u32 %s1148_s19, 10  ;;  %s228_s6 = scalar_lea.vmem [#allocation5], %s1296_s12 }
  0x59   : > { %s1352_s9 = scalar_lea.hbm %s1762_s1, %s1788_s22  ;;  %s237_s13 = sshll.u32 %s228_s6, 4  ;;  %s1355_s13 = int_to_ptr.vmem [resolvable:$true] %s237_s13 }
  0x5a   : > { %s224_s0 = sand.u32 1, %s1152_s20   ;;  %s1000_s7 = scalar_lea.hbm %s1352_s9, 1024 }
  0x5b   : > { %s1358_s2 = scalar_lea.sflag [#allocation6], %s224_s0  ;;  %p1001_p4 = scmp.ne.s32.totalorder %s1352_s9, %s1000_s7 }
  0x5c   : > { %s1005_s10 = scalar_lea.hbm %s1762_s1, 2048  ;;  %p1006_p11 = scmp.lt.u32.totalorder %s1352_s9, %s1762_s1 }
  0x5d   : > { %p1003_p5 = pnand %p1001_p4, %p972_p12  ;;  %p1007_p1 = scmp.lt.u32.totalorder %s1005_s10, %s1000_s7 }
  0x5e   : > { %p1009_p3 = scmp.lt.u32.totalorder %s1000_s7, %s1352_s9 }
  0x5f   : > { %p1004_p10 = pneg %p1003_p5  ;;  %p1008_p0 = por %p1007_p1, %p1006_p11 }
  0x61   : > { %p1010_p7 = por %p1009_p3, %p1008_p0 }
  0x63   : > { %p1011_p8 = pnand %p1010_p7, %p1004_p10 }
  0x65   : > { %1014 = shalt.err (!%p1011_p8)
}
  0x66   : > { %s1015_s0 = scalar_lea.vmem %s1355_s13, 1024  ;;  %s1158_s12 = smov [#allocation5]  }
  0x67   : > { %p1016_p13 = scmp.ne.s32.totalorder %s1355_s13, %s1015_s0  ;;  %s1020_s23 = sshll.u32 %s1158_s12, 4  ;;  %s1021_s23 = int_to_ptr.vmem [resolvable:$false] %s1020_s23 }
  0x68   : > { %s1022_s6 = scalar_lea.vmem %s1021_s23, 2048  ;;  %p1023_p4 = scmp.lt.s32.totalorder %s1355_s13, %s1021_s23 }
  0x69   : > { %p1018_p2 = pnand %p1016_p13, %p972_p12  ;;  %p1024_p5 = scmp.lt.s32.totalorder %s1022_s6, %s1015_s0 }
  0x6b   : > { %p1019_p6 = pneg %p1018_p2  ;;  %p1025_p11 = por %p1024_p5, %p1023_p4 }
  0x6d   : > { %p1026_p1 = pnand %p1025_p11, %p1019_p6 }
  0x6f   : > { %1029 = shalt.err (!%p1026_p1)
}
  0x70   : > { %845 = dma.hbm_to_vmem [thread:$0]  (!%p1787_p9), %s1352_s9, 1024, %s1355_s13, %s1358_s2, %s1156_s11, %s1156_s11, %s1157_s14  }
  0x71   : > { %p1789_p12 = scmp.ne.s32.totalorder %s1779_s28, 0 }
  0x72   : > { %s1390_s7 = sand.u32 (!%p1789_p12), 1, %s1136_s16   ;;  %p1790_p10 = scmp.ne.s32.totalorder (!%p1789_p12), %s1776_s25, 0 }
  0x73   : > { %249 = sbr.rel (%p1789_p12) target bundleno = 499 (0x1f3), region = 32  ;;  %s1393_s24 = sshll.u32 (!%p1789_p12), %s1390_s7, 6 }
  0x74   : > { %s252_s5 = scalar_lea.sflag (!%p1789_p12), [#allocation3], %s1390_s7  ;;  %s255_s8 = scalar_lea.vmem (!%p1789_p12), [#allocation2], %s1393_s24 }
  0x7a   : > { %1111 = dma.done.wait (%p1790_p10), %s252_s5, 1024  }
  0x7b   : > { %1113 = vsyncadd (%p1790_p10), %s252_s5, 4294966272  ;;  %s260_s2 = sand.u32 1, %s1219_s21   ;;  %s1403_s11 = scalar_lea.vmem [#allocation5], %s1393_s24 }
  0x7c   : > { %s261_s28 = scalar_lea.sflag [#allocation6], %s260_s2 }
  0x7d   : > { %1115 = dma.done.wait (%p1790_p10), %s261_s28, 1024  }
  0x7e   : > { %1117 = vsyncadd (%p1790_p10), %s261_s28, 4294966272  ;;  %p1791_p9 = scmp.eq.s32.totalorder %s1219_s21, 0 }
  0x80   : > { %1119 = dma.done.wait (%p1791_p9), [#allocation6], 64   ;;  %p1792_p0 = pmov %p1791_p9 }
  0x81   : > { %vm316_vm0 = vcmask 64512   ;;  %v308_v0 = vld [vmem:[%s255_s8] sm:$0xff]  ;;  %v310_v1 = vld [vmem:[%s255_s8 + $0x10] sm:$0xff]  ;;  %v309_v2 = vld [vmem:[%s255_s8 + $0x8] sm:$0xff]  ;;  %s1575_s21 = scalar_lea.vmem [#allocation8], %s1393_s24  ;;  %s821_s25 = sshll.u32 %s1144_s18, 10 }
  0x82   : > { %1121 = vsyncadd (%p1792_p0), [#allocation6], 4294967232  ;;  %v317_v3 = vsel %vm316_vm0, %v308_v0, 0.0  ;;  %v323_v4 = vsel %vm316_vm0, %v310_v1, 0.0  ;;  %v311_v5 = vld [vmem:[%s255_s8 + $0x18] sm:$0xff]  ;;  %v320_v6 = vsel %vm316_vm0, %v309_v2, 0.0  ;;  %s1626_s10 = scalar_lea.hbm %s1764_s3, %s821_s25 }
  0x83   : > { %318 = vadd.xlane.f32.xlu0 %v317_v3  ;;  %324 = vadd.xlane.f32.xlu1 %v323_v4  ;;  %v326_v7 = vsel %vm316_vm0, %v311_v5, 0.0  ;;  %v312_v8 = vld [vmem:[%s255_s8 + $0x20] sm:$0xff]  ;;  %v313_v9 = vld [vmem:[%s255_s8 + $0x28] sm:$0xff]  ;;  %v1419_v12 = vld [vmem:[%s255_s8 + $0x30] sm:$0xff]  ;;  %s619_s14 = sshll.u32 %s1575_s21, 4  ;;  %s1638_s22 = scalar_lea.vmem [#allocation9], %s1393_s24  ;;  %s1628_s14 = int_to_ptr.vmem [resolvable:$true] %s619_s14 }
  0x84   : > { %v329_v10 = vsel %vm316_vm0, %v312_v8, 0.0  ;;  %v332_v11 = vsel %vm316_vm0, %v313_v9, 0.0  ;;  %v1421_v13 = vld [vmem:[%s255_s8 + $0x38] sm:$0xff]  ;;  %v335_v14 = vsel %vm316_vm0, %v1419_v12, 0.0  ;;  %v1428_v16 = vld [vmem:[%s1403_s11] sm:$0xff]  ;;  %v1431_v17 = vld [vmem:[%s1403_s11 + $0x8] sm:$0xff] }
  0x85   : > { %v338_v15 = vsel %vm316_vm0, %v1421_v13, 0.0  ;;  %v462_v18 = vsel %vm316_vm0, %v1428_v16, 0.0  ;;  %v465_v19 = vsel %vm316_vm0, %v1431_v17, 0.0  ;;  %v1438_v20 = vld [vmem:[%s1403_s11 + $0x10] sm:$0xff]  ;;  %v1441_v21 = vld [vmem:[%s1403_s11 + $0x18] sm:$0xff]  ;;  %v1448_v24 = vld [vmem:[%s1403_s11 + $0x20] sm:$0xff] }
  0x86   : > { %v468_v22 = vsel %vm316_vm0, %v1438_v20, 0.0  ;;  %v471_v23 = vsel %vm316_vm0, %v1441_v21, 0.0  ;;  %v1451_v25 = vld [vmem:[%s1403_s11 + $0x28] sm:$0xff]  ;;  %v474_v26 = vsel %vm316_vm0, %v1448_v24, 0.0  ;;  %v1458_v28 = vld [vmem:[%s1403_s11 + $0x30] sm:$0xff]  ;;  %v1461_v29 = vld [vmem:[%s1403_s11 + $0x38] sm:$0xff] }
  0x87   : > { %321 = vadd.xlane.f32.xlu0 %v320_v6  ;;  %327 = vadd.xlane.f32.xlu1 %v326_v7  ;;  %v477_v27 = vsel %vm316_vm0, %v1451_v25, 0.0  ;;  %v480_v30 = vsel %vm316_vm0, %v1458_v28, 0.0  ;;  %v483_v31 = vsel %vm316_vm0, %v1461_v29, 0.0  ;;  %s599_s30 = scalar_lea.sflag [#allocation4], %s1390_s7  ;;  %s1030_s0 = scalar_lea.vmem %s1628_s14, 1024 }
  0x88   : > { %p1031_p3 = scmp.ne.s32.totalorder %s1628_s14, %s1030_s0  ;;  %p1793_p7 = scmp.ne.s32.totalorder %s1777_s26, 0 }
  0x89   : > { %s1159_s12 = smov [#allocation8]  }
  0x8a   : > { %p1032_p8 = pnand %p1031_p3, %p1793_p7  ;;  %s1034_s23 = sshll.u32 %s1159_s12, 4  ;;  %s1035_s23 = int_to_ptr.vmem [resolvable:$false] %s1034_s23 }
  0x8b   : > { %330 = vadd.xlane.f32.xlu0 %v329_v10  ;;  %333 = vadd.xlane.f32.xlu1 %v332_v11  ;;  %s1036_s6 = scalar_lea.vmem %s1035_s23, 2048  ;;  %p1037_p2 = scmp.lt.s32.totalorder %s1628_s14, %s1035_s23 }
  0x8c   : > { %p1033_p13 = pneg %p1032_p8  ;;  %p1038_p6 = scmp.lt.s32.totalorder %s1036_s6, %s1030_s0 }
  0x8e   : > { %p1039_p4 = por %p1038_p6, %p1037_p2 }
  0x8f   : > { %336 = vadd.xlane.f32.xlu0 %v335_v14  ;;  %339 = vadd.xlane.f32.xlu1 %v338_v15 }
  0x90   : > { %p1040_p5 = pnand %p1039_p4, %p1033_p13 }
  0x93   : > { %463 = vadd.xlane.f32.xlu0 %v462_v18  ;;  %466 = vadd.xlane.f32.xlu1 %v465_v19 }
  0x97   : > { %469 = vadd.xlane.f32.xlu0 %v468_v22  ;;  %472 = vadd.xlane.f32.xlu1 %v471_v23 }
  0x9b   : > { %475 = vadd.xlane.f32.xlu0 %v474_v26  ;;  %478 = vadd.xlane.f32.xlu1 %v477_v27 }
  0x9f   : > { %481 = vadd.xlane.f32.xlu0 %v480_v30  ;;  %484 = vadd.xlane.f32.xlu1 %v483_v31 }
 0x110   : > { %v319_v32 = vpop.xlane.xlu0 %318  ;;  %v325_v33 = vpop.xlane.xlu1 %324 }
 0x111   : > { %v342_v34 = vmul.f32 0.125, %v319_v32  ;;  %v344_v35 = vmul.f32 0.125, %v325_v33 }
 0x113   : > { %v1467_v36 = vsub.f32 %v308_v0, %v342_v34  ;;  %v1469_v37 = vsub.f32 %v310_v1, %v344_v35 }
 0x114   : > { %v322_v38 = vpop.xlane.xlu0 %321  ;;  %v328_v39 = vpop.xlane.xlu1 %327 }
 0x115   : > { %v343_v40 = vmul.f32 0.125, %v322_v38  ;;  %v345_v41 = vmul.f32 0.125, %v328_v39  ;;  %v358_v42 = vmul.f32 %v1467_v36, %v1467_v36  ;;  %v360_v43 = vmul.f32 %v1469_v37, %v1469_v37 }
 0x117   : > { %v1475_v44 = vsub.f32 %v309_v2, %v343_v40  ;;  %v1477_v45 = vsub.f32 %v311_v5, %v345_v41  ;;  %v366_v46 = vsel %vm316_vm0, %v358_v42, 0.0  ;;  %v372_v49 = vsel %vm316_vm0, %v360_v43, 0.0 }
 0x118   : > { %367 = vadd.xlane.f32.xlu0 %v366_v46  ;;  %v331_v47 = vpop.xlane.xlu0 %330  ;;  %v334_v48 = vpop.xlane.xlu1 %333 }
 0x119   : > { %v346_v50 = vmul.f32 0.125, %v331_v47  ;;  %v347_v51 = vmul.f32 0.125, %v334_v48  ;;  %v359_v52 = vmul.f32 %v1475_v44, %v1475_v44  ;;  %v361_v53 = vmul.f32 %v1477_v45, %v1477_v45 }
 0x11b   : > { %v1485_v54 = vsub.f32 %v312_v8, %v346_v50  ;;  %v1487_v55 = vsub.f32 %v313_v9, %v347_v51  ;;  %v369_v56 = vsel %vm316_vm0, %v359_v52, 0.0  ;;  %v375_v59 = vsel %vm316_vm0, %v361_v53, 0.0 }
 0x11c   : > { %373 = vadd.xlane.f32.xlu0 %v372_v49  ;;  %370 = vadd.xlane.f32.xlu1 %v369_v56  ;;  %v337_v57 = vpop.xlane.xlu0 %336  ;;  %v340_v58 = vpop.xlane.xlu1 %339  ;;  %v422_v56 = vlaneseq }
 0x11d   : > { %v348_v60 = vmul.f32 0.125, %v337_v57  ;;  %v349_v61 = vmul.f32 0.125, %v340_v58  ;;  %v362_v62 = vmul.f32 %v1485_v54, %v1485_v54  ;;  %v363_v63 = vmul.f32 %v1487_v55, %v1487_v55 }
 0x11f   : > { %v1496_v0 = vsub.f32 %v1419_v12, %v348_v60  ;;  %v1499_v1 = vsub.f32 %v1421_v13, %v349_v61  ;;  %v378_v2 = vsel %vm316_vm0, %v362_v62, 0.0  ;;  %v381_v5 = vsel %vm316_vm0, %v363_v63, 0.0 }
 0x120   : > { %376 = vadd.xlane.f32.xlu1 %v375_v59  ;;  %379 = vadd.xlane.f32.xlu0 %v378_v2  ;;  %v464_v3 = vpop.xlane.xlu0 %463  ;;  %v467_v4 = vpop.xlane.xlu1 %466  ;;  %v1557_v62 = vshrl.u32 %v422_v56, 7 }
 0x121   : > { %v486_v6 = vmul.f32 0.125, %v464_v3  ;;  %v487_v7 = vmul.f32 0.125, %v467_v4  ;;  %v364_v8 = vmul.f32 %v1496_v0, %v1496_v0  ;;  %v365_v9 = vmul.f32 %v1499_v1, %v1499_v1 }
 0x123   : > { %v1508_v10 = vsub.f32 %v1428_v16, %v486_v6  ;;  %v1511_v11 = vsub.f32 %v1431_v17, %v487_v7  ;;  %v384_v12 = vsel %vm316_vm0, %v364_v8, 0.0  ;;  %v387_v15 = vsel %vm316_vm0, %v365_v9, 0.0  ;;  %v1560_v8 = vld [vmem:[#allocation7] sm:$0xf] }
 0x124   : > { %382 = vadd.xlane.f32.xlu1 %v381_v5  ;;  %385 = vadd.xlane.f32.xlu0 %v384_v12  ;;  %v470_v13 = vpop.xlane.xlu0 %469  ;;  %v473_v14 = vpop.xlane.xlu1 %472  ;;  %v424_v7 = vsub.s32 0, %v1557_v62 }
 0x125   : > { %v488_v18 = vmul.f32 0.125, %v470_v13  ;;  %v489_v19 = vmul.f32 0.125, %v473_v14  ;;  %v502_v22 = vmul.f32 %v1508_v10, %v1508_v10  ;;  %v503_v16 = vmul.f32 %v1511_v11, %v1511_v11 }
 0x126   : > { %v436_v13 = vsub.s32 1, %v1557_v62 }
 0x127   : > { %v1520_v23 = vsub.f32 %v1438_v20, %v488_v18  ;;  %v1523_v17 = vsub.f32 %v1441_v21, %v489_v19  ;;  %v510_v26 = vsel %vm316_vm0, %v502_v22, 0.0  ;;  %v513_v31 = vsel %vm316_vm0, %v503_v16, 0.0 }
 0x128   : > { %388 = vadd.xlane.f32.xlu1 %v387_v15  ;;  %511 = vadd.xlane.f32.xlu0 %v510_v26  ;;  %v476_v27 = vpop.xlane.xlu0 %475  ;;  %v479_v30 = vpop.xlane.xlu1 %478  ;;  %v1564_v22 = vrot.slane %v1560_v8, %v424_v7 }
 0x129   : > { %v490_v32 = vmul.f32 0.125, %v476_v27  ;;  %v491_v33 = vmul.f32 0.125, %v479_v30  ;;  %v504_v34 = vmul.f32 %v1520_v23, %v1520_v23  ;;  %v505_v20 = vmul.f32 %v1523_v17, %v1523_v17 }
 0x12b   : > { %v1532_v35 = vsub.f32 %v1448_v24, %v490_v32  ;;  %v1535_v21 = vsub.f32 %v1451_v25, %v491_v33  ;;  %v516_v38 = vsel %vm316_vm0, %v504_v34, 0.0  ;;  %v519_v41 = vsel %vm316_vm0, %v505_v20, 0.0 }
 0x12c   : > { %514 = vadd.xlane.f32.xlu1 %v513_v31  ;;  %517 = vadd.xlane.f32.xlu0 %v516_v38  ;;  %v482_v39 = vpop.xlane.xlu0 %481  ;;  %v485_v40 = vpop.xlane.xlu1 %484  ;;  %v1568_v31 = vrot.slane %v1560_v8, %v436_v13 }
 0x12d   : > { %v492_v42 = vmul.f32 0.125, %v482_v39  ;;  %v493_v43 = vmul.f32 0.125, %v485_v40  ;;  %v506_v46 = vmul.f32 %v1532_v35, %v1532_v35  ;;  %v507_v24 = vmul.f32 %v1535_v21, %v1535_v21 }
 0x12f   : > { %v1544_v47 = vsub.f32 %v1458_v28, %v492_v42  ;;  %v1547_v25 = vsub.f32 %v1461_v29, %v493_v43  ;;  %v522_v48 = vsel %vm316_vm0, %v506_v46, 0.0  ;;  %v525_v49 = vsel %vm316_vm0, %v507_v24, 0.0 }
 0x130   : > { %520 = vadd.xlane.f32.xlu1 %v519_v41  ;;  %523 = vadd.xlane.f32.xlu0 %v522_v48 }
 0x131   : > { %v508_v50 = vmul.f32 %v1544_v47, %v1544_v47  ;;  %v509_v51 = vmul.f32 %v1547_v25, %v1547_v25 }
 0x133   : > { %v528_v52 = vsel %vm316_vm0, %v508_v50, 0.0  ;;  %v531_v28 = vsel %vm316_vm0, %v509_v51, 0.0 }
 0x134   : > { %526 = vadd.xlane.f32.xlu1 %v525_v49  ;;  %529 = vadd.xlane.f32.xlu0 %v528_v52 }
 0x138   : > { %532 = vadd.xlane.f32.xlu1 %v531_v28 }
 0x1a5   : > { %v368_v29 = vpop.xlane.xlu0 %367 }
 0x1a6   : > { %v390_v53 = vmul.f32 0.125, %v368_v29 }
 0x1a8   : > { %v398_v57 = vadd.f32 1e-05, %v390_v53 }
 0x1a9   : > { %v371_v58 = vpop.xlane.xlu1 %370  ;;  %v374_v59 = vpop.xlane.xlu0 %373 }
 0x1aa   : > { %910 = vrsqrt.f32 %v398_v57  ;;  %v391_v60 = vmul.f32 0.125, %v371_v58  ;;  %v392_v61 = vmul.f32 0.125, %v374_v59 }
 0x1ac   : > { %v399_v63 = vadd.f32 1e-05, %v391_v60  ;;  %v400_v2 = vadd.f32 1e-05, %v392_v61 }
 0x1ad   : > { %v377_v3 = vpop.xlane.xlu1 %376  ;;  %v380_v4 = vpop.xlane.xlu0 %379 }
 0x1ae   : > { %912 = vrsqrt.f32 %v399_v63  ;;  %v393_v5 = vmul.f32 0.125, %v377_v3  ;;  %v394_v6 = vmul.f32 0.125, %v380_v4  ;;  %v568_v4 = vsub.s32 2, %v1557_v62 }
 0x1af   : > { %914 = vrsqrt.f32 %v400_v2 }
 0x1b0   : > { %v401_v9 = vadd.f32 1e-05, %v393_v5  ;;  %v402_v12 = vadd.f32 1e-05, %v394_v6 }
 0x1b1   : > { %v383_v14 = vpop.xlane.xlu1 %382  ;;  %v386_v15 = vpop.xlane.xlu0 %385 }
 0x1b2   : > { %916 = vrsqrt.f32 %v401_v9  ;;  %v395_v18 = vmul.f32 0.125, %v383_v14  ;;  %v396_v19 = vmul.f32 0.125, %v386_v15  ;;  %v580_v9 = vsub.s32 3, %v1557_v62 }
 0x1b3   : > { %918 = vrsqrt.f32 %v402_v12 }
 0x1b4   : > { %v911_v16 = vpop.eup %910  ;;  %v403_v26 = vadd.f32 1e-05, %v395_v18  ;;  %v404_v27 = vadd.f32 1e-05, %v396_v19 }
 0x1b5   : > { %v414_v30 = vmul.f32 %v911_v16, %v1467_v36  ;;  %v389_v32 = vpop.xlane.xlu1 %388  ;;  %v512_v33 = vpop.xlane.xlu0 %511 }
 0x1b6   : > { %920 = vrsqrt.f32 %v403_v26  ;;  %v397_v34 = vmul.f32 0.125, %v389_v32  ;;  %v534_v20 = vmul.f32 0.125, %v512_v33 }
 0x1b7   : > { %v426_v38 = vmul.f32 %v1564_v22, %v414_v30  ;;  %922 = vrsqrt.f32 %v404_v27  ;;  %v1604_v27 = vrot.slane %v1560_v8, %v568_v4 }
 0x1b8   : > { %v913_v39 = vpop.eup %912  ;;  %v405_v40 = vadd.f32 1e-05, %v397_v34  ;;  %v542_v41 = vadd.f32 1e-05, %v534_v20  ;;  %v1609_v34 = vrot.slane %v1560_v8, %v580_v9 }
 0x1b9   : > { %v915_v42 = vpop.eup %914  ;;  %v438_v43 = vadd.f32 %v1568_v31, %v426_v38  ;;  %v415_v36 = vmul.f32 %v913_v39, %v1475_v44  ;;  %v515_v46 = vpop.xlane.xlu1 %514 }
 0x1ba   : > { %v518_v24 = vpop.xlane.xlu0 %517  ;;  %v416_v48 = vmul.f32 %v915_v42, %v1469_v37  ;;  %924 = vrsqrt.f32 %v405_v40  ;;  %v535_v49 = vmul.f32 0.125, %v515_v46 }
 0x1bb   : > { %v536_v50 = vmul.f32 0.125, %v518_v24  ;;  %446 = vst.msk [vmem:[%s1575_s21] sm:$0xff] %vm316_vm0, %v438_v43  ;;  %v427_v51 = vmul.f32 %v1564_v22, %v415_v36  ;;  %926 = vrsqrt.f32 %v542_v41 }
 0x1bc   : > { %v917_v52 = vpop.eup %916  ;;  %v428_v28 = vmul.f32 %v1564_v22, %v416_v48  ;;  %v543_v44 = vadd.f32 1e-05, %v535_v49 }
 0x1bd   : > { %v544_v29 = vadd.f32 1e-05, %v536_v50  ;;  %v919_v53 = vpop.eup %918  ;;  %v439_v37 = vadd.f32 %v1568_v31, %v427_v51  ;;  %v417_v56 = vmul.f32 %v917_v52, %v1477_v45  ;;  %v521_v57 = vpop.xlane.xlu1 %520 }
 0x1be   : > { %v524_v58 = vpop.xlane.xlu0 %523  ;;  %v440_v59 = vadd.f32 %v1568_v31, %v428_v28  ;;  %v418_v60 = vmul.f32 %v919_v53, %v1485_v54  ;;  %928 = vrsqrt.f32 %v543_v44  ;;  %v537_v61 = vmul.f32 0.125, %v521_v57 }
 0x1bf   : > { %447 = vst.msk [vmem:[%s1575_s21 + $0x8] sm:$0xff] %vm316_vm0, %v439_v37  ;;  %v429_v63 = vmul.f32 %v1564_v22, %v417_v56  ;;  %930 = vrsqrt.f32 %v544_v29  ;;  %v538_v2 = vmul.f32 0.125, %v524_v58 }
 0x1c0   : > { %v921_v3 = vpop.eup %920  ;;  %448 = vst.msk [vmem:[%s1575_s21 + $0x10] sm:$0xff] %vm316_vm0, %v440_v59  ;;  %v430_v45 = vmul.f32 %v1564_v22, %v418_v60  ;;  %v545_v5 = vadd.f32 1e-05, %v537_v61 }
 0x1c1   : > { %v923_v6 = vpop.eup %922  ;;  %v441_v54 = vadd.f32 %v1568_v31, %v429_v63  ;;  %v419_v7 = vmul.f32 %v921_v3, %v1487_v55  ;;  %v546_v12 = vadd.f32 1e-05, %v538_v2  ;;  %v527_v13 = vpop.xlane.xlu1 %526 }
 0x1c2   : > { %v530_v14 = vpop.xlane.xlu0 %529  ;;  %v442_v15 = vadd.f32 %v1568_v31, %v430_v45  ;;  %v420_v18 = vmul.f32 %v923_v6, %v1496_v0  ;;  %932 = vrsqrt.f32 %v545_v5  ;;  %v539_v19 = vmul.f32 0.125, %v527_v13 }
 0x1c3   : > { %449 = vst.msk [vmem:[%s1575_s21 + $0x18] sm:$0xff] %vm316_vm0, %v441_v54  ;;  %v431_v16 = vmul.f32 %v1564_v22, %v419_v7  ;;  %934 = vrsqrt.f32 %v546_v12  ;;  %v540_v26 = vmul.f32 0.125, %v530_v14 }
 0x1c4   : > { %v925_v55 = vpop.eup %924  ;;  %450 = vst.msk [vmem:[%s1575_s21 + $0x20] sm:$0xff] %vm316_vm0, %v442_v15  ;;  %v432_v62 = vmul.f32 %v1564_v22, %v420_v18  ;;  %v547_v0 = vadd.f32 1e-05, %v539_v19 }
 0x1c5   : > { %v927_v30 = vpop.eup %926  ;;  %v443_v32 = vadd.f32 %v1568_v31, %v431_v16  ;;  %v421_v33 = vmul.f32 %v925_v55, %v1499_v1  ;;  %v548_v20 = vadd.f32 1e-05, %v540_v26  ;;  %v533_v38 = vpop.xlane.xlu1 %532 }
 0x1c6   : > { %v444_v39 = vadd.f32 %v1568_v31, %v432_v62  ;;  %v558_v40 = vmul.f32 %v927_v30, %v1508_v10  ;;  %936 = vrsqrt.f32 %v547_v0  ;;  %v541_v41 = vmul.f32 0.125, %v533_v38 }
 0x1c7   : > { %451 = vst.msk [vmem:[%s1575_s21 + $0x28] sm:$0xff] %vm316_vm0, %v443_v32  ;;  %v433_v42 = vmul.f32 %v1564_v22, %v421_v33  ;;  %938 = vrsqrt.f32 %v548_v20 }
 0x1c8   : > { %v929_v1 = vpop.eup %928  ;;  %452 = vst.msk [vmem:[%s1575_s21 + $0x30] sm:$0xff] %vm316_vm0, %v444_v39  ;;  %v570_v8 = vmul.f32 %v1604_v27, %v558_v40  ;;  %v549_v43 = vadd.f32 1e-05, %v541_v41 }
 0x1c9   : > { %v931_v10 = vpop.eup %930  ;;  %v445_v22 = vadd.f32 %v1568_v31, %v433_v42  ;;  %v559_v36 = vmul.f32 %v929_v1, %v1511_v11 }
 0x1ca   : > { %v582_v46 = vadd.f32 %v1609_v34, %v570_v8  ;;  %v560_v24 = vmul.f32 %v931_v10, %v1520_v23  ;;  %940 = vrsqrt.f32 %v549_v43 }
 0x1cb   : > { %453 = vst.msk [vmem:[%s1575_s21 + $0x38] sm:$0xff] %vm316_vm0, %v445_v22  ;;  %v571_v48 = vmul.f32 %v1604_v27, %v559_v36 }
 0x1cc   : > { %v933_v49 = vpop.eup %932  ;;  %590 = vst.msk [vmem:[%s1638_s22] sm:$0xff] %vm316_vm0, %v582_v46  ;;  %v572_v31 = vmul.f32 %v1604_v27, %v560_v24 }
 0x1cd   : > { %1043 = shalt.err (!%p1040_p5)
}
 0x1ce   : > { %s1044_s24 = scalar_lea.hbm %s1626_s10, 1024  ;;  %s1048_s2 = scalar_lea.hbm %s1764_s3, 2048 }
 0x1cf   : > { %p1045_p11 = scmp.ne.s32.totalorder %s1626_s10, %s1044_s24  ;;  %p1049_p10 = scmp.lt.u32.totalorder %s1626_s10, %s1764_s3 }
 0x1d0   : > { %p1050_p9 = scmp.lt.u32.totalorder %s1048_s2, %s1044_s24  ;;  %p1052_p3 = scmp.lt.u32.totalorder %s1044_s24, %s1626_s10 }
 0x1d1   : > { %p1046_p1 = pnand %p1045_p11, %p1793_p7 }
 0x1d2   : > { %p1051_p0 = por %p1050_p9, %p1049_p10 }
 0x1d3   : > { %p1047_p12 = pneg %p1046_p1 }
 0x1d4   : > { %p1053_p8 = por %p1052_p3, %p1051_p0 }
 0x1d6   : > { %p1054_p13 = pnand %p1053_p8, %p1047_p12 }
 0x1d8   : > { %1057 = shalt.err (!%p1054_p13)
}
 0x1d9   : > { %s1160_s21 = smov 128   ;;  %s1161_s9 = smov 8   ;;  %v935_v11 = vpop.eup %934  ;;  %v583_v23 = vadd.f32 %v1609_v34, %v571_v48  ;;  %v561_v50 = vmul.f32 %v933_v49, %v1523_v17  ;;  %v584_v51 = vadd.f32 %v1609_v34, %v572_v31 }
 0x1da   : > { %831 = dma.vmem_to_hbm [thread:$0]  (%p1793_p7), %s1628_s14, 1024, %s1626_s10, %s599_s30, %s1160_s21, %s1160_s21, %s1161_s9   ;;  %v562_v52 = vmul.f32 %v935_v11, %v1532_v35  ;;  %v937_v44 = vpop.eup %936 }
 0x1db   : > { %591 = vst.msk [vmem:[%s1638_s22 + $0x8] sm:$0xff] %vm316_vm0, %v583_v23  ;;  %v573_v28 = vmul.f32 %v1604_v27, %v561_v50  ;;  %592 = vst.msk [vmem:[%s1638_s22 + $0x10] sm:$0xff] %vm316_vm0, %v584_v51  ;;  %v939_v53 = vpop.eup %938  ;;  %v563_v37 = vmul.f32 %v937_v44, %v1535_v21  ;;  %s637_s14 = sshll.u32 %s1638_s22, 4  ;;  %s1705_s30 = scalar_lea.hbm %s1765_s4, %s821_s25  ;;  %s1707_s14 = int_to_ptr.vmem [resolvable:$true] %s637_s14 }
 0x1dc   : > { %v574_v29 = vmul.f32 %v1604_v27, %v562_v52  ;;  %v564_v56 = vmul.f32 %v939_v53, %v1544_v47  ;;  %v941_v58 = vpop.eup %940  ;;  %s604_s0 = scalar_lea.sflag [#allocation10], %s1390_s7  ;;  %s1058_s12 = scalar_lea.vmem %s1707_s14, 1024 }
 0x1dd   : > { %v585_v17 = vadd.f32 %v1609_v34, %v573_v28  ;;  %v575_v57 = vmul.f32 %v1604_v27, %v563_v37  ;;  %v565_v21 = vmul.f32 %v941_v58, %v1547_v25  ;;  %p1059_p2 = scmp.ne.s32.totalorder %s1707_s14, %s1058_s12  ;;  %s1162_s23 = smov [#allocation9]  }
 0x1de   : > { %v586_v35 = vadd.f32 %v1609_v34, %v574_v29  ;;  %v576_v59 = vmul.f32 %v1604_v27, %v564_v56  ;;  %s1062_s18 = sshll.u32 %s1162_s23, 4  ;;  %s1063_s18 = int_to_ptr.vmem [resolvable:$false] %s1062_s18 }
 0x1df   : > { %593 = vst.msk [vmem:[%s1638_s22 + $0x18] sm:$0xff] %vm316_vm0, %v585_v17  ;;  %v587_v60 = vadd.f32 %v1609_v34, %v575_v57  ;;  %v577_v47 = vmul.f32 %v1604_v27, %v565_v21  ;;  %p1060_p6 = pnand %p1059_p2, %p1793_p7  ;;  %s1064_s6 = scalar_lea.vmem %s1063_s18, 2048 }
 0x1e0   : > { %594 = vst.msk [vmem:[%s1638_s22 + $0x20] sm:$0xff] %vm316_vm0, %v586_v35  ;;  %v588_v61 = vadd.f32 %v1609_v34, %v576_v59  ;;  %p1065_p5 = scmp.lt.s32.totalorder %s1707_s14, %s1063_s18  ;;  %p1066_p11 = scmp.lt.s32.totalorder %s1064_s6, %s1058_s12 }
 0x1e1   : > { %595 = vst.msk [vmem:[%s1638_s22 + $0x28] sm:$0xff] %vm316_vm0, %v587_v60  ;;  %v589_v63 = vadd.f32 %v1609_v34, %v577_v47  ;;  %p1061_p4 = pneg %p1060_p6 }
 0x1e2   : > { %596 = vst.msk [vmem:[%s1638_s22 + $0x30] sm:$0xff] %vm316_vm0, %v588_v61  ;;  %p1067_p1 = por %p1066_p11, %p1065_p5 }
 0x1e3   : > { %597 = vst.msk [vmem:[%s1638_s22 + $0x38] sm:$0xff] %vm316_vm0, %v589_v63 }
 0x1e4   : > { %p1068_p12 = pnand %p1067_p1, %p1061_p4 }
 0x1e6   : > { %1071 = shalt.err (!%p1068_p12)
}
 0x1e7   : > { %s1072_s25 = scalar_lea.hbm %s1705_s30, 1024  ;;  %s1076_s5 = scalar_lea.hbm %s1765_s4, 2048 }
 0x1e8   : > { %p1073_p10 = scmp.ne.s32.totalorder %s1705_s30, %s1072_s25  ;;  %p1077_p3 = scmp.lt.u32.totalorder %s1705_s30, %s1765_s4 }
 0x1e9   : > { %p1078_p8 = scmp.lt.u32.totalorder %s1076_s5, %s1072_s25  ;;  %p1080_p2 = scmp.lt.u32.totalorder %s1072_s25, %s1705_s30 }
 0x1ea   : > { %p1074_p9 = pnand %p1073_p10, %p1793_p7 }
 0x1eb   : > { %p1079_p13 = por %p1078_p8, %p1077_p3 }
 0x1ec   : > { %p1075_p0 = pneg %p1074_p9 }
 0x1ed   : > { %p1081_p6 = por %p1080_p2, %p1079_p13 }
 0x1ef   : > { %p1082_p4 = pnand %p1081_p6, %p1075_p0 }
 0x1f1   : > { %1085 = shalt.err (!%p1082_p4)
}
 0x1f2   : > { %832 = dma.vmem_to_hbm [thread:$0]  (%p1793_p7), %s1707_s14, 1024, %s1705_s30, %s604_s0, %s1160_s21, %s1160_s21, %s1161_s9  }
 0x1f3 PF: > { %s652_s28 = sand.u32 1, %s1132_s15   ;;  %p1794_p5 = scmp.ne.s32.totalorder %s1778_s27, 0 }
 0x1f4   : > { %p1795_p11 = scmp.ge.s32.totalorder %s1152_s20, 2  ;;  %s653_s11 = scalar_lea.sflag [#allocation4], %s652_s28 }
 0x1f6   : > { %p847_p1 = pnand %p1795_p11, %p1794_p5 }
 0x1f8   : > { %1123 = dma.done.wait (!%p847_p1), %s653_s11, 1024  }
 0x1f9   : > { %1125 = vsyncadd (!%p847_p1), %s653_s11, 4294966272  ;;  %s662_s26 = scalar_lea.sflag [#allocation10], %s652_s28 }
 0x1fa   : > { %1127 = dma.done.wait (!%p847_p1), %s662_s26, 1024  }
 0x1fb   : > { %1129 = vsyncadd (!%p847_p1), %s662_s26, 4294966272  ;;  %s27_s20 = sadd.s32 1, %s1152_s20   ;;  %s1796_s7 = sld [smem:[#allocation16_spill]] }
 0x1fc   : > { %p24_p12 = scmp.ge.s32.totalorder %s27_s20, 4   ;;  %s1797_s15 = smov %s1136_s16 }
 0x1fd   : > { %s1798_s16 = smov %s1140_s17  ;;  %s1799_s17 = smov %s1312_s29 }
 0x1fe   : > { %s1800_s18 = smov %s1148_s19  ;;  %26 = sbr.rel (!%p24_p12) target bundleno = 13 (0xd), region = 111 }
 0x201   : > { %s1801_s19 = smov %s1796_s7 }
 0x205   :  { %667 = vsyncpa [#allocation3], 1 }
 0x206   :  { %669 = vsyncpa [#allocation3 + $0x1], 1 }
 0x207   :  { %670 = vsyncpa [#allocation6], 1 }
 0x208   :  { %672 = vsyncpa [#allocation6 + $0x1], 1 }
 0x209   :  { %673 = vsyncpa [#allocation4], 1 }
 0x20a   :  { %675 = vsyncpa [#allocation4 + $0x1], 1 }
 0x20b   :  { %676 = vsyncpa [#allocation10], 1 }
 0x20c   :  { %678 = vsyncpa [#allocation10 + $0x1], 1 }

// kernel: swin_block_forward.5
= control target key start
LH: loop header
LB: loop body
LE: loop exit
PB: predicated region body
PF: predicated region fallthrough
CT: control target
= control target key end

     0   :  { %s3353_s0 = inlined_call_operand.hbm [shape: f32[2,64,8], index: 0, kind: input, shape index: {}]   ;;  %s3354_s1 = inlined_call_operand.hbm [shape: f32[2,64,8], index: 1, kind: input, shape index: {}]   ;;  %s3355_s2 = inlined_call_operand.hbm [shape: f32[2,64,8], index: 2, kind: input, shape index: {}]   ;;  %s3356_s3 = inlined_call_operand.hbm [shape: f32[2,64,8], index: 3, kind: input, shape index: {}]   ;;  %s3357_s4 = inlined_call_operand.hbm [shape: f32[4,8], index: 4, kind: input, shape index: {}]   ;;  %s3358_s5 = inlined_call_operand.hbm [shape: bf16[2,8,32], index: 5, kind: input, shape index: {}]   ;;  %s3359_s6 = inlined_call_operand.hbm [shape: f32[2,32], index: 6, kind: input, shape index: {}]   ;;  %s3360_s7 = inlined_call_operand.hbm [shape: bf16[2,32,8], index: 7, kind: input, shape index: {}]   ;;  %s3361_s8 = inlined_call_operand.hbm [shape: f32[2,8], index: 8, kind: input, shape index: {}]   ;;  %s3362_s9 = inlined_call_operand.hbm [shape: f32[2,64,8], index: 9, kind: output, shape index: {0}]   ;;  %s3363_s10 = inlined_call_operand.hbm [shape: f32[2,64,8], index: 10, kind: output, shape index: {1}]  }
   0x1   :  { %3391 = sst [smem:[#allocation37_spill]] %s3354_s1 }
   0x2   :  { %3392 = sst [smem:[#allocation38_spill]] %s3357_s4 }
   0x3   :  { %3393 = sst [smem:[#allocation39_spill]] %s3358_s5 }
   0x4   :  { %3394 = sst [smem:[#allocation40_spill]] %s3360_s7 }
   0x5   :  { %3395 = sst [smem:[#allocation41_spill]] %s3362_s9 }
   0x6   :  { %3396 = sst [smem:[#allocation42_spill]] %s3363_s10 }
   0x7   :  { %16 = vsyncpa [#allocation3], 0 }
   0x8   :  { %18 = vsyncpa [#allocation3 + $0x1], 0 }
   0x9   :  { %19 = vsyncpa [#allocation6], 0 }
   0xa   :  { %21 = vsyncpa [#allocation6 + $0x1], 0 }
   0xb   :  { %22 = vsyncpa [#allocation9], 0 }
   0xc   :  { %24 = vsyncpa [#allocation9 + $0x1], 0 }
   0xd   :  { %25 = vsyncpa [#allocation12], 0 }
   0xe   :  { %26 = vsyncpa [#allocation15], 0 }
   0xf   :  { %27 = vsyncpa [#allocation4], 0 }
  0x10   :  { %29 = vsyncpa [#allocation4 + $0x1], 0 }
  0x11   :  { %30 = vsyncpa [#allocation19], 0 }
  0x12   :  { %32 = vsyncpa [#allocation19 + $0x1], 0  ;;  %s2509_s13 = smov 0   ;;  %s2511_s14 = smov 0  }
  0x13   :  { %s2513_s15 = smov 0   ;;  %s2515_s16 = smov 0  }
  0x14   :  { %s2517_s17 = smov 0   ;;  %s2519_s18 = smov 0  }
  0x15 LB: > { %3397 = sst [smem:[#allocation28_spill]] %s2415_s13  ;;  %s2540_s19 = sadd.s32 4294967295, %s2435_s18   ;;  %s2435_s18 = sphi %s2519_s18, %s38_s18   ;;  %s2431_s17 = sphi %s2517_s17, %s3446_s17   ;;  %s2427_s16 = sphi %s2515_s16, %s3445_s16   ;;  %s2423_s15 = sphi %s2513_s15, %s3449_s15   ;;  %s2419_s14 = sphi %s2511_s14, %s3448_s14   ;;  %s2415_s13 = sphi %s2509_s13, %s3447_s13  }
  0x16   : > { %3398 = sst [smem:[#allocation29_spill]] %s2427_s16  ;;  %s1700_s20 = sadd.s32 4294967294, %s2435_s18  }
  0x17   : > { %3399 = sst [smem:[#allocation30_spill]] %s2431_s17  ;;  %p72_p0 = scmp.ne.s32.totalorder %s2419_s14, %s2415_s13 }
  0x18   : > { %3400 = sst [smem:[#allocation31_spill]] %s2540_s19  ;;  %p3366_p1 = scmp.eq.s32.totalorder %s2540_s19, 0 }
  0x19   : > { %p293_p3 = scmp.eq.s32.totalorder %s1700_s20, 1  ;;  %p1701_p5 = scmp.ge.s32.totalorder %s2435_s18, 1 }
  0x1a   : > { %p2549_p4 = por %p3366_p1, %p72_p0  ;;  %p328_p7 = scmp.lt.s32.totalorder %s2435_s18, 3 }
  0x1b   : > { %p2554_p6 = por %p293_p3, %p72_p0  ;;  %s2437_s24 = smov [#allocation10]  }
  0x1c   : > { %s3401_s21 = scalar_select %p2549_p4, 1, 0 }
  0x1d   : > { %s3403_s22 = scalar_select %p2554_p6, 1, 0 }
  0x1e   : > { %3402 = sst [smem:[#allocation32_spill]] %s3401_s21  ;;  %p2559_p8 = pnand %p1701_p5, %p328_p7 }
  0x1f   : > { %3404 = sst [smem:[#allocation33_spill]] %s3403_s22  ;;  %s341_s25 = sshll.u32 %s2437_s24, 4  ;;  %s342_s25 = int_to_ptr.vmem [resolvable:$true] %s341_s25 }
  0x20   : > { %s3405_s23 = scalar_select %p2559_p8, 1, 0 }
  0x21   : > { %p1866_p10 = pneg %p2559_p8  ;;  %s2438_s26 = smov [#allocation11]  }
  0x22   : > { %s351_s27 = sshll.u32 %s2438_s26, 4  ;;  %s2439_s29 = smov [#allocation14]   ;;  %s2572_s27 = int_to_ptr.vmem [resolvable:$true] %s351_s27 }
  0x23   : > { %p2568_p11 = pnand %p1866_p10, %p3366_p1  ;;  %s2574_s30 = sshll.u32 %s2439_s29, 4  ;;  %s376_s30 = int_to_ptr.vmem [resolvable:$true] %s2574_s30 }
  0x24   : > { %s3407_s4 = sld [smem:[#allocation38_spill]] }
  0x25   : > { %s3406_s28 = scalar_select %p2568_p11, 1, 0 }
  0x26   : > { %p2584_p13 = pneg %p2568_p11 }
  0x28   : > { %s3408_s26 = scalar_select %p2584_p13, 1, 0 }
  0x2a   : > { %s2041_s20 = scalar_lea.hbm %s3407_s4, 64 }
  0x2b   : > { %p2042_p12 = scmp.ne.s32.totalorder %s3407_s4, %s2041_s20  ;;  %p2048_p5 = scmp.lt.u32.totalorder %s2041_s20, %s3407_s4 }
  0x2d   : > { %p2044_p0 = pnand %p2584_p13, %p2042_p12 }
  0x2f   : > { %p2045_p3 = pneg %p2044_p0 }
  0x31   : > { %p2050_p7 = pnand %p2048_p5, %p2045_p3 }
  0x33   : > { %2053 = shalt.err (!%p2050_p7)
}
  0x34   : > { %s2054_s11 = scalar_lea.vmem %s342_s25, 64  ;;  %p2062_p2 = scmp.lt.s32.totalorder %s342_s25, %s342_s25 }
  0x35   : > { %p2055_p10 = scmp.ne.s32.totalorder %s342_s25, %s2054_s11  ;;  %p2063_p6 = scmp.lt.s32.totalorder %s2054_s11, %s2054_s11 }
  0x37   : > { %p2057_p9 = pnand %p2055_p10, %p2584_p13  ;;  %p2064_p4 = por %p2063_p6, %p2062_p2 }
  0x39   : > { %p2058_p1 = pneg %p2057_p9 }
  0x3b   : > { %p2065_p8 = pnand %p2064_p4, %p2058_p1 }
  0x3d   : > { %2068 = shalt.err (!%p2065_p8)
}
  0x3e   : > { %1869 = dma.hbm_to_vmem [thread:$0]  (!%p2568_p11), %s3407_s4, 64, %s342_s25, [#allocation9]  }
  0x3f   : > { %s3409_s5 = sld [smem:[#allocation39_spill]] }
  0x45   : > { %s2069_s24 = scalar_lea.hbm %s3409_s5, 128 }
  0x46   : > { %p2070_p9 = scmp.ne.s32.totalorder %s3409_s5, %s2069_s24  ;;  %p2076_p1 = scmp.lt.u32.totalorder %s2069_s24, %s3409_s5 }
  0x48   : > { %p2072_p12 = pnand %p2070_p9, %p2584_p13 }
  0x4a   : > { %p2073_p2 = pneg %p2072_p12 }
  0x4c   : > { %p2078_p4 = pnand %p2076_p1, %p2073_p2 }
  0x4e   : > { %2081 = shalt.err (!%p2078_p4)
}
  0x4f   : > { %s2082_s25 = scalar_lea.vmem %s2572_s27, 128  ;;  %p2090_p3 = scmp.lt.s32.totalorder %s2572_s27, %s2572_s27 }
  0x50   : > { %p2083_p6 = scmp.ne.s32.totalorder %s2572_s27, %s2082_s25  ;;  %p2091_p5 = scmp.lt.s32.totalorder %s2082_s25, %s2082_s25 }
  0x52   : > { %p2085_p8 = pnand %p2083_p6, %p2584_p13  ;;  %p2092_p7 = por %p2091_p5, %p2090_p3 }
  0x54   : > { %p2086_p0 = pneg %p2085_p8 }
  0x56   : > { %p2093_p10 = pnand %p2092_p7, %p2086_p0 }
  0x58   : > { %2096 = shalt.err (!%p2093_p10)
}
  0x59   : > { %s2440_s10 = smov 64   ;;  %s2441_s9 = smov 4  }
  0x5a   : > { %1872 = dma.hbm_to_vmem [thread:$0]  (!%p2568_p11), %s3409_s5, 128, %s2572_s27, [#allocation12], %s2440_s10, %s2440_s10, %s2441_s9  }
  0x5b   : > { %s3410_s7 = sld [smem:[#allocation40_spill]] }
  0x61   : > { %s2097_s24 = scalar_lea.hbm %s3410_s7, 512 }
  0x62   : > { %p2098_p9 = scmp.ne.s32.totalorder %s3410_s7, %s2097_s24  ;;  %p2104_p1 = scmp.lt.u32.totalorder %s2097_s24, %s3410_s7 }
  0x64   : > { %p2100_p12 = pnand %p2098_p9, %p2584_p13 }
  0x66   : > { %p2101_p2 = pneg %p2100_p12 }
  0x68   : > { %p2106_p4 = pnand %p2104_p1, %p2101_p2 }
  0x6a   : > { %2109 = shalt.err (!%p2106_p4)
}
  0x6b   : > { %s2110_s22 = scalar_lea.vmem %s376_s30, 512  ;;  %p2118_p3 = scmp.lt.s32.totalorder %s376_s30, %s376_s30 }
  0x6c   : > { %p2111_p6 = scmp.ne.s32.totalorder %s376_s30, %s2110_s22  ;;  %p2119_p5 = scmp.lt.s32.totalorder %s2110_s22, %s2110_s22 }
  0x6e   : > { %p2113_p8 = pnand %p2111_p6, %p2584_p13  ;;  %p2120_p7 = por %p2119_p5, %p2118_p3 }
  0x70   : > { %p2114_p0 = pneg %p2113_p8 }
  0x72   : > { %p2121_p10 = pnand %p2120_p7, %p2114_p0 }
  0x74   : > { %2124 = shalt.err (!%p2121_p10)
}
  0x75   : > { %1878 = dma.hbm_to_vmem [thread:$0]  (!%p2568_p11), %s3410_s7, 512, %s376_s30, [#allocation15], %s2440_s10, %s2440_s10, %s2441_s9  }
  0x76   : > { %s59_s4 = sadd.s32 1, %s2423_s15  ;;  %s50_s13 = sadd.s32 1, %s2431_s17 }
  0x77   : > { %p66_p9 = scmp.ne.s32.totalorder %s2423_s15, %s2419_s14  ;;  %p52_p12 = scmp.ge.s32.totalorder %s50_s13, 2 }
  0x78   : > { %p67_p2 = scmp.eq.s32.totalorder %s2435_s18, 0  ;;  %p3411_p1 = scmp.eq.s32.totalorder %s2540_s19, 1 }
  0x79   : > { %p1907_p6 = scmp.lt.s32.totalorder %s2435_s18, 2  ;;  %s3451_s13 = smov (%p52_p12, %s50_s13), 0 }
  0x7a   : > { %p2649_p4 = por %p3411_p1, %p66_p9  ;;  %3414 = sst [smem:[#allocation35_spill]] %s3451_s13 }
  0x7b   : > { %p68_p8 = por %p67_p2, %p66_p9  ;;  %s3371_s24 = sand.u32 1, %s2423_s15  }
  0x7c   : > { %s3412_s20 = scalar_select %p2649_p4, 1, 0 }
  0x7d   : > { %s54_s30 = ssub.s32 %s2431_s17, %s3451_s13  ;;  %s2661_s10 = sshll.u32 %s3371_s24, 6 }
  0x7e   : > { %3413 = sst [smem:[#allocation34_spill]] %s3412_s20  ;;  %p57_p0 = scmp.eq.s32.totalorder %s54_s30, 0 }
  0x7f   : > { %s2664_s9 = sshll.u32 %s2431_s17, 10  ;;  %p2666_p3 = pnand %p1907_p6, %p68_p8 }
  0x80   : > { %s2671_s11 = scalar_select %p57_p0, %s2423_s15, %s59_s4  }
  0x81   : > { %s3415_s29 = scalar_select %p2666_p3, 1, 0 }
  0x82   : > { %3416 = sst [smem:[#allocation36_spill]] %s2671_s11  ;;  %s3374_s25 = sand.u32 1, %s2435_s18  }
  0x83   : > { %s3417_s1 = sld [smem:[#allocation37_spill]]  ;;  %s427_s30 = scalar_lea.vmem [#allocation5], %s2661_s10 }
  0x84   : > { %s436_s24 = sshll.u32 %s427_s30, 4  ;;  %s2685_s5 = scalar_lea.sflag [#allocation6], %s3374_s25  ;;  %s2681_s24 = int_to_ptr.vmem [resolvable:$true] %s436_s24 }
  0x85   : > { %p2691_p7 = pneg %p2666_p3 }
  0x87   : > { %s3418_s4 = scalar_select %p2691_p7, 1, 0 }
  0x89   : > { %s2678_s12 = scalar_lea.hbm %s3417_s1, %s2664_s9  ;;  %s2130_s30 = scalar_lea.hbm %s3417_s1, 2048 }
  0x8a   : > { %s2125_s7 = scalar_lea.hbm %s2678_s12, 1024  ;;  %p2131_p12 = scmp.lt.u32.totalorder %s2678_s12, %s3417_s1 }
  0x8b   : > { %p2126_p5 = scmp.ne.s32.totalorder %s2678_s12, %s2125_s7  ;;  %p2132_p2 = scmp.lt.u32.totalorder %s2130_s30, %s2125_s7 }
  0x8c   : > { %p2134_p6 = scmp.lt.u32.totalorder %s2125_s7, %s2678_s12 }
  0x8d   : > { %p2128_p10 = pnand %p2691_p7, %p2126_p5  ;;  %p2133_p1 = por %p2132_p2, %p2131_p12 }
  0x8f   : > { %p2129_p9 = pneg %p2128_p10  ;;  %p2135_p8 = por %p2134_p6, %p2133_p1 }
  0x91   : > { %p2136_p0 = pnand %p2135_p8, %p2129_p9 }
  0x93   : > { %2139 = shalt.err (!%p2136_p0)
}
  0x94   : > { %s2140_s25 = scalar_lea.vmem %s2681_s24, 1024  ;;  %s2442_s22 = smov [#allocation5]  }
  0x95   : > { %p2141_p5 = scmp.ne.s32.totalorder %s2681_s24, %s2140_s25  ;;  %s2145_s27 = sshll.u32 %s2442_s22, 4  ;;  %s2146_s27 = int_to_ptr.vmem [resolvable:$false] %s2145_s27 }
  0x96   : > { %s2147_s17 = scalar_lea.vmem %s2146_s27, 2048  ;;  %p2148_p11 = scmp.lt.s32.totalorder %s2681_s24, %s2146_s27 }
  0x97   : > { %p2143_p10 = pnand %p2141_p5, %p2691_p7  ;;  %p2149_p13 = scmp.lt.s32.totalorder %s2147_s17, %s2140_s25 }
  0x99   : > { %p2144_p4 = pneg %p2143_p10  ;;  %p2150_p12 = por %p2149_p13, %p2148_p11 }
  0x9b   : > { %p2151_p2 = pnand %p2150_p12, %p2144_p4 }
  0x9d   : > { %2154 = shalt.err (!%p2151_p2)
}
  0x9e   : > { %s2443_s7 = smov 128   ;;  %s2444_s13 = smov 8  }
  0x9f   : > { %1888 = dma.hbm_to_vmem [thread:$0]  (!%p2666_p3), %s2678_s12, 1024, %s2681_s24, %s2685_s5, %s2443_s7, %s2443_s7, %s2444_s13  }
  0xa0   : > { %s2445_s30 = smov [#allocation13]   ;;  %s2446_s27 = smov [#allocation16]  }
  0xa1   : > { %s365_s22 = sshll.u32 %s2445_s30, 4  ;;  %s389_s25 = sshll.u32 %s2446_s27, 4  ;;  %s366_s22 = int_to_ptr.vmem [resolvable:$true] %s365_s22  ;;  %s390_s25 = int_to_ptr.vmem [resolvable:$true] %s389_s25 }
  0xa2   : > { %s2155_s11 = scalar_lea.hbm %s3359_s6, 32  ;;  %p3419_p13 = scmp.ne.s32.totalorder %s3408_s26, 0 }
  0xa3   : > { %p2156_p11 = scmp.ne.s32.totalorder %s3359_s6, %s2155_s11  ;;  %p2162_p1 = scmp.lt.u32.totalorder %s2155_s11, %s3359_s6 }
  0xa5   : > { %p2158_p4 = pnand %p2156_p11, %p3419_p13 }
  0xa7   : > { %p2159_p9 = pneg %p2158_p4 }
  0xa9   : > { %p2164_p6 = pnand %p2162_p1, %p2159_p9 }
  0xab   : > { %2167 = shalt.err (!%p2164_p6)
}
  0xac   : > { %s2168_s24 = scalar_lea.vmem %s366_s22, 32  ;;  %p2176_p10 = scmp.lt.s32.totalorder %s366_s22, %s366_s22 }
  0xad   : > { %p2169_p8 = scmp.ne.s32.totalorder %s366_s22, %s2168_s24  ;;  %p2177_p12 = scmp.lt.s32.totalorder %s2168_s24, %s2168_s24 }
  0xaf   : > { %p2171_p0 = pnand %p2169_p8, %p3419_p13  ;;  %p2178_p2 = por %p2177_p12, %p2176_p10 }
  0xb1   : > { %p2172_p5 = pneg %p2171_p0 }
  0xb3   : > { %p2179_p3 = pnand %p2178_p2, %p2172_p5 }
  0xb5   : > { %2182 = shalt.err (!%p2179_p3)
}
  0xb6   : > { %p3420_p11 = scmp.ne.s32.totalorder %s3406_s28, 0  ;;  %s2183_s20 = scalar_lea.hbm %s3361_s8, 32 }
  0xb7   : > { %p2184_p4 = scmp.ne.s32.totalorder %s3361_s8, %s2183_s20  ;;  %p2190_p3 = scmp.lt.u32.totalorder %s2183_s20, %s3361_s8 }
  0xb8   : > { %1875 = dma.hbm_to_vmem [thread:$0]  (!%p3420_p11), %s3359_s6, 32, %s366_s22, [#allocation12]  }
  0xb9   : > { %p2186_p9 = pnand %p2184_p4, %p3419_p13 }
  0xbb   : > { %p2187_p1 = pneg %p2186_p9 }
  0xbd   : > { %p2192_p6 = pnand %p2190_p3, %p2187_p1 }
  0xbf   : > { %2195 = shalt.err (!%p2192_p6)
}
  0xc0   : > { %s2196_s17 = scalar_lea.vmem %s390_s25, 32  ;;  %p2204_p10 = scmp.lt.s32.totalorder %s390_s25, %s390_s25 }
  0xc1   : > { %p2197_p8 = scmp.ne.s32.totalorder %s390_s25, %s2196_s17  ;;  %p2205_p12 = scmp.lt.s32.totalorder %s2196_s17, %s2196_s17 }
  0xc3   : > { %p2199_p0 = pnand %p2197_p8, %p3419_p13  ;;  %p2206_p2 = por %p2205_p12, %p2204_p10 }
  0xc5   : > { %p2200_p5 = pneg %p2199_p0 }
  0xc7   : > { %p2207_p7 = pnand %p2206_p2, %p2200_p5 }
  0xc9   : > { %2210 = shalt.err (!%p2207_p7)
}
  0xca   : > { %1881 = dma.hbm_to_vmem [thread:$0]  (!%p3420_p11), %s3361_s8, 32, %s390_s25, [#allocation15]  }
  0xcb   : > { %s2758_s16 = scalar_lea.hbm %s3353_s0, %s2664_s9  ;;  %s404_s19 = scalar_lea.vmem [#allocation2], %s2661_s10 }
  0xcc   : > { %s413_s28 = sshll.u32 %s404_s19, 4  ;;  %s2767_s11 = scalar_lea.hbm %s3355_s2, %s2664_s9  ;;  %s2761_s28 = int_to_ptr.vmem [resolvable:$true] %s413_s28 }
  0xcd   : > { %s3421_s12 = sand.u32 1, %s2423_s15   ;;  %s2211_s30 = scalar_lea.hbm %s2758_s16, 1024 }
  0xce   : > { %s2771_s25 = scalar_lea.sflag [#allocation3], %s3421_s12  ;;  %p2212_p7 = scmp.ne.s32.totalorder %s2758_s16, %s2211_s30 }
  0xcf   : > { %p3422_p13 = scmp.ne.s32.totalorder %s3418_s4, 0  ;;  %s2216_s22 = scalar_lea.hbm %s3353_s0, 2048 }
  0xd0   : > { %p2217_p9 = scmp.lt.u32.totalorder %s2758_s16, %s3353_s0  ;;  %p2218_p1 = scmp.lt.u32.totalorder %s2216_s22, %s2211_s30 }
  0xd1   : > { %p2214_p11 = pnand %p2212_p7, %p3422_p13  ;;  %p2220_p6 = scmp.lt.u32.totalorder %s2211_s30, %s2758_s16 }
  0xd2   : > { %p2219_p3 = por %p2218_p1, %p2217_p9 }
  0xd3   : > { %p2215_p4 = pneg %p2214_p11 }
  0xd4   : > { %p2221_p8 = por %p2220_p6, %p2219_p3 }
  0xd6   : > { %p2222_p0 = pnand %p2221_p8, %p2215_p4 }
  0xd8   : > { %2225 = shalt.err (!%p2222_p0)
}
  0xd9   : > { %s2226_s26 = scalar_lea.vmem %s2761_s28, 1024  ;;  %s2447_s19 = smov [#allocation2]  }
  0xda   : > { %p2227_p5 = scmp.ne.s32.totalorder %s2761_s28, %s2226_s26  ;;  %s2231_s21 = sshll.u32 %s2447_s19, 4  ;;  %s2232_s21 = int_to_ptr.vmem [resolvable:$false] %s2231_s21 }
  0xdb   : > { %s2233_s20 = scalar_lea.vmem %s2232_s21, 2048  ;;  %p2234_p2 = scmp.lt.s32.totalorder %s2761_s28, %s2232_s21 }
  0xdc   : > { %p2229_p10 = pnand %p2227_p5, %p3422_p13  ;;  %p2235_p7 = scmp.lt.s32.totalorder %s2233_s20, %s2226_s26 }
  0xde   : > { %p2230_p12 = pneg %p2229_p10  ;;  %p2236_p11 = por %p2235_p7, %p2234_p2 }
  0xe0   : > { %p2237_p9 = pnand %p2236_p11, %p2230_p12 }
  0xe2   : > { %2240 = shalt.err (!%p2237_p9)
}
  0xe3   : > { %p3423_p4 = scmp.ne.s32.totalorder %s3415_s29, 0  ;;  %s450_s12 = scalar_lea.vmem [#allocation7], %s2661_s10 }
  0xe4   : > { %s459_s30 = sshll.u32 %s450_s12, 4  ;;  %s2805_s22 = scalar_lea.hbm %s3356_s3, %s2664_s9  ;;  %s2799_s30 = int_to_ptr.vmem [resolvable:$true] %s459_s30 }
  0xe5   : > { %1885 = dma.hbm_to_vmem [thread:$0]  (!%p3423_p4), %s2758_s16, 1024, %s2761_s28, %s2771_s25, %s2443_s7, %s2443_s7, %s2444_s13  }
  0xe6   : > { %s2241_s24 = scalar_lea.hbm %s2767_s11, 1024  ;;  %s2246_s19 = scalar_lea.hbm %s3355_s2, 2048 }
  0xe7   : > { %p2242_p1 = scmp.ne.s32.totalorder %s2767_s11, %s2241_s24  ;;  %p2247_p8 = scmp.lt.u32.totalorder %s2767_s11, %s3355_s2 }
  0xe8   : > { %p2248_p0 = scmp.lt.u32.totalorder %s2246_s19, %s2241_s24  ;;  %p2250_p10 = scmp.lt.u32.totalorder %s2241_s24, %s2767_s11 }
  0xe9   : > { %p2244_p3 = pnand %p2242_p1, %p3422_p13 }
  0xea   : > { %p2249_p5 = por %p2248_p0, %p2247_p8 }
  0xeb   : > { %p2245_p6 = pneg %p2244_p3 }
  0xec   : > { %p2251_p12 = por %p2250_p10, %p2249_p5 }
  0xee   : > { %p2252_p2 = pnand %p2251_p12, %p2245_p6 }
  0xf0   : > { %2255 = shalt.err (!%p2252_p2)
}
  0xf1   : > { %s2256_s9 = scalar_lea.vmem %s2799_s30, 1024  ;;  %s2448_s28 = smov [#allocation7]  }
  0xf2   : > { %p2257_p7 = scmp.ne.s32.totalorder %s2799_s30, %s2256_s9  ;;  %s2261_s25 = sshll.u32 %s2448_s28, 4  ;;  %s2262_s25 = int_to_ptr.vmem [resolvable:$false] %s2261_s25 }
  0xf3   : > { %s2263_s20 = scalar_lea.vmem %s2262_s25, 2048  ;;  %p2264_p1 = scmp.lt.s32.totalorder %s2799_s30, %s2262_s25 }
  0xf4   : > { %p2259_p11 = pnand %p2257_p7, %p3422_p13  ;;  %p2265_p3 = scmp.lt.s32.totalorder %s2263_s20, %s2256_s9 }
  0xf6   : > { %p2260_p9 = pneg %p2259_p11  ;;  %p2266_p8 = por %p2265_p3, %p2264_p1 }
  0xf8   : > { %p2267_p0 = pnand %p2266_p8, %p2260_p9 }
  0xfa   : > { %2270 = shalt.err (!%p2267_p0)
}
  0xfb   : > { %1891 = dma.hbm_to_vmem [thread:$0]  (!%p3423_p4), %s2767_s11, 1024, %s2799_s30, %s2685_s5, %s2443_s7, %s2443_s7, %s2444_s13  }
  0xfc   : > { %s473_s12 = scalar_lea.vmem [#allocation8], %s2661_s10  ;;  %s3424_s17 = sand.u32 1, %s2435_s18  }
  0xfd   : > { %s482_s27 = sshll.u32 %s473_s12, 4  ;;  %s2837_s24 = scalar_lea.sflag [#allocation9], %s3424_s17  ;;  %s2833_s27 = int_to_ptr.vmem [resolvable:$true] %s482_s27 }
  0xfe   : > { %s2271_s1 = scalar_lea.hbm %s2805_s22, 1024  ;;  %s2276_s21 = scalar_lea.hbm %s3356_s3, 2048 }
  0xff   : > { %p2272_p6 = scmp.ne.s32.totalorder %s2805_s22, %s2271_s1  ;;  %p2277_p12 = scmp.lt.u32.totalorder %s2805_s22, %s3356_s3 }
 0x100   : > { %p2278_p2 = scmp.lt.u32.totalorder %s2276_s21, %s2271_s1  ;;  %p2280_p11 = scmp.lt.u32.totalorder %s2271_s1, %s2805_s22 }
 0x101   : > { %p2274_p5 = pnand %p2272_p6, %p3422_p13 }
 0x102   : > { %p2279_p7 = por %p2278_p2, %p2277_p12 }
 0x103   : > { %p2275_p10 = pneg %p2274_p5 }
 0x104   : > { %p2281_p9 = por %p2280_p11, %p2279_p7 }
 0x106   : > { %p2282_p1 = pnand %p2281_p9, %p2275_p10 }
 0x108   : > { %2285 = shalt.err (!%p2282_p1)
}
 0x109   : > { %s2286_s5 = scalar_lea.vmem %s2833_s27, 1024  ;;  %s2449_s10 = smov [#allocation8]  }
 0x10a   : > { %p2287_p3 = scmp.ne.s32.totalorder %s2833_s27, %s2286_s5  ;;  %s2291_s11 = sshll.u32 %s2449_s10, 4  ;;  %s2292_s11 = int_to_ptr.vmem [resolvable:$false] %s2291_s11 }
 0x10b   : > { %s2293_s30 = scalar_lea.vmem %s2292_s11, 2048  ;;  %p2294_p6 = scmp.lt.s32.totalorder %s2833_s27, %s2292_s11 }
 0x10c   : > { %p2289_p8 = pnand %p2287_p3, %p3422_p13  ;;  %p2295_p5 = scmp.lt.s32.totalorder %s2293_s30, %s2286_s5 }
 0x10e   : > { %p2290_p0 = pneg %p2289_p8  ;;  %p2296_p12 = por %p2295_p5, %p2294_p6 }
 0x110   : > { %p2297_p2 = pnand %p2296_p12, %p2290_p0 }
 0x112   : > { %2300 = shalt.err (!%p2297_p2)
}
 0x113   : > { %1894 = dma.hbm_to_vmem [thread:$0]  (!%p3423_p4), %s2805_s22, 1024, %s2833_s27, %s2837_s24, %s2443_s7, %s2443_s7, %s2444_s13  }
 0x114   : > { %p3425_p13 = scmp.ne.s32.totalorder %s3405_s23, 0 }
 0x115   : > { %s3426_s4 = sld [smem:[#allocation32_spill]] (!%p3425_p13)  ;;  %s2867_s28 = sand.u32 (!%p3425_p13), 1, %s2419_s14  }
 0x116   : > { %494 = sbr.rel (%p3425_p13) target bundleno = 1140 (0x474), region = 56  ;;  %s2870_s25 = sshll.u32 (!%p3425_p13), %s2867_s28, 6 }
 0x117   : > { %s497_s29 = scalar_lea.sflag (!%p3425_p13), [#allocation3], %s2867_s28  ;;  %s2874_s20 = scalar_lea.vmem (!%p3425_p13), [#allocation2], %s2870_s25 }
 0x11b   : > { %p3427_p10 = scmp.ne.s32.totalorder (!%p3425_p13), %s3426_s4, 0 }
 0x11d   : > { %2382 = dma.done.wait (%p3427_p10), %s497_s29, 1024  }
 0x11e   : > { %2384 = vsyncadd (%p3427_p10), %s497_s29, 4294966272  ;;  %s3428_s7 = sld [smem:[#allocation31_spill]]  ;;  %s2882_s22 = scalar_lea.vmem [#allocation5], %s2870_s25 }
 0x124   : > { %s505_s23 = sand.u32 1, %s3428_s7  }
 0x125   : > { %s506_s13 = scalar_lea.sflag [#allocation6], %s505_s23 }
 0x126   : > { %2386 = dma.done.wait (%p3427_p10), %s506_s13, 2048  }
 0x127   : > { %2388 = vsyncadd (%p3427_p10), %s506_s13, 4294965248  ;;  %s2889_s12 = scalar_lea.vmem [#allocation7], %s2870_s25  ;;  %s524_s27 = scalar_lea.sflag [#allocation9], %s505_s23 }
 0x128   : > { %s2892_s17 = scalar_lea.vmem [#allocation8], %s2870_s25 }
 0x129   : > { %2390 = dma.done.wait (%p3427_p10), %s524_s27, 1024  }
 0x12a   : > { %2392 = vsyncadd (%p3427_p10), %s524_s27, 4294966272  ;;  %p3429_p4 = scmp.eq.s32.totalorder %s3428_s7, 0 }
 0x12c   : > { %2394 = dma.done.wait (%p3429_p4), [#allocation9], 64   ;;  %p3430_p7 = pmov %p3429_p4 }
 0x12d   : > { %p3431_p11 = pmov %p3429_p4 }
 0x12e   : > { %2396 = vsyncadd (%p3430_p7), [#allocation9], 4294967232 }
 0x12f   : > { %2398 = dma.done.wait (%p3431_p11), [#allocation12], 160   ;;  %p3432_p9 = pmov %p3429_p4 }
 0x130   : > { %p3433_p1 = pmov %p3429_p4 }
 0x131   : > { %2400 = vsyncadd (%p3432_p9), [#allocation12], 4294967136 }
 0x132   : > { %2402 = dma.done.wait (%p3433_p1), [#allocation15], 544   ;;  %p3434_p3 = pmov %p3433_p1 }
 0x133   : > { %v614_v0 = vld [vmem:[%s2874_s20] sm:$0xff]  ;;  %vm643_vm0 = vcmask 64512   ;;  %v616_v2 = vld [vmem:[%s2874_s20 + $0x10] sm:$0xff]  ;;  %v615_v5 = vld [vmem:[%s2874_s20 + $0x8] sm:$0xff]  ;;  %vm793_vm1 = vcmask 1043456   ;;  %vm922_vm2 = vcmask 261120  }
 0x134   : > { %2404 = vsyncadd (%p3434_p3), [#allocation15], 4294966752  ;;  %v622_v1 = vld [vmem:[%s2889_s12] sm:$0xff]  ;;  %v624_v4 = vld [vmem:[%s2889_s12 + $0x10] sm:$0xff]  ;;  %s3435_s24 = sld [smem:[#allocation29_spill]]  ;;  %s596_s1 = scalar_lea.vmem [#allocation17], %s2870_s25 }
 0x135   : > { %v2913_v3 = vadd.f32 %v622_v1, %v614_v0  ;;  %v623_v6 = vld [vmem:[%s2889_s12 + $0x8] sm:$0xff]  ;;  %v2918_v7 = vadd.f32 %v624_v4, %v616_v2  ;;  %v617_v9 = vld [vmem:[%s2874_s20 + $0x18] sm:$0xff]  ;;  %v618_v11 = vld [vmem:[%s2874_s20 + $0x20] sm:$0xff]  ;;  %s1437_s19 = sshll.u32 %s596_s1, 4  ;;  %s3436_s21 = sld [smem:[#allocation34_spill]]  ;;  %s3236_s19 = int_to_ptr.vmem [resolvable:$true] %s1437_s19 }
 0x136   : > { %v2920_v8 = vadd.f32 %v623_v6, %v615_v5  ;;  %v625_v10 = vld [vmem:[%s2889_s12 + $0x18] sm:$0xff]  ;;  %v626_v14 = vld [vmem:[%s2889_s12 + $0x20] sm:$0xff]  ;;  %v619_v15 = vld [vmem:[%s2874_s20 + $0x28] sm:$0xff]  ;;  %s3437_s5 = sld [smem:[#allocation41_spill]]  ;;  %s1417_s11 = scalar_lea.sflag [#allocation4], %s2867_s28 }
 0x137   : > { %v644_v12 = vsel %vm643_vm0, %v2913_v3, 0.0  ;;  %v2927_v13 = vadd.f32 %v625_v10, %v617_v9  ;;  %v627_v16 = vld [vmem:[%s2889_s12 + $0x28] sm:$0xff]  ;;  %v650_v17 = vsel %vm643_vm0, %v2918_v7, 0.0  ;;  %v2936_v19 = vadd.f32 %v626_v14, %v618_v11  ;;  %v620_v22 = vld [vmem:[%s2874_s20 + $0x30] sm:$0xff]  ;;  %v621_v24 = vld [vmem:[%s2874_s20 + $0x38] sm:$0xff]  ;;  %s2301_s30 = scalar_lea.vmem %s3236_s19, 1024 }
 0x138   : > { %645 = vadd.xlane.f32.xlu0 %v644_v12  ;;  %651 = vadd.xlane.f32.xlu1 %v650_v17  ;;  %v647_v18 = vsel %vm643_vm0, %v2920_v8, 0.0  ;;  %v2940_v21 = vadd.f32 %v627_v16, %v619_v15  ;;  %v628_v23 = vld [vmem:[%s2889_s12 + $0x30] sm:$0xff]  ;;  %v629_v25 = vld [vmem:[%s2889_s12 + $0x38] sm:$0xff]  ;;  %v1016_v28 = vld [vmem:[%s2882_s22] sm:$0xff]  ;;  %p2302_p8 = scmp.ne.s32.totalorder %s3236_s19, %s2301_s30  ;;  %s2450_s4 = smov [#allocation17]  }
 0x139   : > { %v653_v20 = vsel %vm643_vm0, %v2927_v13, 0.0  ;;  %v656_v26 = vsel %vm643_vm0, %v2936_v19, 0.0  ;;  %v2948_v27 = vadd.f32 %v628_v23, %v620_v22  ;;  %v2953_v30 = vadd.f32 %v629_v25, %v621_v24  ;;  %v1024_v31 = vld [vmem:[%s2892_s17] sm:$0xff]  ;;  %v1017_v32 = vld [vmem:[%s2882_s22 + $0x8] sm:$0xff]  ;;  %v1018_v38 = vld [vmem:[%s2882_s22 + $0x10] sm:$0xff]  ;;  %s2305_s29 = sshll.u32 %s2450_s4, 4  ;;  %s2306_s29 = int_to_ptr.vmem [resolvable:$false] %s2305_s29 }
 0x13a   : > { %v659_v29 = vsel %vm643_vm0, %v2940_v21, 0.0  ;;  %v1025_v33 = vld [vmem:[%s2892_s17 + $0x8] sm:$0xff]  ;;  %v2960_v35 = vadd.f32 %v1024_v31, %v1016_v28  ;;  %v1026_v39 = vld [vmem:[%s2892_s17 + $0x10] sm:$0xff]  ;;  %v1019_v40 = vld [vmem:[%s2882_s22 + $0x18] sm:$0xff]  ;;  %s1764_s26 = sshll.u32 %s3435_s24, 10  ;;  %s2307_s20 = scalar_lea.vmem %s2306_s29, 2048 }
 0x13b   : > { %v662_v34 = vsel %vm643_vm0, %v2948_v27, 0.0  ;;  %v665_v36 = vsel %vm643_vm0, %v2953_v30, 0.0  ;;  %v2964_v37 = vadd.f32 %v1025_v33, %v1017_v32  ;;  %v1027_v41 = vld [vmem:[%s2892_s17 + $0x18] sm:$0xff]  ;;  %v2972_v43 = vadd.f32 %v1026_v39, %v1018_v38  ;;  %v1020_v46 = vld [vmem:[%s2882_s22 + $0x20] sm:$0xff]  ;;  %v1021_v48 = vld [vmem:[%s2882_s22 + $0x28] sm:$0xff]  ;;  %p3438_p0 = scmp.ne.s32.totalorder %s3436_s21, 0  ;;  %p2308_p12 = scmp.lt.s32.totalorder %s3236_s19, %s2306_s29 }
 0x13c   : > { %648 = vadd.xlane.f32.xlu0 %v647_v18  ;;  %654 = vadd.xlane.f32.xlu1 %v653_v20  ;;  %v1047_v42 = vsel %vm643_vm0, %v2960_v35, 0.0  ;;  %v2976_v45 = vadd.f32 %v1027_v41, %v1019_v40  ;;  %v1028_v47 = vld [vmem:[%s2892_s17 + $0x20] sm:$0xff]  ;;  %v1029_v49 = vld [vmem:[%s2892_s17 + $0x28] sm:$0xff]  ;;  %v1022_v54 = vld [vmem:[%s2882_s22 + $0x30] sm:$0xff]  ;;  %s3234_s10 = scalar_lea.hbm %s3437_s5, %s1764_s26  ;;  %p2309_p2 = scmp.lt.s32.totalorder %s2307_s20, %s2301_s30 }
 0x13d   : > { %v1050_v44 = vsel %vm643_vm0, %v2964_v37, 0.0  ;;  %v1053_v50 = vsel %vm643_vm0, %v2972_v43, 0.0  ;;  %v2984_v51 = vadd.f32 %v1028_v47, %v1020_v46  ;;  %v2988_v53 = vadd.f32 %v1029_v49, %v1021_v48  ;;  %v1030_v55 = vld [vmem:[%s2892_s17 + $0x30] sm:$0xff]  ;;  %v1023_v56 = vld [vmem:[%s2882_s22 + $0x38] sm:$0xff]  ;;  %p2303_p6 = pnand %p2302_p8, %p3438_p0 }
 0x13e   : > { %v1056_v52 = vsel %vm643_vm0, %v2976_v45, 0.0  ;;  %v1031_v57 = vld [vmem:[%s2892_s17 + $0x38] sm:$0xff]  ;;  %v2996_v59 = vadd.f32 %v1030_v55, %v1022_v54  ;;  %p2310_p13 = por %p2309_p2, %p2308_p12 }
 0x13f   : > { %v1059_v58 = vsel %vm643_vm0, %v2984_v51, 0.0  ;;  %v1062_v60 = vsel %vm643_vm0, %v2988_v53, 0.0  ;;  %v3000_v61 = vadd.f32 %v1031_v57, %v1023_v56  ;;  %p2304_p5 = pneg %p2303_p6 }
 0x140   : > { %657 = vadd.xlane.f32.xlu0 %v656_v26  ;;  %660 = vadd.xlane.f32.xlu1 %v659_v29  ;;  %v1065_v62 = vsel %vm643_vm0, %v2996_v59, 0.0 }
 0x141   : > { %v1068_v63 = vsel %vm643_vm0, %v3000_v61, 0.0  ;;  %p2311_p10 = pnand %p2310_p13, %p2304_p5 }
 0x144   : > { %663 = vadd.xlane.f32.xlu0 %v662_v34  ;;  %666 = vadd.xlane.f32.xlu1 %v665_v36 }
 0x148   : > { %1048 = vadd.xlane.f32.xlu0 %v1047_v42  ;;  %1051 = vadd.xlane.f32.xlu1 %v1050_v44 }
 0x14c   : > { %1054 = vadd.xlane.f32.xlu0 %v1053_v50  ;;  %1057 = vadd.xlane.f32.xlu1 %v1056_v52 }
 0x150   : > { %1060 = vadd.xlane.f32.xlu0 %v1059_v58  ;;  %1063 = vadd.xlane.f32.xlu1 %v1062_v60 }
 0x154   : > { %1066 = vadd.xlane.f32.xlu0 %v1065_v62  ;;  %1069 = vadd.xlane.f32.xlu1 %v1068_v63 }
 0x1c5   : > { %v646_v0 = vpop.xlane.xlu0 %645  ;;  %v652_v2 = vpop.xlane.xlu1 %651 }
 0x1c6   : > { %v669_v1 = vmul.f32 0.125, %v646_v0  ;;  %v671_v4 = vmul.f32 0.125, %v652_v2 }
 0x1c8   : > { %v3007_v5 = vsub.f32 %v2913_v3, %v669_v1  ;;  %v3010_v6 = vsub.f32 %v2918_v7, %v671_v4 }
 0x1c9   : > { %v649_v9 = vpop.xlane.xlu0 %648  ;;  %v655_v11 = vpop.xlane.xlu1 %654 }
 0x1ca   : > { %v670_v10 = vmul.f32 0.125, %v649_v9  ;;  %v685_v12 = vmul.f32 %v3007_v5, %v3007_v5  ;;  %v672_v14 = vmul.f32 0.125, %v655_v11  ;;  %v687_v15 = vmul.f32 %v3010_v6, %v3010_v6 }
 0x1cc   : > { %v3017_v16 = vsub.f32 %v2920_v8, %v670_v10  ;;  %v693_v17 = vsel %vm643_vm0, %v685_v12, 0.0  ;;  %v3021_v18 = vsub.f32 %v2927_v13, %v672_v14  ;;  %v699_v24 = vsel %vm643_vm0, %v687_v15, 0.0 }
 0x1cd   : > { %694 = vadd.xlane.f32.xlu0 %v693_v17  ;;  %v658_v20 = vpop.xlane.xlu0 %657  ;;  %v661_v23 = vpop.xlane.xlu1 %660 }
 0x1ce   : > { %v673_v22 = vmul.f32 0.125, %v658_v20  ;;  %v686_v25 = vmul.f32 %v3017_v16, %v3017_v16  ;;  %v674_v26 = vmul.f32 0.125, %v661_v23  ;;  %v688_v28 = vmul.f32 %v3021_v18, %v3021_v18 }
 0x1d0   : > { %v3029_v29 = vsub.f32 %v2936_v19, %v673_v22  ;;  %v696_v31 = vsel %vm643_vm0, %v686_v25, 0.0  ;;  %v3033_v32 = vsub.f32 %v2940_v21, %v674_v26  ;;  %v702_v38 = vsel %vm643_vm0, %v688_v28, 0.0 }
 0x1d1   : > { %700 = vadd.xlane.f32.xlu0 %v699_v24  ;;  %697 = vadd.xlane.f32.xlu1 %v696_v31  ;;  %v664_v33 = vpop.xlane.xlu0 %663  ;;  %v667_v36 = vpop.xlane.xlu1 %666 }
 0x1d2   : > { %v675_v34 = vmul.f32 0.125, %v664_v33  ;;  %v689_v39 = vmul.f32 %v3029_v29, %v3029_v29  ;;  %v676_v40 = vmul.f32 0.125, %v667_v36  ;;  %v690_v41 = vmul.f32 %v3033_v32, %v3033_v32 }
 0x1d4   : > { %v3041_v42 = vsub.f32 %v2948_v27, %v675_v34  ;;  %v705_v44 = vsel %vm643_vm0, %v689_v39, 0.0  ;;  %v3045_v46 = vsub.f32 %v2953_v30, %v676_v40  ;;  %v708_v50 = vsel %vm643_vm0, %v690_v41, 0.0 }
 0x1d5   : > { %703 = vadd.xlane.f32.xlu1 %v702_v38  ;;  %706 = vadd.xlane.f32.xlu0 %v705_v44  ;;  %v1049_v47 = vpop.xlane.xlu0 %1048  ;;  %v1052_v49 = vpop.xlane.xlu1 %1051 }
 0x1d6   : > { %v1071_v48 = vmul.f32 0.125, %v1049_v47  ;;  %v691_v52 = vmul.f32 %v3041_v42, %v3041_v42  ;;  %v1072_v54 = vmul.f32 0.125, %v1052_v49  ;;  %v692_v55 = vmul.f32 %v3045_v46, %v3045_v46 }
 0x1d8   : > { %v3053_v56 = vsub.f32 %v2960_v35, %v1071_v48  ;;  %v711_v57 = vsel %vm643_vm0, %v691_v52, 0.0  ;;  %v3057_v58 = vsub.f32 %v2964_v37, %v1072_v54  ;;  %v714_v0 = vsel %vm643_vm0, %v692_v55, 0.0  ;;  %v630_v54 = vld [vmem:[#allocation11] sm:$0xf] }
 0x1d9   : > { %709 = vadd.xlane.f32.xlu1 %v708_v50  ;;  %712 = vadd.xlane.f32.xlu0 %v711_v57  ;;  %v1055_v60 = vpop.xlane.xlu0 %1054  ;;  %v1058_v63 = vpop.xlane.xlu1 %1057  ;;  %v795_v55 = vsel %vm793_vm1, %v630_v54, 0  ;;  %v1033_v57 = vld [vmem:[#allocation11 + $0x4] sm:$0xf] }
 0x1da   : > { %v1073_v62 = vmul.f32 0.125, %v1055_v60  ;;  %v1087_v1 = vmul.f32 %v3053_v56, %v3053_v56  ;;  %v1074_v2 = vmul.f32 0.125, %v1058_v63  ;;  %v1088_v4 = vmul.f32 %v3057_v58, %v3057_v58  ;;  %1832 = vmatprep.subr.msk.bf16.mxu0 %vm793_vm1, %v630_v54 }
 0x1db   : > { %1789 = vmatpush3.bf16.msra.mxu0 %v795_v55  ;;  %v3102_v60 = vsel %vm793_vm1, %v1033_v57, 0 }
 0x1dc   : > { %v3065_v9 = vsub.f32 %v2972_v43, %v1073_v62  ;;  %v1095_v10 = vsel %vm643_vm0, %v1087_v1, 0.0  ;;  %v3069_v11 = vsub.f32 %v2976_v45, %v1074_v2  ;;  %v1098_v17 = vsel %vm643_vm0, %v1088_v4, 0.0  ;;  %1833 = vmatprep.subr.msk.bf16.mxu0 %vm793_vm1, %v1033_v57 }
 0x1dd   : > { %715 = vadd.xlane.f32.xlu1 %v714_v0  ;;  %1096 = vadd.xlane.f32.xlu0 %v1095_v10  ;;  %v1061_v12 = vpop.xlane.xlu0 %1060  ;;  %v1064_v15 = vpop.xlane.xlu1 %1063  ;;  %v749_v4 = vlaneseq }
 0x1de   : > { %v1075_v14 = vmul.f32 0.125, %v1061_v12  ;;  %v1089_v20 = vmul.f32 %v3065_v9, %v3065_v9  ;;  %v1076_v22 = vmul.f32 0.125, %v1064_v15  ;;  %v1090_v23 = vmul.f32 %v3069_v11, %v3069_v11 }
 0x1e0   : > { %v3077_v24 = vsub.f32 %v2984_v51, %v1075_v14  ;;  %v1101_v25 = vsel %vm643_vm0, %v1089_v20, 0.0  ;;  %v3081_v26 = vsub.f32 %v2988_v53, %v1076_v22  ;;  %v1104_v34 = vsel %vm643_vm0, %v1090_v23, 0.0 }
 0x1e1   : > { %1099 = vadd.xlane.f32.xlu1 %v1098_v17  ;;  %1102 = vadd.xlane.f32.xlu0 %v1101_v25  ;;  %v1067_v28 = vpop.xlane.xlu0 %1066  ;;  %v1070_v33 = vpop.xlane.xlu1 %1069  ;;  %v3104_v22 = vshrl.u32 %v749_v4, 7 }
 0x1e2   : > { %v1077_v31 = vmul.f32 0.125, %v1067_v28  ;;  %v1091_v36 = vmul.f32 %v3077_v24, %v3077_v24  ;;  %v1078_v38 = vmul.f32 0.125, %v1070_v33  ;;  %v1092_v39 = vmul.f32 %v3081_v26, %v3081_v26 }
 0x1e3   : > { %v3117_v57 = vsub.s32 1, %v3104_v22 }
 0x1e4   : > { %v3089_v40 = vsub.f32 %v2996_v59, %v1077_v31  ;;  %v1107_v41 = vsel %vm643_vm0, %v1091_v36, 0.0  ;;  %v3093_v44 = vsub.f32 %v3000_v61, %v1078_v38  ;;  %v1110_v47 = vsel %vm643_vm0, %v1092_v39, 0.0 }
 0x1e5   : > { %1105 = vadd.xlane.f32.xlu1 %v1104_v34  ;;  %1108 = vadd.xlane.f32.xlu0 %v1107_v41  ;;  %v3107_v36 = vsub.s32 0, %v3104_v22  ;;  %v3109_v41 = vld [vmem:[#allocation10] sm:$0xf] }
 0x1e6   : > { %v1093_v48 = vmul.f32 %v3089_v40, %v3089_v40  ;;  %v1094_v49 = vmul.f32 %v3093_v44, %v3093_v44 }
 0x1e7   : > { %v3114_v55 = vrot.slane %v3109_v41, %v3107_v36 }
 0x1e8   : > { %v1113_v50 = vsel %vm643_vm0, %v1093_v48, 0.0  ;;  %v1116_v52 = vsel %vm643_vm0, %v1094_v49, 0.0 }
 0x1e9   : > { %1111 = vadd.xlane.f32.xlu1 %v1110_v47  ;;  %1114 = vadd.xlane.f32.xlu0 %v1113_v50 }
 0x1ed   : > { %1117 = vadd.xlane.f32.xlu1 %v1116_v52 }
 0x25a   : > { %v695_v62 = vpop.xlane.xlu0 %694 }
 0x25b   : > { %v717_v63 = vmul.f32 0.125, %v695_v62 }
 0x25d   : > { %v725_v0 = vadd.f32 1e-05, %v717_v63 }
 0x25e   : > { %v698_v1 = vpop.xlane.xlu1 %697  ;;  %v701_v2 = vpop.xlane.xlu0 %700 }
 0x25f   : > { %1977 = vrsqrt.f32 %v725_v0  ;;  %v718_v10 = vmul.f32 0.125, %v698_v1  ;;  %v719_v12 = vmul.f32 0.125, %v701_v2 }
 0x261   : > { %v726_v14 = vadd.f32 1e-05, %v718_v10  ;;  %v727_v15 = vadd.f32 1e-05, %v719_v12 }
 0x262   : > { %v704_v17 = vpop.xlane.xlu1 %703  ;;  %v707_v20 = vpop.xlane.xlu0 %706 }
 0x263   : > { %1979 = vrsqrt.f32 %v726_v14  ;;  %v720_v23 = vmul.f32 0.125, %v704_v17  ;;  %v721_v25 = vmul.f32 0.125, %v707_v20 }
 0x264   : > { %1981 = vrsqrt.f32 %v727_v15  ;;  %v3123_v15 = vrot.slane %v3109_v41, %v3117_v57 }
 0x265   : > { %v728_v28 = vadd.f32 1e-05, %v720_v23  ;;  %v729_v31 = vadd.f32 1e-05, %v721_v25 }
 0x266   : > { %v710_v33 = vpop.xlane.xlu1 %709  ;;  %v713_v34 = vpop.xlane.xlu0 %712 }
 0x267   : > { %1983 = vrsqrt.f32 %v728_v28  ;;  %v722_v38 = vmul.f32 0.125, %v710_v33  ;;  %v723_v39 = vmul.f32 0.125, %v713_v34 }
 0x268   : > { %1985 = vrsqrt.f32 %v729_v31 }
 0x269   : > { %v1978_v47 = vpop.eup %1977  ;;  %v730_v48 = vadd.f32 1e-05, %v722_v38  ;;  %v731_v49 = vadd.f32 1e-05, %v723_v39 }
 0x26a   : > { %v716_v50 = vpop.xlane.xlu1 %715  ;;  %v1097_v52 = vpop.xlane.xlu0 %1096  ;;  %v741_v54 = vmul.f32 %v1978_v47, %v3007_v5 }
 0x26b   : > { %1987 = vrsqrt.f32 %v730_v48  ;;  %v724_v62 = vmul.f32 0.125, %v716_v50  ;;  %v1119_v63 = vmul.f32 0.125, %v1097_v52 }
 0x26c   : > { %1989 = vrsqrt.f32 %v731_v49  ;;  %v753_v5 = vmul.f32 %v3114_v55, %v741_v54 }
 0x26d   : > { %v1980_v0 = vpop.eup %1979  ;;  %v732_v1 = vadd.f32 1e-05, %v724_v62  ;;  %v1127_v2 = vadd.f32 1e-05, %v1119_v63 }
 0x26e   : > { %v1982_v4 = vpop.eup %1981  ;;  %v1100_v10 = vpop.xlane.xlu1 %1099  ;;  %v742_v14 = vmul.f32 %v1980_v0, %v3017_v16  ;;  %v765_v47 = vadd.f32 %v3123_v15, %v753_v5 }
 0x26f   : > { %v1103_v12 = vpop.xlane.xlu0 %1102  ;;  %v743_v17 = vmul.f32 %v1982_v4, %v3010_v6  ;;  %1991 = vrsqrt.f32 %v732_v1  ;;  %v1120_v20 = vmul.f32 0.125, %v1100_v10 }
 0x270   : > { %v1121_v23 = vmul.f32 0.125, %v1103_v12  ;;  %1993 = vrsqrt.f32 %v1127_v2  ;;  %v754_v25 = vmul.f32 %v3114_v55, %v742_v14 }
 0x271   : > { %v1984_v28 = vpop.eup %1983  ;;  %v1128_v31 = vadd.f32 1e-05, %v1120_v20  ;;  %v755_v6 = vmul.f32 %v3114_v55, %v743_v17 }
 0x272   : > { %v1129_v33 = vadd.f32 1e-05, %v1121_v23  ;;  %v1986_v34 = vpop.eup %1985  ;;  %v744_v16 = vmul.f32 %v1984_v28, %v3021_v18  ;;  %v1106_v38 = vpop.xlane.xlu1 %1105  ;;  %v766_v48 = vadd.f32 %v3123_v15, %v754_v25  ;;  %v1153_v18 = vsub.s32 2, %v3104_v22 }
 0x273   : > { %v1109_v39 = vpop.xlane.xlu0 %1108  ;;  %v745_v49 = vmul.f32 %v1986_v34, %v3029_v29  ;;  %1995 = vrsqrt.f32 %v1128_v31  ;;  %v1122_v50 = vmul.f32 0.125, %v1106_v38  ;;  %v767_v29 = vadd.f32 %v3123_v15, %v755_v6 }
 0x274   : > { %v1123_v52 = vmul.f32 0.125, %v1109_v39  ;;  %1997 = vrsqrt.f32 %v1129_v33  ;;  %v773_v54 = vpack.c.bf16 %v766_v48, %v765_v47  ;;  %v756_v62 = vmul.f32 %v3114_v55, %v744_v16 }
 0x275   : > { %v1988_v63 = vpop.eup %1987  ;;  %v1130_v0 = vadd.f32 1e-05, %v1122_v50  ;;  %v757_v5 = vmul.f32 %v3114_v55, %v745_v49  ;;  %v1165_v31 = vsub.s32 3, %v3104_v22  ;;  %v1154_v33 = vrot.slane %v3109_v41, %v1153_v18 }
 0x276   : > { %v1131_v1 = vadd.f32 1e-05, %v1123_v52  ;;  %v1990_v2 = vpop.eup %1989  ;;  %v746_v4 = vmul.f32 %v1988_v63, %v3033_v32  ;;  %v1112_v10 = vpop.xlane.xlu1 %1111  ;;  %1790 = vmatprep.mubr.msk.bf16.mxu0 %vm643_vm0, %v773_v54  ;;  %v768_v14 = vadd.f32 %v3123_v15, %v756_v62 }
 0x277   : > { %v1115_v12 = vpop.xlane.xlu0 %1114  ;;  %v747_v17 = vmul.f32 %v1990_v2, %v3041_v42  ;;  %1999 = vrsqrt.f32 %v1130_v0  ;;  %v1124_v20 = vmul.f32 0.125, %v1112_v10  ;;  %v769_v42 = vadd.f32 %v3123_v15, %v757_v5 }
 0x278   : > { %v1125_v23 = vmul.f32 0.125, %v1115_v12  ;;  %2001 = vrsqrt.f32 %v1131_v1  ;;  %v774_v25 = vpack.c.bf16 %v768_v14, %v767_v29  ;;  %v758_v28 = vmul.f32 %v3114_v55, %v746_v4 }
 0x279   : > { %v1992_v32 = vpop.eup %1991  ;;  %v1132_v34 = vadd.f32 1e-05, %v1124_v20  ;;  %v759_v6 = vmul.f32 %v3114_v55, %v747_v17  ;;  %v1166_v54 = vrot.slane %v3109_v41, %v1165_v31 }
 0x27a   : > { %v1133_v16 = vadd.f32 1e-05, %v1125_v23  ;;  %v1994_v38 = vpop.eup %1993  ;;  %v748_v39 = vmul.f32 %v1992_v32, %v3045_v46  ;;  %v1118_v47 = vpop.xlane.xlu1 %1117  ;;  %1791 = vmatmul.mubr.msk.bf16.vlgmr.msra.gmra.mrb[0].mxu0 %vm643_vm0, %v774_v25  ;;  %v770_v48 = vadd.f32 %v3123_v15, %v758_v28 }
 0x27b   : > { %v1143_v49 = vmul.f32 %v1994_v38, %v3053_v56  ;;  %2003 = vrsqrt.f32 %v1132_v34  ;;  %v1126_v22 = vmul.f32 0.125, %v1118_v47  ;;  %1811 = vmatpush3.bf16.msra.mxu0 %v3102_v60  ;;  %v771_v0 = vadd.f32 %v3123_v15, %v759_v6 }
 0x27c   : > { %2005 = vrsqrt.f32 %v1133_v16  ;;  %v775_v50 = vpack.c.bf16 %v770_v48, %v769_v42  ;;  %v760_v52 = vmul.f32 %v3114_v55, %v748_v39 }
 0x27d   : > { %v1996_v46 = vpop.eup %1995  ;;  %v1134_v62 = vadd.f32 1e-05, %v1126_v22  ;;  %v1155_v1 = vmul.f32 %v1154_v33, %v1143_v49  ;;  %v1974_v49 = vld [vmem:[#allocation14 + $0x8] sm:$0xff]   ;;  %v612_v22 = vld [vmem:[#allocation13] sm:$0x3] }
 0x27e   : > { %v1998_v63 = vpop.eup %1997  ;;  %v1144_v18 = vmul.f32 %v1996_v46, %v3057_v58  ;;  %1794 = vmatprep.mubr.msk.bf16.mxu0 %vm643_vm0, %v775_v50  ;;  %v772_v56 = vadd.f32 %v3123_v15, %v760_v52 }
 0x27f   : > { %v1145_v60 = vmul.f32 %v1998_v63, %v3065_v9  ;;  %2007 = vrsqrt.f32 %v1134_v62  ;;  %v1167_v58 = vadd.f32 %v1166_v54, %v1155_v1 }
 0x280   : > { %v776_v2 = vpack.c.bf16 %v772_v56, %v771_v0  ;;  %v1156_v4 = vmul.f32 %v1154_v33, %v1144_v18 }
 0x281   : > { %v2000_v55 = vpop.eup %1999  ;;  %v1157_v12 = vmul.f32 %v1154_v33, %v1145_v60 }
 0x282   : > { %v2002_v10 = vpop.eup %2001  ;;  %v1146_v41 = vmul.f32 %v2000_v55, %v3069_v11  ;;  %1795 = vmatmul.mubr.msk.bf16.gmra.mrb[4].mxu0 %vm643_vm0, %v776_v2  ;;  %v1168_v29 = vadd.f32 %v1166_v54, %v1156_v4 }
 0x283   : > { %v1147_v14 = vmul.f32 %v2002_v10, %v3077_v24  ;;  %v1169_v23 = vadd.f32 %v1166_v54, %v1157_v12 }
 0x284   : > { %v1158_v5 = vmul.f32 %v1154_v33, %v1146_v41  ;;  %v1175_v17 = vpack.c.bf16 %v1168_v29, %v1167_v58 }
 0x285   : > { %v2004_v15 = vpop.eup %2003  ;;  %v1159_v28 = vmul.f32 %v1154_v33, %v1147_v14 }
 0x286   : > { %v2006_v20 = vpop.eup %2005  ;;  %v1170_v9 = vadd.f32 %v1166_v54, %v1158_v5  ;;  %v1148_v25 = vmul.f32 %v2004_v15, %v3081_v26  ;;  %1812 = vmatprep.mubr.msk.bf16.mxu0 %vm643_vm0, %v1175_v17 }
 0x287   : > { %v1149_v32 = vmul.f32 %v2006_v20, %v3089_v40  ;;  %v1171_v24 = vadd.f32 %v1166_v54, %v1159_v28  ;;  %v1973_v40 = vld [vmem:[#allocation14] sm:$0xff]   ;;  %v3175_v20 = vrot.slane %v612_v22, %v3117_v57 }
 0x288   : > { %v1176_v11 = vpack.c.bf16 %v1170_v9, %v1169_v23  ;;  %v1160_v31 = vmul.f32 %v1154_v33, %v1148_v25  ;;  %1798 = vmatprep.subr.bf16.mxu1 %v1973_v40 }
 0x289   : > { %v2008_v34 = vpop.eup %2007  ;;  %v1161_v39 = vmul.f32 %v1154_v33, %v1149_v32  ;;  %1799 = vmatpush3.bf16.msra.mxu1 %v1973_v40 }
 0x28a   : > { %v1150_v16 = vmul.f32 %v2008_v34, %v3093_v44  ;;  %1813 = vmatmul.mubr.msk.bf16.vlgmr.msra.gmra.mrb[8].mxu0 %vm643_vm0, %v1176_v11  ;;  %v1172_v38 = vadd.f32 %v1166_v54, %v1160_v31  ;;  %1800 = vmatprep.subr.bf16.mxu1 %v1974_v49  ;;  %v3167_v44 = vld [vmem:[#allocation14 + $0x10] sm:$0xff]  }
 0x28b   : > { %v1173_v26 = vadd.f32 %v1166_v54, %v1161_v39 }
 0x28c   : > { %v1177_v47 = vpack.c.bf16 %v1172_v38, %v1171_v24  ;;  %v1162_v42 = vmul.f32 %v1154_v33, %v1150_v16  ;;  %v780_v33 = vrot.slane %v612_v22, %v3107_v36 }
 0x28d   : > { %1801 = vmatpush3.bf16.msra.mxu1 %v1974_v49 }
 0x28e   : > { %1816 = vmatprep.mubr.msk.bf16.mxu0 %vm643_vm0, %v1177_v47  ;;  %v1174_v48 = vadd.f32 %v1166_v54, %v1162_v42  ;;  %1820 = vmatprep.subr.bf16.mxu1 %v3167_v44 }
 0x290   : > { %v1178_v6 = vpack.c.bf16 %v1174_v48, %v1173_v26 }
 0x292   : > { %1817 = vmatmul.mubr.msk.bf16.gmra.mrb[12].mxu0 %vm643_vm0, %v1178_v6 }
 0x34d   : > { %v1792_v50 = vpop.f32.mrb[0].mxu0 }
 0x34e   : > { %v840_v52 = vadd.f32 %v1792_v50, %v780_v33  ;;  %v831_v46 = vpop.f32.mrb[1].mxu0 }
 0x34f   : > { %v832_v54 = vadd.f32 %v831_v46, %v780_v33  ;;  %v1793_v62 = vpop.f32.mrb[2].mxu0 }
 0x350   : > { %v872_v63 = vmul.f32 0.70710677, %v840_v52  ;;  %v843_v18 = vadd.f32 %v1793_v62, %v780_v33  ;;  %v834_v0 = vpop.f32.mrb[3].mxu0  ;;  %v864_v24 = vmul.f32 0.5, %v840_v52 }
 0x351   : > { %v870_v56 = vmul.f32 0.70710677, %v832_v54  ;;  %v835_v1 = vadd.f32 %v834_v0, %v780_v33  ;;  %v862_v46 = vmul.f32 0.5, %v832_v54 }
 0x352   : > { %2009 = verf.f32 %v872_v63  ;;  %v873_v60 = vmul.f32 0.70710677, %v843_v18  ;;  %v865_v38 = vmul.f32 0.5, %v843_v18 }
 0x353   : > { %2011 = verf.f32 %v870_v56  ;;  %v871_v2 = vmul.f32 0.70710677, %v835_v1  ;;  %v863_v62 = vmul.f32 0.5, %v835_v1 }
 0x354   : > { %2013 = verf.f32 %v873_v60 }
 0x355   : > { %2015 = verf.f32 %v871_v2  ;;  %v1796_v4 = vpop.f32.mrb[4].mxu0 }
 0x356   : > { %v856_v55 = vadd.f32 %v1796_v4, %v780_v33  ;;  %v847_v10 = vpop.f32.mrb[5].mxu0 }
 0x357   : > { %v3171_v12 = vadd.f32 %v847_v10, %v780_v33  ;;  %v1797_v41 = vpop.f32.mrb[6].mxu0 }
 0x358   : > { %v876_v58 = vmul.f32 0.70710677, %v856_v55  ;;  %v859_v29 = vadd.f32 %v1797_v41, %v780_v33  ;;  %v850_v14 = vpop.f32.mrb[7].mxu0 }
 0x359   : > { %v874_v5 = vmul.f32 0.70710677, %v3171_v12  ;;  %v851_v17 = vadd.f32 %v850_v14, %v780_v33 }
 0x35a   : > { %2017 = verf.f32 %v876_v58  ;;  %v877_v15 = vmul.f32 0.70710677, %v859_v29 }
 0x35b   : > { %2019 = verf.f32 %v874_v5  ;;  %v875_v23 = vmul.f32 0.70710677, %v851_v17 }
 0x35c   : > { %v2010_v9 = vpop.eup %2009  ;;  %2021 = verf.f32 %v877_v15 }
 0x35d   : > { %v2012_v25 = vpop.eup %2011  ;;  %v888_v28 = vadd.f32 1.0, %v2010_v9  ;;  %2023 = verf.f32 %v875_v23  ;;  %v1814_v32 = vpop.f32.mrb[8].mxu0  ;;  %v868_v23 = vmul.f32 0.5, %v856_v55  ;;  %v869_v9 = vmul.f32 0.5, %v859_v29 }
 0x35e   : > { %v2014_v11 = vpop.eup %2013  ;;  %v3178_v31 = vadd.f32 %v1814_v32, %v3175_v20  ;;  %v1232_v34 = vpop.f32.mrb[9].mxu0  ;;  %v886_v40 = vadd.f32 1.0, %v2012_v25 }
 0x35f   : > { %v2016_v16 = vpop.eup %2015  ;;  %v889_v39 = vadd.f32 1.0, %v2014_v11  ;;  %v3181_v47 = vadd.f32 %v1232_v34, %v3175_v20  ;;  %v1815_v42 = vpop.f32.mrb[10].mxu0  ;;  %v896_v22 = vmul.f32 %v888_v28, %v864_v24  ;;  %v1976_v11 = vld [vmem:[#allocation14 + $0x18] sm:$0xff]   ;;  %v866_v34 = vmul.f32 0.5, %v3171_v12 }
 0x360   : > { %v1273_v26 = vmul.f32 0.70710677, %v3178_v31  ;;  %v3185_v48 = vadd.f32 %v1815_v42, %v3175_v20  ;;  %v1235_v6 = vpop.f32.mrb[11].mxu0  ;;  %v887_v49 = vadd.f32 1.0, %v2016_v16  ;;  %v894_v60 = vmul.f32 %v886_v40, %v862_v46 }
 0x361   : > { %v897_v33 = vmul.f32 %v889_v39, %v865_v38  ;;  %v1271_v50 = vmul.f32 0.70710677, %v3181_v47  ;;  %v3189_v52 = vadd.f32 %v1235_v6, %v3175_v20  ;;  %v867_v16 = vmul.f32 0.5, %v851_v17 }
 0x362   : > { %2025 = verf.f32 %v1273_v26  ;;  %v1274_v63 = vmul.f32 0.70710677, %v3185_v48  ;;  %v895_v2 = vmul.f32 %v887_v49, %v863_v62 }
 0x363   : > { %v903_v18 = vpack.c.bf16 %v897_v33, %v896_v22  ;;  %2027 = verf.f32 %v1271_v50  ;;  %v1272_v0 = vmul.f32 0.70710677, %v3189_v52 }
 0x364   : > { %v2018_v56 = vpop.eup %2017  ;;  %2029 = verf.f32 %v1274_v63  ;;  %v902_v1 = vpack.c.bf16 %v895_v2, %v894_v60  ;;  %v1263_v60 = vmul.f32 0.5, %v3181_v47  ;;  %v1264_v2 = vmul.f32 0.5, %v3189_v52 }
 0x365   : > { %v2020_v4 = vpop.eup %2019  ;;  %v892_v10 = vadd.f32 1.0, %v2018_v56  ;;  %2031 = verf.f32 %v1272_v0  ;;  %v1818_v41 = vpop.f32.mrb[12].mxu0 }
 0x366   : > { %v2022_v58 = vpop.eup %2021  ;;  %v890_v14 = vadd.f32 1.0, %v2020_v4  ;;  %v1257_v54 = vadd.f32 %v1818_v41, %v3175_v20  ;;  %v1248_v5 = vpop.f32.mrb[13].mxu0  ;;  %1802 = vmatprep.mubr.msk.bf16.mxu1 %vm922_vm2, %v902_v1 }
 0x367   : > { %v2024_v15 = vpop.eup %2023  ;;  %v893_v25 = vadd.f32 1.0, %v2022_v58  ;;  %v1249_v28 = vadd.f32 %v1248_v5, %v3175_v20  ;;  %v1819_v32 = vpop.f32.mrb[14].mxu0  ;;  %v900_v42 = vmul.f32 %v892_v10, %v868_v23  ;;  %1803 = vmatmul.mubr.msk.bf16.vlgmr.msra.gmra.mrb[0].mxu1 %vm922_vm2, %v903_v18 }
 0x368   : > { %v891_v24 = vadd.f32 1.0, %v2024_v15  ;;  %v1277_v38 = vmul.f32 0.70710677, %v1257_v54  ;;  %v1251_v39 = vpop.f32.mrb[15].mxu0  ;;  %v1260_v55 = vadd.f32 %v1819_v32, %v3175_v20  ;;  %v898_v29 = vmul.f32 %v890_v14, %v866_v34  ;;  %1821 = vmatpush3.bf16.msra.mxu1 %v3167_v44 }
 0x369   : > { %v901_v26 = vmul.f32 %v893_v25, %v869_v9  ;;  %v1275_v6 = vmul.f32 0.70710677, %v1249_v28  ;;  %v1252_v12 = vadd.f32 %v1251_v39, %v3175_v20  ;;  %1822 = vmatprep.subr.bf16.mxu1 %v1976_v11  ;;  %v1265_v44 = vmul.f32 0.5, %v3178_v31 }
 0x36a   : > { %v899_v40 = vmul.f32 %v891_v24, %v867_v16  ;;  %2033 = verf.f32 %v1277_v38  ;;  %v1278_v49 = vmul.f32 0.70710677, %v1260_v55  ;;  %v1266_v20 = vmul.f32 0.5, %v3185_v48 }
 0x36b   : > { %v905_v17 = vpack.c.bf16 %v901_v26, %v900_v42  ;;  %2035 = verf.f32 %v1275_v6  ;;  %v1276_v50 = vmul.f32 0.70710677, %v1252_v12  ;;  %v1269_v47 = vmul.f32 0.5, %v1257_v54 }
 0x36c   : > { %v2026_v22 = vpop.eup %2025  ;;  %v904_v33 = vpack.c.bf16 %v899_v40, %v898_v29  ;;  %2037 = verf.f32 %v1278_v49  ;;  %1823 = vmatpush3.bf16.msra.mxu1 %v1976_v11  ;;  %v1270_v32 = vmul.f32 0.5, %v1260_v55  ;;  %v1267_v11 = vmul.f32 0.5, %v1249_v28  ;;  %v613_v29 = vld [vmem:[#allocation16] sm:$0x3] }
 0x36d   : > { %v2028_v46 = vpop.eup %2027  ;;  %v1289_v62 = vadd.f32 1.0, %v2026_v22  ;;  %2039 = verf.f32 %v1276_v50  ;;  %v1268_v34 = vmul.f32 0.5, %v1252_v12  ;;  %v909_v54 = vrot.slane %v613_v29, %v3107_v36 }
 0x36e   : > { %v2030_v63 = vpop.eup %2029  ;;  %v1287_v18 = vadd.f32 1.0, %v2028_v46  ;;  %1806 = vmatprep.mubr.msk.bf16.mxu1 %vm922_vm2, %v904_v33 }
 0x36f   : > { %v2032_v0 = vpop.eup %2031  ;;  %v1290_v56 = vadd.f32 1.0, %v2030_v63  ;;  %v1297_v10 = vmul.f32 %v1289_v62, %v1265_v44  ;;  %1807 = vmatmul.mubr.msk.bf16.gmra.mrb[4].mxu1 %vm922_vm2, %v905_v17 }
 0x370   : > { %v1288_v4 = vadd.f32 1.0, %v2032_v0  ;;  %v1295_v58 = vmul.f32 %v1287_v18, %v1263_v60 }
 0x371   : > { %v1298_v41 = vmul.f32 %v1290_v56, %v1266_v20 }
 0x372   : > { %v1296_v14 = vmul.f32 %v1288_v4, %v1264_v2  ;;  %v3227_v2 = vrot.slane %v613_v29, %v3117_v57 }
 0x373   : > { %v1304_v1 = vpack.c.bf16 %v1298_v41, %v1297_v10 }
 0x374   : > { %v2034_v5 = vpop.eup %2033  ;;  %v1303_v15 = vpack.c.bf16 %v1296_v14, %v1295_v58 }
 0x375   : > { %v2036_v23 = vpop.eup %2035  ;;  %v1293_v9 = vadd.f32 1.0, %v2034_v5 }
 0x376   : > { %1824 = vmatprep.mubr.msk.bf16.mxu1 %vm922_vm2, %v1303_v15  ;;  %v2038_v31 = vpop.eup %2037  ;;  %v1291_v48 = vadd.f32 1.0, %v2036_v23 }
 0x377   : > { %v2040_v25 = vpop.eup %2039  ;;  %v1294_v52 = vadd.f32 1.0, %v2038_v31  ;;  %1825 = vmatmul.mubr.msk.bf16.vlgmr.msra.gmra.mrb[8].mxu1 %vm922_vm2, %v1304_v1  ;;  %v1301_v24 = vmul.f32 %v1293_v9, %v1269_v47 }
 0x378   : > { %v1292_v16 = vadd.f32 1.0, %v2040_v25  ;;  %v1299_v39 = vmul.f32 %v1291_v48, %v1267_v11 }
 0x379   : > { %v1302_v38 = vmul.f32 %v1294_v52, %v1270_v32 }
 0x37a   : > { %v1300_v42 = vmul.f32 %v1292_v16, %v1268_v34 }
 0x37b   : > { %v1306_v26 = vpack.c.bf16 %v1302_v38, %v1301_v24 }
 0x37c   : > { %v1305_v6 = vpack.c.bf16 %v1300_v42, %v1299_v39 }
 0x37e   : > { %1828 = vmatprep.mubr.msk.bf16.mxu1 %vm922_vm2, %v1305_v6 }
 0x37f   : > { %1829 = vmatmul.mubr.msk.bf16.gmra.mrb[12].mxu1 %vm922_vm2, %v1306_v26 }
 0x43a   : > { %v1804_v55 = vpop.f32.mrb[0].mxu1 }
 0x43b   : > { %v978_v28 = vadd.f32 %v1804_v55, %v909_v54  ;;  %v969_v40 = vpop.f32.mrb[1].mxu1 }
 0x43c   : > { %v970_v12 = vadd.f32 %v969_v40, %v909_v54  ;;  %v1805_v17 = vpop.f32.mrb[2].mxu1 }
 0x43d   : > { %v1002_v49 = vadd.f32 %v978_v28, %v2918_v7  ;;  %v981_v22 = vadd.f32 %v1805_v17, %v909_v54  ;;  %v972_v33 = vpop.f32.mrb[3].mxu1 }
 0x43e   : > { %v1000_v50 = vadd.f32 %v970_v12, %v2913_v3  ;;  %v973_v46 = vadd.f32 %v972_v33, %v909_v54 }
 0x43f   : > { %1010 = vst.msk [vmem:[%s596_s1 + $0x10] sm:$0xff] %vm643_vm0, %v1002_v49  ;;  %v1003_v62 = vadd.f32 %v981_v22, %v2927_v13 }
 0x440   : > { %1008 = vst.msk [vmem:[%s596_s1] sm:$0xff] %vm643_vm0, %v1000_v50  ;;  %v1001_v36 = vadd.f32 %v973_v46, %v2920_v8 }
 0x441   : > { %1011 = vst.msk [vmem:[%s596_s1 + $0x18] sm:$0xff] %vm643_vm0, %v1003_v62 }
 0x442   : > { %1009 = vst.msk [vmem:[%s596_s1 + $0x8] sm:$0xff] %vm643_vm0, %v1001_v36  ;;  %v1808_v7 = vpop.f32.mrb[4].mxu1 }
 0x443   : > { %v994_v63 = vadd.f32 %v1808_v7, %v909_v54  ;;  %v985_v18 = vpop.f32.mrb[5].mxu1 }
 0x444   : > { %v986_v0 = vadd.f32 %v985_v18, %v909_v54  ;;  %v1809_v3 = vpop.f32.mrb[6].mxu1 }
 0x445   : > { %v1006_v44 = vadd.f32 %v994_v63, %v2948_v27  ;;  %v997_v20 = vadd.f32 %v1809_v3, %v909_v54  ;;  %v988_v13 = vpop.f32.mrb[7].mxu1 }
 0x446   : > { %v1004_v56 = vadd.f32 %v986_v0, %v2936_v19  ;;  %v989_v8 = vadd.f32 %v988_v13, %v909_v54 }
 0x447   : > { %1014 = vst.msk [vmem:[%s596_s1 + $0x30] sm:$0xff] %vm643_vm0, %v1006_v44  ;;  %v1007_v60 = vadd.f32 %v997_v20, %v2953_v30 }
 0x448   : > { %1012 = vst.msk [vmem:[%s596_s1 + $0x20] sm:$0xff] %vm643_vm0, %v1004_v56  ;;  %v1005_v19 = vadd.f32 %v989_v8, %v2940_v21 }
 0x449   : > { %1015 = vst.msk [vmem:[%s596_s1 + $0x38] sm:$0xff] %vm643_vm0, %v1007_v60 }
 0x44a   : > { %1013 = vst.msk [vmem:[%s596_s1 + $0x28] sm:$0xff] %vm643_vm0, %v1005_v19  ;;  %v1826_v27 = vpop.f32.mrb[8].mxu1 }
 0x44b   : > { %v1378_v30 = vadd.f32 %v1826_v27, %v3227_v2  ;;  %v1369_v57 = vpop.f32.mrb[9].mxu1 }
 0x44c   : > { %2314 = shalt.err (!%p2311_p10)
}
 0x44d   : > { %s2315_s7 = scalar_lea.hbm %s3234_s10, 1024  ;;  %s2319_s22 = scalar_lea.hbm %s3437_s5, 2048 }
 0x44e   : > { %p2316_p4 = scmp.ne.s32.totalorder %s3234_s10, %s2315_s7  ;;  %p2320_p9 = scmp.lt.u32.totalorder %s3234_s10, %s3437_s5 }
 0x44f   : > { %p2321_p1 = scmp.lt.u32.totalorder %s2319_s22, %s2315_s7  ;;  %p2323_p8 = scmp.lt.u32.totalorder %s2315_s7, %s3234_s10 }
 0x450   : > { %p2317_p7 = pnand %p2316_p4, %p3438_p0 }
 0x451   : > { %p2322_p3 = por %p2321_p1, %p2320_p9 }
 0x452   : > { %p2318_p11 = pneg %p2317_p7 }
 0x453   : > { %p2324_p6 = por %p2323_p8, %p2322_p3 }
 0x455   : > { %p2325_p5 = pnand %p2324_p6, %p2318_p11 }
 0x457   : > { %2328 = shalt.err (!%p2325_p5)
}
 0x458   : > { %s2451_s17 = smov 128   ;;  %s2452_s1 = smov 8   ;;  %v1370_v21 = vadd.f32 %v1369_v57, %v3227_v2  ;;  %v1827_v4 = vpop.f32.mrb[10].mxu1  ;;  %v1402_v10 = vadd.f32 %v1378_v30, %v2972_v43 }
 0x459   : > { %1862 = dma.vmem_to_hbm [thread:$0]  (%p3438_p0), %s3236_s19, 1024, %s3234_s10, %s1417_s11, %s2451_s17, %s2451_s17, %s2452_s1   ;;  %v1381_v41 = vadd.f32 %v1827_v4, %v3227_v2  ;;  %v1372_v58 = vpop.f32.mrb[11].mxu1 }
 0x45a   : > { %v1400_v14 = vadd.f32 %v1370_v21, %v2960_v35  ;;  %v1373_v1 = vadd.f32 %v1372_v58, %v3227_v2  ;;  %s603_s16 = scalar_lea.vmem [#allocation18], %s2870_s25  ;;  %v1830_v43 = vpop.f32.mrb[12].mxu1  ;;  %s3439_s10 = sld [smem:[#allocation42_spill]] }
 0x45b   : > { %1410 = vst.msk [vmem:[%s603_s16 + $0x10] sm:$0xff] %vm643_vm0, %v1402_v10  ;;  %v1403_v5 = vadd.f32 %v1381_v41, %v2976_v45  ;;  %v1394_v23 = vadd.f32 %v1830_v43, %v3227_v2  ;;  %v1385_v35 = vpop.f32.mrb[13].mxu1  ;;  %s1455_s25 = sshll.u32 %s603_s16, 4  ;;  %s1422_s30 = scalar_lea.sflag [#allocation19], %s2867_s28  ;;  %s3299_s25 = int_to_ptr.vmem [resolvable:$true] %s1455_s25 }
 0x45c   : > { %1408 = vst.msk [vmem:[%s603_s16] sm:$0xff] %vm643_vm0, %v1400_v14  ;;  %v1401_v15 = vadd.f32 %v1373_v1, %v2964_v37  ;;  %v1386_v9 = vadd.f32 %v1385_v35, %v3227_v2  ;;  %v1831_v31 = vpop.f32.mrb[14].mxu1  ;;  %s2329_s4 = scalar_lea.vmem %s3299_s25, 1024  ;;  %s2453_s24 = smov [#allocation18]  }
 0x45d   : > { %1411 = vst.msk [vmem:[%s603_s16 + $0x18] sm:$0xff] %vm643_vm0, %v1403_v5  ;;  %v1406_v48 = vadd.f32 %v1394_v23, %v2996_v59  ;;  %v1397_v45 = vadd.f32 %v1831_v31, %v3227_v2  ;;  %v1388_v25 = vpop.f32.mrb[15].mxu1  ;;  %p2330_p12 = scmp.ne.s32.totalorder %s3299_s25, %s2329_s4  ;;  %s2333_s29 = sshll.u32 %s2453_s24, 4  ;;  %s2334_s29 = int_to_ptr.vmem [resolvable:$false] %s2333_s29 }
 0x45e   : > { %1409 = vst.msk [vmem:[%s603_s16 + $0x8] sm:$0xff] %vm643_vm0, %v1401_v15  ;;  %v1404_v37 = vadd.f32 %v1386_v9, %v2984_v51  ;;  %v1389_v47 = vadd.f32 %v1388_v25, %v3227_v2  ;;  %p2336_p10 = scmp.lt.s32.totalorder %s3299_s25, %s2334_s29 }
 0x45f   : > { %1414 = vst.msk [vmem:[%s603_s16 + $0x30] sm:$0xff] %vm643_vm0, %v1406_v48  ;;  %v1407_v32 = vadd.f32 %v1397_v45, %v3000_v61  ;;  %p2331_p2 = pnand %p2330_p12, %p3438_p0 }
 0x460   : > { %1412 = vst.msk [vmem:[%s603_s16 + $0x20] sm:$0xff] %vm643_vm0, %v1404_v37  ;;  %v1405_v52 = vadd.f32 %v1389_v47, %v2988_v53  ;;  %s3297_s11 = scalar_lea.hbm %s3439_s10, %s1764_s26  ;;  %s2335_s26 = scalar_lea.vmem %s2334_s29, 2048 }
 0x461   : > { %1415 = vst.msk [vmem:[%s603_s16 + $0x38] sm:$0xff] %vm643_vm0, %v1407_v32  ;;  %p2332_p13 = pneg %p2331_p2  ;;  %p2337_p4 = scmp.lt.s32.totalorder %s2335_s26, %s2329_s4 }
 0x462   : > { %1413 = vst.msk [vmem:[%s603_s16 + $0x28] sm:$0xff] %vm643_vm0, %v1405_v52 }
 0x463   : > { %p2338_p7 = por %p2337_p4, %p2336_p10 }
 0x465   : > { %p2339_p11 = pnand %p2338_p7, %p2332_p13 }
 0x467   : > { %2342 = shalt.err (!%p2339_p11)
}
 0x468   : > { %s2343_s20 = scalar_lea.hbm %s3297_s11, 1024  ;;  %s2347_s13 = scalar_lea.hbm %s3439_s10, 2048 }
 0x469   : > { %p2344_p9 = scmp.ne.s32.totalorder %s3297_s11, %s2343_s20  ;;  %p2348_p8 = scmp.lt.u32.totalorder %s3297_s11, %s3439_s10 }
 0x46a   : > { %p2349_p6 = scmp.lt.u32.totalorder %s2347_s13, %s2343_s20  ;;  %p2351_p12 = scmp.lt.u32.totalorder %s2343_s20, %s3297_s11 }
 0x46b   : > { %p2345_p1 = pnand %p2344_p9, %p3438_p0 }
 0x46c   : > { %p2350_p5 = por %p2349_p6, %p2348_p8 }
 0x46d   : > { %p2346_p3 = pneg %p2345_p1 }
 0x46e   : > { %p2352_p2 = por %p2351_p12, %p2350_p5 }
 0x470   : > { %p2353_p13 = pnand %p2352_p2, %p2346_p3 }
 0x472   : > { %2356 = shalt.err (!%p2353_p13)
}
 0x473   : > { %1863 = dma.vmem_to_hbm [thread:$0]  (%p3438_p0), %s3299_s25, 1024, %s3297_s11, %s1422_s30, %s2451_s17, %s2451_s17, %s2452_s1  }
 0x474 PF: > { %s3440_s27 = sld [smem:[#allocation28_spill]]  ;;  %s3441_s16 = sld [smem:[#allocation33_spill]] }
 0x475   : > { %p3443_p4 = scmp.ge.s32.totalorder %s2435_s18, 2 }
 0x47a   : > { %s1470_s19 = sand.u32 1, %s3440_s27   ;;  %p3442_p10 = scmp.ne.s32.totalorder %s3441_s16, 0 }
 0x47b   : > { %s1471_s9 = scalar_lea.sflag [#allocation4], %s1470_s19 }
 0x47c   : > { %p1896_p7 = pnand %p3443_p4, %p3442_p10 }
 0x47e   : > { %2406 = dma.done.wait (!%p1896_p7), %s1471_s9, 1024  }
 0x47f   : > { %2408 = vsyncadd (!%p1896_p7), %s1471_s9, 4294966272  ;;  %s1480_s21 = scalar_lea.sflag [#allocation19], %s1470_s19 }
 0x480   : > { %2410 = dma.done.wait (!%p1896_p7), %s1480_s21, 1024  }
 0x481   : > { %2412 = vsyncadd (!%p1896_p7), %s1480_s21, 4294966272  ;;  %s38_s18 = sadd.s32 1, %s2435_s18   ;;  %s3444_s28 = sld [smem:[#allocation36_spill]] }
 0x482   : > { %p35_p11 = scmp.ge.s32.totalorder %s38_s18, 4   ;;  %s3445_s16 = sld [smem:[#allocation30_spill]] }
 0x483   : > { %s3446_s17 = sld [smem:[#allocation35_spill]]  ;;  %s3447_s13 = smov %s2419_s14 }
 0x484   : > { %s3448_s14 = smov %s2423_s15  ;;  %37 = sbr.rel (!%p35_p11) target bundleno = 21 (0x15), region = 177 }
 0x487   : > { %s3449_s15 = smov %s3444_s28 }
 0x48b   :  { %1485 = vsyncpa [#allocation3], 1 }
 0x48c   :  { %1487 = vsyncpa [#allocation3 + $0x1], 1 }
 0x48d   :  { %1488 = vsyncpa [#allocation6], 1 }
 0x48e   :  { %1490 = vsyncpa [#allocation6 + $0x1], 1 }
 0x48f   :  { %1491 = vsyncpa [#allocation9], 1 }
 0x490   :  { %1493 = vsyncpa [#allocation9 + $0x1], 1 }
 0x491   :  { %1494 = vsyncpa [#allocation12], 1 }
 0x492   :  { %1495 = vsyncpa [#allocation15], 1 }
 0x493   :  { %1496 = vsyncpa [#allocation4], 1 }
 0x494   :  { %1498 = vsyncpa [#allocation4 + $0x1], 1 }
 0x495   :  { %1499 = vsyncpa [#allocation19], 1 }
 0x496   :  { %1501 = vsyncpa [#allocation19 + $0x1], 1 }

// kernel: swin_block_forward.4
= control target key start
LH: loop header
LB: loop body
LE: loop exit
PB: predicated region body
PF: predicated region fallthrough
CT: control target
= control target key end

     0   :  { %s11421_s0 = inlined_call_operand.hbm [shape: bf16[128,8], index: 0, kind: input, shape index: {}]   ;;  %s11422_s1 = inlined_call_operand.hbm [shape: bf16[128,8], index: 1, kind: input, shape index: {}]   ;;  %s11423_s2 = inlined_call_operand.hbm [shape: bf16[128,8], index: 2, kind: input, shape index: {}]   ;;  %s11424_s3 = inlined_call_operand.hbm [shape: bf16[128,8], index: 3, kind: input, shape index: {}]   ;;  %s11425_s4 = inlined_call_operand.hbm [shape: bf16[2,8,8], index: 4, kind: input, shape index: {}]   ;;  %s11426_s5 = inlined_call_operand.hbm [shape: bf16[2,8,16], index: 5, kind: input, shape index: {}]   ;;  %s11427_s6 = inlined_call_operand.hbm [shape: bf16[2,16,8], index: 6, kind: input, shape index: {}]   ;;  %s11428_s7 = inlined_call_operand.hbm [shape: f32[2,32], index: 7, kind: input, shape index: {}]   ;;  %s11429_s8 = inlined_call_operand.hbm [shape: f32[2,8,8], index: 8, kind: input, shape index: {}]   ;;  %s11430_s9 = inlined_call_operand.hbm [shape: f32[128,8], index: 9, kind: output, shape index: {0}]   ;;  %s11431_s10 = inlined_call_operand.hbm [shape: f32[128,8], index: 10, kind: output, shape index: {1}]  }
   0x1   :  { %11474 = sst [smem:[#allocation53_spill]] %s11422_s1 }
   0x2   :  { %11475 = sst [smem:[#allocation54_spill]] %s11425_s4 }
   0x3   :  { %11476 = sst [smem:[#allocation55_spill]] %s11426_s5 }
   0x4   :  { %11477 = sst [smem:[#allocation56_spill]] %s11428_s7 }
   0x5   :  { %11478 = sst [smem:[#allocation57_spill]] %s11430_s9 }
   0x6   :  { %11479 = sst [smem:[#allocation58_spill]] %s11431_s10 }
   0x7   :  { %16 = vsyncpa [#allocation3], 0 }
   0x8   :  { %18 = vsyncpa [#allocation3 + $0x1], 0 }
   0x9   :  { %19 = vsyncpa [#allocation6], 0 }
   0xa   :  { %21 = vsyncpa [#allocation6 + $0x1], 0 }
   0xb   :  { %22 = vsyncpa [#allocation9], 0 }
   0xc   :  { %24 = vsyncpa [#allocation9 + $0x1], 0 }
   0xd   :  { %25 = vsyncpa [#allocation12], 0 }
   0xe   :  { %26 = vsyncpa [#allocation15], 0 }
   0xf   :  { %27 = vsyncpa [#allocation4], 0 }
  0x10   :  { %29 = vsyncpa [#allocation4 + $0x1], 0 }
  0x11   :  { %30 = vsyncpa [#allocation19], 0 }
  0x12   :  { %32 = vsyncpa [#allocation19 + $0x1], 0  ;;  %s9241_s13 = smov 0   ;;  %s9243_s14 = smov 0  }
  0x13   :  { %s9245_s15 = smov 0   ;;  %s9247_s16 = smov 0  }
  0x14 LB: > { %11480 = sst [smem:[#allocation28_spill]] %s9148_s13  ;;  %s9262_s17 = sadd.s32 4294967295, %s9160_s16   ;;  %s9160_s16 = sphi %s9247_s16, %s11562_s16   ;;  %s9156_s15 = sphi %s9245_s15, %s11566_s15   ;;  %s9152_s14 = sphi %s9243_s14, %s11565_s14   ;;  %s9148_s13 = sphi %s9241_s13, %s11564_s13  }
  0x15   : > { %11481 = sst [smem:[#allocation29_spill]] %s9262_s17  ;;  %s7259_s18 = sadd.s32 4294967294, %s9160_s16  }
  0x16   : > { %p58_p0 = scmp.ne.s32.totalorder %s9152_s14, %s9148_s13  ;;  %p11432_p1 = scmp.eq.s32.totalorder %s9262_s17, 0 }
  0x17   : > { %p271_p3 = scmp.eq.s32.totalorder %s7259_s18, 1  ;;  %p7260_p5 = scmp.ge.s32.totalorder %s9160_s16, 1 }
  0x18   : > { %p9271_p4 = por %p11432_p1, %p58_p0  ;;  %p304_p7 = scmp.lt.s32.totalorder %s9160_s16, 3 }
  0x19   : > { %p9276_p6 = por %p271_p3, %p58_p0  ;;  %s9162_s22 = smov [#allocation10]  }
  0x1a   : > { %s11482_s19 = scalar_select %p9271_p4, 1, 0 }
  0x1b   : > { %s11483_s20 = scalar_select %p9276_p6, 1, 0 }
  0x1c   : > { %p9281_p8 = pnand %p7260_p5, %p304_p7  ;;  %s316_s23 = sshll.u32 %s9162_s22, 4  ;;  %s9285_s23 = int_to_ptr.vmem [resolvable:$true] %s316_s23 }
  0x1d   : > { %11484 = sst [smem:[#allocation30_spill]] %s11483_s20  ;;  %s9163_s25 = smov [#allocation11]  }
  0x1e   : > { %s11485_s21 = scalar_select %p9281_p8, 1, 0 }
  0x1f   : > { %p8417_p9 = pneg %p9281_p8  ;;  %s329_s26 = sshll.u32 %s9163_s25, 4  ;;  %s9296_s26 = int_to_ptr.vmem [resolvable:$true] %s329_s26 }
  0x20   : > { %s9164_s27 = smov [#allocation14]   ;;  %s11487_s4 = sld [smem:[#allocation54_spill]] }
  0x21   : > { %p9292_p11 = pnand %p8417_p9, %p11432_p1  ;;  %s9298_s28 = sshll.u32 %s9164_s27, 4  ;;  %s357_s28 = int_to_ptr.vmem [resolvable:$true] %s9298_s28 }
  0x23   : > { %s11486_s24 = scalar_select %p9292_p11, 1, 0 }
  0x24   : > { %p9308_p13 = pneg %p9292_p11 }
  0x26   : > { %s8782_s11 = scalar_lea.hbm %s11487_s4, 128 }
  0x27   : > { %p8783_p12 = scmp.ne.s32.totalorder %s11487_s4, %s8782_s11  ;;  %p8789_p5 = scmp.lt.u32.totalorder %s8782_s11, %s11487_s4 }
  0x28   : > { %s11488_s22 = scalar_select %p9308_p13, 1, 0 }
  0x29   : > { %p8785_p0 = pnand %p9308_p13, %p8783_p12 }
  0x2b   : > { %p8786_p3 = pneg %p8785_p0 }
  0x2d   : > { %p8791_p7 = pnand %p8789_p5, %p8786_p3 }
  0x2f   : > { %8794 = shalt.err (!%p8791_p7)
}
  0x30   : > { %s8795_s29 = scalar_lea.vmem %s9285_s23, 128  ;;  %p8803_p2 = scmp.lt.s32.totalorder %s9285_s23, %s9285_s23 }
  0x31   : > { %p8796_p9 = scmp.ne.s32.totalorder %s9285_s23, %s8795_s29  ;;  %p8804_p6 = scmp.lt.s32.totalorder %s8795_s29, %s8795_s29 }
  0x33   : > { %p8798_p10 = pnand %p8796_p9, %p9308_p13  ;;  %p8805_p12 = por %p8804_p6, %p8803_p2 }
  0x35   : > { %p8799_p1 = pneg %p8798_p10 }
  0x37   : > { %p8806_p0 = pnand %p8805_p12, %p8799_p1 }
  0x39   : > { %8809 = shalt.err (!%p8806_p0)
}
  0x3a   : > { %s11439_s30 = smov 64   ;;  %s11442_s11 = smov 4  }
  0x3b   : > { %8420 = dma.hbm_to_vmem [thread:$0]  (!%p9292_p11), %s11487_s4, 128, %s9285_s23, [#allocation9], %s11439_s30, %s11439_s30, %s11442_s11  }
  0x3c   : > { %s11489_s5 = sld [smem:[#allocation55_spill]] }
  0x42   : > { %s8810_s29 = scalar_lea.hbm %s11489_s5, 128 }
  0x43   : > { %p8811_p1 = scmp.ne.s32.totalorder %s11489_s5, %s8810_s29  ;;  %p8817_p10 = scmp.lt.u32.totalorder %s8810_s29, %s11489_s5 }
  0x45   : > { %p8813_p2 = pnand %p8811_p1, %p9308_p13 }
  0x47   : > { %p8814_p6 = pneg %p8813_p2 }
  0x49   : > { %p8819_p3 = pnand %p8817_p10, %p8814_p6 }
  0x4b   : > { %8822 = shalt.err (!%p8819_p3)
}
  0x4c   : > { %s8823_s23 = scalar_lea.vmem %s9296_s26, 128  ;;  %p8831_p12 = scmp.lt.s32.totalorder %s9296_s26, %s9296_s26 }
  0x4d   : > { %p8824_p5 = scmp.ne.s32.totalorder %s9296_s26, %s8823_s23  ;;  %p8832_p0 = scmp.lt.s32.totalorder %s8823_s23, %s8823_s23 }
  0x4f   : > { %p8826_p7 = pnand %p8824_p5, %p9308_p13  ;;  %p8833_p1 = por %p8832_p0, %p8831_p12 }
  0x51   : > { %p8827_p9 = pneg %p8826_p7 }
  0x53   : > { %p8834_p2 = pnand %p8833_p1, %p8827_p9 }
  0x55   : > { %8837 = shalt.err (!%p8834_p2)
}
  0x56   : > { %8423 = dma.hbm_to_vmem [thread:$0]  (!%p9292_p11), %s11489_s5, 128, %s9296_s26, [#allocation12], %s11439_s30, %s11439_s30, %s11442_s11  }
  0x57   : > { %s11490_s7 = sld [smem:[#allocation56_spill]] }
  0x5d   : > { %s8838_s12 = scalar_lea.hbm %s11490_s7, 32 }
  0x5e   : > { %p8839_p6 = scmp.ne.s32.totalorder %s11490_s7, %s8838_s12  ;;  %p8845_p5 = scmp.lt.u32.totalorder %s8838_s12, %s11490_s7 }
  0x60   : > { %p8841_p10 = pnand %p8839_p6, %p9308_p13 }
  0x62   : > { %p8842_p3 = pneg %p8841_p10 }
  0x64   : > { %p8847_p7 = pnand %p8845_p5, %p8842_p3 }
  0x66   : > { %8850 = shalt.err (!%p8847_p7)
}
  0x67   : > { %s8851_s23 = scalar_lea.vmem %s357_s28, 32  ;;  %p8859_p1 = scmp.lt.s32.totalorder %s357_s28, %s357_s28 }
  0x68   : > { %p8852_p9 = scmp.ne.s32.totalorder %s357_s28, %s8851_s23  ;;  %p8860_p2 = scmp.lt.s32.totalorder %s8851_s23, %s8851_s23 }
  0x6a   : > { %p8854_p12 = pnand %p8852_p9, %p9308_p13  ;;  %p8861_p4 = por %p8860_p2, %p8859_p1 }
  0x6c   : > { %p8855_p0 = pneg %p8854_p12 }
  0x6e   : > { %p8862_p8 = pnand %p8861_p4, %p8855_p0 }
  0x70   : > { %8865 = shalt.err (!%p8862_p8)
}
  0x71   : > { %8429 = dma.hbm_to_vmem [thread:$0]  (!%p9292_p11), %s11490_s7, 32, %s357_s28, [#allocation15]  }
  0x72   : > { %s9378_s10 = sadd.s32 1, %s9160_s16   ;;  %s45_s20 = sadd.s32 1, %s9156_s15 }
  0x73   : > { %11491 = sst [smem:[#allocation31_spill]] %s9378_s10  ;;  %s42_s13 = ssub.s32 %s9160_s16, %s9378_s10 }
  0x74   : > { %p43_p4 = scmp.eq.s32.totalorder %s42_s13, 0  ;;  %p52_p8 = scmp.ne.s32.totalorder %s9156_s15, %s9152_s14 }
  0x75   : > { %p53_p6 = scmp.eq.s32.totalorder %s9160_s16, 0  ;;  %p8458_p10 = scmp.lt.s32.totalorder %s9160_s16, 2 }
  0x76   : > { %s9388_s12 = scalar_select %p43_p4, %s9156_s15, %s45_s20  }
  0x77   : > { %p54_p3 = por %p53_p6, %p52_p8  ;;  %p11493_p5 = scmp.eq.s32.totalorder %s9262_s17, 1 }
  0x78   : > { %11492 = sst [smem:[#allocation32_spill]] %s9388_s12  ;;  %s11441_s25 = sand.u32 1, %s9156_s15  }
  0x79   : > { %p9392_p7 = por %p11493_p5, %p52_p8  ;;  %s9398_s28 = sshll.u32 %s9160_s16, 9 }
  0x7a   : > { %s9402_s27 = sshll.u32 %s11441_s25, 5  ;;  %p9404_p9 = pnand %p8458_p10, %p54_p3 }
  0x7b   : > { %s11494_s18 = scalar_select %p9392_p7, 1, 0 }
  0x7c   : > { %s11496_s29 = scalar_select %p9404_p9, 1, 0 }
  0x7d   : > { %11495 = sst [smem:[#allocation33_spill]] %s11494_s18  ;;  %s11444_s23 = sand.u32 1, %s9160_s16  }
  0x7e   : > { %s11497_s1 = sld [smem:[#allocation53_spill]]  ;;  %s405_s20 = scalar_lea.vmem [#allocation5], %s9402_s27 }
  0x7f   : > { %s412_s30 = sshll.u32 %s405_s20, 4  ;;  %s9420_s25 = scalar_lea.sflag [#allocation6], %s11444_s23  ;;  %s9416_s30 = int_to_ptr.vmem [resolvable:$true] %s412_s30 }
  0x80   : > { %p9426_p0 = pneg %p9404_p9 }
  0x84   : > { %s9413_s13 = scalar_lea.hbm %s11497_s1, %s9398_s28  ;;  %s8871_s20 = scalar_lea.hbm %s11497_s1, 1024 }
  0x85   : > { %s8866_s11 = scalar_lea.hbm %s9413_s13, 512  ;;  %p8872_p4 = scmp.lt.u32.totalorder %s9413_s13, %s11497_s1 }
  0x86   : > { %p8867_p12 = scmp.ne.s32.totalorder %s9413_s13, %s8866_s11  ;;  %p8873_p8 = scmp.lt.u32.totalorder %s8871_s20, %s8866_s11 }
  0x87   : > { %p8875_p10 = scmp.lt.u32.totalorder %s8866_s11, %s9413_s13 }
  0x88   : > { %p8869_p1 = pnand %p9426_p0, %p8867_p12  ;;  %p8874_p6 = por %p8873_p8, %p8872_p4 }
  0x8a   : > { %p8870_p2 = pneg %p8869_p1  ;;  %p8876_p3 = por %p8875_p10, %p8874_p6 }
  0x8c   : > { %p8877_p5 = pnand %p8876_p3, %p8870_p2 }
  0x8e   : > { %8880 = shalt.err (!%p8877_p5)
}
  0x8f   : > { %s8881_s23 = scalar_lea.vmem %s9416_s30, 512  ;;  %s9167_s26 = smov [#allocation5]  }
  0x90   : > { %p8882_p12 = scmp.ne.s32.totalorder %s9416_s30, %s8881_s23  ;;  %s8886_s9 = sshll.u32 %s9167_s26, 4  ;;  %s8887_s9 = int_to_ptr.vmem [resolvable:$false] %s8886_s9 }
  0x91   : > { %s8888_s5 = scalar_lea.vmem %s8887_s9, 1024  ;;  %p8889_p11 = scmp.lt.s32.totalorder %s9416_s30, %s8887_s9 }
  0x92   : > { %p8884_p1 = pnand %p8882_p12, %p9426_p0  ;;  %p8890_p13 = scmp.lt.s32.totalorder %s8888_s5, %s8881_s23 }
  0x94   : > { %p8885_p7 = pneg %p8884_p1  ;;  %p8891_p4 = por %p8890_p13, %p8889_p11 }
  0x96   : > { %p8892_p8 = pnand %p8891_p4, %p8885_p7 }
  0x98   : > { %8895 = shalt.err (!%p8892_p8)
}
  0x99   : > { %s11499_s7 = smov 4   ;;  %s11500_s11 = smov 64  }
  0x9a   : > { %8439 = dma.hbm_to_vmem [thread:$0]  (!%p9404_p9), %s9413_s13, 512, %s9416_s30, %s9420_s25, %s11500_s11, %s11500_s11, %s11499_s7  }
  0x9b   : > { %s9168_s20 = smov [#allocation13]   ;;  %s9169_s26 = smov [#allocation16]  }
  0x9c   : > { %s342_s1 = sshll.u32 %s9168_s20, 4  ;;  %s366_s12 = sshll.u32 %s9169_s26, 4  ;;  %s343_s1 = int_to_ptr.vmem [resolvable:$true] %s342_s1  ;;  %s9453_s12 = int_to_ptr.vmem [resolvable:$true] %s366_s12 }
  0x9d   : > { %s8896_s5 = scalar_lea.hbm %s11427_s6, 256  ;;  %p11501_p13 = scmp.ne.s32.totalorder %s11488_s22, 0 }
  0x9e   : > { %p8897_p11 = scmp.ne.s32.totalorder %s11427_s6, %s8896_s5  ;;  %p8903_p6 = scmp.lt.u32.totalorder %s8896_s5, %s11427_s6 }
  0xa0   : > { %p8899_p7 = pnand %p8897_p11, %p11501_p13 }
  0xa2   : > { %p8900_p2 = pneg %p8899_p7 }
  0xa4   : > { %p8905_p10 = pnand %p8903_p6, %p8900_p2 }
  0xa6   : > { %8908 = shalt.err (!%p8905_p10)
}
  0xa7   : > { %s8909_s13 = scalar_lea.vmem %s343_s1, 256  ;;  %p8917_p1 = scmp.lt.s32.totalorder %s343_s1, %s343_s1 }
  0xa8   : > { %p8910_p3 = scmp.ne.s32.totalorder %s343_s1, %s8909_s13  ;;  %p8918_p4 = scmp.lt.s32.totalorder %s8909_s13, %s8909_s13 }
  0xaa   : > { %p8912_p5 = pnand %p8910_p3, %p11501_p13  ;;  %p8919_p8 = por %p8918_p4, %p8917_p1 }
  0xac   : > { %p8913_p12 = pneg %p8912_p5 }
  0xae   : > { %p8920_p9 = pnand %p8919_p8, %p8913_p12 }
  0xb0   : > { %8923 = shalt.err (!%p8920_p9)
}
  0xb1   : > { %p11502_p11 = scmp.ne.s32.totalorder %s11486_s24, 0  ;;  %s8924_s26 = scalar_lea.hbm %s11429_s8, 256 }
  0xb2   : > { %p8925_p7 = scmp.ne.s32.totalorder %s11429_s8, %s8924_s26  ;;  %p8931_p6 = scmp.lt.u32.totalorder %s8924_s26, %s11429_s8 }
  0xb3   : > { %8426 = dma.hbm_to_vmem [thread:$0]  (!%p11502_p11), %s11427_s6, 256, %s343_s1, [#allocation12], %s11500_s11, %s11500_s11, %s11499_s7  }
  0xb4   : > { %p8927_p9 = pnand %p8925_p7, %p11501_p13 }
  0xb6   : > { %p8928_p2 = pneg %p8927_p9 }
  0xb8   : > { %p8933_p10 = pnand %p8931_p6, %p8928_p2 }
  0xba   : > { %8936 = shalt.err (!%p8933_p10)
}
  0xbb   : > { %s8937_s1 = scalar_lea.vmem %s9453_s12, 256  ;;  %p8945_p1 = scmp.lt.s32.totalorder %s9453_s12, %s9453_s12 }
  0xbc   : > { %p8938_p3 = scmp.ne.s32.totalorder %s9453_s12, %s8937_s1  ;;  %p8946_p4 = scmp.lt.s32.totalorder %s8937_s1, %s8937_s1 }
  0xbe   : > { %p8940_p5 = pnand %p8938_p3, %p11501_p13  ;;  %p8947_p8 = por %p8946_p4, %p8945_p1 }
  0xc0   : > { %p8941_p12 = pneg %p8940_p5 }
  0xc2   : > { %p8948_p7 = pnand %p8947_p8, %p8941_p12 }
  0xc4   : > { %8951 = shalt.err (!%p8948_p7)
}
  0xc5   : > { %s9170_s13 = smov 128   ;;  %s9171_s17 = smov 8  }
  0xc6   : > { %8432 = dma.hbm_to_vmem [thread:$0]  (!%p11502_p11), %s11429_s8, 256, %s9453_s12, [#allocation15], %s9170_s13, %s9170_s13, %s9171_s17  }
  0xc7   : > { %s9503_s26 = scalar_lea.hbm %s11421_s0, %s9398_s28  ;;  %s384_s23 = scalar_lea.vmem [#allocation2], %s9402_s27 }
  0xc8   : > { %s391_s9 = sshll.u32 %s384_s23, 4  ;;  %s11503_s5 = sand.u32 1, %s9156_s15   ;;  %s9506_s9 = int_to_ptr.vmem [resolvable:$true] %s391_s9 }
  0xc9   : > { %s9510_s30 = scalar_lea.sflag [#allocation3], %s11503_s5  ;;  %s8952_s24 = scalar_lea.hbm %s9503_s26, 512 }
  0xca   : > { %p8953_p13 = scmp.ne.s32.totalorder %s9503_s26, %s8952_s24  ;;  %s8957_s13 = scalar_lea.hbm %s11421_s0, 1024 }
  0xcb   : > { %p8958_p2 = scmp.lt.u32.totalorder %s9503_s26, %s11421_s0  ;;  %p8959_p6 = scmp.lt.u32.totalorder %s8957_s13, %s8952_s24 }
  0xcc   : > { %p8955_p11 = pnand %p8953_p13, %p9426_p0  ;;  %p8961_p3 = scmp.lt.u32.totalorder %s8952_s24, %s9503_s26 }
  0xcd   : > { %p8960_p10 = por %p8959_p6, %p8958_p2 }
  0xce   : > { %p8956_p9 = pneg %p8955_p11 }
  0xcf   : > { %p8962_p5 = por %p8961_p3, %p8960_p10 }
  0xd1   : > { %p8963_p12 = pnand %p8962_p5, %p8956_p9 }
  0xd3   : > { %8966 = shalt.err (!%p8963_p12)
}
  0xd4   : > { %s8967_s18 = scalar_lea.vmem %s9506_s9, 512  ;;  %s9172_s22 = smov [#allocation2]  }
  0xd5   : > { %p8968_p1 = scmp.ne.s32.totalorder %s9506_s9, %s8967_s18  ;;  %s8972_s20 = sshll.u32 %s9172_s22, 4  ;;  %s8973_s20 = int_to_ptr.vmem [resolvable:$false] %s8972_s20 }
  0xd6   : > { %s8974_s23 = scalar_lea.vmem %s8973_s20, 1024  ;;  %p8975_p7 = scmp.lt.s32.totalorder %s9506_s9, %s8973_s20 }
  0xd7   : > { %p8970_p4 = pnand %p8968_p1, %p9426_p0  ;;  %p8976_p13 = scmp.lt.s32.totalorder %s8974_s23, %s8967_s18 }
  0xd9   : > { %p8971_p8 = pneg %p8970_p4  ;;  %p8977_p11 = por %p8976_p13, %p8975_p7 }
  0xdb   : > { %p8978_p2 = pnand %p8977_p11, %p8971_p8 }
  0xdd   : > { %8981 = shalt.err (!%p8978_p2)
}
  0xde   : > { %p11504_p9 = scmp.ne.s32.totalorder %s11496_s29, 0  ;;  %s9541_s12 = scalar_lea.hbm %s11423_s2, %s9398_s28 }
  0xdf   : > { %s426_s1 = scalar_lea.vmem [#allocation7], %s9402_s27  ;;  %s8982_s17 = scalar_lea.hbm %s9541_s12, 512 }
  0xe0   : > { %8436 = dma.hbm_to_vmem [thread:$0]  (!%p11504_p9), %s9503_s26, 512, %s9506_s9, %s9510_s30, %s11500_s11, %s11500_s11, %s11499_s7  }
  0xe1   : > { %s433_s13 = sshll.u32 %s426_s1, 4  ;;  %p8983_p6 = scmp.ne.s32.totalorder %s9541_s12, %s8982_s17  ;;  %s9544_s13 = int_to_ptr.vmem [resolvable:$true] %s433_s13 }
  0xe2   : > { %s8987_s9 = scalar_lea.hbm %s11423_s2, 1024  ;;  %p8988_p5 = scmp.lt.u32.totalorder %s9541_s12, %s11423_s2 }
  0xe3   : > { %p8985_p10 = pnand %p8983_p6, %p9426_p0  ;;  %p8989_p12 = scmp.lt.u32.totalorder %s8987_s9, %s8982_s17 }
  0xe4   : > { %p8991_p4 = scmp.lt.u32.totalorder %s8982_s17, %s9541_s12 }
  0xe5   : > { %p8986_p3 = pneg %p8985_p10  ;;  %p8990_p1 = por %p8989_p12, %p8988_p5 }
  0xe7   : > { %p8992_p8 = por %p8991_p4, %p8990_p1 }
  0xe9   : > { %p8993_p7 = pnand %p8992_p8, %p8986_p3 }
  0xeb   : > { %8996 = shalt.err (!%p8993_p7)
}
  0xec   : > { %s8997_s22 = scalar_lea.vmem %s9544_s13, 512  ;;  %s9173_s20 = smov [#allocation7]  }
  0xed   : > { %p8998_p13 = scmp.ne.s32.totalorder %s9544_s13, %s8997_s22  ;;  %s9002_s23 = sshll.u32 %s9173_s20, 4  ;;  %s9003_s23 = int_to_ptr.vmem [resolvable:$false] %s9002_s23 }
  0xee   : > { %s9004_s5 = scalar_lea.vmem %s9003_s23, 1024  ;;  %p9005_p6 = scmp.lt.s32.totalorder %s9544_s13, %s9003_s23 }
  0xef   : > { %p9000_p11 = pnand %p8998_p13, %p9426_p0  ;;  %p9006_p10 = scmp.lt.s32.totalorder %s9004_s5, %s8997_s22 }
  0xf1   : > { %p9001_p2 = pneg %p9000_p11  ;;  %p9007_p5 = por %p9006_p10, %p9005_p6 }
  0xf3   : > { %p9008_p12 = pnand %p9007_p5, %p9001_p2 }
  0xf5   : > { %9011 = shalt.err (!%p9008_p12)
}
  0xf6   : > { %8442 = dma.hbm_to_vmem [thread:$0]  (!%p11504_p9), %s9541_s12, 512, %s9544_s13, %s9420_s25, %s11500_s11, %s11500_s11, %s11499_s7  }
  0xf7   : > { %s9575_s17 = scalar_lea.hbm %s11424_s3, %s9398_s28  ;;  %s447_s10 = scalar_lea.vmem [#allocation8], %s9402_s27 }
  0xf8   : > { %s454_s26 = sshll.u32 %s447_s10, 4  ;;  %s11505_s9 = sand.u32 1, %s9160_s16   ;;  %s9578_s26 = int_to_ptr.vmem [resolvable:$true] %s454_s26 }
  0xf9   : > { %s9582_s30 = scalar_lea.sflag [#allocation9], %s11505_s9  ;;  %s9012_s18 = scalar_lea.hbm %s9575_s17, 512 }
  0xfa   : > { %p9013_p3 = scmp.ne.s32.totalorder %s9575_s17, %s9012_s18  ;;  %s9017_s28 = scalar_lea.hbm %s11424_s3, 1024 }
  0xfb   : > { %p9018_p8 = scmp.lt.u32.totalorder %s9575_s17, %s11424_s3  ;;  %p9019_p7 = scmp.lt.u32.totalorder %s9017_s28, %s9012_s18 }
  0xfc   : > { %p9015_p1 = pnand %p9013_p3, %p9426_p0  ;;  %p9021_p11 = scmp.lt.u32.totalorder %s9012_s18, %s9575_s17 }
  0xfd   : > { %p9020_p13 = por %p9019_p7, %p9018_p8 }
  0xfe   : > { %p9016_p4 = pneg %p9015_p1 }
  0xff   : > { %p9022_p2 = por %p9021_p11, %p9020_p13 }
 0x101   : > { %p9023_p6 = pnand %p9022_p2, %p9016_p4 }
 0x103   : > { %9026 = shalt.err (!%p9023_p6)
}
 0x104   : > { %s9027_s27 = scalar_lea.vmem %s9578_s26, 512  ;;  %s9174_s20 = smov [#allocation8]  }
 0x105   : > { %p9028_p10 = scmp.ne.s32.totalorder %s9578_s26, %s9027_s27  ;;  %s9032_s23 = sshll.u32 %s9174_s20, 4  ;;  %s9033_s23 = int_to_ptr.vmem [resolvable:$false] %s9032_s23 }
 0x106   : > { %s9034_s5 = scalar_lea.vmem %s9033_s23, 1024  ;;  %p9035_p3 = scmp.lt.s32.totalorder %s9578_s26, %s9033_s23 }
 0x107   : > { %p9030_p5 = pnand %p9028_p10, %p9426_p0  ;;  %p9036_p1 = scmp.lt.s32.totalorder %s9034_s5, %s9027_s27 }
 0x109   : > { %p9031_p12 = pneg %p9030_p5  ;;  %p9037_p8 = por %p9036_p1, %p9035_p3 }
 0x10b   : > { %p9038_p7 = pnand %p9037_p8, %p9031_p12 }
 0x10d   : > { %9041 = shalt.err (!%p9038_p7)
}
 0x10e   : > { %8445 = dma.hbm_to_vmem [thread:$0]  (!%p11504_p9), %s9575_s17, 512, %s9578_s26, %s9582_s30, %s11500_s11, %s11500_s11, %s11499_s7  }
 0x10f   : > { %p11506_p0 = scmp.ne.s32.totalorder %s11485_s21, 0 }
 0x111   : > { %466 = sbr.rel (%p11506_p0) target bundleno = 2136 (0x858), region = 56 }
 0x118   : > { %s9612_s4 = sand.u32 1, %s9152_s14   ;;  %p11507_p4 = scmp.ne.s32.totalorder %s11482_s19, 0 }
 0x119   : > { %s7280_s24 = sshll.u32 %s9612_s4, 5  ;;  %s469_s1 = scalar_lea.sflag [#allocation3], %s9612_s4 }
 0x11a   : > { %s9616_s10 = scalar_lea.vmem [#allocation2], %s7280_s24 }
 0x11b   : > { %9115 = dma.done.wait (%p11507_p4), %s469_s1, 512  }
 0x11c   : > { %9117 = vsyncadd (%p11507_p4), %s469_s1, 4294966784  ;;  %s11508_s29 = sld [smem:[#allocation29_spill]]  ;;  %s9623_s11 = scalar_lea.vmem [#allocation5], %s7280_s24 }
 0x122   : > { %s477_s7 = sand.u32 1, %s11508_s29  }
 0x123   : > { %s478_s21 = scalar_lea.sflag [#allocation6], %s477_s7 }
 0x124   : > { %9119 = dma.done.wait (%p11507_p4), %s478_s21, 1024  }
 0x125   : > { %9121 = vsyncadd (%p11507_p4), %s478_s21, 4294966272  ;;  %s9629_s17 = scalar_lea.vmem [#allocation7], %s7280_s24  ;;  %s496_s26 = scalar_lea.sflag [#allocation9], %s477_s7 }
 0x126   : > { %s9631_s9 = scalar_lea.vmem [#allocation8], %s7280_s24 }
 0x127   : > { %9123 = dma.done.wait (%p11507_p4), %s496_s26, 512  }
 0x128   : > { %9125 = vsyncadd (%p11507_p4), %s496_s26, 4294966784  ;;  %p11509_p9 = scmp.eq.s32.totalorder %s11508_s29, 0 }
 0x12a   : > { %9127 = dma.done.wait (%p11509_p9), [#allocation9], 128   ;;  %p11510_p13 = pmov %p11509_p9 }
 0x12b   : > { %p11511_p11 = pmov %p11509_p9 }
 0x12c   : > { %9129 = vsyncadd (%p11510_p13), [#allocation9], 4294967168 }
 0x12d   : > { %9131 = dma.done.wait (%p11511_p11), [#allocation12], 384   ;;  %p11512_p2 = pmov %p11509_p9 }
 0x12f   : > { %9133 = vsyncadd (%p11512_p2), [#allocation12], 4294966912  ;;  %p11513_p6 = pmov %p11512_p2 }
 0x130   : > { %p11514_p10 = pmov %p11512_p2 }
 0x131   : > { %9135 = dma.done.wait (%p11513_p6), [#allocation15], 288  }
 0x132   : > { %9137 = vsyncadd (%p11514_p10), [#allocation15], 4294967008  ;;  %vm634_vm0 = vcmask 1043456   ;;  %vm621_vm1 = vcmask 64512   ;;  %v592_v0 = vld [vmem:[#allocation11] sm:$0xf]  ;;  %v593_v9 = vlaneseq }
 0x133   : > { %v716_v1 = vld [vmem:[#allocation11 + $0x4] sm:$0xf]  ;;  %8381 = vmatprep.subr.msk.bf16.mxu0 %vm634_vm0, %v592_v0  ;;  %v636_v2 = vsel %vm634_vm0, %v592_v0, 0  ;;  %v8636_v4 = vld [vmem:[%s9616_s10] sm:$0xff]   ;;  %v8640_v11 = vld [vmem:[%s9616_s10 + $0x10] sm:$0xff]   ;;  %s9175_s19 = smov 120  }
 0x134   : > { %8382 = vmatprep.subr.msk.bf16.mxu1 %vm634_vm0, %v716_v1  ;;  %v758_v3 = vsel %vm634_vm0, %v716_v1, 0  ;;  %v8637_v5 = vld [vmem:[%s9623_s11] sm:$0xff]   ;;  %7746 = vmatpush3.bf16.msra.mxu0 %v636_v2  ;;  %v8638_v6 = vld [vmem:[%s9616_s10 + $0x8] sm:$0xff]   ;;  %v8641_v12 = vld [vmem:[%s9623_s11 + $0x10] sm:$0xff]   ;;  %v594_v13 = vshrl.u32 %v593_v9, 7  ;;  %v11458_v31 = vmov 0.0  }
 0x135   : > { %7756 = vmatpush3.bf16.msra.mxu1 %v758_v3  ;;  %7747 = vmatprep.mubr.msk.bf16.mxu0 %vm621_vm1, %v8636_v4  ;;  %v8639_v7 = vld [vmem:[%s9623_s11 + $0x8] sm:$0xff]   ;;  %v959_v8 = vld [vmem:[#allocation10 + $0x4] sm:$0xf]  ;;  %v8642_v14 = vld [vmem:[%s9616_s10 + $0x18] sm:$0xff]   ;;  %vm9177_vm2 = vmmov 0   ;;  %vm1218_vm3 = vcmask 31744  }
 0x136   : > { %7757 = vmatprep.mubr.msk.bf16.mxu1 %vm621_vm1, %v8637_v5  ;;  %8384 = vmatprep.subr.msk.bf16.mxu1 %vm634_vm0, %v959_v8  ;;  %v993_v10 = vsel %vm634_vm0, %v959_v8, 0  ;;  %v8643_v15 = vld [vmem:[%s9623_s11 + $0x18] sm:$0xff]   ;;  %v8644_v16 = vld [vmem:[%s9631_s9] sm:$0xff]   ;;  %v719_v17 = vsub.s32 1, %v594_v13  ;;  %v595_v18 = vsub.s32 0, %v594_v13  ;;  %v8645_v22 = vld [vmem:[%s9631_s9 + $0x8] sm:$0xff]  }
 0x137   : > { %7748 = vmatmul.mubr.msk.bf16.vlgmr.msra.gmra.mrb[0].mxu0 %vm621_vm1, %v8638_v6  ;;  %v837_v19 = vld [vmem:[#allocation10] sm:$0xf]  ;;  %v8649_v23 = vld [vmem:[%s9629_s17 + $0x8] sm:$0xff]   ;;  %v8650_v24 = vld [vmem:[%s9629_s17 + $0x10] sm:$0xff]   ;;  %s9178_s30 = smov 124   ;;  %s9179_s18 = smov 4  }
 0x138   : > { %7758 = vmatmul.mubr.msk.bf16.vlgmr.msra.gmra.mrb[0].mxu1 %vm621_vm1, %v8639_v7  ;;  %7751 = vmatprep.mubr.msk.bf16.mxu0 %vm621_vm1, %v8640_v11  ;;  %v871_v20 = vsel %vm634_vm0, %v837_v19, 0  ;;  %v8648_v21 = vld [vmem:[%s9629_s17] sm:$0xff]   ;;  %v8646_v28 = vld [vmem:[%s9631_s9 + $0x10] sm:$0xff]   ;;  %v8651_v29 = vld [vmem:[%s9629_s17 + $0x18] sm:$0xff]   ;;  %s9180_s25 = smov 8   ;;  %s9181_s12 = smov 12  }
 0x139   : > { %7776 = vmatpush3.bf16.msra.mxu1 %v993_v10  ;;  %7761 = vmatprep.mubr.msk.bf16.mxu1 %vm621_vm1, %v8641_v12  ;;  %v583_v25 = vld [vmem:[#allocation14] sm:$0x3]  ;;  %v8647_v30 = vld [vmem:[%s9631_s9 + $0x18] sm:$0xff]   ;;  %vm6675_vm4 = vcmask 97280   ;;  %vm6699_vm5 = vcmask 130048   ;;  %s9182_s28 = smov 104  }
 0x13a   : > { %8383 = vmatprep.subr.msk.bf16.mxu0 %vm634_vm0, %v837_v19  ;;  %v9680_v26 = vrot.slane %v583_v25, %v719_v17  ;;  %v9682_v27 = vrot.slane %v583_v25, %v595_v18  ;;  %7791 = vmatprep.subr.bf16.mxu1 %v11458_v31  ;;  %s7289_s13 = sshll.u32 %s9612_s4, 6  ;;  %s7521_s27 = sshll.u32 %s11508_s29, 10 }
 0x13b   : > { %7766 = vmatpush3.bf16.msra.mxu0 %v871_v20  ;;  %s568_s22 = scalar_lea.vmem [#allocation17], %s7289_s13  ;;  %s11554_s20 = sld [smem:[#allocation33_spill]] }
 0x13c   : > { %11515 = vst [vmem:[#allocation34_spill] sm:$0xff] %v9680_v26  ;;  %11516 = vst [vmem:[#allocation35_spill] sm:$0xff] %v9682_v27  ;;  %742 = vrot.lane.b32.xlu1 %v9680_v26, %s9175_s19  ;;  %618 = vrot.lane.b32.xlu0 %v9682_v27, %s9175_s19  ;;  %s7025_s23 = sshll.u32 %s568_s22, 4  ;;  %s11555_s1 = sld [smem:[#allocation57_spill]]  ;;  %s11326_s23 = int_to_ptr.vmem [resolvable:$true] %s7025_s23 }
 0x13d   : > { %7785 = vmatprep.subr.bf16.mxu0 %v11458_v31  ;;  %s7007_s7 = scalar_lea.sflag [#allocation4], %s9612_s4  ;;  %s9042_s21 = scalar_lea.vmem %s11326_s23, 1024 }
 0x13e   : > { %p9043_p5 = scmp.ne.s32.totalorder %s11326_s23, %s9042_s21  ;;  %s9183_s11 = smov [#allocation17]  }
 0x13f   : > { %7752 = vmatmul.mubr.msk.bf16.gmra.mrb[4].mxu0 %vm621_vm1, %v8642_v14  ;;  %s9046_s17 = sshll.u32 %s9183_s11, 4  ;;  %s9047_s17 = int_to_ptr.vmem [resolvable:$false] %s9046_s17 }
 0x140   : > { %7762 = vmatmul.mubr.msk.bf16.gmra.mrb[4].mxu1 %vm621_vm1, %v8643_v15  ;;  %7767 = vmatprep.mubr.msk.bf16.mxu0 %vm621_vm1, %v8648_v21  ;;  %s9048_s26 = scalar_lea.vmem %s9047_s17, 2048  ;;  %p9049_p8 = scmp.lt.s32.totalorder %s11326_s23, %s9047_s17 }
 0x141   : > { %7777 = vmatprep.mubr.msk.bf16.mxu1 %vm621_vm1, %v8644_v16  ;;  %p11556_p12 = scmp.ne.s32.totalorder %s11554_s20, 0  ;;  %p9050_p7 = scmp.lt.s32.totalorder %s9048_s26, %s9042_s21 }
 0x142   : > { %s11323_s10 = scalar_lea.hbm %s11555_s1, %s7521_s27 }
 0x143   : > { %p9044_p3 = pnand %p9043_p5, %p11556_p12  ;;  %p9051_p0 = por %p9050_p7, %p9049_p8 }
 0x145   : > { %p9045_p1 = pneg %p9044_p3 }
 0x147   : > { %7768 = vmatmul.mubr.msk.bf16.vlgmr.msra.gmra.mrb[8].mxu0 %vm621_vm1, %v8649_v23  ;;  %p9052_p4 = pnand %p9051_p0, %p9045_p1 }
 0x148   : > { %7778 = vmatmul.mubr.msk.bf16.vlgmr.msra.gmra.mrb[8].mxu1 %vm621_vm1, %v8645_v22  ;;  %7771 = vmatprep.mubr.msk.bf16.mxu0 %vm621_vm1, %v8650_v24 }
 0x149   : > { %7781 = vmatprep.mubr.msk.bf16.mxu1 %vm621_vm1, %v8646_v28 }
 0x14f   : > { %7772 = vmatmul.mubr.msk.bf16.gmra.mrb[12].mxu0 %vm621_vm1, %v8651_v29 }
 0x150   : > { %7782 = vmatmul.mubr.msk.bf16.gmra.mrb[12].mxu1 %vm621_vm1, %v8647_v30  ;;  %7787 = vmatprep.mubr.msk.bf16.mxu0 %vm9177_vm2, %v11458_v31 }
 0x151   : > { %7793 = vmatprep.mubr.msk.bf16.mxu1 %vm9177_vm2, %v11458_v31 }
 0x1ae   : > { %v9703_v32 = vpop.permute.xlu0 %618 }
 0x20a   : > { %v7749_v33 = vpop.f32.mrb[0].mxu0 }
 0x20b   : > { %v9705_v34 = vpop.f32.mrb[0].mxu1  ;;  %v672_v35 = vpop.f32.mrb[1].mxu0  ;;  %v681_v39 = vadd.f32 %v7749_v33, %v9703_v32 }
 0x20c   : > { %v9707_v36 = vpop.f32.mrb[1].mxu1  ;;  %v7750_v37 = vpop.f32.mrb[2].mxu0  ;;  %v673_v38 = vadd.f32 %v672_v35, %v9703_v32 }
 0x20d   : > { %v9711_v40 = vpop.f32.mrb[2].mxu1  ;;  %v675_v41 = vpop.f32.mrb[3].mxu0  ;;  %v684_v45 = vadd.f32 %v7750_v37, %v9703_v32  ;;  %v9723_v47 = vpack.c.bf16 %v681_v39, %v681_v39 }
 0x20e   : > { %v676_v42 = vadd.f32 %v675_v41, %v9703_v32  ;;  %v9714_v43 = vpop.f32.mrb[3].mxu1  ;;  %v9716_v44 = vpack.c.bf16 %v673_v38, %v673_v38 }
 0x20f   : > { %v9729_v50 = vpack.c.bf16 %v684_v45, %v684_v45  ;;  %v1315_v14 = vsel %vm1218_vm3, %v9723_v47, 0 }
 0x210   : > { %v9719_v46 = vpack.c.bf16 %v676_v42, %v676_v42  ;;  %1092 = vrot.lane.b32.xlu0 %v9716_v44, %s9178_s30  ;;  %v1223_v48 = vsel %vm1218_vm3, %v9716_v44, 0 }
 0x211   : > { %7786 = vmatpush3.bf16.xpose.msra.mxu0 %v1223_v48  ;;  %v1361_v21 = vsel %vm1218_vm3, %v9729_v50, 0 }
 0x212   : > { %v7753_v49 = vpop.f32.mrb[4].mxu0  ;;  %1094 = vrot.lane.b32.xlu1 %v9719_v46, %s9178_s30  ;;  %v1269_v51 = vsel %vm1218_vm3, %v9719_v46, 0  ;;  %7797 = vmatprep.subr.bf16.mxu0 %v11458_v31 }
 0x213   : > { %v9734_v52 = vpop.f32.mrb[4].mxu1  ;;  %v688_v53 = vpop.f32.mrb[5].mxu0  ;;  %7792 = vmatpush3.bf16.xpose.msra.mxu1 %v1269_v51  ;;  %v697_v30 = vadd.f32 %v7753_v49, %v9703_v32 }
 0x214   : > { %v9736_v54 = vpop.f32.mrb[5].mxu1  ;;  %v7754_v55 = vpop.f32.mrb[6].mxu0  ;;  %1096 = vrot.lane.b32.xlu0 %v9723_v47, %s9178_s30  ;;  %7803 = vmatprep.subr.bf16.mxu1 %v11458_v31  ;;  %v689_v6 = vadd.f32 %v688_v53, %v9703_v32 }
 0x215   : > { %v9741_v56 = vpop.f32.mrb[6].mxu1  ;;  %v691_v57 = vpop.f32.mrb[7].mxu0  ;;  %v700_v35 = vadd.f32 %v7754_v55, %v9703_v32  ;;  %v9801_v42 = vpack.c.bf16 %v697_v30, %v697_v30 }
 0x216   : > { %v9743_v58 = vpop.f32.mrb[7].mxu1  ;;  %1098 = vrot.lane.b32.xlu1 %v9729_v50, %s9178_s30  ;;  %v692_v11 = vadd.f32 %v691_v57, %v9703_v32  ;;  %v9773_v19 = vpack.c.bf16 %v689_v6, %v689_v6  ;;  %v743_v57 = vpop.permute.xlu1 %742 }
 0x217   : > { %v9809_v48 = vpack.c.bf16 %v700_v35, %v700_v35  ;;  %v822_v30 = vadd.f32 %v9741_v56, %v743_v57 }
 0x218   : > { %v9782_v25 = vpack.c.bf16 %v692_v11, %v692_v11  ;;  %v1407_v39 = vsel %vm1218_vm3, %v9773_v19, 0 }
 0x21a   : > { %v9747_v59 = vpop.f32.mrb[8].mxu0  ;;  %v1453_v32 = vsel %vm1218_vm3, %v9782_v25, 0 }
 0x21b   : > { %v7779_v60 = vpop.f32.mrb[8].mxu1  ;;  %v9749_v61 = vpop.f32.mrb[9].mxu0 }
 0x21c   : > { %v1029_v62 = vpop.f32.mrb[9].mxu1  ;;  %v9751_v63 = vpop.f32.mrb[10].mxu0  ;;  %v1038_v7 = vadd.f32 %v7779_v60, %v9680_v26 }
 0x21d   : > { %v1030_v0 = vadd.f32 %v1029_v62, %v9680_v26  ;;  %v7780_v1 = vpop.f32.mrb[10].mxu1  ;;  %v9754_v2 = vpop.f32.mrb[11].mxu0 }
 0x21e   : > { %v1032_v3 = vpop.f32.mrb[11].mxu1  ;;  %v1041_v12 = vadd.f32 %v7780_v1, %v9680_v26  ;;  %v1062_v20 = vmul.f32 0.5, %v1038_v7  ;;  %v908_v7 = vadd.f32 %v9749_v61, %v9682_v27 }
 0x21f   : > { %v1060_v4 = vmul.f32 0.5, %v1030_v0  ;;  %v1033_v5 = vadd.f32 %v1032_v3, %v9680_v26  ;;  %v1499_v0 = vsel %vm1218_vm3, %v9801_v42, 0  ;;  %v1545_v3 = vsel %vm1218_vm3, %v9809_v48, 0 }
 0x220   : > { %v1063_v28 = vmul.f32 0.5, %v1041_v12  ;;  %v7515_v33 = vpack.c.bf16 %v1062_v20, %v1062_v20  ;;  %v938_v61 = vmul.f32 0.5, %v908_v7  ;;  %v916_v12 = vadd.f32 %v9747_v59, %v9682_v27 }
 0x221   : > { %v7513_v8 = vpack.c.bf16 %v1060_v4, %v1060_v4  ;;  %v1061_v9 = vmul.f32 0.5, %v1033_v5  ;;  %v795_v4 = vadd.f32 %v9707_v36, %v743_v57  ;;  %v798_v5 = vadd.f32 %v9714_v43, %v743_v57 }
 0x222   : > { %v9759_v10 = vpop.f32.mrb[12].mxu0  ;;  %v7516_v37 = vpack.c.bf16 %v1063_v28, %v1063_v28  ;;  %v911_v36 = vadd.f32 %v9754_v2, %v9682_v27  ;;  %v806_v43 = vadd.f32 %v9711_v40, %v743_v57  ;;  %v814_v20 = vadd.f32 %v9743_v58, %v743_v57 }
 0x223   : > { %v7514_v13 = vpack.c.bf16 %v1061_v9, %v1061_v9  ;;  %1200 = vrot.lane.b32.xlu0 %v7513_v8, %s9178_s30  ;;  %7788 = vmatmul.mubr.msk.bf16.vlgmr.msra.gmra.mrb[16].mxu0 %vm1218_vm3, %v7513_v8  ;;  %v7783_v15 = vpop.f32.mrb[12].mxu1  ;;  %v9767_v16 = vpop.f32.mrb[13].mxu0  ;;  %v9839_v8 = vpack.c.bf16 %v795_v4, %v795_v4  ;;  %v803_v9 = vadd.f32 %v9705_v34, %v743_v57 }
 0x224   : > { %7798 = vmatpush3.bf16.xpose.msra.mxu0 %v1315_v14  ;;  %v1045_v17 = vpop.f32.mrb[13].mxu1  ;;  %7799 = vmatprep.mubr.msk.bf16.mxu0 %vm9177_vm2, %v11458_v31  ;;  %v9771_v18 = vpop.f32.mrb[14].mxu0  ;;  %v1054_v45 = vadd.f32 %v7783_v15, %v9680_v26  ;;  %v9845_v11 = vpack.c.bf16 %v798_v5, %v798_v5  ;;  %v939_v2 = vmul.f32 0.5, %v911_v36  ;;  %v9859_v40 = vpack.c.bf16 %v806_v43, %v806_v43 }
 0x225   : > { %1202 = vrot.lane.b32.xlu1 %v7514_v13, %s9178_s30  ;;  %7794 = vmatmul.mubr.msk.bf16.vlgmr.msra.gmra.mrb[16].mxu1 %vm1218_vm3, %v7514_v13  ;;  %v7784_v22 = vpop.f32.mrb[14].mxu1  ;;  %v9779_v23 = vpop.f32.mrb[15].mxu0  ;;  %v1046_v29 = vadd.f32 %v1045_v17, %v9680_v26  ;;  %v9855_v34 = vpack.c.bf16 %v803_v9, %v803_v9  ;;  %v9863_v13 = vpack.c.bf16 %v938_v61, %v938_v61 }
 0x226   : > { %7804 = vmatpush3.bf16.xpose.msra.mxu1 %v1361_v21  ;;  %7809 = vmatprep.subr.bf16.mxu0 %v11458_v31  ;;  %v1048_v24 = vpop.f32.mrb[15].mxu1  ;;  %v1057_v51 = vadd.f32 %v7784_v22, %v9680_v26  ;;  %v1066_v55 = vmul.f32 0.5, %v1054_v45  ;;  %v811_v14 = vadd.f32 %v9736_v54, %v743_v57  ;;  %v919_v15 = vadd.f32 %v9751_v63, %v9682_v27 }
 0x227   : > { %1100 = vrot.lane.b32.xlu0 %v9773_v19, %s9178_s30  ;;  %7805 = vmatprep.mubr.msk.bf16.mxu1 %vm9177_vm2, %v11458_v31  ;;  %v1064_v38 = vmul.f32 0.5, %v1046_v29  ;;  %v1049_v41 = vadd.f32 %v1048_v24, %v9680_v26  ;;  %v9870_v17 = vpack.c.bf16 %v939_v2, %v939_v2  ;;  %v940_v21 = vmul.f32 0.5, %v916_v12 }
 0x228   : > { %7815 = vmatprep.subr.bf16.mxu1 %v11458_v31  ;;  %v1067_v60 = vmul.f32 0.5, %v1057_v51  ;;  %v7519_v1 = vpack.c.bf16 %v1066_v55, %v1066_v55  ;;  %v9877_v59 = vpack.c.bf16 %v811_v14, %v811_v14  ;;  %v941_v22 = vmul.f32 0.5, %v919_v15 }
 0x229   : > { %1102 = vrot.lane.b32.xlu1 %v9782_v25, %s9178_s30  ;;  %v7517_v49 = vpack.c.bf16 %v1064_v38, %v1064_v38  ;;  %v1065_v53 = vmul.f32 0.5, %v1049_v41  ;;  %v9881_v54 = vpack.c.bf16 %v814_v20, %v814_v20  ;;  %v9883_v63 = vpack.c.bf16 %v940_v21, %v940_v21 }
 0x22a   : > { %v7520_v6 = vpack.c.bf16 %v1067_v60, %v1067_v60  ;;  %v924_v58 = vadd.f32 %v9767_v16, %v9682_v27  ;;  %v819_v24 = vadd.f32 %v9734_v52, %v743_v57  ;;  %v9890_v28 = vpack.c.bf16 %v941_v22, %v941_v22 }
 0x22b   : > { %1204 = vrot.lane.b32.xlu0 %v7515_v33, %s9178_s30  ;;  %7800 = vmatmul.mubr.msk.bf16.vlgmr.msra.gmra.mrb[20].mxu0 %vm1218_vm3, %v7515_v33  ;;  %v7518_v62 = vpack.c.bf16 %v1065_v53, %v1065_v53  ;;  %11517 = vst [vmem:[#allocation36_spill] sm:$0xff] %v9881_v54  ;;  %v927_v29 = vadd.f32 %v9779_v23, %v9682_v27  ;;  %v2167_v15 = vsel %vm1218_vm3, %v9839_v8, 0  ;;  %v2213_v21 = vsel %vm1218_vm3, %v9845_v11, 0 }
 0x22c   : > { %7810 = vmatpush3.bf16.xpose.msra.mxu0 %v1407_v39  ;;  %7811 = vmatprep.mubr.msk.bf16.mxu0 %vm9177_vm2, %v11458_v31  ;;  %v932_v33 = vadd.f32 %v9759_v10, %v9682_v27  ;;  %v942_v35 = vmul.f32 0.5, %v924_v58  ;;  %v9901_v16 = vpack.c.bf16 %v819_v24, %v819_v24  ;;  %v935_v52 = vadd.f32 %v9771_v18, %v9682_v27 }
 0x22d   : > { %1206 = vrot.lane.b32.xlu1 %v7516_v37, %s9178_s30  ;;  %7806 = vmatmul.mubr.msk.bf16.vlgmr.msra.gmra.mrb[20].mxu1 %vm1218_vm3, %v7516_v37  ;;  %v943_v37 = vmul.f32 0.5, %v927_v29  ;;  %v9907_v38 = vpack.c.bf16 %v822_v30, %v822_v30  ;;  %v2305_v22 = vsel %vm1218_vm3, %v9859_v40, 0  ;;  %v2397_v24 = vsel %vm1218_vm3, %v9881_v54, 0 }
 0x22e   : > { %7816 = vmatpush3.bf16.xpose.msra.mxu1 %v1453_v32  ;;  %7821 = vmatprep.subr.bf16.mxu0 %v11458_v31  ;;  %11518 = vst [vmem:[#allocation37_spill] sm:$0xff] %v9901_v16  ;;  %v944_v23 = vmul.f32 0.5, %v932_v33  ;;  %v9909_v56 = vpack.c.bf16 %v942_v35, %v942_v35  ;;  %v945_v10 = vmul.f32 0.5, %v935_v52 }
 0x22f   : > { %1104 = vrot.lane.b32.xlu0 %v9801_v42, %s9178_s30  ;;  %7817 = vmatprep.mubr.msk.bf16.mxu1 %vm9177_vm2, %v11458_v31  ;;  %11519 = vst [vmem:[#allocation38_spill] sm:$0xff] %v9907_v38  ;;  %v9913_v39 = vpack.c.bf16 %v943_v37, %v943_v37  ;;  %v2489_v33 = vsel %vm1218_vm3, %v9907_v38, 0 }
 0x230   : > { %7827 = vmatprep.subr.bf16.mxu1 %v11458_v31  ;;  %v9917_v41 = vpack.c.bf16 %v944_v23, %v944_v23  ;;  %v9921_v18 = vpack.c.bf16 %v945_v10, %v945_v10 }
 0x231   : > { %1106 = vrot.lane.b32.xlu1 %v9809_v48, %s9178_s30 }
 0x233   : > { %1208 = vrot.lane.b32.xlu0 %v7517_v49, %s9178_s30  ;;  %7812 = vmatmul.mubr.msk.bf16.vlgmr.msra.gmra.mrb[24].mxu0 %vm1218_vm3, %v7517_v49 }
 0x234   : > { %7822 = vmatpush3.bf16.xpose.msra.mxu0 %v1499_v0  ;;  %7823 = vmatprep.mubr.msk.bf16.mxu0 %vm9177_vm2, %v11458_v31 }
 0x235   : > { %1210 = vrot.lane.b32.xlu1 %v7518_v62, %s9178_s30  ;;  %7818 = vmatmul.mubr.msk.bf16.vlgmr.msra.gmra.mrb[24].mxu1 %vm1218_vm3, %v7518_v62 }
 0x236   : > { %7828 = vmatpush3.bf16.xpose.msra.mxu1 %v1545_v3  ;;  %7829 = vmatprep.mubr.msk.bf16.mxu1 %vm9177_vm2, %v11458_v31 }
 0x237   : > { %1212 = vrot.lane.b32.xlu0 %v7519_v1, %s9178_s30  ;;  %7833 = vmatprep.subr.bf16.mxu0 %v11458_v31 }
 0x238   : > { %7839 = vmatprep.subr.bf16.mxu1 %v11458_v31 }
 0x239   : > { %1214 = vrot.lane.b32.xlu1 %v7520_v6, %s9178_s30 }
 0x23b   : > { %1128 = vrot.lane.b32.xlu0 %v9839_v8, %s9178_s30  ;;  %7824 = vmatmul.mubr.msk.bf16.vlgmr.msra.gmra.mrb[28].mxu0 %vm1218_vm3, %v7519_v1 }
 0x23c   : > { %7835 = vmatprep.mubr.msk.bf16.mxu0 %vm9177_vm2, %v11458_v31 }
 0x23d   : > { %1130 = vrot.lane.b32.xlu1 %v9845_v11, %s9178_s30  ;;  %7830 = vmatmul.mubr.msk.bf16.vlgmr.msra.gmra.mrb[28].mxu1 %vm1218_vm3, %v7520_v6 }
 0x23e   : > { %7841 = vmatprep.mubr.msk.bf16.mxu1 %vm9177_vm2, %v11458_v31 }
 0x23f   : > { %1132 = vrot.lane.b32.xlu0 %v9855_v34, %s9178_s30 }
 0x241   : > { %1134 = vrot.lane.b32.xlu1 %v9859_v40, %s9178_s30 }
 0x243   : > { %1164 = vrot.lane.b32.xlu0 %v9863_v13, %s9178_s30 }
 0x245   : > { %1166 = vrot.lane.b32.xlu1 %v9870_v17, %s9178_s30 }
 0x247   : > { %1136 = vrot.lane.b32.xlu0 %v9877_v59, %s9178_s30 }
 0x249   : > { %1138 = vrot.lane.b32.xlu1 %v9881_v54, %s9178_s30 }
 0x24b   : > { %1168 = vrot.lane.b32.xlu0 %v9883_v63, %s9178_s30 }
 0x24d   : > { %1170 = vrot.lane.b32.xlu1 %v9890_v28, %s9178_s30 }
 0x24f   : > { %1140 = vrot.lane.b32.xlu0 %v9901_v16, %s9178_s30 }
 0x251   : > { %1142 = vrot.lane.b32.xlu1 %v9907_v38, %s9178_s30 }
 0x253   : > { %1172 = vrot.lane.b32.xlu0 %v9909_v56, %s9178_s30 }
 0x255   : > { %1174 = vrot.lane.b32.xlu1 %v9913_v39, %s9178_s30 }
 0x257   : > { %1176 = vrot.lane.b32.xlu0 %v9917_v41, %s9178_s30 }
 0x259   : > { %1178 = vrot.lane.b32.xlu1 %v9921_v18, %s9178_s30 }
 0x25b   : > { %3155 = vrot.lane.b32.xlu0 %v9719_v46, %s9175_s19 }
 0x25d   : > { %3107 = vrot.lane.b32.xlu1 %v9716_v44, %s9175_s19 }
 0x25f   : > { %3251 = vrot.lane.b32.xlu0 %v9729_v50, %s9175_s19 }
 0x261   : > { %3203 = vrot.lane.b32.xlu1 %v9723_v47, %s9175_s19 }
 0x263   : > { %3347 = vrot.lane.b32.xlu0 %v9782_v25, %s9175_s19 }
 0x265   : > { %3299 = vrot.lane.b32.xlu1 %v9773_v19, %s9175_s19 }
 0x267   : > { %3443 = vrot.lane.b32.xlu0 %v9809_v48, %s9175_s19 }
 0x269   : > { %3395 = vrot.lane.b32.xlu1 %v9801_v42, %s9175_s19 }
 0x26d   : > { %4835 = vrot.lane.b32.xlu1 %v9839_v8, %s9175_s19  ;;  %v2259_v8 = vsel %vm1218_vm3, %v9855_v34, 0 }
 0x282   : > { %v1093_v44 = vpop.permute.xlu0 %1092 }
 0x283   : > { %v1591_v46 = vsel %vm1218_vm3, %v1093_v44, 0  ;;  %v7395_v32 = vcombine.low %v1093_v44, %v1093_v44 }
 0x284   : > { %v1095_v50 = vpop.permute.xlu1 %1094  ;;  %7834 = vmatpush3.bf16.xpose.msra.mxu0 %v1591_v46 }
 0x285   : > { %v1637_v47 = vsel %vm1218_vm3, %v1095_v50, 0  ;;  %7845 = vmatprep.subr.bf16.mxu0 %v11458_v31  ;;  %v7397_v48 = vcombine.low %v1095_v50, %v1095_v50 }
 0x286   : > { %v1097_v25 = vpop.permute.xlu0 %1096  ;;  %7840 = vmatpush3.bf16.xpose.msra.mxu1 %v1637_v47 }
 0x287   : > { %v7399_v19 = vcombine.low %v1097_v25, %v1097_v25  ;;  %7851 = vmatprep.subr.bf16.mxu1 %v11458_v31  ;;  %v1683_v51 = vsel %vm1218_vm3, %v1097_v25, 0 }
 0x288   : > { %v1099_v45 = vpop.permute.xlu1 %1098 }
 0x289   : > { %v7401_v42 = vcombine.low %v1099_v45, %v1099_v45  ;;  %3593 = vrot.lane.b32.xlu1 %v7399_v19, %s9175_s19  ;;  %v1729_v55 = vsel %vm1218_vm3, %v1099_v45, 0 }
 0x28b   : > { %3643 = vrot.lane.b32.xlu0 %v7401_v42, %s9175_s19 }
 0x28d   : > { %3493 = vrot.lane.b32.xlu1 %v7395_v32, %s9175_s19 }
 0x28f   : > { %3543 = vrot.lane.b32.xlu0 %v7397_v48, %s9175_s19 }
 0x295   : > { %v1201_v49 = vpop.permute.xlu0 %1200 }
 0x296   : > { %7836 = vmatmul.mubr.msk.bf16.vlgmr.msra.gmra.mrb[32].mxu0 %vm1218_vm3, %v1201_v49 }
 0x297   : > { %7846 = vmatpush3.bf16.xpose.msra.mxu0 %v1683_v51  ;;  %v1203_v53 = vpop.permute.xlu1 %1202  ;;  %7847 = vmatprep.mubr.msk.bf16.mxu0 %vm9177_vm2, %v11458_v31 }
 0x298   : > { %7842 = vmatmul.mubr.msk.bf16.vlgmr.msra.gmra.mrb[32].mxu1 %vm1218_vm3, %v1203_v53  ;;  %7857 = vmatprep.subr.bf16.mxu0 %v11458_v31 }
 0x299   : > { %7852 = vmatpush3.bf16.xpose.msra.mxu1 %v1729_v55  ;;  %v1101_v57 = vpop.permute.xlu0 %1100  ;;  %7853 = vmatprep.mubr.msk.bf16.mxu1 %vm9177_vm2, %v11458_v31 }
 0x29a   : > { %7863 = vmatprep.subr.bf16.mxu1 %v11458_v31  ;;  %v1775_v0 = vsel %vm1218_vm3, %v1101_v57, 0  ;;  %v7403_v9 = vcombine.low %v1101_v57, %v1101_v57  ;;  %v10125_v57 = vld [vmem:[#allocation16] sm:$0xff] }
 0x29b   : > { %v1103_v60 = vpop.permute.xlu1 %1102 }
 0x29c   : > { %v1821_v3 = vsel %vm1218_vm3, %v1103_v60, 0  ;;  %v7405_v2 = vcombine.low %v1103_v60, %v1103_v60 }
 0x29d   : > { %v1205_v62 = vpop.permute.xlu0 %1204 }
 0x29e   : > { %7848 = vmatmul.mubr.msk.bf16.vlgmr.msra.gmra.mrb[36].mxu0 %vm1218_vm3, %v1205_v62 }
 0x29f   : > { %7858 = vmatpush3.bf16.xpose.msra.mxu0 %v1775_v0  ;;  %v1207_v1 = vpop.permute.xlu1 %1206  ;;  %7859 = vmatprep.mubr.msk.bf16.mxu0 %vm9177_vm2, %v11458_v31 }
 0x2a0   : > { %7854 = vmatmul.mubr.msk.bf16.vlgmr.msra.gmra.mrb[36].mxu1 %vm1218_vm3, %v1207_v1  ;;  %7869 = vmatprep.subr.bf16.mxu0 %v11458_v31 }
 0x2a1   : > { %7864 = vmatpush3.bf16.xpose.msra.mxu1 %v1821_v3  ;;  %v1105_v4 = vpop.permute.xlu0 %1104  ;;  %7865 = vmatprep.mubr.msk.bf16.mxu1 %vm9177_vm2, %v11458_v31 }
 0x2a2   : > { %v7407_v5 = vcombine.low %v1105_v4, %v1105_v4  ;;  %7875 = vmatprep.subr.bf16.mxu1 %v11458_v31  ;;  %v1867_v43 = vsel %vm1218_vm3, %v1105_v4, 0 }
 0x2a3   : > { %v1107_v6 = vpop.permute.xlu1 %1106 }
 0x2a4   : > { %v7409_v7 = vcombine.low %v1107_v6, %v1107_v6  ;;  %3793 = vrot.lane.b32.xlu1 %v7407_v5, %s9175_s19  ;;  %v1913_v12 = vsel %vm1218_vm3, %v1107_v6, 0 }
 0x2a5   : > { %v1209_v36 = vpop.permute.xlu0 %1208 }
 0x2a6   : > { %7860 = vmatmul.mubr.msk.bf16.vlgmr.msra.gmra.mrb[40].mxu0 %vm1218_vm3, %v1209_v36  ;;  %3843 = vrot.lane.b32.xlu0 %v7409_v7, %s9175_s19 }
 0x2a7   : > { %7870 = vmatpush3.bf16.xpose.msra.mxu0 %v1867_v43  ;;  %v1211_v61 = vpop.permute.xlu1 %1210  ;;  %7871 = vmatprep.mubr.msk.bf16.mxu0 %vm9177_vm2, %v11458_v31 }
 0x2a8   : > { %7866 = vmatmul.mubr.msk.bf16.vlgmr.msra.gmra.mrb[40].mxu1 %vm1218_vm3, %v1211_v61  ;;  %3693 = vrot.lane.b32.xlu1 %v7403_v9, %s9175_s19 }
 0x2a9   : > { %7876 = vmatpush3.bf16.xpose.msra.mxu1 %v1913_v12  ;;  %7881 = vmatprep.subr.bf16.mxu0 %v11458_v31  ;;  %v1213_v14 = vpop.permute.xlu0 %1212 }
 0x2aa   : > { %3743 = vrot.lane.b32.xlu0 %v7405_v2, %s9175_s19  ;;  %7877 = vmatprep.mubr.msk.bf16.mxu1 %vm9177_vm2, %v11458_v31 }
 0x2ab   : > { %7887 = vmatprep.subr.bf16.mxu1 %v11458_v31  ;;  %v1215_v20 = vpop.permute.xlu1 %1214 }
 0x2ad   : > { %v10017_v58 = vpop.permute.xlu0 %1128 }
 0x2ae   : > { %7872 = vmatmul.mubr.msk.bf16.vlgmr.msra.gmra.mrb[44].mxu0 %vm1218_vm3, %v1213_v14  ;;  %11521 = vst [vmem:[#allocation40_spill] sm:$0xff] %v10017_v58  ;;  %v2535_v37 = vsel %vm1218_vm3, %v10017_v58, 0 }
 0x2af   : > { %7882 = vmatpush3.bf16.xpose.msra.mxu0 %v2167_v15  ;;  %7883 = vmatprep.mubr.msk.bf16.mxu0 %vm9177_vm2, %v11458_v31 }
 0x2b0   : > { %7878 = vmatmul.mubr.msk.bf16.vlgmr.msra.gmra.mrb[44].mxu1 %vm1218_vm3, %v1215_v20  ;;  %7893 = vmatprep.subr.bf16.mxu0 %v11458_v31 }
 0x2b1   : > { %7888 = vmatpush3.bf16.xpose.msra.mxu1 %v2213_v21  ;;  %7889 = vmatprep.mubr.msk.bf16.mxu1 %vm9177_vm2, %v11458_v31 }
 0x2b2   : > { %7899 = vmatprep.subr.bf16.mxu1 %v11458_v31 }
 0x2b6   : > { %7884 = vmatmul.mubr.msk.bf16.vlgmr.msra.gmra.mrb[48].mxu0 %vm1218_vm3, %v9863_v13  ;;  %v10015_v13 = vpop.permute.xlu1 %1130 }
 0x2b7   : > { %7894 = vmatpush3.bf16.xpose.msra.mxu0 %v2259_v8  ;;  %7895 = vmatprep.mubr.msk.bf16.mxu0 %vm9177_vm2, %v11458_v31  ;;  %11520 = vst [vmem:[#allocation39_spill] sm:$0xff] %v10015_v13 }
 0x2b8   : > { %7890 = vmatmul.mubr.msk.bf16.vlgmr.msra.gmra.mrb[48].mxu1 %vm1218_vm3, %v9870_v17  ;;  %7905 = vmatprep.subr.bf16.mxu0 %v11458_v31  ;;  %v2351_v17 = vsel %vm1218_vm3, %v9877_v59, 0 }
 0x2b9   : > { %7900 = vmatpush3.bf16.xpose.msra.mxu1 %v2305_v22  ;;  %7901 = vmatprep.mubr.msk.bf16.mxu1 %vm9177_vm2, %v11458_v31 }
 0x2ba   : > { %7911 = vmatprep.subr.bf16.mxu1 %v11458_v31  ;;  %v10030_v29 = vpop.permute.xlu1 %1134 }
 0x2bb   : > { %11522 = vst [vmem:[#allocation41_spill] sm:$0xff] %v10030_v29 }
 0x2be   : > { %7896 = vmatmul.mubr.msk.bf16.vlgmr.msra.gmra.mrb[52].mxu0 %vm1218_vm3, %v9883_v63  ;;  %v10035_v63 = vpop.permute.xlu0 %1132  ;;  %v1167_v30 = vpop.permute.xlu1 %1166 }
 0x2bf   : > { %7906 = vmatpush3.bf16.xpose.msra.mxu0 %v2351_v17  ;;  %7907 = vmatprep.mubr.msk.bf16.mxu0 %vm9177_vm2, %v11458_v31  ;;  %11523 = vst [vmem:[#allocation42_spill] sm:$0xff] %v10035_v63 }
 0x2c0   : > { %7902 = vmatmul.mubr.msk.bf16.vlgmr.msra.gmra.mrb[52].mxu1 %vm1218_vm3, %v9890_v28  ;;  %7917 = vmatprep.subr.bf16.mxu0 %v11458_v31  ;;  %v2443_v28 = vsel %vm1218_vm3, %v9901_v16, 0 }
 0x2c1   : > { %7912 = vmatpush3.bf16.xpose.msra.mxu1 %v2397_v24  ;;  %7913 = vmatprep.mubr.msk.bf16.mxu1 %vm9177_vm2, %v11458_v31 }
 0x2c2   : > { %7923 = vmatprep.subr.bf16.mxu1 %v11458_v31  ;;  %v1165_v35 = vpop.permute.xlu0 %1164  ;;  %v10051_v52 = vpop.permute.xlu1 %1138 }
 0x2c3   : > { %11524 = vst [vmem:[#allocation43_spill] sm:$0xff] %v10051_v52  ;;  %v2765_v25 = vsel %vm1218_vm3, %v10051_v52, 0 }
 0x2c6   : > { %7908 = vmatmul.mubr.msk.bf16.vlgmr.msra.gmra.mrb[56].mxu0 %vm1218_vm3, %v9909_v56  ;;  %v10057_v23 = vpop.permute.xlu0 %1136  ;;  %v2581_v56 = vsel %vm1218_vm3, %v10015_v13, 0  ;;  %v1171_v10 = vpop.permute.xlu1 %1170 }
 0x2c7   : > { %7918 = vmatpush3.bf16.xpose.msra.mxu0 %v2443_v28  ;;  %7919 = vmatprep.mubr.msk.bf16.mxu0 %vm9177_vm2, %v11458_v31  ;;  %11525 = vst [vmem:[#allocation44_spill] sm:$0xff] %v10057_v23  ;;  %v2719_v50 = vsel %vm1218_vm3, %v10057_v23, 0 }
 0x2c8   : > { %7914 = vmatmul.mubr.msk.bf16.vlgmr.msra.gmra.mrb[56].mxu1 %vm1218_vm3, %v9913_v39  ;;  %7929 = vmatprep.subr.bf16.mxu0 %v11458_v31 }
 0x2c9   : > { %7924 = vmatpush3.bf16.xpose.msra.mxu1 %v2489_v33  ;;  %7925 = vmatprep.mubr.msk.bf16.mxu1 %vm9177_vm2, %v11458_v31 }
 0x2ca   : > { %7935 = vmatprep.subr.bf16.mxu1 %v11458_v31  ;;  %v1169_v39 = vpop.permute.xlu0 %1168  ;;  %v10078_v44 = vpop.permute.xlu1 %1142 }
 0x2cb   : > { %11526 = vst [vmem:[#allocation45_spill] sm:$0xff] %v10078_v44  ;;  %v2857_v48 = vsel %vm1218_vm3, %v10078_v44, 0 }
 0x2ce   : > { %7920 = vmatmul.mubr.msk.bf16.vlgmr.msra.gmra.mrb[60].mxu0 %vm1218_vm3, %v9917_v41  ;;  %v2627_v41 = vsel %vm1218_vm3, %v10035_v63, 0  ;;  %v10083_v46 = vpop.permute.xlu0 %1140  ;;  %v1175_v47 = vpop.permute.xlu1 %1174 }
 0x2cf   : > { %7930 = vmatpush3.bf16.xpose.msra.mxu0 %v2535_v37  ;;  %7931 = vmatprep.mubr.msk.bf16.mxu0 %vm9177_vm2, %v11458_v31  ;;  %11527 = vst [vmem:[#allocation46_spill] sm:$0xff] %v10083_v46  ;;  %v2811_v32 = vsel %vm1218_vm3, %v10083_v46, 0 }
 0x2d0   : > { %7926 = vmatmul.mubr.msk.bf16.vlgmr.msra.gmra.mrb[60].mxu1 %vm1218_vm3, %v9921_v18  ;;  %7941 = vmatprep.subr.bf16.mxu0 %v11458_v31  ;;  %v2673_v18 = vsel %vm1218_vm3, %v10030_v29, 0 }
 0x2d1   : > { %7936 = vmatpush3.bf16.xpose.msra.mxu1 %v2581_v56  ;;  %7937 = vmatprep.mubr.msk.bf16.mxu1 %vm9177_vm2, %v11458_v31 }
 0x2d2   : > { %7947 = vmatprep.subr.bf16.mxu1 %v11458_v31  ;;  %v1173_v19 = vpop.permute.xlu0 %1172  ;;  %v1179_v45 = vpop.permute.xlu1 %1178 }
 0x2d6   : > { %7932 = vmatmul.mubr.msk.bf16.vlgmr.msra.gmra.mrb[64].mxu0 %vm1218_vm3, %v1165_v35  ;;  %v1177_v42 = vpop.permute.xlu0 %1176  ;;  %v3108_v49 = vpop.permute.xlu1 %3107 }
 0x2d7   : > { %7942 = vmatpush3.bf16.xpose.msra.mxu0 %v2627_v41  ;;  %7943 = vmatprep.mubr.msk.bf16.mxu0 %vm9177_vm2, %v11458_v31  ;;  %v10110_v53 = vsel %vm634_vm0, %v3108_v49, 0 }
 0x2d8   : > { %7938 = vmatmul.mubr.msk.bf16.vlgmr.msra.gmra.mrb[64].mxu1 %vm1218_vm3, %v1167_v30  ;;  %7953 = vmatprep.subr.bf16.mxu0 %v11458_v31 }
 0x2d9   : > { %7948 = vmatpush3.bf16.xpose.msra.mxu1 %v2673_v18  ;;  %7949 = vmatprep.mubr.msk.bf16.mxu1 %vm9177_vm2, %v11458_v31 }
 0x2da   : > { %7959 = vmatprep.subr.bf16.mxu1 %v11458_v31  ;;  %v3156_v51 = vpop.permute.xlu0 %3155 }
 0x2db   : > { %v10117_v55 = vsel %vm634_vm0, %v3156_v51, 0 }
 0x2de   : > { %7944 = vmatmul.mubr.msk.bf16.vlgmr.msra.gmra.mrb[68].mxu0 %vm1218_vm3, %v1169_v39 }
 0x2df   : > { %7954 = vmatpush3.bf16.xpose.msra.mxu0 %v2719_v50  ;;  %7955 = vmatprep.mubr.msk.bf16.mxu0 %vm9177_vm2, %v11458_v31 }
 0x2e0   : > { %7950 = vmatmul.mubr.msk.bf16.vlgmr.msra.gmra.mrb[68].mxu1 %vm1218_vm3, %v1171_v10  ;;  %7965 = vmatprep.subr.bf16.mxu0 %v11458_v31 }
 0x2e1   : > { %7960 = vmatpush3.bf16.xpose.msra.mxu1 %v2765_v25  ;;  %7961 = vmatprep.mubr.msk.bf16.mxu1 %vm9177_vm2, %v11458_v31 }
 0x2e2   : > { %7971 = vmatprep.subr.bf16.mxu1 %v11458_v31 }
 0x2e6   : > { %7956 = vmatmul.mubr.msk.bf16.vlgmr.msra.gmra.mrb[72].mxu0 %vm1218_vm3, %v1173_v19 }
 0x2e7   : > { %7966 = vmatpush3.bf16.xpose.msra.mxu0 %v2811_v32  ;;  %7967 = vmatprep.mubr.msk.bf16.mxu0 %vm9177_vm2, %v11458_v31 }
 0x2e8   : > { %7962 = vmatmul.mubr.msk.bf16.vlgmr.msra.gmra.mrb[72].mxu1 %vm1218_vm3, %v1175_v47  ;;  %7977 = vmatprep.subr.bf16.mxu0 %v11458_v31 }
 0x2e9   : > { %7972 = vmatpush3.bf16.xpose.msra.mxu1 %v2857_v48  ;;  %7973 = vmatprep.mubr.msk.bf16.mxu1 %vm9177_vm2, %v11458_v31 }
 0x2ea   : > { %7983 = vmatprep.subr.bf16.mxu1 %v11458_v31 }
 0x2ee   : > { %7968 = vmatmul.mubr.msk.bf16.vlgmr.msra.gmra.mrb[76].mxu0 %vm1218_vm3, %v1177_v42 }
 0x2ef   : > { %7978 = vmatpush3.bf16.msra.mxu0 %v10110_v53  ;;  %7979 = vmatprep.mubr.msk.bf16.mxu0 %vm9177_vm2, %v11458_v31 }
 0x2f0   : > { %7974 = vmatmul.mubr.msk.bf16.vlgmr.msra.gmra.mrb[76].mxu1 %vm1218_vm3, %v1179_v45  ;;  %7989 = vmatprep.subr.bf16.mxu0 %v11458_v31 }
 0x2f1   : > { %7984 = vmatpush3.bf16.msra.mxu1 %v10117_v55  ;;  %7985 = vmatprep.mubr.msk.bf16.mxu1 %vm9177_vm2, %v11458_v31 }
 0x2f2   : > { %7995 = vmatprep.subr.bf16.mxu1 %v11458_v31 }
 0x2f6   : > { %v1259_v60 = vpop.f32.mrb[16].mxu0 }
 0x2f7   : > { %v10128_v62 = vadd.f32 %v1259_v60, %v10125_v57  ;;  %v7789_v0 = vpop.f32.mrb[17].mxu0 }
 0x2f8   : > { %v1262_v1 = vpop.f32.mrb[18].mxu0  ;;  %v1305_v3 = vpop.f32.mrb[16].mxu1 }
 0x2f9   : > { %v10131_v4 = vadd.f32 %v1305_v3, %v10125_v57  ;;  %v7790_v5 = vpop.f32.mrb[19].mxu0  ;;  %v7795_v6 = vpop.f32.mrb[17].mxu1  ;;  %v1971_v7 = vsel %vm621_vm1, %v10128_v62, -inf }
 0x2fa   : > { %v1308_v36 = vpop.f32.mrb[18].mxu1  ;;  %1972 = vmax.xlane.f32.xlu0 %v1971_v7  ;;  %v10167_v6 = vpop.permute.xlu1 %3203 }
 0x2fb   : > { %v7796_v9 = vpop.f32.mrb[19].mxu1  ;;  %v1974_v43 = vsel %vm621_vm1, %v10131_v4, -inf  ;;  %v10169_v7 = vpop.permute.xlu0 %3251 }
 0x2fc   : > { %1975 = vmax.xlane.f32.xlu1 %v1974_v43  ;;  %v10175_v43 = vld [vmem:[#allocation16 + $0x8] sm:$0xff] }
 0x2fe   : > { %v1351_v61 = vpop.f32.mrb[20].mxu0  ;;  %v10171_v36 = vpop.permute.xlu1 %3299 }
 0x2ff   : > { %v10138_v2 = vadd.f32 %v1351_v61, %v10125_v57  ;;  %v7801_v12 = vpop.f32.mrb[21].mxu0  ;;  %v10173_v9 = vpop.permute.xlu0 %3347 }
 0x300   : > { %v1354_v14 = vpop.f32.mrb[22].mxu0  ;;  %v1397_v15 = vpop.f32.mrb[20].mxu1 }
 0x301   : > { %v10141_v20 = vadd.f32 %v1397_v15, %v10125_v57  ;;  %v7802_v21 = vpop.f32.mrb[23].mxu0  ;;  %v7807_v8 = vpop.f32.mrb[21].mxu1  ;;  %v1977_v22 = vsel %vm621_vm1, %v10138_v2, -inf }
 0x302   : > { %v1400_v17 = vpop.f32.mrb[22].mxu1  ;;  %1978 = vmax.xlane.f32.xlu0 %v1977_v22  ;;  %v10177_v61 = vpop.permute.xlu1 %3395 }
 0x303   : > { %v7808_v24 = vpop.f32.mrb[23].mxu1  ;;  %v1980_v28 = vsel %vm621_vm1, %v10141_v20, -inf  ;;  %v10179_v14 = vpop.permute.xlu0 %3443 }
 0x306   : > { %v1443_v30 = vpop.f32.mrb[24].mxu0  ;;  %1981 = vmax.xlane.f32.xlu0 %v1980_v28 }
 0x307   : > { %v10148_v33 = vadd.f32 %v1443_v30, %v10125_v57  ;;  %v7813_v35 = vpop.f32.mrb[25].mxu0 }
 0x308   : > { %v1446_v37 = vpop.f32.mrb[26].mxu0  ;;  %v1489_v56 = vpop.f32.mrb[24].mxu1 }
 0x309   : > { %v10151_v10 = vadd.f32 %v1489_v56, %v10125_v57  ;;  %v7814_v39 = vpop.f32.mrb[27].mxu0  ;;  %v7819_v41 = vpop.f32.mrb[25].mxu1  ;;  %v1983_v18 = vsel %vm621_vm1, %v10148_v33, -inf }
 0x30a   : > { %v1492_v50 = vpop.f32.mrb[26].mxu1  ;;  %1984 = vmax.xlane.f32.xlu1 %v1983_v18  ;;  %v10189_v37 = vpop.permute.xlu1 %4835 }
 0x30b   : > { %v7820_v47 = vpop.f32.mrb[27].mxu1  ;;  %v1986_v25 = vsel %vm621_vm1, %v10151_v10, -inf  ;;  %11528 = vst [vmem:[#allocation47_spill] sm:$0xff] %v10189_v37  ;;  %v10193_v41 = vpop.permute.xlu0 %3643 }
 0x30c   : > { %1987 = vmax.xlane.f32.xlu0 %v1986_v25 }
 0x30e   : > { %v1535_v19 = vpop.f32.mrb[28].mxu0  ;;  %v10195_v50 = vpop.permute.xlu1 %3593 }
 0x30f   : > { %v10158_v45 = vadd.f32 %v1535_v19, %v10125_v57  ;;  %v7825_v32 = vpop.f32.mrb[29].mxu0 }
 0x310   : > { %v1538_v42 = vpop.f32.mrb[30].mxu0  ;;  %v1581_v48 = vpop.f32.mrb[28].mxu1 }
 0x311   : > { %v10161_v49 = vadd.f32 %v1581_v48, %v10125_v57  ;;  %v7826_v51 = vpop.f32.mrb[31].mxu0  ;;  %v7831_v60 = vpop.f32.mrb[29].mxu1  ;;  %v1989_v0 = vsel %vm621_vm1, %v10158_v45, -inf }
 0x312   : > { %v1584_v1 = vpop.f32.mrb[30].mxu1  ;;  %1990 = vmax.xlane.f32.xlu1 %v1989_v0 }
 0x313   : > { %v7832_v3 = vpop.f32.mrb[31].mxu1  ;;  %v1992_v5 = vsel %vm621_vm1, %v10161_v49, -inf  ;;  %v10205_v1 = vpop.permute.xlu0 %3543 }
 0x314   : > { %1993 = vmax.xlane.f32.xlu0 %v1992_v5 }
 0x369   : > { %v1627_v12 = vpop.f32.mrb[32].mxu0 }
 0x36a   : > { %v10182_v15 = vadd.f32 %v1627_v12, %v10175_v43  ;;  %v7837_v21 = vpop.f32.mrb[33].mxu0  ;;  %v10209_v12 = vpop.permute.xlu1 %3493 }
 0x36b   : > { %v1630_v8 = vpop.f32.mrb[34].mxu0  ;;  %v1673_v22 = vpop.f32.mrb[32].mxu1 }
 0x36c   : > { %v10185_v17 = vadd.f32 %v1673_v22, %v10175_v43  ;;  %v7838_v24 = vpop.f32.mrb[35].mxu0  ;;  %v7843_v28 = vpop.f32.mrb[33].mxu1  ;;  %v1995_v30 = vsel %vm621_vm1, %v10182_v15, -inf }
 0x36d   : > { %v1676_v35 = vpop.f32.mrb[34].mxu1  ;;  %1996 = vmax.xlane.f32.xlu1 %v1995_v30  ;;  %v10211_v8 = vpop.permute.xlu0 %3843 }
 0x36e   : > { %v7844_v56 = vpop.f32.mrb[35].mxu1  ;;  %v1998_v39 = vsel %vm621_vm1, %v10185_v17, -inf }
 0x36f   : > { %1999 = vmax.xlane.f32.xlu0 %v1998_v39 }
 0x371   : > { %v1719_v18 = vpop.f32.mrb[36].mxu0 }
 0x372   : > { %v10198_v47 = vadd.f32 %v1719_v18, %v10175_v43  ;;  %v7849_v25 = vpop.f32.mrb[37].mxu0 }
 0x373   : > { %v1722_v19 = vpop.f32.mrb[38].mxu0  ;;  %v1765_v32 = vpop.f32.mrb[36].mxu1 }
 0x374   : > { %v10201_v42 = vadd.f32 %v1765_v32, %v10175_v43  ;;  %v7850_v48 = vpop.f32.mrb[39].mxu0  ;;  %v7855_v51 = vpop.f32.mrb[37].mxu1  ;;  %v2001_v60 = vsel %vm621_vm1, %v10198_v47, -inf }
 0x375   : > { %v1768_v0 = vpop.f32.mrb[38].mxu1  ;;  %2002 = vmax.xlane.f32.xlu1 %v2001_v60  ;;  %v10223_v48 = vpop.permute.xlu1 %3793 }
 0x376   : > { %v7856_v3 = vpop.f32.mrb[39].mxu1  ;;  %v2004_v5 = vsel %vm621_vm1, %v10201_v42, -inf  ;;  %v10225_v60 = vpop.permute.xlu0 %3743 }
 0x377   : > { %2005 = vmax.xlane.f32.xlu0 %v2004_v5 }
 0x379   : > { %v1811_v21 = vpop.f32.mrb[40].mxu0 }
 0x37a   : > { %v10214_v22 = vadd.f32 %v1811_v21, %v10175_v43  ;;  %v7861_v24 = vpop.f32.mrb[41].mxu0 }
 0x37b   : > { %v1814_v28 = vpop.f32.mrb[42].mxu0  ;;  %v1857_v30 = vpop.f32.mrb[40].mxu1 }
 0x37c   : > { %v10217_v35 = vadd.f32 %v1857_v30, %v10175_v43  ;;  %v7862_v56 = vpop.f32.mrb[43].mxu0  ;;  %v7867_v39 = vpop.f32.mrb[41].mxu1  ;;  %v2007_v18 = vsel %vm621_vm1, %v10214_v22, -inf }
 0x37d   : > { %v1860_v25 = vpop.f32.mrb[42].mxu1  ;;  %2008 = vmax.xlane.f32.xlu1 %v2007_v18  ;;  %v10235_v39 = vpop.permute.xlu1 %3693 }
 0x37e   : > { %v7868_v19 = vpop.f32.mrb[43].mxu1  ;;  %v2010_v32 = vsel %vm621_vm1, %v10217_v35, -inf }
 0x37f   : > { %2011 = vmax.xlane.f32.xlu0 %v2010_v32 }
 0x381   : > { %v1903_v51 = vpop.f32.mrb[44].mxu0 }
 0x382   : > { %v10228_v0 = vadd.f32 %v1903_v51, %v10175_v43  ;;  %v7873_v3 = vpop.f32.mrb[45].mxu0 }
 0x383   : > { %v1906_v5 = vpop.f32.mrb[46].mxu0  ;;  %v1949_v21 = vpop.f32.mrb[44].mxu1 }
 0x384   : > { %v10231_v24 = vadd.f32 %v1949_v21, %v10175_v43  ;;  %v7874_v28 = vpop.f32.mrb[47].mxu0  ;;  %v7879_v30 = vpop.f32.mrb[45].mxu1  ;;  %v2013_v56 = vsel %vm621_vm1, %v10228_v0, -inf }
 0x385   : > { %v1952_v18 = vpop.f32.mrb[46].mxu1  ;;  %2014 = vmax.xlane.f32.xlu1 %v2013_v56 }
 0x386   : > { %v7880_v25 = vpop.f32.mrb[47].mxu1  ;;  %v2016_v19 = vsel %vm621_vm1, %v10231_v24, -inf }
 0x387   : > { %2017 = vmax.xlane.f32.xlu0 %v2016_v19  ;;  %v1973_v32 = vpop.xlane.xlu0 %1972 }
 0x388   : > { %v2019_v51 = vsub.f32 %v10128_v62, %v1973_v32 }
 0x389   : > { %v1976_v3 = vpop.xlane.xlu1 %1975  ;;  %v2203_v5 = vpop.f32.mrb[48].mxu0 }
 0x38a   : > { %v2035_v21 = vmul.f32 1.442695, %v2019_v51  ;;  %v2020_v28 = vsub.f32 %v10131_v4, %v1976_v3  ;;  %v10242_v30 = vadd.f32 %v2203_v5, %v10125_v57  ;;  %v7885_v31 = vpop.f32.mrb[49].mxu0 }
 0x38b   : > { %v2206_v26 = vpop.f32.mrb[50].mxu0  ;;  %v2249_v18 = vpop.f32.mrb[48].mxu1 }
 0x38c   : > { %8654 = vpow2.f32 %v2035_v21  ;;  %v2037_v56 = vmul.f32 1.442695, %v2020_v28  ;;  %v10245_v25 = vadd.f32 %v2249_v18, %v10125_v57  ;;  %v7886_v19 = vpop.f32.mrb[51].mxu0  ;;  %v7891_v27 = vpop.f32.mrb[49].mxu1  ;;  %v2915_v62 = vsel %vm621_vm1, %v10242_v30, -inf }
 0x38d   : > { %v2252_v32 = vpop.f32.mrb[50].mxu1  ;;  %2916 = vmax.xlane.f32.xlu1 %v2915_v62 }
 0x38e   : > { %8656 = vpow2.f32 %v2037_v56  ;;  %v7892_v4 = vpop.f32.mrb[51].mxu1  ;;  %v2918_v51 = vsel %vm621_vm1, %v10245_v25, -inf }
 0x38f   : > { %2919 = vmax.xlane.f32.xlu0 %v2918_v51  ;;  %v1979_v26 = vpop.xlane.xlu0 %1978 }
 0x390   : > { %v2021_v31 = vsub.f32 %v10138_v2, %v1979_v26 }
 0x391   : > { %v2295_v3 = vpop.f32.mrb[52].mxu0 }
 0x392   : > { %v2039_v5 = vmul.f32 1.442695, %v2021_v31  ;;  %v10253_v21 = vadd.f32 %v2295_v3, %v10125_v57  ;;  %v7897_v27 = vpop.f32.mrb[53].mxu0 }
 0x393   : > { %v2341_v28 = vpop.f32.mrb[52].mxu1  ;;  %v1982_v18 = vpop.xlane.xlu0 %1981 }
 0x394   : > { %8658 = vpow2.f32 %v2039_v5  ;;  %v10256_v19 = vadd.f32 %v2341_v28, %v10125_v57  ;;  %v2022_v56 = vsub.f32 %v10141_v20, %v1982_v18  ;;  %v2298_v62 = vpop.f32.mrb[54].mxu0  ;;  %v7903_v32 = vpop.f32.mrb[53].mxu1  ;;  %v2921_v4 = vsel %vm621_vm1, %v10253_v21, -inf }
 0x395   : > { %v7898_v2 = vpop.f32.mrb[55].mxu0  ;;  %v2344_v51 = vpop.f32.mrb[54].mxu1  ;;  %2922 = vmax.xlane.f32.xlu1 %v2921_v4 }
 0x396   : > { %v10261_v26 = vpop.eup %8654  ;;  %v2041_v31 = vmul.f32 1.442695, %v2022_v56  ;;  %v7904_v3 = vpop.f32.mrb[55].mxu1  ;;  %v2924_v5 = vsel %vm621_vm1, %v10256_v19, -inf }
 0x397   : > { %v1985_v27 = vpop.xlane.xlu1 %1984  ;;  %2925 = vmax.xlane.f32.xlu0 %v2924_v5  ;;  %v2067_v20 = vsel %vm621_vm1, %v10261_v26, 0.0 }
 0x398   : > { %v10267_v28 = vpop.eup %8656  ;;  %8660 = vpow2.f32 %v2041_v31  ;;  %v2023_v18 = vsub.f32 %v10148_v33, %v1985_v27 }
 0x399   : > { %v1988_v62 = vpop.xlane.xlu0 %1987  ;;  %2068 = vadd.xlane.f32.xlu1 %v2067_v20  ;;  %v2387_v32 = vpop.f32.mrb[56].mxu0  ;;  %v2070_v56 = vsel %vm621_vm1, %v10267_v28, 0.0 }
 0x39a   : > { %v2043_v4 = vmul.f32 1.442695, %v2023_v18  ;;  %v2024_v2 = vsub.f32 %v10151_v10, %v1988_v62  ;;  %v10274_v51 = vadd.f32 %v2387_v32, %v10125_v57  ;;  %v7909_v3 = vpop.f32.mrb[57].mxu0 }
 0x39b   : > { %v2433_v5 = vpop.f32.mrb[56].mxu1  ;;  %2071 = vadd.xlane.f32.xlu0 %v2070_v56  ;;  %v2390_v37 = vpop.f32.mrb[58].mxu0 }
 0x39c   : > { %8662 = vpow2.f32 %v2043_v4  ;;  %v2045_v31 = vmul.f32 1.442695, %v2024_v2  ;;  %v10277_v33 = vadd.f32 %v2433_v5, %v10125_v57  ;;  %v7910_v27 = vpop.f32.mrb[59].mxu0  ;;  %v7915_v20 = vpop.f32.mrb[57].mxu1  ;;  %v2927_v44 = vsel %vm621_vm1, %v10274_v51, -inf }
 0x39d   : > { %v2436_v18 = vpop.f32.mrb[58].mxu1  ;;  %2928 = vmax.xlane.f32.xlu1 %v2927_v44 }
 0x39e   : > { %v10281_v10 = vpop.eup %8658  ;;  %8664 = vpow2.f32 %v2045_v31  ;;  %v7916_v62 = vpop.f32.mrb[59].mxu1  ;;  %v2930_v32 = vsel %vm621_vm1, %v10277_v33, -inf }
 0x39f   : > { %v1991_v37 = vpop.xlane.xlu1 %1990  ;;  %2931 = vmax.xlane.f32.xlu0 %v2930_v32  ;;  %v2073_v56 = vsel %vm621_vm1, %v10281_v10, 0.0 }
 0x3a0   : > { %v2025_v4 = vsub.f32 %v10158_v45, %v1991_v37 }
 0x3a1   : > { %v1994_v2 = vpop.xlane.xlu0 %1993  ;;  %2074 = vadd.xlane.f32.xlu1 %v2073_v56  ;;  %v2479_v3 = vpop.f32.mrb[60].mxu0 }
 0x3a2   : > { %v10288_v5 = vpop.eup %8660  ;;  %v2047_v44 = vmul.f32 1.442695, %v2025_v4  ;;  %v2026_v27 = vsub.f32 %v10161_v49, %v1994_v2  ;;  %v10292_v31 = vadd.f32 %v2479_v3, %v10125_v57  ;;  %v7921_v20 = vpop.f32.mrb[61].mxu0 }
 0x3a3   : > { %v2482_v18 = vpop.f32.mrb[62].mxu0  ;;  %v2525_v62 = vpop.f32.mrb[60].mxu1  ;;  %v2076_v32 = vsel %vm621_vm1, %v10288_v5, 0.0 }
 0x3a4   : > { %8666 = vpow2.f32 %v2047_v44  ;;  %v2049_v52 = vmul.f32 1.442695, %v2026_v27  ;;  %v10297_v45 = vadd.f32 %v2525_v62, %v10125_v57  ;;  %v7927_v37 = vpop.f32.mrb[61].mxu1  ;;  %2077 = vadd.xlane.f32.xlu0 %v2076_v32  ;;  %v7922_v56 = vpop.f32.mrb[63].mxu0  ;;  %v2933_v49 = vsel %vm621_vm1, %v10292_v31, -inf }
 0x3a5   : > { %v2528_v4 = vpop.f32.mrb[62].mxu1  ;;  %2934 = vmax.xlane.f32.xlu1 %v2933_v49 }
 0x3a6   : > { %v10301_v2 = vpop.eup %8662  ;;  %8668 = vpow2.f32 %v2049_v52  ;;  %v7928_v3 = vpop.f32.mrb[63].mxu1  ;;  %v2936_v20 = vsel %vm621_vm1, %v10297_v45, -inf }
 0x3a7   : > { %v2079_v44 = vsel %vm621_vm1, %v10301_v2, 0.0 }
 0x3a8   : > { %v10307_v57 = vpop.eup %8664  ;;  %2937 = vmax.xlane.f32.xlu0 %v2936_v20 }
 0x3a9   : > { %2080 = vadd.xlane.f32.xlu1 %v2079_v44  ;;  %v2571_v27 = vpop.f32.mrb[64].mxu0  ;;  %v2082_v52 = vsel %vm621_vm1, %v10307_v57, 0.0 }
 0x3aa   : > { %v10310_v18 = vadd.f32 %v2571_v27, %v10175_v43  ;;  %v7933_v62 = vpop.f32.mrb[65].mxu0 }
 0x3ab   : > { %v2617_v32 = vpop.f32.mrb[64].mxu1  ;;  %v2574_v37 = vpop.f32.mrb[66].mxu0 }
 0x3ac   : > { %v10315_v56 = vadd.f32 %v2617_v32, %v10175_v43  ;;  %2083 = vadd.xlane.f32.xlu0 %v2082_v52  ;;  %v2939_v49 = vsel %vm621_vm1, %v10310_v18, -inf  ;;  %v7934_v4 = vpop.f32.mrb[67].mxu0  ;;  %v7939_v3 = vpop.f32.mrb[65].mxu1 }
 0x3ad   : > { %2940 = vmax.xlane.f32.xlu1 %v2939_v49  ;;  %v2620_v20 = vpop.f32.mrb[66].mxu1 }
 0x3ae   : > { %v10319_v44 = vpop.eup %8666  ;;  %v2942_v27 = vsel %vm621_vm1, %v10315_v56, -inf  ;;  %v7940_v62 = vpop.f32.mrb[67].mxu1 }
 0x3af   : > { %v2085_v37 = vsel %vm621_vm1, %v10319_v44, 0.0 }
 0x3b0   : > { %v10325_v29 = vpop.eup %8668  ;;  %2943 = vmax.xlane.f32.xlu0 %v2942_v27 }
 0x3b1   : > { %2086 = vadd.xlane.f32.xlu1 %v2085_v37  ;;  %v2663_v32 = vpop.f32.mrb[68].mxu0  ;;  %v2088_v3 = vsel %vm621_vm1, %v10325_v29, 0.0 }
 0x3b2   : > { %v10328_v52 = vadd.f32 %v2663_v32, %v10175_v43  ;;  %v7945_v4 = vpop.f32.mrb[69].mxu0 }
 0x3b3   : > { %v2709_v49 = vpop.f32.mrb[68].mxu1  ;;  %v2666_v20 = vpop.f32.mrb[70].mxu0 }
 0x3b4   : > { %v10333_v13 = vadd.f32 %v2709_v49, %v10175_v43  ;;  %2089 = vadd.xlane.f32.xlu0 %v2088_v3  ;;  %v2945_v62 = vsel %vm621_vm1, %v10328_v52, -inf  ;;  %v7951_v38 = vpop.f32.mrb[69].mxu1  ;;  %v7946_v27 = vpop.f32.mrb[71].mxu0 }
 0x3b5   : > { %2946 = vmax.xlane.f32.xlu1 %v2945_v62  ;;  %v2712_v37 = vpop.f32.mrb[70].mxu1 }
 0x3b6   : > { %v2948_v32 = vsel %vm621_vm1, %v10333_v13, -inf  ;;  %v7952_v4 = vpop.f32.mrb[71].mxu1 }
 0x3b8   : > { %2949 = vmax.xlane.f32.xlu0 %v2948_v32 }
 0x3b9   : > { %v2755_v16 = vpop.f32.mrb[72].mxu0 }
 0x3ba   : > { %v10340_v46 = vadd.f32 %v2755_v16, %v10175_v43  ;;  %v7957_v20 = vpop.f32.mrb[73].mxu0 }
 0x3bb   : > { %v2801_v49 = vpop.f32.mrb[72].mxu1  ;;  %v2758_v23 = vpop.f32.mrb[74].mxu0 }
 0x3bc   : > { %v10343_v3 = vadd.f32 %v2801_v49, %v10175_v43  ;;  %v2951_v38 = vsel %vm621_vm1, %v10340_v46, -inf  ;;  %v7958_v62 = vpop.f32.mrb[75].mxu0  ;;  %v7963_v27 = vpop.f32.mrb[73].mxu1 }
 0x3bd   : > { %2952 = vmax.xlane.f32.xlu1 %v2951_v38  ;;  %v2804_v37 = vpop.f32.mrb[74].mxu1 }
 0x3be   : > { %v2954_v32 = vsel %vm621_vm1, %v10343_v3, -inf  ;;  %v7964_v4 = vpop.f32.mrb[75].mxu1 }
 0x3bf   : > { %2955 = vmax.xlane.f32.xlu0 %v2954_v32 }
 0x3c1   : > { %v2847_v16 = vpop.f32.mrb[76].mxu0 }
 0x3c2   : > { %v10350_v20 = vadd.f32 %v2847_v16, %v10175_v43  ;;  %v7969_v23 = vpop.f32.mrb[77].mxu0 }
 0x3c3   : > { %v2893_v63 = vpop.f32.mrb[76].mxu1  ;;  %v2850_v49 = vpop.f32.mrb[78].mxu0 }
 0x3c4   : > { %v10353_v58 = vadd.f32 %v2893_v63, %v10175_v43  ;;  %v2957_v62 = vsel %vm621_vm1, %v10350_v20, -inf  ;;  %v7975_v38 = vpop.f32.mrb[77].mxu1  ;;  %v7970_v27 = vpop.f32.mrb[79].mxu0 }
 0x3c5   : > { %2958 = vmax.xlane.f32.xlu1 %v2957_v62  ;;  %v2896_v37 = vpop.f32.mrb[78].mxu1 }
 0x3c6   : > { %v2960_v32 = vsel %vm621_vm1, %v10353_v58, -inf  ;;  %v7976_v4 = vpop.f32.mrb[79].mxu1 }
 0x3c7   : > { %2961 = vmax.xlane.f32.xlu0 %v2960_v32 }
 0x3dd   : > { %4883 = vrot.lane.b32.xlu0 %v9845_v11, %s9175_s19 }
 0x3fa   : > { %v1997_v16 = vpop.xlane.xlu1 %1996 }
 0x3fb   : > { %v2027_v23 = vsub.f32 %v10182_v15, %v1997_v16 }
 0x3fc   : > { %v2000_v63 = vpop.xlane.xlu0 %1999 }
 0x3fd   : > { %v2051_v43 = vmul.f32 1.442695, %v2027_v23  ;;  %v2028_v49 = vsub.f32 %v10185_v17, %v2000_v63 }
 0x3ff   : > { %8670 = vpow2.f32 %v2051_v43  ;;  %v2053_v38 = vmul.f32 1.442695, %v2028_v49 }
 0x401   : > { %8672 = vpow2.f32 %v2053_v38 }
 0x402   : > { %v2003_v62 = vpop.xlane.xlu1 %2002 }
 0x403   : > { %v2029_v27 = vsub.f32 %v10198_v47, %v2003_v62 }
 0x404   : > { %v2006_v37 = vpop.xlane.xlu0 %2005 }
 0x405   : > { %v2055_v54 = vmul.f32 1.442695, %v2029_v27  ;;  %v2030_v32 = vsub.f32 %v10201_v42, %v2006_v37 }
 0x407   : > { %8674 = vpow2.f32 %v2055_v54  ;;  %v2057_v4 = vmul.f32 1.442695, %v2030_v32 }
 0x409   : > { %v10365_v11 = vpop.eup %8670  ;;  %8676 = vpow2.f32 %v2057_v4 }
 0x40a   : > { %v2009_v15 = vpop.xlane.xlu1 %2008  ;;  %v2091_v16 = vsel %vm621_vm1, %v10365_v11, 0.0 }
 0x40b   : > { %v10369_v17 = vpop.eup %8672  ;;  %v2031_v23 = vsub.f32 %v10214_v22, %v2009_v15  ;;  %2092 = vadd.xlane.f32.xlu1 %v2091_v16 }
 0x40c   : > { %v2012_v63 = vpop.xlane.xlu0 %2011  ;;  %v2094_v47 = vsel %vm621_vm1, %v10369_v17, 0.0 }
 0x40d   : > { %v2059_v43 = vmul.f32 1.442695, %v2031_v23  ;;  %v2032_v54 = vsub.f32 %v10217_v35, %v2012_v63  ;;  %2095 = vadd.xlane.f32.xlu0 %v2094_v47 }
 0x40f   : > { %8678 = vpow2.f32 %v2059_v43  ;;  %v2061_v42 = vmul.f32 1.442695, %v2032_v54 }
 0x411   : > { %v10375_v49 = vpop.eup %8674  ;;  %8680 = vpow2.f32 %v2061_v42 }
 0x412   : > { %v2015_v38 = vpop.xlane.xlu1 %2014  ;;  %v2097_v62 = vsel %vm621_vm1, %v10375_v49, 0.0 }
 0x413   : > { %v10379_v27 = vpop.eup %8676  ;;  %v2033_v22 = vsub.f32 %v10228_v0, %v2015_v38  ;;  %2098 = vadd.xlane.f32.xlu1 %v2097_v62 }
 0x414   : > { %v2018_v37 = vpop.xlane.xlu0 %2017  ;;  %v2100_v32 = vsel %vm621_vm1, %v10379_v27, 0.0 }
 0x415   : > { %v2063_v35 = vmul.f32 1.442695, %v2033_v22  ;;  %v2034_v4 = vsub.f32 %v10231_v24, %v2018_v37  ;;  %2101 = vadd.xlane.f32.xlu0 %v2100_v32 }
 0x417   : > { %8682 = vpow2.f32 %v2063_v35  ;;  %v2065_v15 = vmul.f32 1.442695, %v2034_v4 }
 0x419   : > { %v10385_v16 = vpop.eup %8678  ;;  %8684 = vpow2.f32 %v2065_v15 }
 0x41a   : > { %v2917_v23 = vpop.xlane.xlu1 %2916  ;;  %v2103_v63 = vsel %vm621_vm1, %v10385_v16, 0.0 }
 0x41b   : > { %v10389_v47 = vpop.eup %8680  ;;  %v2963_v0 = vsub.f32 %v10242_v30, %v2917_v23  ;;  %2104 = vadd.xlane.f32.xlu1 %v2103_v63 }
 0x41c   : > { %v2920_v43 = vpop.xlane.xlu0 %2919  ;;  %v2106_v54 = vsel %vm621_vm1, %v10389_v47, 0.0 }
 0x41d   : > { %v2979_v24 = vmul.f32 1.442695, %v2963_v0  ;;  %v2964_v42 = vsub.f32 %v10245_v25, %v2920_v43  ;;  %2107 = vadd.xlane.f32.xlu0 %v2106_v54 }
 0x41f   : > { %8686 = vpow2.f32 %v2979_v24  ;;  %v2981_v38 = vmul.f32 1.442695, %v2964_v42 }
 0x421   : > { %v10395_v62 = vpop.eup %8682  ;;  %8688 = vpow2.f32 %v2981_v38 }
 0x422   : > { %v2923_v22 = vpop.xlane.xlu1 %2922  ;;  %v2109_v37 = vsel %vm621_vm1, %v10395_v62, 0.0 }
 0x423   : > { %v10399_v32 = vpop.eup %8684  ;;  %v2965_v30 = vsub.f32 %v10253_v21, %v2923_v22  ;;  %2110 = vadd.xlane.f32.xlu1 %v2109_v37 }
 0x424   : > { %v2926_v35 = vpop.xlane.xlu0 %2925  ;;  %v2112_v4 = vsel %vm621_vm1, %v10399_v32, 0.0 }
 0x425   : > { %v2983_v25 = vmul.f32 1.442695, %v2965_v30  ;;  %v2966_v15 = vsub.f32 %v10256_v19, %v2926_v35  ;;  %2113 = vadd.xlane.f32.xlu0 %v2112_v4 }
 0x426   : > { %v2069_v23 = vpop.xlane.xlu1 %2068 }
 0x427   : > { %8690 = vpow2.f32 %v2983_v25  ;;  %v2985_v63 = vmul.f32 1.442695, %v2966_v15 }
 0x428   : > { %8692 = vrcp.f32 %v2069_v23  ;;  %v2072_v0 = vpop.xlane.xlu0 %2071 }
 0x429   : > { %v10405_v43 = vpop.eup %8686  ;;  %8694 = vpow2.f32 %v2985_v63 }
 0x42a   : > { %8696 = vrcp.f32 %v2072_v0  ;;  %v10407_v54 = vpop.xlane.xlu1 %2928  ;;  %v3011_v21 = vsel %vm621_vm1, %v10405_v43, 0.0 }
 0x42b   : > { %v10411_v24 = vpop.eup %8688  ;;  %3012 = vadd.xlane.f32.xlu1 %v3011_v21 }
 0x42c   : > { %v2932_v42 = vpop.xlane.xlu0 %2931  ;;  %v3014_v19 = vsel %vm621_vm1, %v10411_v24, 0.0 }
 0x42d   : > { %v2968_v38 = vsub.f32 %v10277_v33, %v2932_v42  ;;  %3015 = vadd.xlane.f32.xlu0 %v3014_v19 }
 0x42e   : > { %v2075_v22 = vpop.xlane.xlu1 %2074 }
 0x42f   : > { %v2989_v37 = vmul.f32 1.442695, %v2968_v38  ;;  %8698 = vrcp.f32 %v2075_v22 }
 0x431   : > { %v10416_v30 = vpop.eup %8690  ;;  %8700 = vpow2.f32 %v2989_v37  ;;  %v2078_v35 = vpop.xlane.xlu0 %2077  ;;  %v10433_v37 = vsel %vm634_vm0, %v10167_v6, 0 }
 0x432   : > { %v8693_v4 = vpop.eup %8692  ;;  %8702 = vrcp.f32 %v2078_v35  ;;  %v10418_v25 = vpop.xlane.xlu1 %2934  ;;  %v3017_v15 = vsel %vm621_vm1, %v10416_v30, 0.0 }
 0x433   : > { %v10422_v23 = vpop.eup %8694  ;;  %3018 = vadd.xlane.f32.xlu1 %v3017_v15  ;;  %v2131_v33 = vmul.f32 %v8693_v4, %v10261_v26  ;;  %v11529_v4 = vmov 0.0  }
 0x434   : > { %v8697_v63 = vpop.eup %8696  ;;  %v3020_v0 = vsel %vm621_vm1, %v10422_v23, 0.0 }
 0x435   : > { %3021 = vadd.xlane.f32.xlu0 %v3020_v0  ;;  %v2938_v21 = vpop.xlane.xlu0 %2937  ;;  %v10427_v42 = vpack.c.bf16 %v2131_v33, %v2131_v33  ;;  %v2132_v19 = vmul.f32 %v8697_v63, %v10267_v28  ;;  %v10444_v28 = vsel %vm634_vm0, %v10169_v7, 0 }
 0x436   : > { %v2970_v38 = vsub.f32 %v10297_v45, %v2938_v21  ;;  %v2081_v22 = vpop.xlane.xlu1 %2080 }
 0x437   : > { %7980 = vmatmul.mubr.msk.bf16.vlgmr.msra.gmra.mrb[80].mxu0 %vm621_vm1, %v10427_v42  ;;  %v10437_v26 = vpack.c.bf16 %v2132_v19, %v2132_v19  ;;  %8704 = vrcp.f32 %v2081_v22 }
 0x438   : > { %v2993_v35 = vmul.f32 1.442695, %v2970_v38  ;;  %7990 = vmatpush3.bf16.msra.mxu0 %v10433_v37  ;;  %7991 = vmatprep.mubr.msk.bf16.mxu0 %vm9177_vm2, %v11529_v4 }
 0x439   : > { %7986 = vmatmul.mubr.msk.bf16.vlgmr.msra.gmra.mrb[80].mxu1 %vm621_vm1, %v10437_v26  ;;  %v2084_v6 = vpop.xlane.xlu0 %2083  ;;  %8001 = vmatprep.subr.bf16.mxu0 %v11529_v4  ;;  %v8699_v45 = vpop.eup %8698 }
 0x43a   : > { %8706 = vpow2.f32 %v2993_v35  ;;  %7996 = vmatpush3.bf16.msra.mxu1 %v10444_v28  ;;  %v10450_v15 = vpop.xlane.xlu1 %2940  ;;  %7997 = vmatprep.mubr.msk.bf16.mxu1 %vm9177_vm2, %v11529_v4  ;;  %v2133_v7 = vmul.f32 %v8699_v45, %v10281_v10 }
 0x43b   : > { %v10454_v33 = vpop.eup %8700  ;;  %8708 = vrcp.f32 %v2084_v6  ;;  %8007 = vmatprep.subr.bf16.mxu1 %v11529_v4  ;;  %v10466_v6 = vsel %vm634_vm0, %v10171_v36, 0 }
 0x43c   : > { %v8703_v63 = vpop.eup %8702  ;;  %v3026_v0 = vsel %vm621_vm1, %v10454_v33, 0.0  ;;  %v10460_v19 = vpack.c.bf16 %v2133_v7, %v2133_v7 }
 0x43d   : > { %3027 = vadd.xlane.f32.xlu0 %v3026_v0  ;;  %v2944_v21 = vpop.xlane.xlu0 %2943  ;;  %v2134_v38 = vmul.f32 %v8703_v63, %v10288_v5  ;;  %v10477_v5 = vsel %vm634_vm0, %v10173_v9, 0 }
 0x43e   : > { %v2972_v22 = vsub.f32 %v10315_v56, %v2944_v21  ;;  %v2087_v35 = vpop.xlane.xlu1 %2086 }
 0x43f   : > { %7992 = vmatmul.mubr.msk.bf16.vlgmr.msra.gmra.mrb[84].mxu0 %vm621_vm1, %v10460_v19  ;;  %v10470_v10 = vpack.c.bf16 %v2134_v38, %v2134_v38  ;;  %8710 = vrcp.f32 %v2087_v35 }
 0x440   : > { %v2997_v45 = vmul.f32 1.442695, %v2972_v22  ;;  %8002 = vmatpush3.bf16.msra.mxu0 %v10466_v6  ;;  %8003 = vmatprep.mubr.msk.bf16.mxu0 %vm9177_vm2, %v11529_v4 }
 0x441   : > { %7998 = vmatmul.mubr.msk.bf16.vlgmr.msra.gmra.mrb[84].mxu1 %vm621_vm1, %v10470_v10  ;;  %v2090_v36 = vpop.xlane.xlu0 %2089  ;;  %8013 = vmatprep.subr.bf16.mxu0 %v11529_v4  ;;  %v8705_v56 = vpop.eup %8704 }
 0x442   : > { %8712 = vpow2.f32 %v2997_v45  ;;  %8008 = vmatpush3.bf16.msra.mxu1 %v10477_v5  ;;  %8009 = vmatprep.mubr.msk.bf16.mxu1 %vm9177_vm2, %v11529_v4  ;;  %v2135_v7 = vmul.f32 %v8705_v56, %v10301_v2  ;;  %v10499_v2 = vsel %vm634_vm0, %v10177_v61, 0 }
 0x443   : > { %8714 = vrcp.f32 %v2090_v36  ;;  %8019 = vmatprep.subr.bf16.mxu1 %v11529_v4 }
 0x444   : > { %v10487_v9 = vpop.eup %8706  ;;  %4931 = vrot.lane.b32.xlu1 %v9855_v34, %s9175_s19  ;;  %v10493_v38 = vpack.c.bf16 %v2135_v7, %v2135_v7 }
 0x445   : > { %v8709_v63 = vpop.eup %8708  ;;  %v2950_v0 = vpop.xlane.xlu0 %2949  ;;  %v3032_v21 = vsel %vm621_vm1, %v10487_v9, 0.0 }
 0x446   : > { %v2974_v22 = vsub.f32 %v10333_v13, %v2950_v0  ;;  %3033 = vadd.xlane.f32.xlu0 %v3032_v21  ;;  %v2136_v35 = vmul.f32 %v8709_v63, %v10307_v57  ;;  %v10511_v57 = vsel %vm634_vm0, %v10179_v14, 0 }
 0x447   : > { %8004 = vmatmul.mubr.msk.bf16.vlgmr.msra.gmra.mrb[88].mxu0 %vm621_vm1, %v10493_v38 }
 0x448   : > { %v3001_v34 = vmul.f32 1.442695, %v2974_v22  ;;  %8014 = vmatpush3.bf16.msra.mxu0 %v10499_v2  ;;  %v10504_v45 = vpack.c.bf16 %v2136_v35, %v2136_v35  ;;  %8015 = vmatprep.mubr.msk.bf16.mxu0 %vm9177_vm2, %v11529_v4 }
 0x449   : > { %8025 = vmatprep.subr.bf16.mxu0 %v11529_v4  ;;  %v8711_v13 = vpop.eup %8710 }
 0x44a   : > { %8716 = vpow2.f32 %v3001_v34  ;;  %8010 = vmatmul.mubr.msk.bf16.vlgmr.msra.gmra.mrb[88].mxu1 %vm621_vm1, %v10504_v45  ;;  %v2137_v61 = vmul.f32 %v8711_v13, %v10319_v44  ;;  %v10530_v44 = vsel %vm634_vm0, %v10209_v12, 0  ;;  %v2967_v12 = vsub.f32 %v10274_v51, %v10407_v54 }
 0x44b   : > { %8020 = vmatpush3.bf16.msra.mxu1 %v10511_v57  ;;  %8021 = vmatprep.mubr.msk.bf16.mxu1 %vm9177_vm2, %v11529_v4  ;;  %v2969_v51 = vsub.f32 %v10292_v31, %v10418_v25 }
 0x44c   : > { %v10519_v36 = vpop.eup %8712  ;;  %v2956_v56 = vpop.xlane.xlu0 %2955  ;;  %8031 = vmatprep.subr.bf16.mxu1 %v11529_v4  ;;  %v10525_v0 = vpack.c.bf16 %v2137_v61, %v2137_v61  ;;  %v2987_v61 = vmul.f32 1.442695, %v2967_v12 }
 0x44d   : > { %v8715_v7 = vpop.eup %8714  ;;  %v2976_v14 = vsub.f32 %v10343_v3, %v2956_v56  ;;  %v3038_v63 = vsel %vm621_vm1, %v10519_v36, 0.0  ;;  %v2991_v56 = vmul.f32 1.442695, %v2969_v51 }
 0x44e   : > { %3039 = vadd.xlane.f32.xlu0 %v3038_v63  ;;  %v2138_v21 = vmul.f32 %v8715_v7, %v10325_v29  ;;  %v10542_v29 = vsel %vm634_vm0, %v10205_v1, 0  ;;  %v2971_v7 = vsub.f32 %v10310_v18, %v10450_v15  ;;  %v2947_v63 = vpop.xlane.xlu1 %2946 }
 0x44f   : > { %v3005_v22 = vmul.f32 1.442695, %v2976_v14  ;;  %8016 = vmatmul.mubr.msk.bf16.vlgmr.msra.gmra.mrb[92].mxu0 %vm621_vm1, %v10525_v0 }
 0x450   : > { %8026 = vmatpush3.bf16.msra.mxu0 %v10530_v44  ;;  %v10535_v35 = vpack.c.bf16 %v2138_v21, %v2138_v21  ;;  %8027 = vmatprep.mubr.msk.bf16.mxu0 %vm9177_vm2, %v11529_v4  ;;  %v2995_v21 = vmul.f32 1.442695, %v2971_v7 }
 0x451   : > { %8718 = vpow2.f32 %v3005_v22  ;;  %8037 = vmatprep.subr.bf16.mxu0 %v11529_v4  ;;  %v2973_v22 = vsub.f32 %v10328_v52, %v2947_v63 }
 0x452   : > { %8022 = vmatmul.mubr.msk.bf16.vlgmr.msra.gmra.mrb[92].mxu1 %vm621_vm1, %v10535_v35  ;;  %v2953_v31 = vpop.xlane.xlu1 %2952 }
 0x453   : > { %8032 = vmatpush3.bf16.msra.mxu1 %v10542_v29  ;;  %8033 = vmatprep.mubr.msk.bf16.mxu1 %vm9177_vm2, %v11529_v4  ;;  %v2999_v25 = vmul.f32 1.442695, %v2973_v22  ;;  %v2975_v12 = vsub.f32 %v10340_v46, %v2953_v31 }
 0x454   : > { %v10551_v3 = vpop.eup %8716  ;;  %v2962_v34 = vpop.xlane.xlu0 %2961  ;;  %8043 = vmatprep.subr.bf16.mxu1 %v11529_v4 }
 0x455   : > { %v2978_v13 = vsub.f32 %v10353_v58, %v2962_v34  ;;  %v3044_v1 = vsel %vm621_vm1, %v10551_v3, 0.0 }
 0x456   : > { %3045 = vadd.xlane.f32.xlu0 %v3044_v1  ;;  %v3003_v1 = vmul.f32 1.442695, %v2975_v12 }
 0x457   : > { %v3009_v54 = vmul.f32 1.442695, %v2978_v13  ;;  %v2959_v13 = vpop.xlane.xlu1 %2958 }
 0x459   : > { %8720 = vpow2.f32 %v3009_v54 }
 0x45a   : > { %8722 = vpow2.f32 %v2987_v61  ;;  %v2977_v61 = vsub.f32 %v10350_v20, %v2959_v13 }
 0x45b   : > { %v10561_v14 = vpop.eup %8718  ;;  %8724 = vpow2.f32 %v2991_v56 }
 0x45c   : > { %v3050_v58 = vsel %vm621_vm1, %v10561_v14, 0.0  ;;  %8726 = vpow2.f32 %v2995_v21  ;;  %v3007_v46 = vmul.f32 1.442695, %v2977_v61 }
 0x45d   : > { %3051 = vadd.xlane.f32.xlu0 %v3050_v58  ;;  %8728 = vpow2.f32 %v2999_v25  ;;  %v10596_v25 = vpop.permute.xlu0 %4883 }
 0x45e   : > { %8730 = vpow2.f32 %v3003_v1 }
 0x45f   : > { %8732 = vpow2.f32 %v3007_v46 }
 0x463   : > { %v10567_v34 = vpop.eup %8720 }
 0x464   : > { %v10569_v18 = vpop.eup %8722  ;;  %v3056_v15 = vsel %vm621_vm1, %v10567_v34, 0.0 }
 0x465   : > { %3057 = vadd.xlane.f32.xlu0 %v3056_v15  ;;  %v3023_v52 = vsel %vm621_vm1, %v10569_v18, 0.0  ;;  %v10576_v51 = vpop.eup %8724 }
 0x466   : > { %v3029_v54 = vsel %vm621_vm1, %v10576_v51, 0.0  ;;  %v10580_v56 = vpop.eup %8726 }
 0x467   : > { %v3035_v7 = vsel %vm621_vm1, %v10580_v56, 0.0  ;;  %v10584_v63 = vpop.eup %8728 }
 0x468   : > { %3024 = vadd.xlane.f32.xlu1 %v3023_v52  ;;  %v3041_v20 = vsel %vm621_vm1, %v10584_v63, 0.0  ;;  %v10588_v58 = vpop.eup %8730 }
 0x469   : > { %v3047_v21 = vsel %vm621_vm1, %v10588_v58, 0.0  ;;  %v10592_v22 = vpop.eup %8732 }
 0x46a   : > { %v3053_v31 = vsel %vm621_vm1, %v10592_v22, 0.0 }
 0x46c   : > { %3030 = vadd.xlane.f32.xlu1 %v3029_v54 }
 0x470   : > { %3036 = vadd.xlane.f32.xlu1 %v3035_v7 }
 0x474   : > { %3042 = vadd.xlane.f32.xlu1 %v3041_v20  ;;  %v10604_v20 = vsel %vm634_vm0, %v10195_v50, 0 }
 0x478   : > { %3048 = vadd.xlane.f32.xlu1 %v3047_v21 }
 0x47c   : > { %3054 = vadd.xlane.f32.xlu1 %v3053_v31 }
 0x498   : > { %v2093_v12 = vpop.xlane.xlu1 %2092 }
 0x499   : > { %8734 = vrcp.f32 %v2093_v12 }
 0x49a   : > { %v2096_v13 = vpop.xlane.xlu0 %2095 }
 0x49b   : > { %8736 = vrcp.f32 %v2096_v13 }
 0x4a0   : > { %v2099_v15 = vpop.xlane.xlu1 %2098 }
 0x4a1   : > { %8738 = vrcp.f32 %v2099_v15 }
 0x4a2   : > { %v2102_v1 = vpop.xlane.xlu0 %2101 }
 0x4a3   : > { %v8735_v61 = vpop.eup %8734  ;;  %8740 = vrcp.f32 %v2102_v1  ;;  %v10630_v1 = vsel %vm634_vm0, %v10235_v39, 0 }
 0x4a4   : > { %v2139_v52 = vmul.f32 %v8735_v61, %v10365_v11  ;;  %v10615_v11 = vsel %vm634_vm0, %v10193_v41, 0 }
 0x4a5   : > { %v8737_v46 = vpop.eup %8736 }
 0x4a6   : > { %v2140_v54 = vmul.f32 %v8737_v46, %v10369_v17  ;;  %v10600_v7 = vpack.c.bf16 %v2139_v52, %v2139_v52 }
 0x4a8   : > { %8028 = vmatmul.mubr.msk.bf16.vlgmr.msra.gmra.mrb[96].mxu0 %vm621_vm1, %v10600_v7  ;;  %v2105_v21 = vpop.xlane.xlu1 %2104  ;;  %v10608_v31 = vpack.c.bf16 %v2140_v54, %v2140_v54 }
 0x4a9   : > { %8038 = vmatpush3.bf16.msra.mxu0 %v10604_v20  ;;  %8742 = vrcp.f32 %v2105_v21  ;;  %8039 = vmatprep.mubr.msk.bf16.mxu0 %vm9177_vm2, %v11529_v4 }
 0x4aa   : > { %8034 = vmatmul.mubr.msk.bf16.vlgmr.msra.gmra.mrb[96].mxu1 %vm621_vm1, %v10608_v31  ;;  %v2108_v50 = vpop.xlane.xlu0 %2107  ;;  %8049 = vmatprep.subr.bf16.mxu0 %v11529_v4 }
 0x4ab   : > { %v8739_v17 = vpop.eup %8738  ;;  %8044 = vmatpush3.bf16.msra.mxu1 %v10615_v11  ;;  %8744 = vrcp.f32 %v2108_v50  ;;  %8045 = vmatprep.mubr.msk.bf16.mxu1 %vm9177_vm2, %v11529_v4  ;;  %v10656_v50 = vsel %vm634_vm0, %v10223_v48, 0 }
 0x4ac   : > { %v2141_v12 = vmul.f32 %v8739_v17, %v10375_v49  ;;  %8055 = vmatprep.subr.bf16.mxu1 %v11529_v4  ;;  %v10641_v49 = vsel %vm634_vm0, %v10225_v60, 0 }
 0x4ad   : > { %v8741_v13 = vpop.eup %8740 }
 0x4ae   : > { %v2142_v41 = vmul.f32 %v8741_v13, %v10379_v27  ;;  %v10626_v15 = vpack.c.bf16 %v2141_v12, %v2141_v12 }
 0x4b0   : > { %8040 = vmatmul.mubr.msk.bf16.vlgmr.msra.gmra.mrb[100].mxu0 %vm621_vm1, %v10626_v15  ;;  %v2111_v61 = vpop.xlane.xlu1 %2110  ;;  %v10634_v52 = vpack.c.bf16 %v2142_v41, %v2142_v41 }
 0x4b1   : > { %8050 = vmatpush3.bf16.msra.mxu0 %v10630_v1  ;;  %8746 = vrcp.f32 %v2111_v61  ;;  %8051 = vmatprep.mubr.msk.bf16.mxu0 %vm9177_vm2, %v11529_v4 }
 0x4b2   : > { %8046 = vmatmul.mubr.msk.bf16.vlgmr.msra.gmra.mrb[100].mxu1 %vm621_vm1, %v10634_v52  ;;  %v2114_v39 = vpop.xlane.xlu0 %2113  ;;  %8061 = vmatprep.subr.bf16.mxu0 %v11529_v4 }
 0x4b3   : > { %v8743_v27 = vpop.eup %8742  ;;  %8056 = vmatpush3.bf16.msra.mxu1 %v10641_v49  ;;  %8748 = vrcp.f32 %v2114_v39  ;;  %8057 = vmatprep.mubr.msk.bf16.mxu1 %vm9177_vm2, %v11529_v4 }
 0x4b4   : > { %v2143_v46 = vmul.f32 %v8743_v27, %v10385_v16  ;;  %8067 = vmatprep.subr.bf16.mxu1 %v11529_v4  ;;  %v10667_v16 = vsel %vm634_vm0, %v10211_v8, 0 }
 0x4b5   : > { %v8745_v54 = vpop.eup %8744 }
 0x4b6   : > { %v2144_v60 = vmul.f32 %v8745_v54, %v10389_v47  ;;  %v10652_v21 = vpack.c.bf16 %v2143_v46, %v2143_v46 }
 0x4b8   : > { %8052 = vmatmul.mubr.msk.bf16.vlgmr.msra.gmra.mrb[104].mxu0 %vm621_vm1, %v10652_v21  ;;  %v3013_v17 = vpop.xlane.xlu1 %3012  ;;  %v10660_v12 = vpack.c.bf16 %v2144_v60, %v2144_v60 }
 0x4b9   : > { %8062 = vmatpush3.bf16.msra.mxu0 %v10656_v50  ;;  %8750 = vrcp.f32 %v3013_v17  ;;  %8063 = vmatprep.mubr.msk.bf16.mxu0 %vm9177_vm2, %v11529_v4 }
 0x4ba   : > { %8058 = vmatmul.mubr.msk.bf16.vlgmr.msra.gmra.mrb[104].mxu1 %vm621_vm1, %v10660_v12  ;;  %v3016_v48 = vpop.xlane.xlu0 %3015  ;;  %8073 = vmatprep.subr.bf16.mxu0 %v11529_v4 }
 0x4bb   : > { %v8747_v47 = vpop.eup %8746  ;;  %8068 = vmatpush3.bf16.msra.mxu1 %v10667_v16  ;;  %8752 = vrcp.f32 %v3016_v48  ;;  %8069 = vmatprep.mubr.msk.bf16.mxu1 %vm9177_vm2, %v11529_v4 }
 0x4bc   : > { %v2145_v13 = vmul.f32 %v8747_v47, %v10395_v62  ;;  %8079 = vmatprep.subr.bf16.mxu1 %v11529_v4 }
 0x4bd   : > { %v8749_v41 = vpop.eup %8748 }
 0x4be   : > { %v2146_v8 = vmul.f32 %v8749_v41, %v10399_v32  ;;  %v10678_v61 = vpack.c.bf16 %v2145_v13, %v2145_v13 }
 0x4c0   : > { %8064 = vmatmul.mubr.msk.bf16.vlgmr.msra.gmra.mrb[108].mxu0 %vm621_vm1, %v10678_v61  ;;  %v3019_v39 = vpop.xlane.xlu1 %3018  ;;  %v10682_v27 = vpack.c.bf16 %v2146_v8, %v2146_v8 }
 0x4c1   : > { %8074 = vmatpush3.bf16.msra.mxu0 %v10110_v53  ;;  %8754 = vrcp.f32 %v3019_v39  ;;  %8075 = vmatprep.mubr.msk.bf16.mxu0 %vm9177_vm2, %v11529_v4 }
 0x4c2   : > { %8070 = vmatmul.mubr.msk.bf16.vlgmr.msra.gmra.mrb[108].mxu1 %vm621_vm1, %v10682_v27  ;;  %v3022_v62 = vpop.xlane.xlu0 %3021  ;;  %8085 = vmatprep.subr.bf16.mxu0 %v11529_v4 }
 0x4c3   : > { %v8751_v32 = vpop.eup %8750  ;;  %8080 = vmatpush3.bf16.msra.mxu1 %v10117_v55  ;;  %8756 = vrcp.f32 %v3022_v62  ;;  %8081 = vmatprep.mubr.msk.bf16.mxu1 %vm9177_vm2, %v11529_v4 }
 0x4c4   : > { %v3075_v46 = vmul.f32 %v8751_v32, %v10405_v43  ;;  %8091 = vmatprep.subr.bf16.mxu1 %v11529_v4 }
 0x4c5   : > { %v8753_v53 = vpop.eup %8752 }
 0x4c6   : > { %v10695_v54 = vpack.c.bf16 %v3075_v46, %v3075_v46  ;;  %v3076_v60 = vmul.f32 %v8753_v53, %v10411_v24 }
 0x4c8   : > { %3891 = vxpose.xlu1.c.b16.start.end [1/1] (short) (narrow) %v10695_v54, 16  ;;  %v10699_v17 = vpack.c.bf16 %v3076_v60, %v3076_v60 }
 0x4ca   : > { %3950 = vxpose.xlu0.c.b16.start.end [1/1] (short) (narrow) %v10699_v17, 16  ;;  %v3028_v55 = vpop.xlane.xlu0 %3027 }
 0x4cb   : > { %v8755_v48 = vpop.eup %8754  ;;  %8758 = vrcp.f32 %v3028_v55 }
 0x4cc   : > { %v3077_v47 = vmul.f32 %v8755_v48, %v10416_v30 }
 0x4cd   : > { %v8757_v13 = vpop.eup %8756 }
 0x4ce   : > { %v10703_v43 = vpack.c.bf16 %v3077_v47, %v3077_v47  ;;  %v3078_v41 = vmul.f32 %v8757_v13, %v10422_v23 }
 0x4d0   : > { %4009 = vxpose.xlu1.c.b16.start.end [1/1] (short) (narrow) %v10703_v43, 16  ;;  %v10707_v8 = vpack.c.bf16 %v3078_v41, %v3078_v41 }
 0x4d2   : > { %4068 = vxpose.xlu0.c.b16.start.end [1/1] (short) (narrow) %v10707_v8, 16 }
 0x4d3   : > { %v3034_v24 = vpop.xlane.xlu0 %3033 }
 0x4d4   : > { %8760 = vrcp.f32 %v3034_v24 }
 0x4d5   : > { %v8759_v39 = vpop.eup %8758 }
 0x4d6   : > { %v3080_v62 = vmul.f32 %v8759_v39, %v10454_v33  ;;  %v10722_v33 = vpop.permute.xlu1 %4931 }
 0x4d8   : > { %v10711_v32 = vpack.c.bf16 %v3080_v62, %v3080_v62 }
 0x4da   : > { %4186 = vxpose.xlu0.c.b16.start.end [1/1] (short) (narrow) %v10711_v32, 16 }
 0x4db   : > { %v3040_v30 = vpop.xlane.xlu0 %3039 }
 0x4dc   : > { %8762 = vrcp.f32 %v3040_v30 }
 0x4de   : > { %v8761_v46 = vpop.eup %8760 }
 0x4df   : > { %v3082_v23 = vmul.f32 %v8761_v46, %v10487_v9 }
 0x4e1   : > { %v10715_v53 = vpack.c.bf16 %v3082_v23, %v3082_v23 }
 0x4e3   : > { %4304 = vxpose.xlu0.c.b16.start.end [1/1] (short) (narrow) %v10715_v53, 16  ;;  %v3046_v9 = vpop.xlane.xlu0 %3045 }
 0x4e6   : > { %v8763_v60 = vpop.eup %8762 }
 0x4e7   : > { %v3084_v55 = vmul.f32 %v8763_v60, %v10519_v36 }
 0x4e9   : > { %v10719_v48 = vpack.c.bf16 %v3084_v55, %v3084_v55 }
 0x4ea   : > { %v3052_v39 = vpop.xlane.xlu0 %3051 }
 0x4eb   : > { %11530 = vst [vmem:[#allocation48_spill] sm:$0xff] %v10719_v48  ;;  %4422 = vxpose.xlu0.c.b16.start.end [1/1] (short) (narrow) %v10719_v48, 16 }
 0x4f2   : > { %v3058_v23 = vpop.xlane.xlu0 %3057 }
 0x4f4   : > { %4979 = vrot.lane.b32.xlu0 %v9859_v40, %s9175_s19 }
 0x4f5   : > { %v3025_v47 = vpop.xlane.xlu1 %3024 }
 0x4f6   : > { %8764 = vrcp.f32 %v3025_v47 }
 0x4f9   : > { %v3031_v13 = vpop.xlane.xlu1 %3030 }
 0x4fa   : > { %8766 = vrcp.f32 %v3031_v13 }
 0x4fd   : > { %v3037_v41 = vpop.xlane.xlu1 %3036 }
 0x4fe   : > { %8768 = vrcp.f32 %v3037_v41 }
 0x4ff   : > { %8770 = vrcp.f32 %v3046_v9 }
 0x500   : > { %v8765_v24 = vpop.eup %8764 }
 0x501   : > { %v3043_v36 = vpop.xlane.xlu1 %3042  ;;  %v3079_v62 = vmul.f32 %v8765_v24, %v10569_v18 }
 0x502   : > { %8772 = vrcp.f32 %v3043_v36 }
 0x503   : > { %8774 = vrcp.f32 %v3052_v39  ;;  %v10727_v30 = vpack.c.bf16 %v3079_v62, %v3079_v62 }
 0x504   : > { %v8767_v46 = vpop.eup %8766 }
 0x505   : > { %4127 = vxpose.xlu1.c.b16.start.end [1/1] (short) (narrow) %v10727_v30, 16  ;;  %v3049_v40 = vpop.xlane.xlu1 %3048  ;;  %v3081_v60 = vmul.f32 %v8767_v46, %v10576_v51 }
 0x506   : > { %8776 = vrcp.f32 %v3049_v40 }
 0x507   : > { %8778 = vrcp.f32 %v3058_v23  ;;  %v10731_v55 = vpack.c.bf16 %v3081_v60, %v3081_v60 }
 0x508   : > { %v8769_v47 = vpop.eup %8768 }
 0x509   : > { %v8771_v13 = vpop.eup %8770  ;;  %4245 = vxpose.xlu1.c.b16.start.end [1/1] (short) (narrow) %v10731_v55, 16  ;;  %v3083_v18 = vmul.f32 %v8769_v47, %v10580_v56 }
 0x50a   : > { %v10735_v9 = vpop.f32.mrb[80].mxu0  ;;  %v3086_v51 = vmul.f32 %v8771_v13, %v10551_v3 }
 0x50b   : > { %11531 = vst [vmem:[#allocation49_spill] sm:$0xff] %v10735_v9  ;;  %v7981_v41 = vpop.f32.mrb[81].mxu0  ;;  %v10737_v24 = vpack.c.bf16 %v3083_v18, %v3083_v18 }
 0x50c   : > { %v8773_v39 = vpop.eup %8772  ;;  %v3152_v36 = vpop.f32.mrb[82].mxu0  ;;  %v10746_v18 = vpack.c.bf16 %v3086_v51, %v3086_v51 }
 0x50d   : > { %v10739_v62 = vpop.f32.mrb[80].mxu1  ;;  %v8775_v46 = vpop.eup %8774  ;;  %4363 = vxpose.xlu1.c.b16.start.end [1/1] (short) (narrow) %v10737_v24, 16  ;;  %v3085_v60 = vmul.f32 %v8773_v39, %v10584_v63 }
 0x50e   : > { %11532 = vst [vmem:[#allocation50_spill] sm:$0xff] %v10739_v62  ;;  %v7982_v23 = vpop.f32.mrb[83].mxu0  ;;  %v7987_v40 = vpop.f32.mrb[81].mxu1  ;;  %v3088_v36 = vmul.f32 %v8775_v46, %v10561_v14 }
 0x50f   : > { %v3200_v48 = vpop.f32.mrb[82].mxu1  ;;  %v10744_v47 = vpack.c.bf16 %v3085_v60, %v3085_v60 }
 0x510   : > { %v7988_v56 = vpop.f32.mrb[83].mxu1  ;;  %v8777_v41 = vpop.eup %8776  ;;  %v10758_v40 = vpack.c.bf16 %v3088_v36, %v3088_v36 }
 0x511   : > { %v8779_v9 = vpop.eup %8778  ;;  %4481 = vxpose.xlu1.c.b16.start.end [1/1] (short) (narrow) %v10744_v47, 16  ;;  %v3087_v3 = vmul.f32 %v8777_v41, %v10588_v58 }
 0x512   : > { %v10751_v13 = vpop.f32.mrb[84].mxu0  ;;  %4540 = vxpose.xlu0.c.b16.start.end [1/1] (short) (narrow) %v10746_v18, 16  ;;  %v3090_v51 = vmul.f32 %v8779_v9, %v10567_v34 }
 0x513   : > { %11533 = vst [vmem:[#allocation51_spill] sm:$0xff] %v10751_v13  ;;  %v7993_v23 = vpop.f32.mrb[85].mxu0  ;;  %v10754_v63 = vpack.c.bf16 %v3087_v3, %v3087_v3 }
 0x514   : > { %v3248_v48 = vpop.f32.mrb[86].mxu0  ;;  %v10756_v39 = vpop.f32.mrb[84].mxu1  ;;  %v10763_v56 = vpack.c.bf16 %v3090_v51, %v3090_v51  ;;  %v11535_v51 = vld [vmem:[#allocation36_spill] sm:$0xff] }
 0x515   : > { %11534 = vst [vmem:[#allocation52_spill] sm:$0xff] %v10756_v39  ;;  %v7994_v14 = vpop.f32.mrb[87].mxu0  ;;  %v7999_v46 = vpop.f32.mrb[85].mxu1  ;;  %4599 = vxpose.xlu1.c.b16.start.end [1/1] (short) (narrow) %v10754_v63, 16 }
 0x516   : > { %v3296_v60 = vpop.f32.mrb[86].mxu1  ;;  %4658 = vxpose.xlu0.c.b16.start.end [1/1] (short) (narrow) %v10758_v40, 16 }
 0x517   : > { %v8000_v58 = vpop.f32.mrb[87].mxu1 }
 0x519   : > { %5027 = vrot.lane.b32.xlu1 %v9877_v59, %s9175_s19  ;;  %v11536_v59 = vld [vmem:[#allocation40_spill] sm:$0xff] }
 0x51a   : > { %v10767_v41 = vpop.f32.mrb[88].mxu0  ;;  %4776 = vxpose.xlu0.c.b16.start.end [1/1] (short) (narrow) %v10763_v56, 16  ;;  %v7435_v13 = vcombine.low %v11536_v59, %v11536_v59 }
 0x51b   : > { %v8005_v36 = vpop.f32.mrb[89].mxu0 }
 0x51c   : > { %v3344_v3 = vpop.f32.mrb[90].mxu0  ;;  %v3055_v36 = vpop.xlane.xlu1 %3054 }
 0x51d   : > { %v8006_v34 = vpop.f32.mrb[91].mxu0  ;;  %v10770_v9 = vpop.f32.mrb[88].mxu1  ;;  %8780 = vrcp.f32 %v3055_v36 }
 0x51e   : > { %v8011_v23 = vpop.f32.mrb[89].mxu1 }
 0x51f   : > { %v3392_v48 = vpop.f32.mrb[90].mxu1 }
 0x520   : > { %v8012_v14 = vpop.f32.mrb[91].mxu1  ;;  %v11537_v48 = vld [vmem:[#allocation42_spill] sm:$0xff] }
 0x521   : > { %v7439_v14 = vcombine.low %v11537_v48, %v11537_v48 }
 0x522   : > { %v10772_v46 = vpop.f32.mrb[92].mxu0 }
 0x523   : > { %v8017_v60 = vpop.f32.mrb[93].mxu0  ;;  %5075 = vrot.lane.b32.xlu0 %v11535_v51, %s9175_s19 }
 0x524   : > { %v3440_v58 = vpop.f32.mrb[94].mxu0  ;;  %v11538_v60 = vld [vmem:[#allocation44_spill] sm:$0xff] }
 0x525   : > { %v8018_v39 = vpop.f32.mrb[95].mxu0  ;;  %v10778_v62 = vpop.f32.mrb[92].mxu1  ;;  %v7443_v51 = vcombine.low %v11538_v60, %v11538_v60  ;;  %v11543_v60 = vld [vmem:[#allocation41_spill] sm:$0xff] }
 0x526   : > { %v8023_v3 = vpop.f32.mrb[93].mxu1 }
 0x527   : > { %v3488_v34 = vpop.f32.mrb[94].mxu1  ;;  %5221 = vrot.lane.b32.xlu0 %v7435_v13, %s9175_s19  ;;  %v11539_v13 = vld [vmem:[#allocation46_spill] sm:$0xff]  ;;  %v8781_v36 = vpop.eup %8780 }
 0x528   : > { %v8024_v23 = vpop.f32.mrb[95].mxu1  ;;  %v7447_v59 = vcombine.low %v11539_v13, %v11539_v13  ;;  %v3089_v3 = vmul.f32 %v8781_v36, %v10592_v22  ;;  %v11540_v22 = vld [vmem:[#allocation37_spill] sm:$0xff] }
 0x529   : > { %v11542_v23 = vld [vmem:[#allocation39_spill] sm:$0xff]  ;;  %v11545_v13 = vld [vmem:[#allocation45_spill] sm:$0xff] }
 0x52a   : > { %v7437_v48 = vcombine.low %v11542_v23, %v11542_v23 }
 0x52b   : > { %5321 = vrot.lane.b32.xlu0 %v7439_v14, %s9175_s19 }
 0x52e   : > { %v3899_v58 = vpop.trf.xlu1 }
 0x52f   : > { %5421 = vrot.lane.b32.xlu0 %v7443_v51, %s9175_s19  ;;  %8076 = vmatmul.mubr.msk.bf16.vlgmr.msra.gmra.mrb[112].mxu0 %vm621_vm1, %v3899_v58  ;;  %v7441_v51 = vcombine.low %v11543_v60, %v11543_v60 }
 0x530   : > { %8086 = vmatpush3.bf16.msra.mxu0 %v10433_v37  ;;  %v3958_v39 = vpop.trf.xlu0  ;;  %8087 = vmatprep.mubr.msk.bf16.mxu0 %vm9177_vm2, %v11529_v4 }
 0x531   : > { %8082 = vmatmul.mubr.msk.bf16.vlgmr.msra.gmra.mrb[112].mxu1 %vm621_vm1, %v3958_v39  ;;  %8097 = vmatprep.subr.bf16.mxu0 %v11529_v4 }
 0x532   : > { %8092 = vmatpush3.bf16.msra.mxu1 %v10444_v28  ;;  %8093 = vmatprep.mubr.msk.bf16.mxu1 %vm9177_vm2, %v11529_v4  ;;  %v10808_v28 = vpack.c.bf16 %v3089_v3, %v3089_v3 }
 0x533   : > { %5521 = vrot.lane.b32.xlu0 %v7447_v59, %s9175_s19  ;;  %8103 = vmatprep.subr.bf16.mxu1 %v11529_v4  ;;  %v7449_v59 = vcombine.low %v11545_v13, %v11545_v13 }
 0x536   : > { %v4017_v37 = vpop.trf.xlu1 }
 0x537   : > { %8088 = vmatmul.mubr.msk.bf16.vlgmr.msra.gmra.mrb[116].mxu0 %vm621_vm1, %v4017_v37 }
 0x538   : > { %8098 = vmatpush3.bf16.msra.mxu0 %v10466_v6  ;;  %v4076_v34 = vpop.trf.xlu0  ;;  %8099 = vmatprep.mubr.msk.bf16.mxu0 %vm9177_vm2, %v11529_v4 }
 0x539   : > { %8094 = vmatmul.mubr.msk.bf16.vlgmr.msra.gmra.mrb[116].mxu1 %vm621_vm1, %v4076_v34  ;;  %8109 = vmatprep.subr.bf16.mxu0 %v11529_v4 }
 0x53a   : > { %8104 = vmatpush3.bf16.msra.mxu1 %v10477_v5  ;;  %8105 = vmatprep.mubr.msk.bf16.mxu1 %vm9177_vm2, %v11529_v4  ;;  %v11541_v5 = vld [vmem:[#allocation38_spill] sm:$0xff] }
 0x53b   : > { %8115 = vmatprep.subr.bf16.mxu1 %v11529_v4 }
 0x53c   : > { %4717 = vxpose.xlu1.c.b16.start.end [1/1] (short) (narrow) %v10808_v28, 16 }
 0x540   : > { %v4194_v6 = vpop.trf.xlu0  ;;  %5123 = vrot.lane.b32.xlu1 %v11540_v22, %s9175_s19 }
 0x541   : > { %8106 = vmatmul.mubr.msk.bf16.vlgmr.msra.gmra.mrb[120].mxu1 %vm621_vm1, %v4194_v6 }
 0x542   : > { %8116 = vmatpush3.bf16.msra.mxu1 %v10511_v57  ;;  %8117 = vmatprep.mubr.msk.bf16.mxu1 %vm9177_vm2, %v11529_v4  ;;  %v11544_v57 = vld [vmem:[#allocation43_spill] sm:$0xff] }
 0x543   : > { %8127 = vmatprep.subr.bf16.mxu1 %v11529_v4  ;;  %v7445_v58 = vcombine.low %v11544_v57, %v11544_v57 }
 0x544   : > { %5171 = vrot.lane.b32.xlu1 %v11541_v5, %s9175_s19  ;;  %v10896_v5 = vsel %vm634_vm0, %v10596_v25, 0 }
 0x548   : > { %5271 = vrot.lane.b32.xlu1 %v7437_v48, %s9175_s19 }
 0x549   : > { %v4312_v14 = vpop.trf.xlu0 }
 0x54a   : > { %8118 = vmatmul.mubr.msk.bf16.vlgmr.msra.gmra.mrb[124].mxu1 %vm621_vm1, %v4312_v14 }
 0x54b   : > { %8128 = vmatpush3.bf16.msra.mxu1 %v10542_v29  ;;  %8129 = vmatprep.mubr.msk.bf16.mxu1 %vm9177_vm2, %v11529_v4 }
 0x54c   : > { %5371 = vrot.lane.b32.xlu1 %v7441_v51, %s9175_s19  ;;  %8139 = vmatprep.subr.bf16.mxu1 %v11529_v4 }
 0x550   : > { %5471 = vrot.lane.b32.xlu1 %v7445_v58, %s9175_s19 }
 0x551   : > { %v4430_v39 = vpop.trf.xlu0  ;;  %5619 = vxpose.xlu0.c.b16.start.end [1/1] (short) (narrow) %v10427_v42, 16 }
 0x552   : > { %8130 = vmatmul.mubr.msk.bf16.vlgmr.msra.gmra.mrb[128].mxu1 %vm621_vm1, %v4430_v39 }
 0x553   : > { %8140 = vmatpush3.bf16.msra.mxu1 %v10615_v11  ;;  %8141 = vmatprep.mubr.msk.bf16.mxu1 %vm9177_vm2, %v11529_v4 }
 0x554   : > { %5571 = vrot.lane.b32.xlu1 %v7449_v59, %s9175_s19  ;;  %8151 = vmatprep.subr.bf16.mxu1 %v11529_v4 }
 0x555   : > { %5737 = vxpose.xlu0.c.b16.start.end [1/1] (short) (narrow) %v10460_v19, 16 }
 0x559   : > { %5796 = vxpose.xlu0.c.b16.start.end [1/1] (short) (narrow) %v10470_v10, 16 }
 0x55d   : > { %5914 = vxpose.xlu0.c.b16.start.end [1/1] (short) (narrow) %v10504_v45, 16 }
 0x561   : > { %6032 = vxpose.xlu0.c.b16.start.end [1/1] (short) (narrow) %v10535_v35, 16 }
 0x565   : > { %6150 = vxpose.xlu0.c.b16.start.end [1/1] (short) (narrow) %v10608_v31, 16 }
 0x566   : > { %v10859_v10 = vpop.permute.xlu0 %4979 }
 0x569   : > { %6268 = vxpose.xlu0.c.b16.start.end [1/1] (short) (narrow) %v10634_v52, 16 }
 0x56b   : > { %v4135_v42 = vpop.trf.xlu1 }
 0x56c   : > { %8100 = vmatmul.mubr.msk.bf16.vlgmr.msra.gmra.mrb[120].mxu0 %vm621_vm1, %v4135_v42 }
 0x56d   : > { %8110 = vmatpush3.bf16.msra.mxu0 %v10499_v2  ;;  %6386 = vxpose.xlu0.c.b16.start.end [1/1] (short) (narrow) %v10660_v12, 16 }
 0x56e   : > { %8111 = vmatprep.mubr.msk.bf16.mxu0 %vm9177_vm2, %v11529_v4  ;;  %8121 = vmatprep.subr.bf16.mxu0 %v11529_v4 }
 0x56f   : > { %v4253_v19 = vpop.trf.xlu1 }
 0x571   : > { %6504 = vxpose.xlu0.c.b16.start.end [1/1] (short) (narrow) %v10682_v27, 16 }
 0x573   : > { %v4371_v45 = vpop.trf.xlu1 }
 0x574   : > { %8112 = vmatmul.mubr.msk.bf16.vlgmr.msra.gmra.mrb[124].mxu0 %vm621_vm1, %v4253_v19 }
 0x575   : > { %8122 = vmatpush3.bf16.msra.mxu0 %v10530_v44  ;;  %8123 = vmatprep.mubr.msk.bf16.mxu0 %vm9177_vm2, %v11529_v4 }
 0x576   : > { %8133 = vmatprep.subr.bf16.mxu0 %v11529_v4 }
 0x577   : > { %5678 = vxpose.xlu1.c.b16.start.end [1/1] (short) (narrow) %v10437_v26, 16  ;;  %v4489_v27 = vpop.trf.xlu1 }
 0x578   : > { %v4548_v2 = vpop.trf.xlu0 }
 0x579   : > { %8142 = vmatmul.mubr.msk.bf16.vlgmr.msra.gmra.mrb[132].mxu1 %vm621_vm1, %v4548_v2 }
 0x57a   : > { %8152 = vmatpush3.bf16.msra.mxu1 %v10641_v49  ;;  %8153 = vmatprep.mubr.msk.bf16.mxu1 %vm9177_vm2, %v11529_v4 }
 0x57b   : > { %5855 = vxpose.xlu1.c.b16.start.end [1/1] (short) (narrow) %v10493_v38, 16  ;;  %v10872_v35 = vpop.f32.mrb[96].mxu0  ;;  %8163 = vmatprep.subr.bf16.mxu1 %v11529_v4 }
 0x57c   : > { %v8029_v44 = vpop.f32.mrb[97].mxu0  ;;  %8124 = vmatmul.mubr.msk.bf16.vlgmr.msra.gmra.mrb[128].mxu0 %vm621_vm1, %v4371_v45  ;;  %v4666_v29 = vpop.trf.xlu0 }
 0x57d   : > { %8134 = vmatpush3.bf16.msra.mxu0 %v10604_v20  ;;  %v3538_v26 = vpop.f32.mrb[98].mxu0  ;;  %v3585_v31 = vpop.f32.mrb[96].mxu1  ;;  %8135 = vmatprep.mubr.msk.bf16.mxu0 %vm9177_vm2, %v11529_v4 }
 0x57e   : > { %v8516_v11 = vpack.i.bf16 %v3585_v31, %v10872_v35  ;;  %v8030_v52 = vpop.f32.mrb[99].mxu0  ;;  %v8035_v49 = vpop.f32.mrb[97].mxu1  ;;  %8145 = vmatprep.subr.bf16.mxu0 %v11529_v4 }
 0x57f   : > { %v3588_v38 = vpop.f32.mrb[98].mxu1  ;;  %5973 = vxpose.xlu1.c.b16.start.end [1/1] (short) (narrow) %v10525_v0, 16 }
 0x580   : > { %v8036_v12 = vpop.f32.mrb[99].mxu1  ;;  %v4784_v37 = vpop.trf.xlu0 }
 0x581   : > { %8154 = vmatmul.mubr.msk.bf16.vlgmr.msra.gmra.mrb[136].mxu1 %vm621_vm1, %v4666_v29  ;;  %v11546_v29 = vld [vmem:[#allocation47_spill] sm:$0xff] }
 0x582   : > { %8164 = vmatpush3.bf16.msra.mxu1 %v10667_v16  ;;  %8165 = vmatprep.mubr.msk.bf16.mxu1 %vm9177_vm2, %v11529_v4  ;;  %v10939_v26 = vsel %vm634_vm0, %v11546_v29, 0 }
 0x583   : > { %6091 = vxpose.xlu1.c.b16.start.end [1/1] (short) (narrow) %v10600_v7, 16  ;;  %v3635_v20 = vpop.f32.mrb[100].mxu0  ;;  %8175 = vmatprep.subr.bf16.mxu1 %v11529_v4 }
 0x584   : > { %v8041_v36 = vpop.f32.mrb[101].mxu0  ;;  %8136 = vmatmul.mubr.msk.bf16.vlgmr.msra.gmra.mrb[132].mxu0 %vm621_vm1, %v4489_v27 }
 0x585   : > { %8146 = vmatpush3.bf16.msra.mxu0 %v10630_v1  ;;  %v3638_v0 = vpop.f32.mrb[102].mxu0  ;;  %v3685_v3 = vpop.f32.mrb[100].mxu1  ;;  %8147 = vmatprep.mubr.msk.bf16.mxu0 %vm9177_vm2, %v11529_v4 }
 0x586   : > { %v8521_v16 = vpack.i.bf16 %v3685_v3, %v3635_v20  ;;  %v8042_v34 = vpop.f32.mrb[103].mxu0  ;;  %v8047_v6 = vpop.f32.mrb[101].mxu1  ;;  %8157 = vmatprep.subr.bf16.mxu0 %v11529_v4  ;;  %v11547_v20 = vld [vmem:[#allocation48_spill] sm:$0xff] }
 0x587   : > { %v3688_v7 = vpop.f32.mrb[102].mxu1  ;;  %6209 = vxpose.xlu1.c.b16.start.end [1/1] (short) (narrow) %v10626_v15, 16  ;;  %v4607_v1 = vpop.trf.xlu1 }
 0x588   : > { %v8048_v22 = vpop.f32.mrb[103].mxu1 }
 0x589   : > { %8166 = vmatmul.mubr.msk.bf16.vlgmr.msra.gmra.mrb[140].mxu1 %vm621_vm1, %v4784_v37 }
 0x58a   : > { %8176 = vmatpush3.bf16.msra.mxu1 %v10896_v5  ;;  %8177 = vmatprep.mubr.msk.bf16.mxu1 %vm9177_vm2, %v11529_v4 }
 0x58b   : > { %6327 = vxpose.xlu1.c.b16.start.end [1/1] (short) (narrow) %v10652_v21, 16  ;;  %v3735_v23 = vpop.f32.mrb[104].mxu0  ;;  %8187 = vmatprep.subr.bf16.mxu1 %v11529_v4  ;;  %v5028_v35 = vpop.permute.xlu1 %5027 }
 0x58c   : > { %v8053_v48 = vpop.f32.mrb[105].mxu0  ;;  %8148 = vmatmul.mubr.msk.bf16.vlgmr.msra.gmra.mrb[136].mxu0 %vm621_vm1, %v4607_v1  ;;  %v10957_v31 = vsel %vm634_vm0, %v5028_v35, 0 }
 0x58d   : > { %8158 = vmatpush3.bf16.msra.mxu0 %v10656_v50  ;;  %v3738_v25 = vpop.f32.mrb[106].mxu0  ;;  %v3785_v15 = vpop.f32.mrb[104].mxu1  ;;  %8159 = vmatprep.mubr.msk.bf16.mxu0 %vm9177_vm2, %v11529_v4  ;;  %v10913_v50 = vsel %vm634_vm0, %v10859_v10, 0 }
 0x58e   : > { %v8526_v14 = vpack.i.bf16 %v3785_v15, %v3735_v23  ;;  %v8054_v60 = vpop.f32.mrb[107].mxu0  ;;  %v8059_v51 = vpop.f32.mrb[105].mxu1  ;;  %8169 = vmatprep.subr.bf16.mxu0 %v11529_v4 }
 0x58f   : > { %v3788_v57 = vpop.f32.mrb[106].mxu1  ;;  %6445 = vxpose.xlu1.c.b16.start.end [1/1] (short) (narrow) %v10678_v61, 16 }
 0x590   : > { %v8060_v21 = vpop.f32.mrb[107].mxu1  ;;  %8527 = vrot.lane.b32.xlu0 %v8526_v14, %s9179_s18 }
 0x591   : > { %8178 = vmatmul.mubr.msk.bf16.vlgmr.msra.gmra.mrb[144].mxu1 %vm621_vm1, %v10699_v17 }
 0x592   : > { %8188 = vmatpush3.bf16.msra.mxu1 %v10913_v50  ;;  %8189 = vmatprep.mubr.msk.bf16.mxu1 %vm9177_vm2, %v11529_v4 }
 0x593   : > { %8517 = vrot.lane.b32.xlu1 %v8516_v11, %s9179_s18  ;;  %v3835_v58 = vpop.f32.mrb[108].mxu0  ;;  %8199 = vmatprep.subr.bf16.mxu1 %v11529_v4 }
 0x594   : > { %v8065_v61 = vpop.f32.mrb[109].mxu0 }
 0x595   : > { %v3885_v39 = vpop.f32.mrb[108].mxu1  ;;  %v5076_v13 = vpop.permute.xlu0 %5075 }
 0x596   : > { %v8531_v59 = vpack.i.bf16 %v3885_v39, %v3835_v58  ;;  %v3838_v42 = vpop.f32.mrb[110].mxu0  ;;  %v8071_v19 = vpop.f32.mrb[109].mxu1  ;;  %v10925_v45 = vsel %vm634_vm0, %v5076_v13, 0 }
 0x597   : > { %v8066_v10 = vpop.f32.mrb[111].mxu0  ;;  %v3888_v2 = vpop.f32.mrb[110].mxu1  ;;  %8522 = vrot.lane.b32.xlu1 %v8521_v16, %s9179_s18 }
 0x598   : > { %v8072_v17 = vpop.f32.mrb[111].mxu1  ;;  %8532 = vrot.lane.b32.xlu0 %v8531_v59, %s9179_s18 }
 0x599   : > { %8190 = vmatmul.mubr.msk.bf16.vlgmr.msra.gmra.mrb[148].mxu1 %vm621_vm1, %v10707_v8  ;;  %v10948_v8 = vsel %vm634_vm0, %v10722_v33, 0 }
 0x59a   : > { %8200 = vmatpush3.bf16.msra.mxu1 %v10925_v45  ;;  %8201 = vmatprep.mubr.msk.bf16.mxu1 %vm9177_vm2, %v11529_v4 }
 0x59b   : > { %8211 = vmatprep.subr.bf16.mxu1 %v11529_v4 }
 0x5a1   : > { %8202 = vmatmul.mubr.msk.bf16.vlgmr.msra.gmra.mrb[152].mxu1 %vm621_vm1, %v10711_v32 }
 0x5a2   : > { %v4725_v44 = vpop.trf.xlu1  ;;  %8213 = vmatprep.mubr.msk.bf16.mxu1 %vm9177_vm2, %v11529_v4 }
 0x5a3   : > { %8160 = vmatmul.mubr.msk.bf16.vlgmr.msra.gmra.mrb[140].mxu0 %vm621_vm1, %v4725_v44 }
 0x5a4   : > { %8170 = vmatpush3.bf16.msra.mxu0 %v10939_v26  ;;  %8171 = vmatprep.mubr.msk.bf16.mxu0 %vm9177_vm2, %v11529_v4 }
 0x5a5   : > { %8181 = vmatprep.subr.bf16.mxu0 %v11529_v4 }
 0x5ab   : > { %8172 = vmatmul.mubr.msk.bf16.vlgmr.msra.gmra.mrb[144].mxu0 %vm621_vm1, %v10695_v54  ;;  %v5222_v54 = vpop.permute.xlu0 %5221 }
 0x5ac   : > { %8182 = vmatpush3.bf16.msra.mxu0 %v10948_v8  ;;  %8183 = vmatprep.mubr.msk.bf16.mxu0 %vm9177_vm2, %v11529_v4  ;;  %v10989_v27 = vsel %vm634_vm0, %v5222_v54, 0 }
 0x5ad   : > { %8193 = vmatprep.subr.bf16.mxu0 %v11529_v4 }
 0x5af   : > { %v5322_v38 = vpop.permute.xlu0 %5321 }
 0x5b2   : > { %v5124_v32 = vpop.permute.xlu1 %5123 }
 0x5b3   : > { %8184 = vmatmul.mubr.msk.bf16.vlgmr.msra.gmra.mrb[148].mxu0 %vm621_vm1, %v10703_v43  ;;  %v10971_v49 = vsel %vm634_vm0, %v5124_v32, 0 }
 0x5b4   : > { %8194 = vmatpush3.bf16.msra.mxu0 %v10957_v31  ;;  %8195 = vmatprep.mubr.msk.bf16.mxu0 %vm9177_vm2, %v11529_v4 }
 0x5b5   : > { %8205 = vmatprep.subr.bf16.mxu0 %v11529_v4 }
 0x5b6   : > { %v5172_v33 = vpop.permute.xlu1 %5171 }
 0x5b7   : > { %v10966_v11 = vsel %vm634_vm0, %v5172_v33, 0 }
 0x5b8   : > { %8212 = vmatpush3.bf16.msra.mxu1 %v10966_v11 }
 0x5b9   : > { %8223 = vmatprep.subr.bf16.mxu1 %v11529_v4 }
 0x5ba   : > { %v5272_v52 = vpop.permute.xlu1 %5271 }
 0x5bb   : > { %v10974_v43 = vsel %vm634_vm0, %v5272_v52, 0  ;;  %8196 = vmatmul.mubr.msk.bf16.vlgmr.msra.gmra.mrb[152].mxu0 %vm621_vm1, %v10727_v30  ;;  %8214 = vmatmul.mubr.msk.bf16.vlgmr.msra.gmra.mrb[156].mxu1 %vm621_vm1, %v10715_v53  ;;  %v5422_v30 = vpop.permute.xlu0 %5421 }
 0x5bc   : > { %8206 = vmatpush3.bf16.msra.mxu0 %v10971_v49  ;;  %8224 = vmatpush3.bf16.msra.mxu1 %v10974_v43  ;;  %v11025_v34 = vsel %vm634_vm0, %v5422_v30, 0 }
 0x5bd   : > { %8207 = vmatprep.mubr.msk.bf16.mxu0 %vm9177_vm2, %v11529_v4  ;;  %8217 = vmatprep.subr.bf16.mxu0 %v11529_v4 }
 0x5be   : > { %8225 = vmatprep.mubr.msk.bf16.mxu1 %vm9177_vm2, %v11529_v4  ;;  %8235 = vmatprep.subr.bf16.mxu1 %v11529_v4  ;;  %v5372_v12 = vpop.permute.xlu1 %5371 }
 0x5bf   : > { %v10992_v53 = vsel %vm634_vm0, %v5372_v12, 0  ;;  %v5522_v36 = vpop.permute.xlu0 %5521 }
 0x5c2   : > { %v5472_v37 = vpop.permute.xlu1 %5471 }
 0x5c3   : > { %8208 = vmatmul.mubr.msk.bf16.vlgmr.msra.gmra.mrb[156].mxu0 %vm621_vm1, %v10731_v55  ;;  %8226 = vmatmul.mubr.msk.bf16.vlgmr.msra.gmra.mrb[160].mxu1 %vm621_vm1, %v11547_v20  ;;  %v11007_v55 = vsel %vm634_vm0, %v5322_v38, 0  ;;  %v11010_v0 = vsel %vm634_vm0, %v5472_v37, 0  ;;  %v5627_v3 = vpop.trf.xlu0 }
 0x5c4   : > { %8218 = vmatpush3.bf16.msra.mxu0 %v10989_v27  ;;  %8236 = vmatpush3.bf16.msra.mxu1 %v10992_v53 }
 0x5c5   : > { %8219 = vmatprep.mubr.msk.bf16.mxu0 %vm9177_vm2, %v11529_v4  ;;  %8229 = vmatprep.subr.bf16.mxu0 %v11529_v4 }
 0x5c6   : > { %8237 = vmatprep.mubr.msk.bf16.mxu1 %vm9177_vm2, %v11529_v4  ;;  %8247 = vmatprep.subr.bf16.mxu1 %v11529_v4  ;;  %v5572_v16 = vpop.permute.xlu1 %5571 }
 0x5cb   : > { %8220 = vmatmul.mubr.msk.bf16.vlgmr.msra.gmra.mrb[160].mxu0 %vm621_vm1, %v10737_v24  ;;  %8238 = vmatmul.mubr.msk.bf16.vlgmr.msra.gmra.mrb[164].mxu1 %vm621_vm1, %v10746_v18  ;;  %v5745_v24 = vpop.trf.xlu0  ;;  %v11028_v18 = vsel %vm634_vm0, %v5572_v16, 0 }
 0x5cc   : > { %8230 = vmatpush3.bf16.msra.mxu0 %v11007_v55  ;;  %8248 = vmatpush3.bf16.msra.mxu1 %v11010_v0 }
 0x5cd   : > { %8231 = vmatprep.mubr.msk.bf16.mxu0 %vm9177_vm2, %v11529_v4  ;;  %8241 = vmatprep.subr.bf16.mxu0 %v11529_v4 }
 0x5ce   : > { %8249 = vmatprep.mubr.msk.bf16.mxu1 %vm9177_vm2, %v11529_v4  ;;  %8259 = vmatprep.subr.bf16.mxu1 %v11529_v4 }
 0x5cf   : > { %v5804_v6 = vpop.trf.xlu0 }
 0x5d3   : > { %8232 = vmatmul.mubr.msk.bf16.vlgmr.msra.gmra.mrb[164].mxu0 %vm621_vm1, %v10744_v47  ;;  %8250 = vmatmul.mubr.msk.bf16.vlgmr.msra.gmra.mrb[168].mxu1 %vm621_vm1, %v10758_v40  ;;  %v11043_v47 = vsel %vm634_vm0, %v5522_v36, 0  ;;  %v5922_v40 = vpop.trf.xlu0 }
 0x5d4   : > { %8242 = vmatpush3.bf16.msra.mxu0 %v11025_v34  ;;  %8260 = vmatpush3.bf16.msra.mxu1 %v11028_v18 }
 0x5d5   : > { %8243 = vmatprep.mubr.msk.bf16.mxu0 %vm9177_vm2, %v11529_v4  ;;  %8253 = vmatprep.subr.bf16.mxu0 %v11529_v4 }
 0x5d6   : > { %8261 = vmatprep.mubr.msk.bf16.mxu1 %vm9177_vm2, %v11529_v4  ;;  %8271 = vmatprep.subr.bf16.mxu1 %v11529_v4 }
 0x5db   : > { %8244 = vmatmul.mubr.msk.bf16.vlgmr.msra.gmra.mrb[168].mxu0 %vm621_vm1, %v10754_v63  ;;  %8262 = vmatmul.mubr.msk.bf16.vlgmr.msra.gmra.mrb[172].mxu1 %vm621_vm1, %v10763_v56  ;;  %v6040_v63 = vpop.trf.xlu0 }
 0x5dc   : > { %8254 = vmatpush3.bf16.msra.mxu0 %v11043_v47  ;;  %8272 = vmatpush3.bf16.msra.mxu1 %v10896_v5 }
 0x5dd   : > { %8255 = vmatprep.mubr.msk.bf16.mxu0 %vm9177_vm2, %v11529_v4  ;;  %8265 = vmatprep.subr.bf16.mxu0 %v11529_v4  ;;  %v5686_v7 = vpop.trf.xlu1 }
 0x5de   : > { %8273 = vmatprep.mubr.msk.bf16.mxu1 %vm9177_vm2, %v11529_v4  ;;  %8283 = vmatprep.subr.bf16.mxu1 %v11529_v4 }
 0x5df   : > { %v6158_v56 = vpop.trf.xlu0 }
 0x5e1   : > { %v5863_v5 = vpop.trf.xlu1 }
 0x5e3   : > { %8256 = vmatmul.mubr.msk.bf16.vlgmr.msra.gmra.mrb[172].mxu0 %vm621_vm1, %v10808_v28  ;;  %8274 = vmatmul.mubr.msk.bf16.vlgmr.msra.gmra.mrb[176].mxu1 %vm621_vm1, %v5686_v7  ;;  %v6276_v28 = vpop.trf.xlu0 }
 0x5e4   : > { %8266 = vmatpush3.bf16.msra.mxu0 %v10939_v26  ;;  %8284 = vmatpush3.bf16.msra.mxu1 %v10913_v50 }
 0x5e5   : > { %8267 = vmatprep.mubr.msk.bf16.mxu0 %vm9177_vm2, %v11529_v4  ;;  %8277 = vmatprep.subr.bf16.mxu0 %v11529_v4  ;;  %v5981_v23 = vpop.trf.xlu1 }
 0x5e6   : > { %8285 = vmatprep.mubr.msk.bf16.mxu1 %vm9177_vm2, %v11529_v4  ;;  %8295 = vmatprep.subr.bf16.mxu1 %v11529_v4 }
 0x5e7   : > { %v6394_v22 = vpop.trf.xlu0 }
 0x5eb   : > { %8268 = vmatmul.mubr.msk.bf16.vlgmr.msra.gmra.mrb[176].mxu0 %vm621_vm1, %v5627_v3  ;;  %8286 = vmatmul.mubr.msk.bf16.vlgmr.msra.gmra.mrb[180].mxu1 %vm621_vm1, %v5804_v6  ;;  %v11092_v1 = vpop.trf.xlu0 }
 0x5ec   : > { %8278 = vmatpush3.bf16.msra.mxu0 %v10948_v8  ;;  %8296 = vmatpush3.bf16.msra.mxu1 %v10925_v45 }
 0x5ed   : > { %8279 = vmatprep.mubr.msk.bf16.mxu0 %vm9177_vm2, %v11529_v4  ;;  %8289 = vmatprep.subr.bf16.mxu0 %v11529_v4 }
 0x5ee   : > { %8297 = vmatprep.mubr.msk.bf16.mxu1 %vm9177_vm2, %v11529_v4  ;;  %8307 = vmatprep.subr.bf16.mxu1 %v11529_v4 }
 0x5f3   : > { %8280 = vmatmul.mubr.msk.bf16.vlgmr.msra.gmra.mrb[180].mxu0 %vm621_vm1, %v5745_v24  ;;  %8298 = vmatmul.mubr.msk.bf16.vlgmr.msra.gmra.mrb[184].mxu1 %vm621_vm1, %v5922_v40 }
 0x5f4   : > { %8290 = vmatpush3.bf16.msra.mxu0 %v10957_v31  ;;  %8308 = vmatpush3.bf16.msra.mxu1 %v10966_v11 }
 0x5f5   : > { %8291 = vmatprep.mubr.msk.bf16.mxu0 %vm9177_vm2, %v11529_v4  ;;  %8301 = vmatprep.subr.bf16.mxu0 %v11529_v4 }
 0x5f6   : > { %8309 = vmatprep.mubr.msk.bf16.mxu1 %vm9177_vm2, %v11529_v4  ;;  %8319 = vmatprep.subr.bf16.mxu1 %v11529_v4 }
 0x5fb   : > { %8292 = vmatmul.mubr.msk.bf16.vlgmr.msra.gmra.mrb[184].mxu0 %vm621_vm1, %v5863_v5  ;;  %8310 = vmatmul.mubr.msk.bf16.vlgmr.msra.gmra.mrb[188].mxu1 %vm621_vm1, %v6040_v63 }
 0x5fc   : > { %8302 = vmatpush3.bf16.msra.mxu0 %v10971_v49  ;;  %8320 = vmatpush3.bf16.msra.mxu1 %v10974_v43 }
 0x5fd   : > { %8303 = vmatprep.mubr.msk.bf16.mxu0 %vm9177_vm2, %v11529_v4  ;;  %8313 = vmatprep.subr.bf16.mxu0 %v11529_v4 }
 0x5fe   : > { %8321 = vmatprep.mubr.msk.bf16.mxu1 %vm9177_vm2, %v11529_v4  ;;  %8331 = vmatprep.subr.bf16.mxu1 %v11529_v4 }
 0x602   : > { %v8528_v48 = vpop.permute.xlu0 %8527  ;;  %v3944_v25 = vpop.f32.mrb[112].mxu0 }
 0x603   : > { %v8530_v15 = vunpack.i.h.bf16 %v8528_v48  ;;  %v8529_v14 = vunpack.i.l.bf16 %v8528_v48  ;;  %8304 = vmatmul.mubr.msk.bf16.vlgmr.msra.gmra.mrb[188].mxu0 %vm621_vm1, %v5981_v23  ;;  %8322 = vmatmul.mubr.msk.bf16.vlgmr.msra.gmra.mrb[192].mxu1 %vm621_vm1, %v6158_v56  ;;  %v8077_v60 = vpop.f32.mrb[113].mxu0 }
 0x604   : > { %8314 = vmatpush3.bf16.msra.mxu0 %v10989_v27  ;;  %8332 = vmatpush3.bf16.msra.mxu1 %v10992_v53  ;;  %v4003_v51 = vpop.f32.mrb[112].mxu1  ;;  %v3947_v57 = vpop.f32.mrb[114].mxu0 }
 0x605   : > { %v11106_v21 = vsel %vm1218_vm3, %v10770_v9, %v8530_v15  ;;  %v11110_v50 = vsel %vm1218_vm3, %v10767_v41, %v8529_v14  ;;  %v8536_v58 = vpack.i.bf16 %v4003_v51, %v3944_v25  ;;  %v8083_v61 = vpop.f32.mrb[113].mxu1  ;;  %8315 = vmatprep.mubr.msk.bf16.mxu0 %vm9177_vm2, %v11529_v4  ;;  %8325 = vmatprep.subr.bf16.mxu0 %v11529_v4  ;;  %v8078_v13 = vpop.f32.mrb[115].mxu0 }
 0x606   : > { %v4006_v39 = vpop.f32.mrb[114].mxu1  ;;  %8333 = vmatprep.mubr.msk.bf16.mxu1 %vm9177_vm2, %v11529_v4  ;;  %8343 = vmatprep.subr.bf16.mxu1 %v11529_v4  ;;  %v6099_v41 = vpop.trf.xlu1 }
 0x607   : > { %8537 = vrot.lane.b32.xlu1 %v8536_v58, %s9180_s25  ;;  %v8084_v9 = vpop.f32.mrb[115].mxu1 }
 0x60a   : > { %v4062_v59 = vpop.f32.mrb[116].mxu0  ;;  %v6217_v29 = vpop.trf.xlu1 }
 0x60b   : > { %8316 = vmatmul.mubr.msk.bf16.vlgmr.msra.gmra.mrb[192].mxu0 %vm621_vm1, %v6099_v41  ;;  %8334 = vmatmul.mubr.msk.bf16.vlgmr.msra.gmra.mrb[196].mxu1 %vm621_vm1, %v6276_v28  ;;  %v8089_v42 = vpop.f32.mrb[117].mxu0 }
 0x60c   : > { %8326 = vmatpush3.bf16.msra.mxu0 %v11007_v55  ;;  %8344 = vmatpush3.bf16.msra.mxu1 %v11010_v0  ;;  %v4121_v19 = vpop.f32.mrb[116].mxu1  ;;  %v4065_v10 = vpop.f32.mrb[118].mxu0 }
 0x60d   : > { %v8541_v2 = vpack.i.bf16 %v4121_v19, %v4062_v59  ;;  %8327 = vmatprep.mubr.msk.bf16.mxu0 %vm9177_vm2, %v11529_v4  ;;  %8337 = vmatprep.subr.bf16.mxu0 %v11529_v4  ;;  %v8095_v17 = vpop.f32.mrb[117].mxu1  ;;  %v8090_v45 = vpop.f32.mrb[119].mxu0 }
 0x60e   : > { %8345 = vmatprep.mubr.msk.bf16.mxu1 %vm9177_vm2, %v11529_v4  ;;  %8355 = vmatprep.subr.bf16.mxu1 %v11529_v4  ;;  %v4124_v35 = vpop.f32.mrb[118].mxu1  ;;  %v6335_v54 = vpop.trf.xlu1 }
 0x60f   : > { %8542 = vrot.lane.b32.xlu0 %v8541_v2, %s9180_s25  ;;  %v8096_v44 = vpop.f32.mrb[119].mxu1 }
 0x612   : > { %v6453_v43 = vpop.trf.xlu1 }
 0x613   : > { %8328 = vmatmul.mubr.msk.bf16.vlgmr.msra.gmra.mrb[196].mxu0 %vm621_vm1, %v6217_v29  ;;  %8346 = vmatmul.mubr.msk.bf16.vlgmr.msra.gmra.mrb[200].mxu1 %vm621_vm1, %v6394_v22 }
 0x614   : > { %8338 = vmatpush3.bf16.msra.mxu0 %v11025_v34  ;;  %8356 = vmatpush3.bf16.msra.mxu1 %v11028_v18  ;;  %v4239_v26 = vpop.f32.mrb[120].mxu1 }
 0x615   : > { %8339 = vmatprep.mubr.msk.bf16.mxu0 %vm9177_vm2, %v11529_v4  ;;  %8349 = vmatprep.subr.bf16.mxu0 %v11529_v4  ;;  %v8107_v8 = vpop.f32.mrb[121].mxu1 }
 0x616   : > { %8357 = vmatprep.mubr.msk.bf16.mxu1 %vm9177_vm2, %v11529_v4  ;;  %v4242_v32 = vpop.f32.mrb[122].mxu1 }
 0x617   : > { %v8108_v31 = vpop.f32.mrb[123].mxu1 }
 0x61b   : > { %8340 = vmatmul.mubr.msk.bf16.vlgmr.msra.gmra.mrb[200].mxu0 %vm621_vm1, %v6335_v54  ;;  %8358 = vmatmul.mubr.msk.bf16.vlgmr.msra.gmra.mrb[204].mxu1 %vm621_vm1, %v11092_v1 }
 0x61c   : > { %8350 = vmatpush3.bf16.msra.mxu0 %v11043_v47  ;;  %8351 = vmatprep.mubr.msk.bf16.mxu0 %vm9177_vm2, %v11529_v4  ;;  %v8652_v47 = vld [vmem:[#allocation13] sm:$0xff]  }
 0x61d   : > { %v11145_v33 = vpop.f32.mrb[124].mxu1  ;;  %8361 = vmatprep.subr.bf16.mxu0 %v8652_v47 }
 0x61e   : > { %v8119_v11 = vpop.f32.mrb[125].mxu1 }
 0x61f   : > { %v4360_v52 = vpop.f32.mrb[126].mxu1 }
 0x620   : > { %v8120_v49 = vpop.f32.mrb[127].mxu1 }
 0x623   : > { %8352 = vmatmul.mubr.msk.bf16.vlgmr.msra.gmra.mrb[204].mxu0 %vm621_vm1, %v6453_v43 }
 0x624   : > { %8362 = vmatpush3.bf16.msra.mxu0 %v8652_v47 }
 0x625   : > { %v4475_v38 = vpop.f32.mrb[128].mxu1 }
 0x626   : > { %v8131_v12 = vpop.f32.mrb[129].mxu1 }
 0x627   : > { %v4478_v30 = vpop.f32.mrb[130].mxu1 }
 0x628   : > { %v8132_v27 = vpop.f32.mrb[131].mxu1 }
 0x63f   : > { %v4180_v53 = vpop.f32.mrb[120].mxu0 }
 0x640   : > { %v8546_v20 = vpack.i.bf16 %v4239_v26, %v4180_v53  ;;  %v8101_v36 = vpop.f32.mrb[121].mxu0 }
 0x641   : > { %v4183_v37 = vpop.f32.mrb[122].mxu0 }
 0x642   : > { %8547 = vrot.lane.b32.xlu1 %v8546_v20, %s9180_s25  ;;  %v8102_v55 = vpop.f32.mrb[123].mxu0 }
 0x647   : > { %v11149_v4 = vpop.f32.mrb[124].mxu0 }
 0x648   : > { %v8591_v0 = vpack.i.bf16 %v11145_v33, %v11149_v4  ;;  %v8113_v3 = vpop.f32.mrb[125].mxu0 }
 0x649   : > { %v4301_v16 = vpop.f32.mrb[126].mxu0 }
 0x64a   : > { %v8114_v24 = vpop.f32.mrb[127].mxu0 }
 0x64c   : > { %v4593_v34 = vpop.f32.mrb[132].mxu1 }
 0x64d   : > { %v8143_v18 = vpop.f32.mrb[133].mxu1 }
 0x64e   : > { %v4596_v6 = vpop.f32.mrb[134].mxu1 }
 0x64f   : > { %v4416_v40 = vpop.f32.mrb[128].mxu0  ;;  %v8144_v7 = vpop.f32.mrb[135].mxu1 }
 0x650   : > { %v8551_v63 = vpack.i.bf16 %v4475_v38, %v4416_v40  ;;  %v8125_v56 = vpop.f32.mrb[129].mxu0 }
 0x651   : > { %v4419_v28 = vpop.f32.mrb[130].mxu0 }
 0x652   : > { %8552 = vrot.lane.b32.xlu1 %v8551_v63, %s9181_s12  ;;  %v8126_v22 = vpop.f32.mrb[131].mxu0 }
 0x654   : > { %v11154_v5 = vpop.f32.mrb[136].mxu1 }
 0x655   : > { %v8155_v1 = vpop.f32.mrb[137].mxu1 }
 0x656   : > { %v4714_v23 = vpop.f32.mrb[138].mxu1 }
 0x657   : > { %v4534_v48 = vpop.f32.mrb[132].mxu0  ;;  %v8156_v25 = vpop.f32.mrb[139].mxu1 }
 0x658   : > { %v8556_v15 = vpack.i.bf16 %v4593_v34, %v4534_v48  ;;  %v8137_v14 = vpop.f32.mrb[133].mxu0  ;;  %v11183_v48 = vpop.permute.xlu1 %8517 }
 0x659   : > { %v4537_v60 = vpop.f32.mrb[134].mxu0 }
 0x65a   : > { %8557 = vrot.lane.b32.xlu0 %v8556_v15, %s9181_s12  ;;  %v8138_v51 = vpop.f32.mrb[135].mxu0 }
 0x65c   : > { %v11157_v57 = vpop.f32.mrb[140].mxu1 }
 0x65d   : > { %v8167_v58 = vpop.f32.mrb[141].mxu1 }
 0x65e   : > { %v4832_v61 = vpop.f32.mrb[142].mxu1 }
 0x65f   : > { %v8168_v39 = vpop.f32.mrb[143].mxu1  ;;  %v11159_v13 = vpop.f32.mrb[136].mxu0 }
 0x660   : > { %v8596_v9 = vpack.i.bf16 %v11154_v5, %v11159_v13  ;;  %v8149_v41 = vpop.f32.mrb[137].mxu0 }
 0x661   : > { %v4655_v59 = vpop.f32.mrb[138].mxu0 }
 0x662   : > { %v8150_v42 = vpop.f32.mrb[139].mxu0  ;;  %v11186_v59 = vpop.permute.xlu1 %8522 }
 0x663   : > { %v8525_v5 = vunpack.i.h.bf16 %v11186_v59  ;;  %v8524_v13 = vunpack.i.l.bf16 %v11186_v59 }
 0x664   : > { %v11163_v19 = vpop.f32.mrb[144].mxu1 }
 0x665   : > { %v8179_v10 = vpop.f32.mrb[145].mxu1 }
 0x666   : > { %v4928_v2 = vpop.f32.mrb[146].mxu1 }
 0x667   : > { %v8180_v17 = vpop.f32.mrb[147].mxu1 }
 0x66c   : > { %v11165_v45 = vpop.f32.mrb[148].mxu1 }
 0x66d   : > { %v8191_v35 = vpop.f32.mrb[149].mxu1 }
 0x66e   : > { %v5024_v44 = vpop.f32.mrb[150].mxu1 }
 0x66f   : > { %v8192_v29 = vpop.f32.mrb[151].mxu1 }
 0x674   : > { %v11167_v26 = vpop.f32.mrb[152].mxu1 }
 0x675   : > { %v8203_v8 = vpop.f32.mrb[153].mxu1 }
 0x676   : > { %v11169_v32 = vpop.f32.mrb[140].mxu0  ;;  %v5120_v31 = vpop.f32.mrb[154].mxu1 }
 0x677   : > { %v8611_v54 = vpack.i.bf16 %v11157_v57, %v11169_v32  ;;  %v8161_v11 = vpop.f32.mrb[141].mxu0  ;;  %v8204_v52 = vpop.f32.mrb[155].mxu1 }
 0x678   : > { %v4773_v49 = vpop.f32.mrb[142].mxu0 }
 0x679   : > { %v8162_v43 = vpop.f32.mrb[143].mxu0  ;;  %v8538_v11 = vpop.permute.xlu1 %8537 }
 0x67e   : > { %v11173_v38 = vpop.f32.mrb[144].mxu0 }
 0x67f   : > { %v8173_v12 = vpop.f32.mrb[145].mxu0 }
 0x680   : > { %v4880_v30 = vpop.f32.mrb[146].mxu0 }
 0x681   : > { %v8174_v27 = vpop.f32.mrb[147].mxu0 }
 0x686   : > { %v11175_v53 = vpop.f32.mrb[148].mxu0 }
 0x687   : > { %v8185_v20 = vpop.f32.mrb[149].mxu0 }
 0x688   : > { %v4976_v36 = vpop.f32.mrb[150].mxu0 }
 0x689   : > { %v8186_v37 = vpop.f32.mrb[151].mxu0 }
 0x68e   : > { %v11177_v55 = vpop.f32.mrb[152].mxu0  ;;  %v11179_v3 = vpop.f32.mrb[156].mxu1 }
 0x68f   : > { %v8197_v16 = vpop.f32.mrb[153].mxu0  ;;  %v8215_v24 = vpop.f32.mrb[157].mxu1 }
 0x690   : > { %v5072_v34 = vpop.f32.mrb[154].mxu0  ;;  %v5216_v18 = vpop.f32.mrb[158].mxu1 }
 0x691   : > { %v8198_v6 = vpop.f32.mrb[155].mxu0  ;;  %v8216_v47 = vpop.f32.mrb[159].mxu1 }
 0x696   : > { %v11181_v40 = vpop.f32.mrb[156].mxu0  ;;  %v5313_v7 = vpop.f32.mrb[160].mxu1 }
 0x697   : > { %v8209_v63 = vpop.f32.mrb[157].mxu0  ;;  %v8227_v56 = vpop.f32.mrb[161].mxu1 }
 0x698   : > { %v5168_v28 = vpop.f32.mrb[158].mxu0  ;;  %v5316_v22 = vpop.f32.mrb[162].mxu1 }
 0x699   : > { %v8210_v1 = vpop.f32.mrb[159].mxu0  ;;  %v8228_v23 = vpop.f32.mrb[163].mxu1 }
 0x69e   : > { %v5263_v25 = vpop.f32.mrb[160].mxu0  ;;  %v5413_v15 = vpop.f32.mrb[164].mxu1 }
 0x69f   : > { %v8561_v14 = vpack.i.bf16 %v5313_v7, %v5263_v25  ;;  %v8221_v60 = vpop.f32.mrb[161].mxu0  ;;  %v8239_v51 = vpop.f32.mrb[165].mxu1 }
 0x6a0   : > { %v5266_v58 = vpop.f32.mrb[162].mxu0  ;;  %v5416_v61 = vpop.f32.mrb[166].mxu1 }
 0x6a1   : > { %v8240_v39 = vpop.f32.mrb[167].mxu1  ;;  %8562 = vrot.lane.b32.xlu0 %v8561_v14, %s9179_s18  ;;  %v8222_v41 = vpop.f32.mrb[163].mxu0 }
 0x6a2   : > { %v8519_v41 = vunpack.i.l.bf16 %v11183_v48 }
 0x6a6   : > { %v5363_v42 = vpop.f32.mrb[164].mxu0  ;;  %v5513_v10 = vpop.f32.mrb[168].mxu1 }
 0x6a7   : > { %v8566_v2 = vpack.i.bf16 %v5413_v15, %v5363_v42  ;;  %v8233_v17 = vpop.f32.mrb[165].mxu0  ;;  %v8251_v35 = vpop.f32.mrb[169].mxu1 }
 0x6a8   : > { %v5366_v44 = vpop.f32.mrb[166].mxu0  ;;  %v5516_v29 = vpop.f32.mrb[170].mxu1  ;;  %v8539_v17 = vunpack.i.l.bf16 %v8538_v11 }
 0x6a9   : > { %v8252_v8 = vpop.f32.mrb[171].mxu1  ;;  %8567 = vrot.lane.b32.xlu0 %v8566_v2, %s9179_s18  ;;  %v8234_v31 = vpop.f32.mrb[167].mxu0  ;;  %v8540_v2 = vunpack.i.h.bf16 %v8538_v11  ;;  %v11548_v44 = vld [vmem:[#allocation50_spill] sm:$0xff] }
 0x6aa   : > { %v11199_v15 = vpop.permute.xlu0 %8532  ;;  %v11549_v8 = vld [vmem:[#allocation49_spill] sm:$0xff] }
 0x6ab   : > { %v6659_v31 = vsel %vm1218_vm3, %v11549_v8, %v8519_v41 }
 0x6ac   : > { %v6667_v11 = vsel %vm621_vm1, %v6659_v31, %v8539_v17 }
 0x6ae   : > { %v5463_v52 = vpop.f32.mrb[168].mxu0  ;;  %v5613_v49 = vpop.f32.mrb[172].mxu1 }
 0x6af   : > { %v8571_v43 = vpack.i.bf16 %v5513_v10, %v5463_v52  ;;  %v8245_v12 = vpop.f32.mrb[169].mxu0  ;;  %v8263_v30 = vpop.f32.mrb[173].mxu1 }
 0x6b0   : > { %v5466_v27 = vpop.f32.mrb[170].mxu0  ;;  %v5616_v20 = vpop.f32.mrb[174].mxu1 }
 0x6b1   : > { %v8264_v36 = vpop.f32.mrb[175].mxu1  ;;  %8572 = vrot.lane.b32.xlu1 %v8571_v43, %s9179_s18  ;;  %v8246_v37 = vpop.f32.mrb[171].mxu0 }
 0x6b2   : > { %v8543_v52 = vpop.permute.xlu0 %8542 }
 0x6b4   : > { %v8548_v16 = vpop.permute.xlu1 %8547 }
 0x6b5   : > { %v8550_v24 = vunpack.i.h.bf16 %v8548_v16  ;;  %v8549_v34 = vunpack.i.l.bf16 %v8548_v16 }
 0x6b6   : > { %v5563_v18 = vpop.f32.mrb[172].mxu0  ;;  %v5731_v6 = vpop.f32.mrb[176].mxu1 }
 0x6b7   : > { %v11192_v47 = vsel %vm621_vm1, %v11106_v21, %v8550_v24  ;;  %v11196_v7 = vsel %vm621_vm1, %v11110_v50, %v8549_v34  ;;  %v8576_v63 = vpack.i.bf16 %v5613_v49, %v5563_v18  ;;  %v8257_v56 = vpop.f32.mrb[173].mxu0  ;;  %v8275_v28 = vpop.f32.mrb[177].mxu1  ;;  %v8520_v50 = vunpack.i.h.bf16 %v11183_v48 }
 0x6b8   : > { %v5566_v22 = vpop.f32.mrb[174].mxu0  ;;  %v5734_v1 = vpop.f32.mrb[178].mxu1  ;;  %v8544_v56 = vunpack.i.l.bf16 %v8543_v52 }
 0x6b9   : > { %8577 = vrot.lane.b32.xlu0 %v8576_v63, %s9179_s18  ;;  %v8258_v23 = vpop.f32.mrb[175].mxu0  ;;  %v8276_v25 = vpop.f32.mrb[179].mxu1  ;;  %v6660_v29 = vsel %vm1218_vm3, %v11548_v44, %v8520_v50  ;;  %v8545_v63 = vunpack.i.h.bf16 %v8543_v52  ;;  %v11550_v22 = vld [vmem:[#allocation52_spill] sm:$0xff] }
 0x6ba   : > { %v6668_v48 = vsel %vm621_vm1, %v6660_v29, %v8540_v2  ;;  %v6662_v1 = vsel %vm1218_vm3, %v11550_v22, %v8525_v5  ;;  %v11551_v23 = vld [vmem:[#allocation51_spill] sm:$0xff] }
 0x6bb   : > { %v6661_v25 = vsel %vm1218_vm3, %v11551_v23, %v8524_v13  ;;  %v6670_v59 = vsel %vm621_vm1, %v6662_v1, %v8545_v63 }
 0x6be   : > { %v5672_v14 = vpop.f32.mrb[176].mxu0  ;;  %v5849_v60 = vpop.f32.mrb[180].mxu1 }
 0x6bf   : > { %v8581_v51 = vpack.i.bf16 %v5731_v6, %v5672_v14  ;;  %v8269_v21 = vpop.f32.mrb[177].mxu0  ;;  %v8287_v58 = vpop.f32.mrb[181].mxu1 }
 0x6c0   : > { %v5675_v61 = vpop.f32.mrb[178].mxu0  ;;  %v5852_v39 = vpop.f32.mrb[182].mxu1 }
 0x6c1   : > { %8582 = vrot.lane.b32.xlu1 %v8581_v51, %s9180_s25  ;;  %v8270_v42 = vpop.f32.mrb[179].mxu0  ;;  %v8288_v10 = vpop.f32.mrb[183].mxu1  ;;  %v6669_v51 = vsel %vm621_vm1, %v6661_v25, %v8544_v56 }
 0x6c4   : > { %v8553_v35 = vpop.permute.xlu1 %8552 }
 0x6c5   : > { %v8555_v49 = vunpack.i.h.bf16 %v8553_v35  ;;  %v8554_v43 = vunpack.i.l.bf16 %v8553_v35  ;;  %8597 = vrot.lane.b32.xlu1 %v8596_v9, %s9181_s12 }
 0x6c6   : > { %v5790_v12 = vpop.f32.mrb[180].mxu0  ;;  %v5967_v30 = vpop.f32.mrb[184].mxu1 }
 0x6c7   : > { %v6677_v27 = vsel %vm6675_vm4, %v6668_v48, %v8555_v49  ;;  %v6676_v20 = vsel %vm6675_vm4, %v6667_v11, %v8554_v43  ;;  %v8586_v36 = vpack.i.bf16 %v5849_v60, %v5790_v12  ;;  %v8281_v37 = vpop.f32.mrb[181].mxu0  ;;  %v8299_v16 = vpop.f32.mrb[185].mxu1  ;;  %v8653_v48 = vld [vmem:[#allocation13 + $0x8] sm:$0xff]  }
 0x6c8   : > { %v6684_v24 = vpack.c.bf16 %v6677_v27, %v6676_v20  ;;  %v5793_v34 = vpop.f32.mrb[182].mxu0  ;;  %v5970_v18 = vpop.f32.mrb[186].mxu1  ;;  %8371 = vmatprep.subr.bf16.mxu1 %v8653_v48 }
 0x6c9   : > { %8587 = vrot.lane.b32.xlu0 %v8586_v36, %s9180_s25  ;;  %v8282_v9 = vpop.f32.mrb[183].mxu0  ;;  %v8300_v6 = vpop.f32.mrb[187].mxu1  ;;  %8372 = vmatpush3.bf16.msra.mxu1 %v8653_v48  ;;  %v11552_v34 = vld [vmem:[#allocation35_spill] sm:$0xff] }
 0x6ca   : > { %8363 = vmatprep.mubr.msk.bf16.mxu0 %vm6699_vm5, %v6684_v24 }
 0x6cc   : > { %v8558_v28 = vpop.permute.xlu0 %8557 }
 0x6cd   : > { %v8560_v14 = vunpack.i.h.bf16 %v8558_v28  ;;  %v8559_v60 = vunpack.i.l.bf16 %v8558_v28  ;;  %8592 = vrot.lane.b32.xlu0 %v8591_v0, %s9180_s25 }
 0x6ce   : > { %v5908_v21 = vpop.f32.mrb[184].mxu0  ;;  %v6085_v58 = vpop.f32.mrb[188].mxu1 }
 0x6cf   : > { %v6679_v61 = vsel %vm6675_vm4, %v6670_v59, %v8560_v14  ;;  %v6678_v39 = vsel %vm6675_vm4, %v6669_v51, %v8559_v60  ;;  %v8601_v50 = vpack.i.bf16 %v5967_v30, %v5908_v21  ;;  %v8293_v41 = vpop.f32.mrb[185].mxu0  ;;  %v8311_v42 = vpop.f32.mrb[189].mxu1 }
 0x6d0   : > { %v6685_v10 = vpack.c.bf16 %v6679_v61, %v6678_v39  ;;  %v5911_v2 = vpop.f32.mrb[186].mxu0  ;;  %v6088_v17 = vpop.f32.mrb[190].mxu1 }
 0x6d1   : > { %8602 = vrot.lane.b32.xlu1 %v8601_v50, %s9180_s25  ;;  %v8294_v33 = vpop.f32.mrb[187].mxu0  ;;  %v8312_v4 = vpop.f32.mrb[191].mxu1  ;;  %v11553_v50 = vld [vmem:[#allocation34_spill] sm:$0xff] }
 0x6d2   : > { %8364 = vmatmul.mubr.msk.bf16.vlgmr.msra.gmra.mrb[208].mxu0 %vm6699_vm5, %v6685_v10 }
 0x6d6   : > { %v6026_v0 = vpop.f32.mrb[188].mxu0  ;;  %v6203_v35 = vpop.f32.mrb[192].mxu1 }
 0x6d7   : > { %v8606_v44 = vpack.i.bf16 %v6085_v58, %v6026_v0  ;;  %v8305_v29 = vpop.f32.mrb[189].mxu0  ;;  %v8323_v8 = vpop.f32.mrb[193].mxu1 }
 0x6d8   : > { %v6029_v31 = vpop.f32.mrb[190].mxu0  ;;  %v6206_v52 = vpop.f32.mrb[194].mxu1 }
 0x6d9   : > { %8607 = vrot.lane.b32.xlu0 %v8606_v44, %s9180_s25  ;;  %v8306_v49 = vpop.f32.mrb[191].mxu0  ;;  %v8324_v43 = vpop.f32.mrb[195].mxu1  ;;  %v8535_v52 = vunpack.i.h.bf16 %v11199_v15 }
 0x6da   : > { %v8534_v49 = vunpack.i.l.bf16 %v11199_v15 }
 0x6dd   : > { %8612 = vrot.lane.b32.xlu0 %v8611_v54, %s9181_s12 }
 0x6de   : > { %v6144_v11 = vpop.f32.mrb[192].mxu0  ;;  %v6321_v12 = vpop.f32.mrb[196].mxu1 }
 0x6df   : > { %v8616_v30 = vpack.i.bf16 %v6203_v35, %v6144_v11  ;;  %v8317_v27 = vpop.f32.mrb[193].mxu0  ;;  %v8335_v20 = vpop.f32.mrb[197].mxu1 }
 0x6e0   : > { %v6147_v36 = vpop.f32.mrb[194].mxu0  ;;  %v6324_v37 = vpop.f32.mrb[198].mxu1 }
 0x6e1   : > { %8617 = vrot.lane.b32.xlu1 %v8616_v30, %s9181_s12  ;;  %v8318_v16 = vpop.f32.mrb[195].mxu0  ;;  %v8336_v24 = vpop.f32.mrb[199].mxu1  ;;  %6696 = vrot.lane.b32.xlu0 %v11552_v34, %s9182_s28 }
 0x6e6   : > { %v6262_v18 = vpop.f32.mrb[196].mxu0  ;;  %v6439_v57 = vpop.f32.mrb[200].mxu1 }
 0x6e7   : > { %v8621_v32 = vpack.i.bf16 %v6321_v12, %v6262_v18  ;;  %v8329_v54 = vpop.f32.mrb[197].mxu0  ;;  %v8347_v5 = vpop.f32.mrb[201].mxu1 }
 0x6e8   : > { %v6265_v13 = vpop.f32.mrb[198].mxu0  ;;  %v6442_v9 = vpop.f32.mrb[202].mxu1 }
 0x6e9   : > { %8622 = vrot.lane.b32.xlu1 %v8621_v32, %s9181_s12  ;;  %v8330_v6 = vpop.f32.mrb[199].mxu0  ;;  %v8348_v63 = vpop.f32.mrb[203].mxu1 }
 0x6ee   : > { %v6380_v56 = vpop.f32.mrb[200].mxu0  ;;  %v6557_v28 = vpop.f32.mrb[204].mxu1 }
 0x6ef   : > { %v8626_v22 = vpack.i.bf16 %v6439_v57, %v6380_v56  ;;  %v8341_v1 = vpop.f32.mrb[201].mxu0  ;;  %v8359_v23 = vpop.f32.mrb[205].mxu1 }
 0x6f0   : > { %v6383_v25 = vpop.f32.mrb[202].mxu0  ;;  %v6560_v14 = vpop.f32.mrb[206].mxu1 }
 0x6f1   : > { %8627 = vrot.lane.b32.xlu1 %v8626_v22, %s9181_s12  ;;  %v8342_v60 = vpop.f32.mrb[203].mxu0  ;;  %v8360_v59 = vpop.f32.mrb[207].mxu1 }
 0x6f6   : > { %v6498_v51 = vpop.f32.mrb[204].mxu0 }
 0x6f7   : > { %v8631_v21 = vpack.i.bf16 %v6557_v28, %v6498_v51  ;;  %v8353_v58 = vpop.f32.mrb[205].mxu0 }
 0x6f8   : > { %v6501_v61 = vpop.f32.mrb[206].mxu0 }
 0x6f9   : > { %8632 = vrot.lane.b32.xlu1 %v8631_v21, %s9181_s12  ;;  %v8354_v39 = vpop.f32.mrb[207].mxu0 }
 0x6fd   : > { %6918 = vrot.lane.b32.xlu1 %v11553_v50, %s9182_s28 }
 0x713   : > { %v8563_v10 = vpop.permute.xlu0 %8562 }
 0x714   : > { %v8565_v27 = vunpack.i.h.bf16 %v8563_v10  ;;  %v8564_v20 = vunpack.i.l.bf16 %v8563_v10 }
 0x716   : > { %v6881_v54 = vsel %vm1218_vm3, %v11173_v38, %v8564_v20 }
 0x71b   : > { %v8568_v4 = vpop.permute.xlu0 %8567 }
 0x71c   : > { %v8570_v22 = vunpack.i.h.bf16 %v8568_v4  ;;  %v8569_v1 = vunpack.i.l.bf16 %v8568_v4 }
 0x71e   : > { %v6884_v25 = vsel %vm1218_vm3, %v11165_v45, %v8570_v22  ;;  %v6883_v14 = vsel %vm1218_vm3, %v11175_v53, %v8569_v1 }
 0x723   : > { %v11245_v41 = vpop.permute.xlu1 %8572 }
 0x724   : > { %v8575_v50 = vunpack.i.h.bf16 %v11245_v41 }
 0x72b   : > { %v11251_v29 = vpop.permute.xlu0 %8577 }
 0x733   : > { %v8583_v42 = vpop.permute.xlu1 %8582 }
 0x734   : > { %v8585_v16 = vunpack.i.h.bf16 %v8583_v42  ;;  %v8584_v24 = vunpack.i.l.bf16 %v8583_v42  ;;  %v8574_v42 = vunpack.i.l.bf16 %v11245_v41 }
 0x736   : > { %v6889_v6 = vsel %vm621_vm1, %v6881_v54, %v8584_v24 }
 0x737   : > { %v8598_v2 = vpop.permute.xlu1 %8597 }
 0x738   : > { %v8600_v17 = vunpack.i.h.bf16 %v8598_v2  ;;  %v8599_v33 = vunpack.i.l.bf16 %v8598_v2  ;;  %v6886_v2 = vsel %vm1218_vm3, %v11167_v26, %v8575_v50 }
 0x73a   : > { %v6681_v0 = vsel %vm6675_vm4, %v11192_v47, %v8600_v17  ;;  %v6680_v35 = vsel %vm6675_vm4, %v11196_v7, %v8599_v33  ;;  %v6666_v47 = vsel %vm1218_vm3, %v10778_v62, %v8535_v52  ;;  %v6665_v7 = vsel %vm1218_vm3, %v10772_v46, %v8534_v49 }
 0x73b   : > { %v6686_v44 = vpack.c.bf16 %v6681_v0, %v6680_v35  ;;  %v8588_v8 = vpop.permute.xlu0 %8587  ;;  %v6882_v46 = vsel %vm1218_vm3, %v11163_v19, %v8565_v27  ;;  %v6885_v17 = vsel %vm1218_vm3, %v11177_v55, %v8574_v42  ;;  %v8579_v52 = vunpack.i.l.bf16 %v11251_v29 }
 0x73c   : > { %v6890_v9 = vsel %vm621_vm1, %v6882_v46, %v8585_v16  ;;  %v8590_v23 = vunpack.i.h.bf16 %v8588_v8  ;;  %v8589_v19 = vunpack.i.l.bf16 %v8588_v8 }
 0x73d   : > { %8367 = vmatprep.mubr.msk.bf16.mxu0 %vm6699_vm5, %v6686_v44 }
 0x73e   : > { %v6892_v51 = vsel %vm621_vm1, %v6884_v25, %v8590_v23  ;;  %v6891_v21 = vsel %vm621_vm1, %v6883_v14, %v8589_v19 }
 0x73f   : > { %v8593_v31 = vpop.permute.xlu0 %8592 }
 0x740   : > { %v8595_v48 = vunpack.i.h.bf16 %v8593_v31  ;;  %v8594_v11 = vunpack.i.l.bf16 %v8593_v31  ;;  %v8580_v31 = vunpack.i.h.bf16 %v11251_v29 }
 0x742   : > { %v6674_v15 = vsel %vm621_vm1, %v6666_v47, %v8595_v48  ;;  %v6673_v34 = vsel %vm621_vm1, %v6665_v7, %v8594_v11  ;;  %v6888_v48 = vsel %vm1218_vm3, %v11179_v3, %v8580_v31  ;;  %v6887_v11 = vsel %vm1218_vm3, %v11181_v40, %v8579_v52 }
 0x743   : > { %v8603_v12 = vpop.permute.xlu1 %8602 }
 0x744   : > { %v8605_v10 = vunpack.i.h.bf16 %v8603_v12  ;;  %v8604_v45 = vunpack.i.l.bf16 %v8603_v12 }
 0x746   : > { %v6894_v0 = vsel %vm621_vm1, %v6886_v2, %v8605_v10  ;;  %v6893_v35 = vsel %vm621_vm1, %v6885_v17, %v8604_v45 }
 0x74b   : > { %v11256_v43 = vpop.permute.xlu0 %8607 }
 0x74c   : > { %v8610_v26 = vunpack.i.h.bf16 %v11256_v43  ;;  %v8609_v55 = vunpack.i.l.bf16 %v11256_v43 }
 0x74e   : > { %v6896_v12 = vsel %vm621_vm1, %v6888_v48, %v8610_v26  ;;  %v6895_v29 = vsel %vm621_vm1, %v6887_v11, %v8609_v55 }
 0x74f   : > { %v8613_v30 = vpop.permute.xlu0 %8612 }
 0x750   : > { %v8615_v36 = vunpack.i.h.bf16 %v8613_v30  ;;  %v8614_v37 = vunpack.i.l.bf16 %v8613_v30 }
 0x752   : > { %v6683_v18 = vsel %vm6675_vm4, %v6674_v15, %v8615_v36  ;;  %v6682_v57 = vsel %vm6675_vm4, %v6673_v34, %v8614_v37 }
 0x753   : > { %v6687_v62 = vpack.c.bf16 %v6683_v18, %v6682_v57  ;;  %v8618_v32 = vpop.permute.xlu1 %8617  ;;  %v6697_v3 = vpop.permute.xlu0 %6696 }
 0x754   : > { %v8620_v5 = vunpack.i.h.bf16 %v8618_v32  ;;  %v8619_v13 = vunpack.i.l.bf16 %v8618_v32 }
 0x755   : > { %8368 = vmatmul.mubr.msk.bf16.gmra.mrb[212].mxu0 %vm6699_vm5, %v6687_v62 }
 0x756   : > { %v6898_v63 = vsel %vm6675_vm4, %v6890_v9, %v8620_v5  ;;  %v6897_v56 = vsel %vm6675_vm4, %v6889_v6, %v8619_v13 }
 0x757   : > { %v6905_v28 = vpack.c.bf16 %v6898_v63, %v6897_v56 }
 0x759   : > { %8373 = vmatprep.mubr.msk.bf16.mxu1 %vm6699_vm5, %v6905_v28 }
 0x75b   : > { %v8623_v38 = vpop.permute.xlu1 %8622 }
 0x75c   : > { %v8625_v60 = vunpack.i.h.bf16 %v8623_v38  ;;  %v8624_v59 = vunpack.i.l.bf16 %v8623_v38 }
 0x75e   : > { %v6900_v58 = vsel %vm6675_vm4, %v6892_v51, %v8625_v60  ;;  %v6899_v61 = vsel %vm6675_vm4, %v6891_v21, %v8624_v59 }
 0x75f   : > { %v6906_v39 = vpack.c.bf16 %v6900_v58, %v6899_v61 }
 0x761   : > { %8374 = vmatmul.mubr.msk.bf16.vlgmr.msra.gmra.mrb[208].mxu1 %vm6699_vm5, %v6906_v39 }
 0x763   : > { %v8628_v53 = vpop.permute.xlu1 %8627 }
 0x764   : > { %v8630_v33 = vunpack.i.h.bf16 %v8628_v53  ;;  %v8629_v4 = vunpack.i.l.bf16 %v8628_v53 }
 0x766   : > { %v6902_v44 = vsel %vm6675_vm4, %v6894_v0, %v8630_v33  ;;  %v6901_v41 = vsel %vm6675_vm4, %v6893_v35, %v8629_v4 }
 0x767   : > { %v6907_v8 = vpack.c.bf16 %v6902_v44, %v6901_v41 }
 0x769   : > { %8377 = vmatprep.mubr.msk.bf16.mxu1 %vm6699_vm5, %v6907_v8 }
 0x76b   : > { %v8633_v49 = vpop.permute.xlu1 %8632 }
 0x76c   : > { %v8635_v47 = vunpack.i.h.bf16 %v8633_v49  ;;  %v8634_v7 = vunpack.i.l.bf16 %v8633_v49 }
 0x76e   : > { %v6904_v30 = vsel %vm6675_vm4, %v6896_v12, %v8635_v47  ;;  %v6903_v43 = vsel %vm6675_vm4, %v6895_v29, %v8634_v7 }
 0x76f   : > { %v6908_v27 = vpack.c.bf16 %v6904_v30, %v6903_v43 }
 0x771   : > { %8378 = vmatmul.mubr.msk.bf16.gmra.mrb[212].mxu1 %vm6699_vm5, %v6908_v27 }
 0x7a5   : > { %v8365_v20 = vpop.f32.mrb[208].mxu0 }
 0x7a6   : > { %v6755_v36 = vadd.f32 %v8365_v20, %v6697_v3  ;;  %v6746_v40 = vpop.f32.mrb[209].mxu0 }
 0x7a7   : > { %v6747_v37 = vadd.f32 %v6746_v40, %v6697_v3  ;;  %v8366_v16 = vpop.f32.mrb[210].mxu0 }
 0x7a8   : > { %6779 = vst.msk [vmem:[%s568_s22 + $0x10] sm:$0xff] %vm621_vm1, %v6755_v36  ;;  %v6758_v24 = vadd.f32 %v8366_v16, %v6697_v3  ;;  %v6749_v15 = vpop.f32.mrb[211].mxu0 }
 0x7a9   : > { %6777 = vst.msk [vmem:[%s568_s22] sm:$0xff] %vm621_vm1, %v6747_v37  ;;  %v6750_v34 = vadd.f32 %v6749_v15, %v6697_v3 }
 0x7aa   : > { %6780 = vst.msk [vmem:[%s568_s22 + $0x18] sm:$0xff] %vm621_vm1, %v6758_v24 }
 0x7ab   : > { %6778 = vst.msk [vmem:[%s568_s22 + $0x8] sm:$0xff] %vm621_vm1, %v6750_v34 }
 0x828   : > { %v8369_v18 = vpop.f32.mrb[212].mxu0 }
 0x829   : > { %v6771_v57 = vadd.f32 %v8369_v18, %v6697_v3  ;;  %v6762_v62 = vpop.f32.mrb[213].mxu0 }
 0x82a   : > { %v6763_v32 = vadd.f32 %v6762_v62, %v6697_v3  ;;  %v8370_v46 = vpop.f32.mrb[214].mxu0 }
 0x82b   : > { %6783 = vst.msk [vmem:[%s568_s22 + $0x30] sm:$0xff] %vm621_vm1, %v6771_v57  ;;  %v6774_v54 = vadd.f32 %v8370_v46, %v6697_v3  ;;  %v6765_v5 = vpop.f32.mrb[215].mxu0 }
 0x82c   : > { %6781 = vst.msk [vmem:[%s568_s22 + $0x20] sm:$0xff] %vm621_vm1, %v6763_v32  ;;  %v6766_v13 = vadd.f32 %v6765_v5, %v6697_v3 }
 0x82d   : > { %6784 = vst.msk [vmem:[%s568_s22 + $0x38] sm:$0xff] %vm621_vm1, %v6774_v54 }
 0x82e   : > { %6782 = vst.msk [vmem:[%s568_s22 + $0x28] sm:$0xff] %vm621_vm1, %v6766_v13 }
 0x82f   : > { %9055 = shalt.err (!%p9052_p4)
}
 0x830   : > { %s9056_s9 = scalar_lea.hbm %s11323_s10, 1024  ;;  %s9060_s18 = scalar_lea.hbm %s11555_s1, 2048 }
 0x831   : > { %p9057_p9 = scmp.ne.s32.totalorder %s11323_s10, %s9056_s9  ;;  %p9061_p2 = scmp.lt.u32.totalorder %s11323_s10, %s11555_s1 }
 0x832   : > { %p9062_p6 = scmp.lt.u32.totalorder %s9060_s18, %s9056_s9  ;;  %p9064_p5 = scmp.lt.u32.totalorder %s9056_s9, %s11323_s10 }
 0x833   : > { %p9058_p13 = pnand %p9057_p9, %p11556_p12 }
 0x834   : > { %p9063_p10 = por %p9062_p6, %p9061_p2 }
 0x835   : > { %p9059_p11 = pneg %p9058_p13 }
 0x836   : > { %p9065_p3 = por %p9064_p5, %p9063_p10 }
 0x838   : > { %p9066_p1 = pnand %p9065_p3, %p9059_p11 }
 0x83a   : > { %9069 = shalt.err (!%p9066_p1)
}
 0x83b   : > { %s9184_s22 = smov 128   ;;  %v6919_v9 = vpop.permute.xlu1 %6918  ;;  %v8375_v6 = vpop.f32.mrb[208].mxu1  ;;  %s575_s5 = scalar_lea.vmem [#allocation18], %s7289_s13 }
 0x83c   : > { %8413 = dma.vmem_to_hbm [thread:$0]  (%p11556_p12), %s11326_s23, 1024, %s11323_s10, %s7007_s7, %s9184_s22, %s9184_s22, %s9180_s25   ;;  %v6976_v63 = vadd.f32 %v8375_v6, %v6919_v9  ;;  %v6967_v56 = vpop.f32.mrb[209].mxu1 }
 0x83d   : > { %v6968_v28 = vadd.f32 %v6967_v56, %v6919_v9  ;;  %v8376_v22 = vpop.f32.mrb[210].mxu1  ;;  %s7041_s23 = sshll.u32 %s575_s5, 4  ;;  %s11557_s10 = sld [smem:[#allocation58_spill]]  ;;  %s11372_s23 = int_to_ptr.vmem [resolvable:$true] %s7041_s23 }
 0x83e   : > { %7000 = vst.msk [vmem:[%s575_s5 + $0x10] sm:$0xff] %vm621_vm1, %v6976_v63  ;;  %v6979_v1 = vadd.f32 %v8376_v22, %v6919_v9  ;;  %v6970_v23 = vpop.f32.mrb[211].mxu1  ;;  %s7012_s21 = scalar_lea.sflag [#allocation19], %s9612_s4  ;;  %s9070_s11 = scalar_lea.vmem %s11372_s23, 1024 }
 0x83f   : > { %6998 = vst.msk [vmem:[%s575_s5] sm:$0xff] %vm621_vm1, %v6968_v28  ;;  %v6971_v19 = vadd.f32 %v6970_v23, %v6919_v9  ;;  %p9071_p8 = scmp.ne.s32.totalorder %s11372_s23, %s9070_s11  ;;  %s9185_s29 = smov [#allocation18]  }
 0x840   : > { %7001 = vst.msk [vmem:[%s575_s5 + $0x18] sm:$0xff] %vm621_vm1, %v6979_v1  ;;  %s9074_s17 = sshll.u32 %s9185_s29, 4  ;;  %s9075_s17 = int_to_ptr.vmem [resolvable:$false] %s9074_s17 }
 0x841   : > { %6999 = vst.msk [vmem:[%s575_s5 + $0x8] sm:$0xff] %vm621_vm1, %v6971_v19  ;;  %p9072_p7 = pnand %p9071_p8, %p11556_p12  ;;  %p9077_p4 = scmp.lt.s32.totalorder %s11372_s23, %s9075_s17 }
 0x843   : > { %s11370_s7 = scalar_lea.hbm %s11557_s10, %s7521_s27  ;;  %p9073_p0 = pneg %p9072_p7 }
 0x844   : > { %v8379_v38 = vpop.f32.mrb[212].mxu1  ;;  %s9076_s27 = scalar_lea.vmem %s9075_s17, 2048 }
 0x845   : > { %v6992_v25 = vadd.f32 %v8379_v38, %v6919_v9  ;;  %v6983_v14 = vpop.f32.mrb[213].mxu1  ;;  %p9078_p9 = scmp.lt.s32.totalorder %s9076_s27, %s9070_s11 }
 0x846   : > { %v6984_v60 = vadd.f32 %v6983_v14, %v6919_v9  ;;  %v8380_v59 = vpop.f32.mrb[214].mxu1 }
 0x847   : > { %7004 = vst.msk [vmem:[%s575_s5 + $0x30] sm:$0xff] %vm621_vm1, %v6992_v25  ;;  %v6995_v51 = vadd.f32 %v8380_v59, %v6919_v9  ;;  %v6986_v21 = vpop.f32.mrb[215].mxu1  ;;  %p9079_p13 = por %p9078_p9, %p9077_p4 }
 0x848   : > { %7002 = vst.msk [vmem:[%s575_s5 + $0x20] sm:$0xff] %vm621_vm1, %v6984_v60  ;;  %v6987_v58 = vadd.f32 %v6986_v21, %v6919_v9 }
 0x849   : > { %7005 = vst.msk [vmem:[%s575_s5 + $0x38] sm:$0xff] %vm621_vm1, %v6995_v51  ;;  %p9080_p11 = pnand %p9079_p13, %p9073_p0 }
 0x84a   : > { %7003 = vst.msk [vmem:[%s575_s5 + $0x28] sm:$0xff] %vm621_vm1, %v6987_v58 }
 0x84b   : > { %9083 = shalt.err (!%p9080_p11)
}
 0x84c   : > { %s9084_s26 = scalar_lea.hbm %s11370_s7, 1024  ;;  %s9088_s30 = scalar_lea.hbm %s11557_s10, 2048 }
 0x84d   : > { %p9085_p2 = scmp.ne.s32.totalorder %s11370_s7, %s9084_s26  ;;  %p9089_p5 = scmp.lt.u32.totalorder %s11370_s7, %s11557_s10 }
 0x84e   : > { %p9090_p3 = scmp.lt.u32.totalorder %s9088_s30, %s9084_s26  ;;  %p9092_p8 = scmp.lt.u32.totalorder %s9084_s26, %s11370_s7 }
 0x84f   : > { %p9086_p6 = pnand %p9085_p2, %p11556_p12 }
 0x850   : > { %p9091_p1 = por %p9090_p3, %p9089_p5 }
 0x851   : > { %p9087_p10 = pneg %p9086_p6 }
 0x852   : > { %p9093_p7 = por %p9092_p8, %p9091_p1 }
 0x854   : > { %p9094_p0 = pnand %p9093_p7, %p9087_p10 }
 0x856   : > { %9097 = shalt.err (!%p9094_p0)
}
 0x857   : > { %8414 = dma.vmem_to_hbm [thread:$0]  (%p11556_p12), %s11372_s23, 1024, %s11370_s7, %s7012_s21, %s9184_s22, %s9184_s22, %s9180_s25  }
 0x858 PF: > { %s11558_s28 = sld [smem:[#allocation28_spill]]  ;;  %s11559_s5 = sld [smem:[#allocation30_spill]] }
 0x859   : > { %p11561_p9 = scmp.ge.s32.totalorder %s9160_s16, 2 }
 0x85e   : > { %s7056_s13 = sand.u32 1, %s11558_s28   ;;  %p11560_p4 = scmp.ne.s32.totalorder %s11559_s5, 0 }
 0x85f   : > { %s7057_s24 = scalar_lea.sflag [#allocation4], %s7056_s13 }
 0x860   : > { %p8447_p13 = pnand %p11561_p9, %p11560_p4 }
 0x862   : > { %9139 = dma.done.wait (!%p8447_p13), %s7057_s24, 1024  }
 0x863   : > { %9141 = vsyncadd (!%p8447_p13), %s7057_s24, 4294966272  ;;  %s7066_s20 = scalar_lea.sflag [#allocation19], %s7056_s13 }
 0x864   : > { %9143 = dma.done.wait (!%p8447_p13), %s7066_s20, 1024  }
 0x865   : > { %9145 = vsyncadd (!%p8447_p13), %s7066_s20, 4294966272  ;;  %s11562_s16 = sld [smem:[#allocation31_spill]]  ;;  %s11563_s4 = sld [smem:[#allocation32_spill]] }
 0x866   : > { %s11564_s13 = smov %s9152_s14  ;;  %s11565_s14 = smov %s9156_s15 }
 0x86b   : > { %p35_p12 = scmp.ge.s32.totalorder %s11562_s16, 4   ;;  %s11566_s15 = smov %s11563_s4 }
 0x86d   :  { %37 = sbr.rel (!%p35_p12) target bundleno = 20 (0x14), region = 178 }
 0x874   :  { %7071 = vsyncpa [#allocation3], 1 }
 0x875   :  { %7073 = vsyncpa [#allocation3 + $0x1], 1 }
 0x876   :  { %7074 = vsyncpa [#allocation6], 1 }
 0x877   :  { %7076 = vsyncpa [#allocation6 + $0x1], 1 }
 0x878   :  { %7077 = vsyncpa [#allocation9], 1 }
 0x879   :  { %7079 = vsyncpa [#allocation9 + $0x1], 1 }
 0x87a   :  { %7080 = vsyncpa [#allocation12], 1 }
 0x87b   :  { %7081 = vsyncpa [#allocation15], 1 }
 0x87c   :  { %7082 = vsyncpa [#allocation4], 1 }
 0x87d   :  { %7084 = vsyncpa [#allocation4 + $0x1], 1 }
 0x87e   :  { %7085 = vsyncpa [#allocation19], 1 }
 0x87f   :  { %7087 = vsyncpa [#allocation19 + $0x1], 1 }

</bundles_post_ra>
